<compile_context>
chip_gen: v5e
topology: v5e:2x2
jax: 0.10.0
libtpu: 0.0.40
codegen_flags: <defaults>
</compile_context>

<pallas_src>
import functools

import jax
import jax.numpy as jnp
from jax.experimental import pallas as pl
from jax.experimental.pallas import tpu as pltpu

LN_EPS = 1e-5  # nn.LayerNorm default


def _round_up(x, m):
    return ((x + m - 1) // m) * m


def _cdiv(a, b):
    return (a + b - 1) // b


def _vmem_capacity_bytes():
    try:
        return int(pltpu.get_tpu_info().vmem_capacity_bytes)
    except Exception:
        return 128 << 20  # conservative default (v5e/v6e)


def _layer_norm_epilogue(z, gamma, beta, out_dtype):
    mean = jnp.mean(z, axis=-1, keepdims=True)
    c = z - mean
    var = jnp.mean(c * c, axis=-1, keepdims=True)
    return (c * jax.lax.rsqrt(var + LN_EPS) * gamma + beta).astype(out_dtype)


def _proj_kernel_resident(x_ref, w_ref, b_ref, res_ref, gamma_ref, beta_ref,
                          o_ref):
    # Whole K resident in VMEM: single MXU matmul, fused bias + residual + LN.
    y = jnp.dot(x_ref[...], w_ref[...], preferred_element_type=jnp.float32)
    z = y + b_ref[...] + res_ref[...].astype(jnp.float32)
    o_ref[...] = _layer_norm_epilogue(z, gamma_ref[...], beta_ref[...],
                                      o_ref.dtype)


def _proj_kernel_ktiled(x_ref, w_ref, b_ref, res_ref, gamma_ref, beta_ref,
                        o_ref, acc_ref):
    # K is tiled (grid axis 1, always >= 2 steps when this kernel is used).
    k = pl.program_id(1)
    last = pl.num_programs(1) - 1
    part = jnp.dot(x_ref[...], w_ref[...], preferred_element_type=jnp.float32)

    @pl.when(k == 0)
    def _():
        acc_ref[...] = part          # store directly; no zero-init + "+="

    @pl.when(jnp.logical_and(k > 0, k < last))
    def _():
        acc_ref[...] += part

    @pl.when(k == last)
    def _():
        # Fold the last partial, bias, residual and LN in registers.
        z = acc_ref[...] + part + b_ref[...] + res_ref[...].astype(jnp.float32)
        o_ref[...] = _layer_norm_epilogue(z, gamma_ref[...], beta_ref[...],
                                          o_ref.dtype)


@functools.partial(jax.jit, static_argnames=("tm", "tk"))
def projection_forward(hidden_states, input_tensor, w, b, gamma, beta,
                       *, tm=1024, tk=4096):
    """y = LayerNorm(hidden_states @ w + b + input_tensor).

    hidden_states: [B, S, K]; input_tensor: [B, S, H]; w: [K, H] (Linear W^T).
    Dropout is eval-mode identity.  Output dtype follows input_tensor.
    """
    B, S, K = hidden_states.shape
    H = input_tensor.shape[-1]
    rows = B * S
    out_dtype = input_tensor.dtype
    compute_dtype = jnp.bfloat16

    cbytes = 2                                       # bf16 activations/weight
    rbytes = jnp.dtype(input_tensor.dtype).itemsize  # residual stays f32
    obytes = jnp.dtype(out_dtype).itemsize

    vmem_cap = _vmem_capacity_bytes()
    vmem_budget = int(0.7 * vmem_cap)  # headroom for compiler scratch (v7x: ~45 MiB)

    # --- K (reduction) handling: resident weight when it fits -------------
    K_p0 = _round_up(K, 128)
    resident_w_budget = min(24 << 20, vmem_budget // 2)
    resident = (K_p0 <= tk) and (2 * K_p0 * H * cbytes <= resident_w_budget)
    if resident:
        tk_eff, K_p, nk = K_p0, K_p0, 1
    else:
        nk = max(2, _cdiv(K, tk))
        tk_eff = _round_up(_cdiv(K, nk), 128)   # minimize K zero-padding
        K_p = _round_up(K, tk_eff)
        nk = K_p // tk_eff
        if nk < 2:                               # degenerate: just go resident
            resident, tk_eff, K_p, nk = True, K_p, K_p, 1

    # --- Row tiling: >=2 tiles (both v7x TCs busy), minimal padding -------
    rows8 = _round_up(rows, 8)
    n_row = max(_cdiv(rows8, tm), 2 if rows8 >= 16 else 1)
    tm_eff = _round_up(_cdiv(rows8, n_row), 8)

    def _vmem_est(tm_e):
        est = (2 * tm_e * tk_eff * cbytes        # activation tile (dbl-buffered)
               + 2 * tk_eff * H * cbytes         # weight slab
               + 2 * tm_e * H * rbytes           # residual tile
               + 2 * tm_e * H * obytes           # output tile
               + 6 * _round_up(H, 128) * 4)      # bias / gamma / beta
        if not resident:
            est += tm_e * H * 4                  # f32 accumulator scratch
        return est

    while _vmem_est(tm_eff) > vmem_budget and tm_eff > 64:
        tm_eff = max(64, _round_up(tm_eff // 2, 8))
    rows_pad = _round_up(rows, tm_eff)
    n_row = rows_pad // tm_eff

    # --- Flatten / cast / pad (casts are no-ops when the caller already
    #     supplies bf16 activations + weights and f32 residual/params) -----
    x2d = hidden_states.reshape(rows, K)
    if x2d.dtype != compute_dtype:
        x2d = x2d.astype(compute_dtype)
    r2d = input_tensor.reshape(rows, H)
    w2d = w if w.dtype == compute_dtype else w.astype(compute_dtype)
    b2d = b.reshape(1, H).astype(jnp.float32)
    g2d = gamma.reshape(1, H).astype(jnp.float32)
    be2d = beta.reshape(1, H).astype(jnp.float32)

    if rows_pad != rows or K_p != K:
        x2d = jnp.pad(x2d, ((0, rows_pad - rows), (0, K_p - K)))
    if rows_pad != rows:
        r2d = jnp.pad(r2d, ((0, rows_pad - rows), (0, 0)))
    if K_p != K:
        w2d = jnp.pad(w2d, ((0, K_p - K), (0, 0)))

    vmem_limit = max(16 << 20,
                     min(int(1.25 * _vmem_est(tm_eff)) + (2 << 20), vmem_budget))

    # Honest byte count: weight is re-read per row tile only in the tiled path.
    weight_bytes = K_p * H * cbytes * (1 if resident else n_row)
    cost = pl.CostEstimate(
        flops=2 * rows_pad * K_p * H,
        transcendentals=rows_pad,   # one rsqrt per token row
        bytes_accessed=(rows_pad * K_p * cbytes + weight_bytes
                        + rows_pad * H * rbytes + rows_pad * H * obytes
                        + 3 * H * 4),
    )
    out_shape = jax.ShapeDtypeStruct((rows_pad, H), out_dtype)

    if resident:
        out2d = pl.pallas_call(
            _proj_kernel_resident,
            out_shape=out_shape,
            grid_spec=pltpu.PrefetchScalarGridSpec(
                num_scalar_prefetch=0,
                grid=(n_row,),
                in_specs=[
                    pl.BlockSpec((tm_eff, K_p), lambda i: (i, 0)),   # activations
                    pl.BlockSpec((K_p, H), lambda i: (0, 0)),        # weight (resident)
                    pl.BlockSpec((1, H), lambda i: (0, 0)),          # bias
                    pl.BlockSpec((tm_eff, H), lambda i: (i, 0)),     # residual
                    pl.BlockSpec((1, H), lambda i: (0, 0)),          # ln gamma
                    pl.BlockSpec((1, H), lambda i: (0, 0)),          # ln beta
                ],
                out_specs=pl.BlockSpec((tm_eff, H), lambda i: (i, 0)),
            ),
            compiler_params=pltpu.CompilerParams(
                dimension_semantics=("parallel",),
                vmem_limit_bytes=vmem_limit,
            ),
            cost_estimate=cost,
        )(x2d, w2d, b2d, r2d, g2d, be2d)
    else:
        out2d = pl.pallas_call(
            _proj_kernel_ktiled,
            out_shape=out_shape,
            grid_spec=pltpu.PrefetchScalarGridSpec(
                num_scalar_prefetch=0,
                grid=(n_row, nk),
                in_specs=[
                    pl.BlockSpec((tm_eff, tk_eff), lambda i, k: (i, k)),  # activations
                    pl.BlockSpec((tk_eff, H), lambda i, k: (k, 0)),       # weight slab
                    pl.BlockSpec((1, H), lambda i, k: (0, 0)),            # bias
                    pl.BlockSpec((tm_eff, H), lambda i, k: (i, 0)),       # residual
                    pl.BlockSpec((1, H), lambda i, k: (0, 0)),            # ln gamma
                    pl.BlockSpec((1, H), lambda i, k: (0, 0)),            # ln beta
                ],
                out_specs=pl.BlockSpec((tm_eff, H), lambda i, k: (i, 0)),
                scratch_shapes=[pltpu.VMEM((tm_eff, H), jnp.float32)],
            ),
            compiler_params=pltpu.CompilerParams(
                dimension_semantics=("parallel", "arbitrary"),
                vmem_limit_bytes=vmem_limit,
            ),
            cost_estimate=cost,
        )(x2d, w2d, b2d, r2d, g2d, be2d)

    out = out2d if rows_pad == rows else out2d[:rows]
    return out.reshape(B, S, H)


def reference_forward(hidden_states, input_tensor, w, b, gamma, beta):
    # Matches the kernel's numerics: bf16 matmul operands, f32 accumulation,
    # f32 residual add and LayerNorm.
    y = jnp.einsum("bsk,kh->bsh",
                   hidden_states.astype(jnp.bfloat16),
                   w.astype(jnp.bfloat16),
                   preferred_element_type=jnp.float32) + b.astype(jnp.float32)
    z = y + input_tensor.astype(jnp.float32)
    mean = jnp.mean(z, axis=-1, keepdims=True)
    var = jnp.mean((z - mean) ** 2, axis=-1, keepdims=True)
    out = (z - mean) * jax.lax.rsqrt(var + LN_EPS) * gamma + beta
    return out.astype(input_tensor.dtype)


def _make_case(key, B, S, K, H):
    k1, k2, k3, k4 = jax.random.split(key, 4)
    hidden_states = jax.random.normal(k1, (B, S, K), dtype=jnp.float32)
    input_tensor = jax.random.normal(k2, (B, S, H), dtype=jnp.float32)
    bound = 1.0 / (K ** 0.5)
    w = jax.random.uniform(k3, (K, H), jnp.float32, -bound, bound)  # [K, H] = W^T
    b = jax.random.uniform(k4, (H,), jnp.float32, -bound, bound)
    gamma = jnp.ones((H,), jnp.float32)
    beta = jnp.zeros((H,), jnp.float32)
    return hidden_states, input_tensor, w, b, gamma, beta


if __name__ == "__main__":
    key = jax.random.PRNGKey(0)
    k_a, k_b = jax.random.split(key)

    # --- Case 1: module-sized projection (intermediate=3072 -> hidden=768),
    #     small batch.  Exercises the resident-weight fast path. ----------
    hs, res, w, b, gamma, beta = _make_case(k_a, B=2, S=32, K=3072, H=768)
    # Cast activations/weight to bf16 ONCE outside the jit (no in-kernel-call
    # astype HBM round trips); residual/params stay f32.
    out = projection_forward(hs.astype(jnp.bfloat16), res,
                             w.astype(jnp.bfloat16), b, gamma, beta)
    jax.block_until_ready(out)
    ref = reference_forward(hs, res, w, b, gamma, beta)
    assert out.shape == (2, 32, 768)
    assert jnp.allclose(out, ref, atol=3e-2, rtol=3e-2), "mismatch (resident path)"

    # --- Case 2: small config forcing the K-tiled accumulator fallback
    #     (tk < K), plus row/K padding coverage. ---------------------------
    hs2, res2, w2, b2, gamma2, beta2 = _make_case(k_b, B=1, S=24, K=640, H=256)
    out2 = projection_forward(hs2.astype(jnp.bfloat16), res2,
                              w2.astype(jnp.bfloat16), b2, gamma2, beta2,
                              tk=256)
    jax.block_until_ready(out2)
    ref2 = reference_forward(hs2, res2, w2, b2, gamma2, beta2)
    assert out2.shape == (1, 24, 256)
    assert jnp.allclose(out2, ref2, atol=3e-2, rtol=3e-2), "mismatch (k-tiled path)"

    print("KERNEL_OK")
</pallas_src>

<mosaic_0001>
module attributes {stable_mosaic.version = 11 : i64} {
  func.func @_proj_kernel_resident(%arg0: i32, %arg1: memref<32x3072xbf16, #tpu.memory_space<vmem>>, %arg2: memref<3072x768xbf16, #tpu.memory_space<vmem>>, %arg3: memref<1x768xf32, #tpu.memory_space<vmem>>, %arg4: memref<32x768xf32, #tpu.memory_space<vmem>>, %arg5: memref<1x768xf32, #tpu.memory_space<vmem>>, %arg6: memref<1x768xf32, #tpu.memory_space<vmem>>, %arg7: memref<32x768xf32, #tpu.memory_space<vmem>>) attributes {dimension_semantics = [#tpu.dimension_semantics<parallel>], iteration_bounds = array<i64: 2>, scalar_prefetch = 0 : i64, scratch_operands = 0 : i64, tpu.core_type = #tpu.core_type<tc>, window_params = [{transform_indices = @transform_0, window_bounds = array<i64: 32, 3072>}, {pipeline_mode = #tpu.pipeline_mode<synchronous>, transform_indices = @transform_1, window_bounds = array<i64: 3072, 768>}, {pipeline_mode = #tpu.pipeline_mode<synchronous>, transform_indices = @transform_2, window_bounds = array<i64: 1, 768>}, {transform_indices = @transform_3, window_bounds = array<i64: 32, 768>}, {pipeline_mode = #tpu.pipeline_mode<synchronous>, transform_indices = @transform_4, window_bounds = array<i64: 1, 768>}, {pipeline_mode = #tpu.pipeline_mode<synchronous>, transform_indices = @transform_5, window_bounds = array<i64: 1, 768>}, {transform_indices = @transform_6, window_bounds = array<i64: 32, 768>}]} {
    %c0 = arith.constant 0 : index
    %c0_0 = arith.constant 0 : index
    %0 = vector.load %arg1[%c0, %c0_0] : memref<32x3072xbf16, #tpu.memory_space<vmem>>, vector<32x3072xbf16>
    %c0_1 = arith.constant 0 : index
    %c0_2 = arith.constant 0 : index
    %1 = vector.load %arg2[%c0_1, %c0_2] : memref<3072x768xbf16, #tpu.memory_space<vmem>>, vector<3072x768xbf16>
    %cst = arith.constant dense<0.000000e+00> : vector<32x768xf32>
    %2 = tpu.matmul %0, %1, %cst {dimension_numbers = #tpu.dot_dimension_numbers<[1], [0], [0], [1], [0, 0, 1, 1], [], []>} : vector<32x3072xbf16>, vector<3072x768xbf16>, vector<32x768xf32> -> vector<32x768xf32>
    %c0_3 = arith.constant 0 : index
    %c0_4 = arith.constant 0 : index
    %3 = vector.load %arg3[%c0_3, %c0_4] : memref<1x768xf32, #tpu.memory_space<vmem>>, vector<1x768xf32>
    %4 = vector.broadcast %3 : vector<1x768xf32> to vector<32x768xf32>
    %5 = arith.addf %2, %4 : vector<32x768xf32>
    %c0_5 = arith.constant 0 : index
    %c0_6 = arith.constant 0 : index
    %6 = vector.load %arg4[%c0_5, %c0_6] : memref<32x768xf32, #tpu.memory_space<vmem>>, vector<32x768xf32>
    %7 = arith.addf %5, %6 : vector<32x768xf32>
    %c0_7 = arith.constant 0 : index
    %c0_8 = arith.constant 0 : index
    %8 = vector.load %arg5[%c0_7, %c0_8] : memref<1x768xf32, #tpu.memory_space<vmem>>, vector<1x768xf32>
    %c0_9 = arith.constant 0 : index
    %c0_10 = arith.constant 0 : index
    %9 = vector.load %arg6[%c0_9, %c0_10] : memref<1x768xf32, #tpu.memory_space<vmem>>, vector<1x768xf32>
    %cst_11 = arith.constant dense<0.000000e+00> : vector<32xf32>
    %10 = vector.multi_reduction <add>, %7, %cst_11 [1] : vector<32x768xf32> to vector<32xf32>
    %11 = vector.shape_cast %10 : vector<32xf32> to vector<32x1xf32>
    %cst_12 = arith.constant 7.680000e+02 : f32
    %12 = vector.broadcast %cst_12 : f32 to vector<32x1xf32>
    %13 = arith.divf %11, %12 : vector<32x1xf32>
    %14 = vector.broadcast %13 : vector<32x1xf32> to vector<32x768xf32>
    %15 = arith.subf %7, %14 : vector<32x768xf32>
    %16 = arith.mulf %15, %15 : vector<32x768xf32>
    %cst_13 = arith.constant dense<0.000000e+00> : vector<32xf32>
    %17 = vector.multi_reduction <add>, %16, %cst_13 [1] : vector<32x768xf32> to vector<32xf32>
    %18 = vector.shape_cast %17 : vector<32xf32> to vector<32x1xf32>
    %cst_14 = arith.constant 7.680000e+02 : f32
    %19 = vector.broadcast %cst_14 : f32 to vector<32x1xf32>
    %20 = arith.divf %18, %19 : vector<32x1xf32>
    %cst_15 = arith.constant 9.99999974E-6 : f32
    %21 = vector.broadcast %cst_15 : f32 to vector<32x1xf32>
    %22 = arith.addf %20, %21 : vector<32x1xf32>
    %23 = math.rsqrt %22 : vector<32x1xf32>
    %24 = vector.broadcast %23 : vector<32x1xf32> to vector<32x768xf32>
    %25 = arith.mulf %15, %24 : vector<32x768xf32>
    %26 = vector.broadcast %8 : vector<1x768xf32> to vector<32x768xf32>
    %27 = arith.mulf %25, %26 : vector<32x768xf32>
    %28 = vector.broadcast %9 : vector<1x768xf32> to vector<32x768xf32>
    %29 = arith.addf %27, %28 : vector<32x768xf32>
    %c0_16 = arith.constant 0 : index
    %c0_17 = arith.constant 0 : index
    %30 = vector.load %arg7[%c0_16, %c0_17] : memref<32x768xf32, #tpu.memory_space<vmem>>, vector<32x768xf32>
    tpu.vector_store %arg7[%c0_16, %c0_17], %29 {strides = array<i32>} : memref<32x768xf32, #tpu.memory_space<vmem>>, vector<32x768xf32>,
    return
  }
  func.func @transform_0(%arg0: i32) -> (i32, i32) {
    %c0_i32 = arith.constant 0 : i32
    %c0_i32_0 = arith.constant 0 : i32
    return %arg0, %c0_i32 : i32, i32
  }
  func.func @transform_1(%arg0: i32) -> (i32, i32) {
    %c0_i32 = arith.constant 0 : i32
    %c0_i32_0 = arith.constant 0 : i32
    %c0_i32_1 = arith.constant 0 : i32
    return %c0_i32, %c0_i32_0 : i32, i32
  }
  func.func @transform_2(%arg0: i32) -> (i32, i32) {
    %c0_i32 = arith.constant 0 : i32
    %c0_i32_0 = arith.constant 0 : i32
    %c0_i32_1 = arith.constant 0 : i32
    return %c0_i32, %c0_i32_0 : i32, i32
  }
  func.func @transform_3(%arg0: i32) -> (i32, i32) {
    %c0_i32 = arith.constant 0 : i32
    %c0_i32_0 = arith.constant 0 : i32
    return %arg0, %c0_i32 : i32, i32
  }
  func.func @transform_4(%arg0: i32) -> (i32, i32) {
    %c0_i32 = arith.constant 0 : i32
    %c0_i32_0 = arith.constant 0 : i32
    %c0_i32_1 = arith.constant 0 : i32
    return %c0_i32, %c0_i32_0 : i32, i32
  }
  func.func @transform_5(%arg0: i32) -> (i32, i32) {
    %c0_i32 = arith.constant 0 : i32
    %c0_i32_0 = arith.constant 0 : i32
    %c0_i32_1 = arith.constant 0 : i32
    return %c0_i32, %c0_i32_0 : i32, i32
  }
  func.func @transform_6(%arg0: i32) -> (i32, i32) {
    %c0_i32 = arith.constant 0 : i32
    %c0_i32_0 = arith.constant 0 : i32
    return %arg0, %c0_i32 : i32, i32
  }
}

</mosaic_0001>

<bundles_post_ra>
// kernel: projection_forward.1
= control target key start
LH: loop header
LB: loop body
LE: loop exit
PB: predicated region body
PF: predicated region fallthrough
CT: control target
= control target key end

     0   :  { %s18519_s0 = inlined_call_operand.hbm [shape: bf16[64,3072], index: 0, kind: input, shape index: {}]   ;;  %s18520_s1 = inlined_call_operand.hbm [shape: bf16[3072,768], index: 1, kind: input, shape index: {}]   ;;  %s18521_s2 = inlined_call_operand.vmem [shape: f32[1,768], index: 2, kind: input, shape index: {}]   ;;  %s18522_s3 = inlined_call_operand.hbm [shape: f32[64,768], index: 3, kind: input, shape index: {}]   ;;  %s18523_s4 = inlined_call_operand.vmem [shape: f32[1,768], index: 4, kind: input, shape index: {}]   ;;  %s18524_s5 = inlined_call_operand.vmem [shape: f32[1,768], index: 5, kind: input, shape index: {}]   ;;  %s18525_s6 = inlined_call_operand.hbm [shape: f32[64,768], index: 6, kind: output, shape index: {}]  }
   0x1   :  { %18571 = sst [smem:[#allocation52_spill]] %s18519_s0 }
   0x2   :  { %18572 = sst [smem:[#allocation53_spill]] %s18520_s1 }
   0x3   :  { %11 = vsyncpa [#allocation3], 0 }
   0x4   :  { %13 = vsyncpa [#allocation3 + $0x1], 0 }
   0x5   :  { %14 = vsyncpa [#allocation6], 0 }
   0x6   :  { %15 = vsyncpa [#allocation4], 0 }
   0x7   :  { %17 = vsyncpa [#allocation4 + $0x1], 0  ;;  %s17059_s21 = smov 0   ;;  %s17061_s22 = smov 0  }
   0x8   :  { %s17063_s23 = smov 0   ;;  %s17065_s24 = smov 0  }
   0x9 LB: > { %18573 = sst [smem:[#allocation13_spill]] %s17008_s23  ;;  %s17080_s25 = sadd.s32 1, %s17012_s24   ;;  %s17012_s24 = sphi %s17065_s24, %s18746_s24   ;;  %s17008_s23 = sphi %s17063_s23, %s18743_s23   ;;  %s17004_s22 = sphi %s17061_s22, %s18745_s22   ;;  %s17000_s21 = sphi %s17059_s21, %s18744_s21  }
   0xa   : > { %s30_s26 = sadd.s32 1, %s17008_s23  ;;  %s27_s27 = ssub.s32 %s17012_s24, %s17080_s25 }
   0xb   : > { %p37_p0 = scmp.ne.s32.totalorder %s17008_s23, %s17004_s22  ;;  %p28_p1 = scmp.eq.s32.totalorder %s27_s27, 0 }
   0xc   : > { %p38_p2 = scmp.eq.s32.totalorder %s17012_s24, 0  ;;  %p16788_p4 = scmp.lt.s32.totalorder %s17012_s24, 2 }
   0xd   : > { %s17091_s28 = scalar_select %p28_p1, %s17008_s23, %s30_s26  }
   0xe   : > { %p39_p5 = por %p38_p2, %p37_p0  ;;  %s226_s29 = sand.u32 1, %s17012_s24  }
   0xf   : > { %18574 = sst [smem:[#allocation14_spill]] %s17091_s28  ;;  %s228_s30 = sand.u32 1, %s17008_s23  }
  0x10   : > { %s16755_s7 = smul.u32 384, %s228_s30  ;;  %p17100_p6 = pnand %p16788_p4, %p39_p5 }
  0x11   : > { %s16756_s9 = smul.u32 384, %s17012_s24  ;;  %s18576_s0 = sld [smem:[#allocation52_spill]] }
  0x12   : > { %s230_s13 = scalar_lea.vmem [#allocation2], %s16755_s7  ;;  %s17108_s16 = scalar_lea.sflag [#allocation3], %s226_s29 }
  0x13   : > { %s239_s14 = sshll.u32 %s230_s13, 4  ;;  %p16852_p8 = pneg %p17100_p6  ;;  %s240_s14 = int_to_ptr.vmem [resolvable:$true] %s239_s14 }
  0x17   : > { %s236_s12 = scalar_lea.hbm %s18576_s0, %s16756_s9  ;;  %s16855_s26 = scalar_lea.hbm %s18576_s0, 768 }
  0x18   : > { %s237_s15 = sshll.u32 %s236_s12, 4  ;;  %s238_s15 = int_to_ptr.hbm [resolvable:$true] %s237_s15 }
  0x19   : > { %s16848_s17 = sshra.s32 %s238_s15, 4  ;;  %s16849_s17 = int_to_ptr.hbm [resolvable:$true] %s16848_s17 }
  0x1a   : > { %s16850_s18 = scalar_lea.hbm %s16849_s17, 384  ;;  %p16856_p11 = scmp.lt.s32.totalorder %s16849_s17, %s18576_s0 }
  0x1b   : > { %p16851_p7 = scmp.ne.s32.totalorder %s16849_s17, %s16850_s18  ;;  %p16857_p12 = scmp.lt.s32.totalorder %s16855_s26, %s16850_s18 }
  0x1d   : > { %p16853_p9 = pnand %p16852_p8, %p16851_p7  ;;  %p16858_p13 = por %p16857_p12, %p16856_p11 }
  0x1f   : > { %p16854_p10 = pneg %p16853_p9 }
  0x21   : > { %p16859_p1 = pnand %p16858_p13, %p16854_p10 }
  0x23   : > { %16862 = shalt.err (!%p16859_p1)
}
  0x24   : > { %s17014_s29 = smov 1536   ;;  %s17015_s9 = smov 96  }
  0x25   : > { %16779 = dma.hbm_to_vmem [thread:$0]  (!%p17100_p6), %s238_s15, 6144, %s240_s14, %s17108_s16, %s17014_s29, %s17014_s29, %s17015_s9  }
  0x26   : > { %s16757_s10 = smul.u32 192, %s228_s30  ;;  %s17127_s11 = sadd.s32 4294967295, %s17012_s24  }
  0x27   : > { %s10738_s12 = sadd.s32 4294967294, %s17012_s24   ;;  %p43_p2 = scmp.ne.s32.totalorder %s17004_s22, %s17000_s21 }
  0x28   : > { %p44_p4 = scmp.eq.s32.totalorder %s17127_s11, 0  ;;  %p177_p5 = scmp.eq.s32.totalorder %s17127_s11, 1 }
  0x29   : > { %p183_p7 = scmp.eq.s32.totalorder %s10738_s12, 1  ;;  %p10739_p10 = scmp.ge.s32.totalorder %s17012_s24, 1 }
  0x2a   : > { %p17136_p9 = por %p44_p4, %p43_p2  ;;  %p17144_p11 = por %p177_p5, %p37_p0 }
  0x2b   : > { %p17148_p12 = por %p183_p7, %p43_p2  ;;  %p190_p13 = scmp.lt.s32.totalorder %s17012_s24, 3 }
  0x2c   : > { %s18580_s1 = sld [smem:[#allocation53_spill]]  ;;  %s17016_s20 = smov [#allocation5]  }
  0x2d   : > { %p17156_p1 = pnand %p10739_p10, %p190_p13  ;;  %s203_s26 = sshll.u32 %s17016_s20, 4  ;;  %s204_s26 = int_to_ptr.vmem [resolvable:$true] %s203_s26 }
  0x2e   : > { %s16758_s27 = smul.u32 192, %s17012_s24  ;;  %s253_s7 = scalar_lea.vmem [#allocation7], %s16757_s10 }
  0x2f   : > { %p16772_p0 = pneg %p17156_p1  ;;  %s262_s29 = sshll.u32 %s253_s7, 4  ;;  %s263_s29 = int_to_ptr.vmem [resolvable:$true] %s262_s29 }
  0x30   : > { %s259_s15 = scalar_lea.hbm %s18522_s3, %s16758_s27  ;;  %s17017_s0 = smov 384  }
  0x31   : > { %p16773_p2 = pnand %p16772_p0, %p44_p4  ;;  %s260_s17 = sshll.u32 %s259_s15, 4  ;;  %s261_s17 = int_to_ptr.hbm [resolvable:$true] %s260_s17 }
  0x32   : > { %s201_s18 = sshll.u32 %s18580_s1, 4  ;;  %s17018_s1 = smov 24   ;;  %s202_s18 = int_to_ptr.hbm [resolvable:$true] %s201_s18 }
  0x33   : > { %16775 = dma.hbm_to_vmem [thread:$0]  (!%p16773_p2), %s202_s18, 147456, %s204_s26, [#allocation6], %s17017_s0, %s17017_s0, %s17018_s1  }
  0x34   : > { %s16908_s20 = sshra.s32 %s261_s17, 4  ;;  %s16915_s23 = scalar_lea.hbm %s18522_s3, 384  ;;  %s16909_s20 = int_to_ptr.hbm [resolvable:$true] %s16908_s20 }
  0x35   : > { %s16910_s28 = scalar_lea.hbm %s16909_s20, 192  ;;  %p16916_p13 = scmp.lt.s32.totalorder %s16909_s20, %s18522_s3 }
  0x36   : > { %p16911_p5 = scmp.ne.s32.totalorder %s16909_s20, %s16910_s28  ;;  %p16917_p0 = scmp.lt.s32.totalorder %s16915_s23, %s16910_s28 }
  0x38   : > { %p16913_p7 = pnand %p16911_p5, %p16852_p8  ;;  %p16918_p3 = por %p16917_p0, %p16916_p13 }
  0x3a   : > { %p16914_p10 = pneg %p16913_p7 }
  0x3c   : > { %p16919_p2 = pnand %p16918_p3, %p16914_p10 }
  0x3e   : > { %16922 = shalt.err (!%p16919_p2)
}
  0x3f   : > { %s17019_s0 = smov 768   ;;  %s17020_s1 = smov 48  }
  0x40   : > { %16782 = dma.hbm_to_vmem [thread:$0]  (!%p17100_p6), %s261_s17, 3072, %s263_s29, %s17108_s16, %s17019_s0, %s17019_s0, %s17020_s1  }
  0x41   : > { %274 = sbr.rel (%p17156_p1) target bundleno = 1694 (0x69e), region = 44 }
  0x46   : > { %s276_s18 = sand.u32 1, %s17127_s11   ;;  %s17184_s26 = sand.u32 1, %s17004_s22  }
  0x47   : > { %s16759_s23 = smul.u32 384, %s17184_s26  ;;  %s277_s28 = scalar_lea.sflag [#allocation3], %s276_s18 }
  0x49   : > { %s17187_s12 = scalar_lea.vmem [#allocation2], %s16759_s23 }
  0x4a   : > { %16983 = dma.done.wait (%p17136_p9), %s277_s28, 6144  }
  0x4b   : > { %16985 = vsyncadd (%p17136_p9), %s277_s28, 4294961152 }
  0x4c   : > { %16987 = dma.done.wait (%p44_p4), [#allocation6], 147456  }
  0x4d   : > { %16989 = vsyncadd (%p44_p4), [#allocation6], 4294819840  ;;  %s16760_s8 = smul.u32 192, %s17184_s26 }
  0x4f   : > { %s17200_s16 = scalar_lea.vmem [#allocation7], %s16760_s8 }
  0x50   : > { %16991 = dma.done.wait (%p17136_p9), %s277_s28, 3072  }
  0x51   : > { %16993 = vsyncadd (%p17136_p9), %s277_s28, 4294964224  ;;  %v11112_v0 = vld [vmem:[#allocation5 + $0x150] sm:$0xf]  ;;  %v15648_v1 = vld [vmem:[#allocation5 + $0x164] sm:$0xf0]  ;;  %s10619_s17 = scalar_lea.sflag [#allocation4], %s17184_s26 }
  0x52   : > { %v11304_v2 = vld [vmem:[#allocation5 + $0x2d0] sm:$0xf]  ;;  %v11113_v3 = vor.u32 %v15648_v1, %v11112_v0  ;;  %v15696_v4 = vld [vmem:[#allocation5 + $0x2e4] sm:$0xf0]  ;;  %v11088_v11 = vld [vmem:[#allocation5 + $0x120] sm:$0xf] }
  0x53   : > { %v11496_v5 = vld [vmem:[#allocation5 + $0x450] sm:$0xf]  ;;  %v15744_v6 = vld [vmem:[#allocation5 + $0x464] sm:$0xf0]  ;;  %v11305_v7 = vor.u32 %v15696_v4, %v11304_v2  ;;  %v15642_v13 = vld [vmem:[#allocation5 + $0x134] sm:$0xf0] }
  0x54   : > { %v11497_v8 = vor.u32 %v15744_v6, %v11496_v5  ;;  %v11688_v9 = vld [vmem:[#allocation5 + $0x5d0] sm:$0xf]  ;;  %v15792_v10 = vld [vmem:[#allocation5 + $0x5e4] sm:$0xf0]  ;;  %7547 = vmatpush.bf16.msra.mxu0 %v11113_v3  ;;  %v11280_v14 = vld [vmem:[#allocation5 + $0x2a0] sm:$0xf]  ;;  %v11089_v16 = vor.u32 %v15642_v13, %v11088_v11 }
  0x55   : > { %v11689_v12 = vor.u32 %v15792_v10, %v11688_v9  ;;  %v15690_v15 = vld [vmem:[#allocation5 + $0x2b4] sm:$0xf0]  ;;  %7566 = vmatpush.bf16.msra.mxu1 %v11305_v7  ;;  %v11472_v18 = vld [vmem:[#allocation5 + $0x420] sm:$0xf]  ;;  %v11064_v23 = vld [vmem:[#allocation5 + $0xf0] sm:$0xf] }
  0x56   : > { %7585 = vmatpush.bf16.msra.mxu2 %v11497_v8  ;;  %v11281_v17 = vor.u32 %v15690_v15, %v11280_v14  ;;  %v15738_v19 = vld [vmem:[#allocation5 + $0x434] sm:$0xf0]  ;;  %v11664_v20 = vld [vmem:[#allocation5 + $0x5a0] sm:$0xf]  ;;  %v15636_v24 = vld [vmem:[#allocation5 + $0x104] sm:$0xf0] }
  0x57   : > { %7604 = vmatpush.bf16.msra.mxu3 %v11689_v12  ;;  %v11473_v21 = vor.u32 %v15738_v19, %v11472_v18  ;;  %v15786_v22 = vld [vmem:[#allocation5 + $0x5b4] sm:$0xf0]  ;;  %v11256_v26 = vld [vmem:[#allocation5 + $0x270] sm:$0xf]  ;;  %v15684_v27 = vld [vmem:[#allocation5 + $0x284] sm:$0xf0]  ;;  %v11065_v29 = vor.u32 %v15636_v24, %v11064_v23 }
  0x58   : > { %v11665_v25 = vor.u32 %v15786_v22, %v11664_v20  ;;  %v11448_v28 = vld [vmem:[#allocation5 + $0x3f0] sm:$0xf]  ;;  %7548 = vmatpush.bf16.msra.mxu0 %v11089_v16  ;;  %v15732_v30 = vld [vmem:[#allocation5 + $0x404] sm:$0xf0]  ;;  %v11257_v33 = vor.u32 %v15684_v27, %v11256_v26  ;;  %v11040_v35 = vld [vmem:[#allocation5 + $0xc0] sm:$0xf] }
  0x59   : > { %v11640_v31 = vld [vmem:[#allocation5 + $0x570] sm:$0xf]  ;;  %v15780_v32 = vld [vmem:[#allocation5 + $0x584] sm:$0xf0]  ;;  %7567 = vmatpush.bf16.msra.mxu1 %v11281_v17  ;;  %v11449_v34 = vor.u32 %v15732_v30, %v11448_v28  ;;  %v15630_v36 = vld [vmem:[#allocation5 + $0xd4] sm:$0xf0] }
  0x5a   : > { %7586 = vmatpush.bf16.msra.mxu2 %v11473_v21  ;;  %v11232_v37 = vld [vmem:[#allocation5 + $0x240] sm:$0xf]  ;;  %v11641_v38 = vor.u32 %v15780_v32, %v11640_v31  ;;  %v15678_v39 = vld [vmem:[#allocation5 + $0x254] sm:$0xf0]  ;;  %v11041_v44 = vor.u32 %v15630_v36, %v11040_v35  ;;  %v11016_v47 = vld [vmem:[#allocation5 + $0x90] sm:$0xf] }
  0x5b   : > { %7605 = vmatpush.bf16.msra.mxu3 %v11665_v25  ;;  %v11424_v40 = vld [vmem:[#allocation5 + $0x3c0] sm:$0xf]  ;;  %v15726_v41 = vld [vmem:[#allocation5 + $0x3d4] sm:$0xf0]  ;;  %v11233_v45 = vor.u32 %v15678_v39, %v11232_v37  ;;  %v15624_v48 = vld [vmem:[#allocation5 + $0xa4] sm:$0xf0] }
  0x5c   : > { %v11616_v42 = vld [vmem:[#allocation5 + $0x540] sm:$0xf]  ;;  %v15774_v43 = vld [vmem:[#allocation5 + $0x554] sm:$0xf0]  ;;  %7549 = vmatpush.bf16.msra.mxu0 %v11065_v29  ;;  %v11425_v46 = vor.u32 %v15726_v41, %v11424_v40  ;;  %v11208_v49 = vld [vmem:[#allocation5 + $0x210] sm:$0xf]  ;;  %v11017_v56 = vor.u32 %v15624_v48, %v11016_v47 }
  0x5d   : > { %7568 = vmatpush.bf16.msra.mxu1 %v11257_v33  ;;  %v11617_v50 = vor.u32 %v15774_v43, %v11616_v42  ;;  %v15672_v51 = vld [vmem:[#allocation5 + $0x224] sm:$0xf0]  ;;  %v11400_v52 = vld [vmem:[#allocation5 + $0x390] sm:$0xf]  ;;  %v10992_v59 = vld [vmem:[#allocation5 + $0x60] sm:$0xf] }
  0x5e   : > { %7587 = vmatpush.bf16.msra.mxu2 %v11449_v34  ;;  %v15720_v53 = vld [vmem:[#allocation5 + $0x3a4] sm:$0xf0]  ;;  %v11592_v54 = vld [vmem:[#allocation5 + $0x510] sm:$0xf]  ;;  %v11209_v57 = vor.u32 %v15672_v51, %v11208_v49  ;;  %v15618_v60 = vld [vmem:[#allocation5 + $0x74] sm:$0xf0] }
  0x5f   : > { %7606 = vmatpush.bf16.msra.mxu3 %v11641_v38  ;;  %v15768_v55 = vld [vmem:[#allocation5 + $0x524] sm:$0xf0]  ;;  %v11401_v58 = vor.u32 %v15720_v53, %v11400_v52  ;;  %v11184_v61 = vld [vmem:[#allocation5 + $0x1e0] sm:$0xf]  ;;  %v15666_v63 = vld [vmem:[#allocation5 + $0x1f4] sm:$0xf0]  ;;  %v10993_v4 = vor.u32 %v15618_v60, %v10992_v59 }
  0x60   : > { %7550 = vmatpush.bf16.msra.mxu0 %v11041_v44  ;;  %v11593_v62 = vor.u32 %v15768_v55, %v11592_v54  ;;  %v11376_v0 = vld [vmem:[#allocation5 + $0x360] sm:$0xf]  ;;  %v15714_v1 = vld [vmem:[#allocation5 + $0x374] sm:$0xf0]  ;;  %v11185_v5 = vor.u32 %v15666_v63, %v11184_v61  ;;  %v10968_v7 = vld [vmem:[#allocation5 + $0x30] sm:$0xf] }
  0x61   : > { %7569 = vmatpush.bf16.msra.mxu1 %v11233_v45  ;;  %v11568_v2 = vld [vmem:[#allocation5 + $0x4e0] sm:$0xf]  ;;  %v15762_v3 = vld [vmem:[#allocation5 + $0x4f4] sm:$0xf0]  ;;  %v11377_v6 = vor.u32 %v15714_v1, %v11376_v0  ;;  %v15612_v8 = vld [vmem:[#allocation5 + $0x44] sm:$0xf0] }
  0x62   : > { %7588 = vmatpush.bf16.msra.mxu2 %v11425_v46  ;;  %v11160_v9 = vld [vmem:[#allocation5 + $0x1b0] sm:$0xf]  ;;  %v11569_v10 = vor.u32 %v15762_v3, %v11568_v2  ;;  %v15660_v11 = vld [vmem:[#allocation5 + $0x1c4] sm:$0xf0]  ;;  %v10944_v16 = vld [vmem:[#allocation5] sm:$0xf]  ;;  %v10969_v17 = vor.u32 %v15612_v8, %v10968_v7 }
  0x63   : > { %7607 = vmatpush.bf16.msra.mxu3 %v11617_v50  ;;  %v11352_v12 = vld [vmem:[#allocation5 + $0x330] sm:$0xf]  ;;  %v15708_v13 = vld [vmem:[#allocation5 + $0x344] sm:$0xf0]  ;;  %v15606_v18 = vld [vmem:[#allocation5 + $0x14] sm:$0xf0]  ;;  %v11161_v21 = vor.u32 %v15660_v11, %v11160_v9 }
  0x64   : > { %7551 = vmatpush.bf16.msra.mxu0 %v11017_v56  ;;  %v11544_v14 = vld [vmem:[#allocation5 + $0x4b0] sm:$0xf]  ;;  %v15756_v15 = vld [vmem:[#allocation5 + $0x4c4] sm:$0xf0]  ;;  %v11136_v19 = vld [vmem:[#allocation5 + $0x180] sm:$0xf]  ;;  %v11353_v22 = vor.u32 %v15708_v13, %v11352_v12  ;;  %v10945_v34 = vor.u32 %v15606_v18, %v10944_v16 }
  0x65   : > { %7570 = vmatpush.bf16.msra.mxu1 %v11209_v57  ;;  %v15654_v20 = vld [vmem:[#allocation5 + $0x194] sm:$0xf0]  ;;  %v11328_v23 = vld [vmem:[#allocation5 + $0x300] sm:$0xf]  ;;  %v11545_v26 = vor.u32 %v15756_v15, %v11544_v14  ;;  %v15555_v30 = vld [vmem:[%s17187_s12 + $0x4] sm:$0xf] }
  0x66   : > { %7589 = vmatpush.bf16.msra.mxu2 %v11401_v58  ;;  %v15702_v24 = vld [vmem:[#allocation5 + $0x314] sm:$0xf0]  ;;  %v11520_v25 = vld [vmem:[#allocation5 + $0x480] sm:$0xf]  ;;  %v10754_v31 = vld [vmem:[%s17187_s12 + $0x60] sm:$0xf0]  ;;  %v11137_v38 = vor.u32 %v15654_v20, %v11136_v19 }
  0x67   : > { %7608 = vmatpush.bf16.msra.mxu3 %v11593_v62  ;;  %v15750_v27 = vld [vmem:[#allocation5 + $0x494] sm:$0xf0]  ;;  %v10752_v28 = vld [vmem:[%s17187_s12] sm:$0xf]  ;;  %v12264_v32 = vld [vmem:[#allocation5 + $0xa50] sm:$0xf]  ;;  %v11329_v39 = vor.u32 %v15702_v24, %v11328_v23  ;;  %v17216_v53 = vor.u32 %v15555_v30, %v10754_v31 }
  0x68   : > { %7552 = vmatpush.bf16.msra.mxu0 %v10993_v4  ;;  %v15567_v29 = vld [vmem:[%s17187_s12 + $0x5c] sm:$0xf0]  ;;  %v15936_v33 = vld [vmem:[#allocation5 + $0xa64] sm:$0xf0]  ;;  %v12072_v36 = vld [vmem:[#allocation5 + $0x8d0] sm:$0xf]  ;;  %v11521_v43 = vor.u32 %v15750_v27, %v11520_v25 }
  0x69   : > { %7571 = vmatpush.bf16.msra.mxu1 %v11185_v5  ;;  %v10760_v35 = vld [vmem:[%s17187_s12 + $0x8] sm:$0xf]  ;;  %v15556_v41 = vld [vmem:[%s17187_s12 + $0xc] sm:$0xf]  ;;  %v12265_v44 = vor.u32 %v15936_v33, %v12264_v32  ;;  %v11880_v45 = vld [vmem:[#allocation5 + $0x750] sm:$0xf]  ;;  %v17214_v48 = vor.u32 %v15567_v29, %v10752_v28 }
  0x6a   : > { %7590 = vmatpush.bf16.msra.mxu2 %v11377_v6  ;;  %v15888_v37 = vld [vmem:[#allocation5 + $0x8e4] sm:$0xf0]  ;;  %v10762_v42 = vld [vmem:[%s17187_s12 + $0x68] sm:$0xf0]  ;;  %v12456_v47 = vld [vmem:[#allocation5 + $0xbd0] sm:$0xf] }
  0x6b   : > { %7609 = vmatpush.bf16.msra.mxu3 %v11569_v10  ;;  %v15568_v40 = vld [vmem:[%s17187_s12 + $0x64] sm:$0xf0]  ;;  %v12073_v49 = vor.u32 %v15888_v37, %v12072_v36  ;;  %v12240_v51 = vld [vmem:[#allocation5 + $0xa20] sm:$0xf]  ;;  %v15930_v52 = vld [vmem:[#allocation5 + $0xa34] sm:$0xf0]  ;;  %v17220_v57 = vor.u32 %v15556_v41, %v10762_v42 }
  0x6c   : > { %7553 = vmatpush.bf16.msra.mxu0 %v10969_v17  ;;  %v15840_v46 = vld [vmem:[#allocation5 + $0x764] sm:$0xf0]  ;;  %v17218_v54 = vor.u32 %v15568_v40, %v10760_v35  ;;  %v12048_v55 = vld [vmem:[#allocation5 + $0x8a0] sm:$0xf]  ;;  %v15882_v56 = vld [vmem:[#allocation5 + $0x8b4] sm:$0xf0]  ;;  %v12241_v60 = vor.u32 %v15930_v52, %v12240_v51 }
  0x6d   : > { %7572 = vmatpush.bf16.msra.mxu1 %v11161_v21  ;;  %v15984_v50 = vld [vmem:[#allocation5 + $0xbe4] sm:$0xf0]  ;;  %v11881_v58 = vor.u32 %v15840_v46, %v11880_v45  ;;  %v11856_v61 = vld [vmem:[#allocation5 + $0x720] sm:$0xf]  ;;  %v15834_v62 = vld [vmem:[#allocation5 + $0x734] sm:$0xf0]  ;;  %v12049_v0 = vor.u32 %v15882_v56, %v12048_v55 }
  0x6e   : > { %7591 = vmatpush.bf16.msra.mxu2 %v11353_v22  ;;  %v12457_v59 = vor.u32 %v15984_v50, %v12456_v47  ;;  %v12432_v63 = vld [vmem:[#allocation5 + $0xba0] sm:$0xf]  ;;  %v15978_v1 = vld [vmem:[#allocation5 + $0xbb4] sm:$0xf0]  ;;  %v12216_v2 = vld [vmem:[#allocation5 + $0x9f0] sm:$0xf]  ;;  %v11857_v6 = vor.u32 %v15834_v62, %v11856_v61 }
  0x6f   : > { %7610 = vmatpush.bf16.msra.mxu3 %v11545_v26  ;;  %v15924_v3 = vld [vmem:[#allocation5 + $0xa04] sm:$0xf0]  ;;  %v12024_v4 = vld [vmem:[#allocation5 + $0x870] sm:$0xf]  ;;  %v12433_v7 = vor.u32 %v15978_v1, %v12432_v63  ;;  %v12192_v14 = vld [vmem:[#allocation5 + $0x9c0] sm:$0xf] }
  0x70   : > { %7554 = vmatpush.bf16.msra.mxu0 %v10945_v34  ;;  %v15876_v5 = vld [vmem:[#allocation5 + $0x884] sm:$0xf0]  ;;  %v12217_v8 = vor.u32 %v15924_v3, %v12216_v2  ;;  %v11832_v9 = vld [vmem:[#allocation5 + $0x6f0] sm:$0xf]  ;;  %v15918_v15 = vld [vmem:[#allocation5 + $0x9d4] sm:$0xf0] }
  0x71   : > { %7573 = vmatpush.bf16.msra.mxu1 %v11137_v38  ;;  %v15828_v10 = vld [vmem:[#allocation5 + $0x704] sm:$0xf0]  ;;  %v12408_v11 = vld [vmem:[#allocation5 + $0xb70] sm:$0xf]  ;;  %v12025_v12 = vor.u32 %v15876_v5, %v12024_v4  ;;  %v12000_v16 = vld [vmem:[#allocation5 + $0x840] sm:$0xf]  ;;  %v12193_v23 = vor.u32 %v15918_v15, %v12192_v14 }
  0x72   : > { %7592 = vmatpush.bf16.msra.mxu2 %v11329_v39  ;;  %v15972_v13 = vld [vmem:[#allocation5 + $0xb84] sm:$0xf0]  ;;  %v15870_v17 = vld [vmem:[#allocation5 + $0x854] sm:$0xf0]  ;;  %v11833_v18 = vor.u32 %v15828_v10, %v11832_v9  ;;  %v11808_v19 = vld [vmem:[#allocation5 + $0x6c0] sm:$0xf] }
  0x73   : > { %7611 = vmatpush.bf16.msra.mxu3 %v11521_v43  ;;  %7555 = vmatmul.bf16.vlgmr.msra.gmra.mxu0 %v17214_v48  ;;  %v15822_v20 = vld [vmem:[#allocation5 + $0x6d4] sm:$0xf0]  ;;  %v12384_v21 = vld [vmem:[#allocation5 + $0xb40] sm:$0xf]  ;;  %v12409_v22 = vor.u32 %v15972_v13, %v12408_v11  ;;  %v12001_v27 = vor.u32 %v15870_v17, %v12000_v16  ;;  %v15579_v28 = vld [vmem:[%s17187_s12 + $0xc4] sm:$0xf] }
  0x74   : > { %7574 = vmatmul.bf16.vlgmr.msra.gmra.mxu1 %v17216_v53  ;;  %7623 = vmatpush.bf16.msrb.mxu0 %v11881_v58  ;;  %v15966_v24 = vld [vmem:[#allocation5 + $0xb54] sm:$0xf0]  ;;  %v10848_v25 = vld [vmem:[%s17187_s12 + $0xc0] sm:$0xf]  ;;  %v10850_v29 = vld [vmem:[%s17187_s12 + $0x120] sm:$0xf0]  ;;  %v11809_v35 = vor.u32 %v15822_v20, %v11808_v19 }
  0x75   : > { %7642 = vmatpush.bf16.msrb.mxu1 %v12073_v49  ;;  %7593 = vmatmul.bf16.vlgmr.msra.gmra.mxu2 %v17218_v54  ;;  %v15591_v26 = vld [vmem:[%s17187_s12 + $0x11c] sm:$0xf0]  ;;  %v12168_v30 = vld [vmem:[#allocation5 + $0x990] sm:$0xf]  ;;  %v15912_v31 = vld [vmem:[#allocation5 + $0x9a4] sm:$0xf0]  ;;  %v12385_v39 = vor.u32 %v15966_v24, %v12384_v21  ;;  %v17236_v50 = vor.u32 %v15579_v28, %v10850_v29 }
  0x76   : > { %7661 = vmatpush.bf16.msrb.mxu2 %v12265_v44  ;;  %7612 = vmatmul.bf16.vlgmr.msra.gmra.mxu3 %v17220_v57  ;;  %v10856_v32 = vld [vmem:[%s17187_s12 + $0xc8] sm:$0xf]  ;;  %v11976_v33 = vld [vmem:[#allocation5 + $0x810] sm:$0xf]  ;;  %v15580_v37 = vld [vmem:[%s17187_s12 + $0xcc] sm:$0xf]  ;;  %v12169_v40 = vor.u32 %v15912_v31, %v12168_v30  ;;  %v17234_v44 = vor.u32 %v15591_v26, %v10848_v25 }
  0x77   : > { %7680 = vmatpush.bf16.msrb.mxu3 %v12457_v59  ;;  %v15864_v34 = vld [vmem:[#allocation5 + $0x824] sm:$0xf0]  ;;  %v10858_v38 = vld [vmem:[%s17187_s12 + $0x128] sm:$0xf0]  ;;  %v11784_v41 = vld [vmem:[#allocation5 + $0x690] sm:$0xf] }
  0x78   : > { %7624 = vmatpush.bf16.msrb.mxu0 %v11857_v6  ;;  %v15592_v36 = vld [vmem:[%s17187_s12 + $0x124] sm:$0xf0]  ;;  %v12360_v43 = vld [vmem:[#allocation5 + $0xb10] sm:$0xf]  ;;  %v11977_v45 = vor.u32 %v15864_v34, %v11976_v33  ;;  %v12144_v47 = vld [vmem:[#allocation5 + $0x960] sm:$0xf]  ;;  %v17240_v56 = vor.u32 %v15580_v37, %v10858_v38 }
  0x79   : > { %7643 = vmatpush.bf16.msrb.mxu1 %v12049_v0  ;;  %v15816_v42 = vld [vmem:[#allocation5 + $0x6a4] sm:$0xf0]  ;;  %v15906_v49 = vld [vmem:[#allocation5 + $0x974] sm:$0xf0]  ;;  %v17238_v51 = vor.u32 %v15592_v36, %v10856_v32  ;;  %v11952_v52 = vld [vmem:[#allocation5 + $0x7e0] sm:$0xf] }
  0x7a   : > { %7662 = vmatpush.bf16.msrb.mxu2 %v12241_v60  ;;  %v15960_v46 = vld [vmem:[#allocation5 + $0xb24] sm:$0xf0]  ;;  %v15858_v55 = vld [vmem:[#allocation5 + $0x7f4] sm:$0xf0]  ;;  %v11785_v58 = vor.u32 %v15816_v42, %v11784_v41  ;;  %v12145_v60 = vor.u32 %v15906_v49, %v12144_v47  ;;  %v11760_v61 = vld [vmem:[#allocation5 + $0x660] sm:$0xf] }
  0x7b   : > { %7681 = vmatpush.bf16.msrb.mxu3 %v12433_v7  ;;  %v12361_v59 = vor.u32 %v15960_v46, %v12360_v43  ;;  %v15810_v62 = vld [vmem:[#allocation5 + $0x674] sm:$0xf0]  ;;  %v12336_v63 = vld [vmem:[#allocation5 + $0xae0] sm:$0xf]  ;;  %v11953_v0 = vor.u32 %v15858_v55, %v11952_v52  ;;  %v12120_v2 = vld [vmem:[#allocation5 + $0x930] sm:$0xf] }
  0x7c   : > { %7625 = vmatpush.bf16.msrb.mxu0 %v11833_v18  ;;  %v15954_v1 = vld [vmem:[#allocation5 + $0xaf4] sm:$0xf0]  ;;  %v15900_v3 = vld [vmem:[#allocation5 + $0x944] sm:$0xf0]  ;;  %v11928_v4 = vld [vmem:[#allocation5 + $0x7b0] sm:$0xf]  ;;  %v11761_v6 = vor.u32 %v15810_v62, %v11760_v61 }
  0x7d   : > { %7644 = vmatpush.bf16.msrb.mxu1 %v12025_v12  ;;  %v15852_v5 = vld [vmem:[#allocation5 + $0x7c4] sm:$0xf0]  ;;  %v11736_v7 = vld [vmem:[#allocation5 + $0x630] sm:$0xf]  ;;  %v12121_v9 = vor.u32 %v15900_v3, %v12120_v2  ;;  %v12096_v14 = vld [vmem:[#allocation5 + $0x900] sm:$0xf] }
  0x7e   : > { %7663 = vmatpush.bf16.msrb.mxu2 %v12217_v8  ;;  %v12337_v8 = vor.u32 %v15954_v1, %v12336_v63  ;;  %v15804_v10 = vld [vmem:[#allocation5 + $0x644] sm:$0xf0]  ;;  %v12312_v11 = vld [vmem:[#allocation5 + $0xab0] sm:$0xf]  ;;  %v11929_v13 = vor.u32 %v15852_v5, %v11928_v4  ;;  %v15894_v15 = vld [vmem:[#allocation5 + $0x914] sm:$0xf0] }
  0x7f   : > { %7682 = vmatpush.bf16.msrb.mxu3 %v12409_v22  ;;  %v15948_v12 = vld [vmem:[#allocation5 + $0xac4] sm:$0xf0]  ;;  %v11904_v16 = vld [vmem:[#allocation5 + $0x780] sm:$0xf]  ;;  %v15846_v17 = vld [vmem:[#allocation5 + $0x794] sm:$0xf0]  ;;  %v11737_v20 = vor.u32 %v15804_v10, %v11736_v7  ;;  %v12097_v25 = vor.u32 %v15894_v15, %v12096_v14 }
  0x80   : > { %7626 = vmatpush.bf16.msrb.mxu0 %v11809_v35  ;;  %v13032_v18 = vld [vmem:[#allocation5 + $0x1050] sm:$0xf]  ;;  %v16128_v19 = vld [vmem:[#allocation5 + $0x1064] sm:$0xf0]  ;;  %v11712_v21 = vld [vmem:[#allocation5 + $0x600] sm:$0xf]  ;;  %v12313_v24 = vor.u32 %v15948_v12, %v12312_v11  ;;  %v11905_v29 = vor.u32 %v15846_v17, %v11904_v16 }
  0x81   : > { %7645 = vmatpush.bf16.msrb.mxu1 %v12001_v27  ;;  %v12840_v22 = vld [vmem:[#allocation5 + $0xed0] sm:$0xf]  ;;  %v15798_v26 = vld [vmem:[#allocation5 + $0x614] sm:$0xf0]  ;;  %v12288_v27 = vld [vmem:[#allocation5 + $0xa80] sm:$0xf]  ;;  %v13033_v34 = vor.u32 %v16128_v19, %v13032_v18 }
  0x82   : > { %7664 = vmatpush.bf16.msrb.mxu2 %v12193_v23  ;;  %v16080_v23 = vld [vmem:[#allocation5 + $0xee4] sm:$0xf0]  ;;  %v15942_v28 = vld [vmem:[#allocation5 + $0xa94] sm:$0xf0]  ;;  %v10768_v30 = vld [vmem:[%s17187_s12 + $0x10] sm:$0xf]  ;;  %v11713_v42 = vor.u32 %v15798_v26, %v11712_v21 }
  0x83   : > { %7683 = vmatpush.bf16.msrb.mxu3 %v12385_v39  ;;  %7560 = vmatmul.bf16.gmra.mxu0 %v17234_v44  ;;  %v15569_v31 = vld [vmem:[%s17187_s12 + $0x6c] sm:$0xf0]  ;;  %v15557_v32 = vld [vmem:[%s17187_s12 + $0x14] sm:$0xf]  ;;  %v16032_v36 = vld [vmem:[#allocation5 + $0xd64] sm:$0xf0]  ;;  %v12841_v38 = vor.u32 %v16080_v23, %v12840_v22  ;;  %v12289_v47 = vor.u32 %v15942_v28, %v12288_v27 }
  0x84   : > { %7579 = vmatmul.bf16.gmra.mxu1 %v17236_v50  ;;  %7627 = vmatpush.bf16.msrb.mxu0 %v11785_v58  ;;  %v10770_v33 = vld [vmem:[%s17187_s12 + $0x70] sm:$0xf0]  ;;  %v12648_v35 = vld [vmem:[#allocation5 + $0xd50] sm:$0xf]  ;;  %v16176_v39 = vld [vmem:[#allocation5 + $0x11e4] sm:$0xf0] }
  0x85   : > { %7646 = vmatpush.bf16.msrb.mxu1 %v11977_v45  ;;  %7598 = vmatmul.bf16.gmra.mxu2 %v17238_v51  ;;  %v13224_v37 = vld [vmem:[#allocation5 + $0x11d0] sm:$0xf]  ;;  %v16122_v41 = vld [vmem:[#allocation5 + $0x1034] sm:$0xf0]  ;;  %v15558_v46 = vld [vmem:[%s17187_s12 + $0x1c] sm:$0xf]  ;;  %v12649_v52 = vor.u32 %v16032_v36, %v12648_v35  ;;  %v17256_v1 = vor.u32 %v15557_v32, %v10770_v33 }
  0x86   : > { %7665 = vmatpush.bf16.msrb.mxu2 %v12169_v40  ;;  %7617 = vmatmul.bf16.gmra.mxu3 %v17240_v56  ;;  %v13008_v40 = vld [vmem:[#allocation5 + $0x1020] sm:$0xf]  ;;  %v10776_v43 = vld [vmem:[%s17187_s12 + $0x18] sm:$0xf]  ;;  %v10778_v49 = vld [vmem:[%s17187_s12 + $0x78] sm:$0xf0] }
  0x87   : > { %7684 = vmatpush.bf16.msrb.mxu3 %v12361_v59  ;;  %v15570_v45 = vld [vmem:[%s17187_s12 + $0x74] sm:$0xf0]  ;;  %v12624_v55 = vld [vmem:[#allocation5 + $0xd20] sm:$0xf]  ;;  %v13225_v59 = vor.u32 %v16176_v39, %v13224_v37  ;;  %v12984_v3 = vld [vmem:[#allocation5 + $0xff0] sm:$0xf] }
  0x88   : > { %7628 = vmatpush.bf16.msrb.mxu0 %v11761_v6  ;;  %v16026_v58 = vld [vmem:[#allocation5 + $0xd34] sm:$0xf0]  ;;  %v12816_v61 = vld [vmem:[#allocation5 + $0xea0] sm:$0xf]  ;;  %v16116_v4 = vld [vmem:[#allocation5 + $0x1004] sm:$0xf0]  ;;  %v17258_v5 = vor.u32 %v15570_v45, %v10776_v43  ;;  %v17260_v6 = vor.u32 %v15558_v46, %v10778_v49 }
  0x89   : > { %7647 = vmatpush.bf16.msrb.mxu1 %v11953_v0  ;;  %v16074_v62 = vld [vmem:[#allocation5 + $0xeb4] sm:$0xf0]  ;;  %v13200_v63 = vld [vmem:[#allocation5 + $0x11a0] sm:$0xf]  ;;  %v17254_v0 = vor.u32 %v15569_v31, %v10768_v30  ;;  %v12625_v7 = vor.u32 %v16026_v58, %v12624_v55  ;;  %v16020_v10 = vld [vmem:[#allocation5 + $0xd04] sm:$0xf0]  ;;  %v12985_v12 = vor.u32 %v16116_v4, %v12984_v3 }
  0x8a   : > { %7666 = vmatpush.bf16.msrb.mxu2 %v12145_v60  ;;  %v13009_v60 = vor.u32 %v16122_v41, %v13008_v40  ;;  %v16170_v2 = vld [vmem:[#allocation5 + $0x11b4] sm:$0xf0]  ;;  %v16068_v14 = vld [vmem:[#allocation5 + $0xe84] sm:$0xf0]  ;;  %v13176_v15 = vld [vmem:[#allocation5 + $0x1170] sm:$0xf] }
  0x8b   : > { %7685 = vmatpush.bf16.msrb.mxu3 %v12337_v8  ;;  %v12817_v8 = vor.u32 %v16074_v62, %v12816_v61  ;;  %v13201_v11 = vor.u32 %v16170_v2, %v13200_v63  ;;  %v16164_v16 = vld [vmem:[#allocation5 + $0x1184] sm:$0xf0]  ;;  %v12960_v17 = vld [vmem:[#allocation5 + $0xfc0] sm:$0xf]  ;;  %v16110_v18 = vld [vmem:[#allocation5 + $0xfd4] sm:$0xf0] }
  0x8c   : > { %7629 = vmatpush.bf16.msrb.mxu0 %v11737_v20  ;;  %v12576_v21 = vld [vmem:[#allocation5 + $0xcc0] sm:$0xf]  ;;  %v16014_v22 = vld [vmem:[#allocation5 + $0xcd4] sm:$0xf0]  ;;  %v13177_v23 = vor.u32 %v16164_v16, %v13176_v15  ;;  %v16104_v30 = vld [vmem:[#allocation5 + $0xfa4] sm:$0xf0] }
  0x8d   : > { %7648 = vmatpush.bf16.msrb.mxu1 %v11929_v13  ;;  %v12792_v13 = vld [vmem:[#allocation5 + $0xe70] sm:$0xf]  ;;  %v16062_v26 = vld [vmem:[#allocation5 + $0xe54] sm:$0xf0]  ;;  %v13152_v27 = vld [vmem:[#allocation5 + $0x1140] sm:$0xf]  ;;  %v12577_v31 = vor.u32 %v16014_v22, %v12576_v21 }
  0x8e   : > { %7667 = vmatpush.bf16.msrb.mxu2 %v12121_v9  ;;  %v12600_v9 = vld [vmem:[#allocation5 + $0xcf0] sm:$0xf]  ;;  %v12793_v20 = vor.u32 %v16068_v14, %v12792_v13  ;;  %v16158_v28 = vld [vmem:[#allocation5 + $0x1154] sm:$0xf0]  ;;  %v10866_v39 = vld [vmem:[%s17187_s12 + $0x130] sm:$0xf0] }
  0x8f   : > { %7686 = vmatpush.bf16.msrb.mxu3 %v12313_v24  ;;  %v12601_v19 = vor.u32 %v16020_v10, %v12600_v9  ;;  %v12961_v24 = vor.u32 %v16110_v18, %v12960_v17  ;;  %v12552_v33 = vld [vmem:[#allocation5 + $0xc90] sm:$0xf]  ;;  %v13153_v35 = vor.u32 %v16158_v28, %v13152_v27  ;;  %v16152_v45 = vld [vmem:[#allocation5 + $0x1124] sm:$0xf0]  ;;  %v12912_v46 = vld [vmem:[#allocation5 + $0xf60] sm:$0xf] }
  0x90   : > { %7630 = vmatpush.bf16.msrb.mxu0 %v11713_v42  ;;  %v10864_v36 = vld [vmem:[%s17187_s12 + $0xd0] sm:$0xf]  ;;  %v16056_v42 = vld [vmem:[#allocation5 + $0xe24] sm:$0xf0]  ;;  %v10872_v49 = vld [vmem:[%s17187_s12 + $0xd8] sm:$0xf] }
  0x91   : > { %7649 = vmatpush.bf16.msrb.mxu1 %v11905_v29  ;;  %v12936_v29 = vld [vmem:[#allocation5 + $0xf90] sm:$0xf]  ;;  %v15582_v55 = vld [vmem:[%s17187_s12 + $0xdc] sm:$0xf]  ;;  %v12528_v61 = vld [vmem:[#allocation5 + $0xc60] sm:$0xf] }
  0x92   : > { %7668 = vmatpush.bf16.msrb.mxu2 %v12097_v25  ;;  %v12768_v25 = vld [vmem:[#allocation5 + $0xe40] sm:$0xf]  ;;  %v15593_v37 = vld [vmem:[%s17187_s12 + $0x12c] sm:$0xf0]  ;;  %v12937_v40 = vor.u32 %v16104_v30, %v12936_v29  ;;  %v10874_v58 = vld [vmem:[%s17187_s12 + $0x138] sm:$0xf0] }
  0x93   : > { %7687 = vmatpush.bf16.msrb.mxu3 %v12289_v47  ;;  %7631 = vmatmul.bf16.vlgmr.msrb.gmra.mxu0 %v17254_v0  ;;  %v12769_v32 = vor.u32 %v16062_v26, %v12768_v25  ;;  %v12744_v41 = vld [vmem:[#allocation5 + $0xe10] sm:$0xf]  ;;  %v16098_v47 = vld [vmem:[#allocation5 + $0xf74] sm:$0xf0]  ;;  %v12720_v3 = vld [vmem:[#allocation5 + $0xde0] sm:$0xf]  ;;  %v17280_v14 = vor.u32 %v15582_v55, %v10874_v58 }
  0x94   : > { %7699 = vmatpush.bf16.msra.mxu0 %v12649_v52  ;;  %7650 = vmatmul.bf16.vlgmr.msrb.gmra.mxu1 %v17256_v1  ;;  %v13128_v43 = vld [vmem:[#allocation5 + $0x1110] sm:$0xf]  ;;  %v15594_v52 = vld [vmem:[%s17187_s12 + $0x134] sm:$0xf0]  ;;  %v12913_v2 = vor.u32 %v16098_v47, %v12912_v46  ;;  %v15996_v18 = vld [vmem:[#allocation5 + $0xc44] sm:$0xf0] }
  0x95   : > { %7718 = vmatpush.bf16.msra.mxu1 %v12841_v38  ;;  %7669 = vmatmul.bf16.vlgmr.msrb.gmra.mxu2 %v17258_v5  ;;  %v15581_v38 = vld [vmem:[%s17187_s12 + $0xd4] sm:$0xf]  ;;  %v16002_v62 = vld [vmem:[#allocation5 + $0xc74] sm:$0xf0]  ;;  %v13129_v63 = vor.u32 %v16152_v45, %v13128_v43  ;;  %v17278_v13 = vor.u32 %v15594_v52, %v10872_v49  ;;  %v12504_v17 = vld [vmem:[#allocation5 + $0xc30] sm:$0xf] }
  0x96   : > { %7737 = vmatpush.bf16.msra.mxu2 %v13033_v34  ;;  %7688 = vmatmul.bf16.vlgmr.msrb.gmra.mxu3 %v17260_v6  ;;  %v16008_v34 = vld [vmem:[#allocation5 + $0xca4] sm:$0xf0]  ;;  %v16050_v4 = vld [vmem:[#allocation5 + $0xdf4] sm:$0xf0]  ;;  %v17276_v9 = vor.u32 %v15581_v38, %v10866_v39  ;;  %v12529_v15 = vor.u32 %v16002_v62, %v12528_v61  ;;  %v12696_v21 = vld [vmem:[#allocation5 + $0xdb0] sm:$0xf]  ;;  %v12505_v29 = vor.u32 %v15996_v18, %v12504_v17 }
  0x97   : > { %7756 = vmatpush.bf16.msra.mxu3 %v13225_v59  ;;  %v12553_v59 = vor.u32 %v16008_v34, %v12552_v33  ;;  %v16146_v10 = vld [vmem:[#allocation5 + $0x10f4] sm:$0xf0]  ;;  %v12721_v16 = vor.u32 %v16050_v4, %v12720_v3  ;;  %v16044_v22 = vld [vmem:[#allocation5 + $0xdc4] sm:$0xf0]  ;;  %v12864_v25 = vld [vmem:[#allocation5 + $0xf00] sm:$0xf] }
  0x98   : > { %7700 = vmatpush.bf16.msra.mxu0 %v12625_v7  ;;  %v13104_v7 = vld [vmem:[#allocation5 + $0x10e0] sm:$0xf]  ;;  %v16086_v26 = vld [vmem:[#allocation5 + $0xf14] sm:$0xf0]  ;;  %v13800_v27 = vld [vmem:[#allocation5 + $0x1650] sm:$0xf]  ;;  %v12697_v30 = vor.u32 %v16044_v22, %v12696_v21 }
  0x99   : > { %7719 = vmatpush.bf16.msra.mxu1 %v12817_v8  ;;  %v17274_v8 = vor.u32 %v15593_v37, %v10864_v36  ;;  %v16320_v28 = vld [vmem:[#allocation5 + $0x1664] sm:$0xf0]  ;;  %v12672_v33 = vld [vmem:[#allocation5 + $0xd80] sm:$0xf]  ;;  %v16038_v36 = vld [vmem:[#allocation5 + $0xd94] sm:$0xf0] }
  0x9a   : > { %7738 = vmatpush.bf16.msra.mxu2 %v13009_v60  ;;  %v12745_v60 = vor.u32 %v16056_v42, %v12744_v41  ;;  %v13056_v37 = vld [vmem:[#allocation5 + $0x1080] sm:$0xf]  ;;  %v16134_v38 = vld [vmem:[#allocation5 + $0x1094] sm:$0xf0]  ;;  %v13801_v39 = vor.u32 %v16320_v28, %v13800_v27  ;;  %v16224_v41 = vld [vmem:[#allocation5 + $0x1364] sm:$0xf0]  ;;  %v12673_v49 = vor.u32 %v16038_v36, %v12672_v33 }
  0x9b   : > { %7757 = vmatpush.bf16.msra.mxu3 %v13201_v11  ;;  %v12888_v11 = vld [vmem:[#allocation5 + $0xf30] sm:$0xf]  ;;  %v16272_v43 = vld [vmem:[#allocation5 + $0x14e4] sm:$0xf0]  ;;  %v13776_v52 = vld [vmem:[#allocation5 + $0x1620] sm:$0xf]  ;;  %v13057_v58 = vor.u32 %v16134_v38, %v13056_v37 }
  0x9c   : > { %7701 = vmatpush.bf16.msra.mxu0 %v12601_v19  ;;  %v13105_v19 = vor.u32 %v16146_v10, %v13104_v7  ;;  %v13608_v42 = vld [vmem:[#allocation5 + $0x14d0] sm:$0xf]  ;;  %v16368_v46 = vld [vmem:[#allocation5 + $0x17e4] sm:$0xf0]  ;;  %v16314_v55 = vld [vmem:[#allocation5 + $0x1634] sm:$0xf0] }
  0x9d   : > { %7720 = vmatpush.bf16.msra.mxu1 %v12793_v20  ;;  %v13992_v45 = vld [vmem:[#allocation5 + $0x17d0] sm:$0xf]  ;;  %v15559_v61 = vld [vmem:[%s17187_s12 + $0x24] sm:$0xf]  ;;  %v13392_v4 = vld [vmem:[#allocation5 + $0x1320] sm:$0xf] }
  0x9e   : > { %7739 = vmatpush.bf16.msra.mxu2 %v12985_v12  ;;  %v16092_v12 = vld [vmem:[#allocation5 + $0xf44] sm:$0xf0]  ;;  %v13993_v3 = vor.u32 %v16368_v46, %v13992_v45  ;;  %v16218_v7 = vld [vmem:[#allocation5 + $0x1334] sm:$0xf0]  ;;  %v13584_v17 = vld [vmem:[#allocation5 + $0x14a0] sm:$0xf] }
  0x9f   : > { %7758 = vmatpush.bf16.msra.mxu3 %v13177_v23  ;;  %v12889_v20 = vor.u32 %v16092_v12, %v12888_v11  ;;  %v13080_v23 = vld [vmem:[#allocation5 + $0x10b0] sm:$0xf]  ;;  %v10792_v10 = vld [vmem:[%s17187_s12 + $0x28] sm:$0xf]  ;;  %v15560_v12 = vld [vmem:[%s17187_s12 + $0x2c] sm:$0xf] }
  0xa0   : > { %7702 = vmatpush.bf16.msra.mxu0 %v12577_v31  ;;  %v12480_v31 = vld [vmem:[#allocation5 + $0xc00] sm:$0xf]  ;;  %v15572_v11 = vld [vmem:[%s17187_s12 + $0x84] sm:$0xf0]  ;;  %v16266_v18 = vld [vmem:[#allocation5 + $0x14b4] sm:$0xf0] }
  0xa1   : > { %7721 = vmatpush.bf16.msra.mxu1 %v12769_v32  ;;  %v15990_v32 = vld [vmem:[#allocation5 + $0xc14] sm:$0xf0]  ;;  %v13752_v22 = vld [vmem:[#allocation5 + $0x15f0] sm:$0xf]  ;;  %v16212_v27 = vld [vmem:[#allocation5 + $0x1304] sm:$0xf0]  ;;  %v17298_v28 = vor.u32 %v15572_v11, %v10792_v10 }
  0xa2   : > { %7740 = vmatpush.bf16.msra.mxu2 %v12961_v24  ;;  %v16140_v24 = vld [vmem:[#allocation5 + $0x10c4] sm:$0xf0]  ;;  %v12481_v47 = vor.u32 %v15990_v32, %v12480_v31  ;;  %v16362_v21 = vld [vmem:[#allocation5 + $0x17b4] sm:$0xf0]  ;;  %v13560_v32 = vld [vmem:[#allocation5 + $0x1470] sm:$0xf] }
  0xa3   : > { %7759 = vmatpush.bf16.msra.mxu3 %v13153_v35  ;;  %7636 = vmatmul.bf16.gmra.mxu0 %v17274_v8  ;;  %v13081_v34 = vor.u32 %v16140_v24, %v13080_v23  ;;  %v12865_v35 = vor.u32 %v16086_v26, %v12864_v25  ;;  %v16308_v25 = vld [vmem:[#allocation5 + $0x1604] sm:$0xf0]  ;;  %v13368_v26 = vld [vmem:[#allocation5 + $0x12f0] sm:$0xf]  ;;  %v13728_v38 = vld [vmem:[#allocation5 + $0x15c0] sm:$0xf] }
  0xa4   : > { %7703 = vmatpush.bf16.msra.mxu0 %v12553_v59  ;;  %7655 = vmatmul.bf16.gmra.mxu1 %v17276_v9  ;;  %v10784_v59 = vld [vmem:[%s17187_s12 + $0x20] sm:$0xf]  ;;  %v16260_v33 = vld [vmem:[#allocation5 + $0x1484] sm:$0xf0]  ;;  %v13944_v36 = vld [vmem:[#allocation5 + $0x1770] sm:$0xf] }
  0xa5   : > { %7722 = vmatpush.bf16.msra.mxu1 %v12745_v60  ;;  %7674 = vmatmul.bf16.gmra.mxu2 %v17278_v13  ;;  %v15571_v60 = vld [vmem:[%s17187_s12 + $0x7c] sm:$0xf0]  ;;  %v16356_v37 = vld [vmem:[#allocation5 + $0x1784] sm:$0xf0]  ;;  %v16254_v46 = vld [vmem:[#allocation5 + $0x1454] sm:$0xf0] }
  0xa6   : > { %7741 = vmatpush.bf16.msra.mxu2 %v12937_v40  ;;  %7693 = vmatmul.bf16.gmra.mxu3 %v17280_v14  ;;  %v13416_v40 = vld [vmem:[#allocation5 + $0x1350] sm:$0xf]  ;;  %v17294_v23 = vor.u32 %v15571_v60, %v10784_v59  ;;  %v13536_v45 = vld [vmem:[#allocation5 + $0x1440] sm:$0xf]  ;;  %v16296_v59 = vld [vmem:[#allocation5 + $0x15a4] sm:$0xf0] }
  0xa7   : > { %7760 = vmatpush.bf16.msra.mxu3 %v13129_v63  ;;  %v13417_v62 = vor.u32 %v16224_v41, %v13416_v40  ;;  %v10786_v63 = vld [vmem:[%s17187_s12 + $0x80] sm:$0xf0]  ;;  %v13344_v40 = vld [vmem:[#allocation5 + $0x12c0] sm:$0xf]  ;;  %v16206_v41 = vld [vmem:[#allocation5 + $0x12d4] sm:$0xf0] }
  0xa8   : > { %7704 = vmatpush.bf16.msra.mxu0 %v12529_v15  ;;  %v13777_v15 = vor.u32 %v16314_v55, %v13776_v52  ;;  %v17296_v24 = vor.u32 %v15559_v61, %v10786_v63  ;;  %v13920_v52 = vld [vmem:[#allocation5 + $0x1740] sm:$0xf]  ;;  %v16350_v55 = vld [vmem:[#allocation5 + $0x1754] sm:$0xf0]  ;;  %v13320_v60 = vld [vmem:[#allocation5 + $0x1290] sm:$0xf] }
  0xa9   : > { %7723 = vmatpush.bf16.msra.mxu1 %v12721_v16  ;;  %v10794_v16 = vld [vmem:[%s17187_s12 + $0x88] sm:$0xf0]  ;;  %v16200_v61 = vld [vmem:[#allocation5 + $0x12a4] sm:$0xf0]  ;;  %v13921_v63 = vor.u32 %v16350_v55, %v13920_v52  ;;  %v15583_v10 = vld [vmem:[%s17187_s12 + $0xe4] sm:$0xf] }
  0xaa   : > { %7742 = vmatpush.bf16.msra.mxu2 %v12913_v2  ;;  %v13609_v2 = vor.u32 %v16272_v43, %v13608_v42  ;;  %v13561_v42 = vor.u32 %v16260_v33, %v13560_v32  ;;  %v13945_v43 = vor.u32 %v16356_v37, %v13944_v36  ;;  %v10882_v11 = vld [vmem:[%s17187_s12 + $0x140] sm:$0xf0]  ;;  %v13488_v32 = vld [vmem:[#allocation5 + $0x13e0] sm:$0xf]  ;;  %v16242_v33 = vld [vmem:[#allocation5 + $0x13f4] sm:$0xf0] }
  0xab   : > { %7761 = vmatpush.bf16.msra.mxu3 %v13105_v19  ;;  %v13393_v19 = vor.u32 %v16218_v7, %v13392_v4  ;;  %v10880_v4 = vld [vmem:[%s17187_s12 + $0xe0] sm:$0xf]  ;;  %v16338_v37 = vld [vmem:[#allocation5 + $0x16f4] sm:$0xf0]  ;;  %v13464_v52 = vld [vmem:[#allocation5 + $0x13b0] sm:$0xf] }
  0xac   : > { %7705 = vmatpush.bf16.msra.mxu0 %v12505_v29  ;;  %v17300_v29 = vor.u32 %v15560_v12, %v10794_v16  ;;  %v15595_v7 = vld [vmem:[%s17187_s12 + $0x13c] sm:$0xf0]  ;;  %v13896_v16 = vld [vmem:[#allocation5 + $0x1710] sm:$0xf]  ;;  %v16236_v55 = vld [vmem:[#allocation5 + $0x13c4] sm:$0xf0] }
  0xad   : > { %7724 = vmatpush.bf16.msra.mxu1 %v12697_v30  ;;  %v13585_v30 = vor.u32 %v16266_v18, %v13584_v17  ;;  %v16344_v17 = vld [vmem:[#allocation5 + $0x1724] sm:$0xf0]  ;;  %v13680_v18 = vld [vmem:[#allocation5 + $0x1560] sm:$0xf]  ;;  %s16958_s27 = scalar_lea.hbm %s18525_s6, 384 }
  0xae   : > { %7743 = vmatpush.bf16.msra.mxu2 %v12889_v20  ;;  %v13968_v20 = vld [vmem:[#allocation5 + $0x17a0] sm:$0xf] }
  0xaf   : > { %7762 = vmatpush.bf16.msra.mxu3 %v13081_v34  ;;  %v13969_v31 = vor.u32 %v16362_v21, %v13968_v20  ;;  %v13753_v34 = vor.u32 %v16308_v25, %v13752_v22  ;;  %v13296_v20 = vld [vmem:[#allocation5 + $0x1260] sm:$0xf]  ;;  %v16194_v21 = vld [vmem:[#allocation5 + $0x1274] sm:$0xf0]  ;;  %v10888_v22 = vld [vmem:[%s17187_s12 + $0xe8] sm:$0xf] }
  0xb0   : > { %7706 = vmatpush.bf16.msra.mxu0 %v12481_v47  ;;  %v15596_v25 = vld [vmem:[%s17187_s12 + $0x144] sm:$0xf0]  ;;  %v13872_v36 = vld [vmem:[#allocation5 + $0x16e0] sm:$0xf] }
  0xb1   : > { %7725 = vmatpush.bf16.msra.mxu1 %v12673_v49  ;;  %v13345_v49 = vor.u32 %v16206_v41, %v13344_v40  ;;  %v17316_v40 = vor.u32 %v15583_v10, %v10882_v11  ;;  %v16284_v41 = vld [vmem:[#allocation5 + $0x1544] sm:$0xf0]  ;;  %v14184_v10 = vld [vmem:[#allocation5 + $0x1950] sm:$0xf] }
  0xb2   : > { %7744 = vmatpush.bf16.msra.mxu2 %v12865_v35  ;;  %v13369_v35 = vor.u32 %v16212_v27, %v13368_v26  ;;  %v15584_v26 = vld [vmem:[%s17187_s12 + $0xec] sm:$0xf]  ;;  %v16416_v11 = vld [vmem:[#allocation5 + $0x1964] sm:$0xf0] }
  0xb3   : > { %7763 = vmatpush.bf16.msra.mxu3 %v13057_v58  ;;  %7707 = vmatmul.bf16.vlgmr.msra.gmra.mxu0 %v17294_v23  ;;  %v13704_v58 = vld [vmem:[#allocation5 + $0x1590] sm:$0xf]  ;;  %v10890_v27 = vld [vmem:[%s17187_s12 + $0x148] sm:$0xf0] }
  0xb4   : > { %7775 = vmatpush.bf16.msrb.mxu0 %v13417_v62  ;;  %7726 = vmatmul.bf16.vlgmr.msra.gmra.mxu1 %v17296_v24  ;;  %v13537_v62 = vor.u32 %v16254_v46, %v13536_v45  ;;  %v13705_v12 = vor.u32 %v16296_v59, %v13704_v58  ;;  %v17318_v45 = vor.u32 %v15596_v25, %v10888_v22  ;;  %v13848_v58 = vld [vmem:[#allocation5 + $0x16b0] sm:$0xf]  ;;  %v16464_v25 = vld [vmem:[#allocation5 + $0x1ae4] sm:$0xf0] }
  0xb5   : > { %7794 = vmatpush.bf16.msrb.mxu1 %v13609_v2  ;;  %7745 = vmatmul.bf16.vlgmr.msra.gmra.mxu2 %v17298_v28  ;;  %v13512_v2 = vld [vmem:[#allocation5 + $0x1410] sm:$0xf]  ;;  %v17320_v46 = vor.u32 %v15584_v26, %v10890_v27  ;;  %v14185_v27 = vor.u32 %v16416_v11, %v14184_v10 }
  0xb6   : > { %7813 = vmatpush.bf16.msrb.mxu2 %v13801_v39  ;;  %v16302_v39 = vld [vmem:[#allocation5 + $0x15d4] sm:$0xf0]  ;;  %7764 = vmatmul.bf16.vlgmr.msra.gmra.mxu3 %v17300_v29  ;;  %v14376_v22 = vld [vmem:[#allocation5 + $0x1ad0] sm:$0xf] }
  0xb7   : > { %7832 = vmatpush.bf16.msrb.mxu3 %v13993_v3  ;;  %v13729_v47 = vor.u32 %v16302_v39, %v13728_v38  ;;  %v16248_v3 = vld [vmem:[#allocation5 + $0x1424] sm:$0xf0]  ;;  %v13656_v38 = vld [vmem:[#allocation5 + $0x1530] sm:$0xf]  ;;  %v17314_v39 = vor.u32 %v15595_v7, %v10880_v4 }
  0xb8   : > { %7776 = vmatpush.bf16.msrb.mxu0 %v13393_v19  ;;  %v16290_v19 = vld [vmem:[#allocation5 + $0x1574] sm:$0xf0]  ;;  %v13657_v59 = vor.u32 %v16284_v41, %v13656_v38  ;;  %v14568_v4 = vld [vmem:[#allocation5 + $0x1c50] sm:$0xf]  ;;  %v16512_v7 = vld [vmem:[#allocation5 + $0x1c64] sm:$0xf0] }
  0xb9   : > { %7795 = vmatpush.bf16.msrb.mxu1 %v13585_v30  ;;  %v13513_v30 = vor.u32 %v16248_v3, %v13512_v2  ;;  %v13248_v2 = vld [vmem:[#allocation5 + $0x1200] sm:$0xf]  ;;  %v16182_v3 = vld [vmem:[#allocation5 + $0x1214] sm:$0xf0]  ;;  %v14569_v26 = vor.u32 %v16512_v7, %v14568_v4  ;;  %v10800_v38 = vld [vmem:[%s17187_s12 + $0x30] sm:$0xf] }
  0xba   : > { %7814 = vmatpush.bf16.msrb.mxu2 %v13777_v15  ;;  %v13321_v15 = vor.u32 %v16200_v61, %v13320_v60  ;;  %v16332_v61 = vld [vmem:[#allocation5 + $0x16c4] sm:$0xf0]  ;;  %v15573_v41 = vld [vmem:[%s17187_s12 + $0x8c] sm:$0xf0] }
  0xbb   : > { %7833 = vmatpush.bf16.msrb.mxu3 %v13969_v31  ;;  %v13897_v31 = vor.u32 %v16344_v17, %v13896_v16  ;;  %v13440_v16 = vld [vmem:[#allocation5 + $0x1380] sm:$0xf]  ;;  %v16230_v17 = vld [vmem:[#allocation5 + $0x1394] sm:$0xf0]  ;;  %v14520_v4 = vld [vmem:[#allocation5 + $0x1bf0] sm:$0xf] }
  0xbc   : > { %7777 = vmatpush.bf16.msrb.mxu0 %v13369_v35  ;;  %v13297_v35 = vor.u32 %v16194_v21, %v13296_v20  ;;  %v13249_v20 = vor.u32 %v16182_v3, %v13248_v2  ;;  %v16326_v21 = vld [vmem:[#allocation5 + $0x1694] sm:$0xf0]  ;;  %v15562_v2 = vld [vmem:[%s17187_s12 + $0x3c] sm:$0xf]  ;;  %v16500_v7 = vld [vmem:[#allocation5 + $0x1c04] sm:$0xf0] }
  0xbd   : > { %7796 = vmatpush.bf16.msrb.mxu1 %v13561_v42  ;;  %v13272_v42 = vld [vmem:[#allocation5 + $0x1230] sm:$0xf]  ;;  %v10810_v3 = vld [vmem:[%s17187_s12 + $0x98] sm:$0xf0] }
  0xbe   : > { %7815 = vmatpush.bf16.msrb.mxu2 %v13753_v34  ;;  %v13681_v34 = vor.u32 %v16290_v19, %v13680_v18  ;;  %v13824_v18 = vld [vmem:[#allocation5 + $0x1680] sm:$0xf] }
  0xbf   : > { %7834 = vmatpush.bf16.msrb.mxu3 %v13945_v43  ;;  %v16188_v43 = vld [vmem:[#allocation5 + $0x1244] sm:$0xf0] }
  0xc0   : > { %7778 = vmatpush.bf16.msrb.mxu0 %v13345_v49  ;;  %v13873_v49 = vor.u32 %v16338_v37, %v13872_v36  ;;  %v13273_v60 = vor.u32 %v16188_v43, %v13272_v42  ;;  %v13441_v36 = vor.u32 %v16230_v17, %v13440_v16  ;;  %v13825_v37 = vor.u32 %v16326_v21, %v13824_v18  ;;  %v15561_v42 = vld [vmem:[%s17187_s12 + $0x34] sm:$0xf]  ;;  %v14328_v16 = vld [vmem:[#allocation5 + $0x1a70] sm:$0xf]  ;;  %v16548_v21 = vld [vmem:[#allocation5 + $0x1d84] sm:$0xf0] }
  0xc1   : > { %7797 = vmatpush.bf16.msrb.mxu1 %v13537_v62  ;;  %v13632_v62 = vld [vmem:[#allocation5 + $0x1500] sm:$0xf]  ;;  %v10802_v43 = vld [vmem:[%s17187_s12 + $0x90] sm:$0xf0]  ;;  %v17334_v17 = vor.u32 %v15573_v41, %v10800_v38  ;;  %v16542_v41 = vld [vmem:[#allocation5 + $0x1d54] sm:$0xf0] }
  0xc2   : > { %7816 = vmatpush.bf16.msrb.mxu2 %v13729_v47  ;;  %v13489_v47 = vor.u32 %v16242_v33, %v13488_v32  ;;  %v14544_v32 = vld [vmem:[#allocation5 + $0x1c20] sm:$0xf]  ;;  %v16506_v33 = vld [vmem:[#allocation5 + $0x1c34] sm:$0xf0]  ;;  %v17336_v18 = vor.u32 %v15561_v42, %v10802_v43 }
  0xc3   : > { %7835 = vmatpush.bf16.msrb.mxu3 %v13921_v63  ;;  %v16278_v63 = vld [vmem:[#allocation5 + $0x1514] sm:$0xf0]  ;;  %7712 = vmatmul.bf16.gmra.mxu0 %v17314_v39  ;;  %v14688_v38 = vld [vmem:[#allocation5 + $0x1d40] sm:$0xf] }
  0xc4   : > { %7779 = vmatpush.bf16.msrb.mxu0 %v13321_v15  ;;  %7731 = vmatmul.bf16.gmra.mxu1 %v17316_v40  ;;  %v13849_v15 = vor.u32 %v16332_v61, %v13848_v58  ;;  %v13633_v19 = vor.u32 %v16278_v63, %v13632_v62  ;;  %v16554_v61 = vld [vmem:[#allocation5 + $0x1db4] sm:$0xf0] }
  0xc5   : > { %7798 = vmatpush.bf16.msrb.mxu1 %v13513_v30  ;;  %7750 = vmatmul.bf16.gmra.mxu2 %v17318_v45  ;;  %v14760_v30 = vld [vmem:[#allocation5 + $0x1dd0] sm:$0xf]  ;;  %v10808_v62 = vld [vmem:[%s17187_s12 + $0x38] sm:$0xf] }
  0xc6   : > { %7817 = vmatpush.bf16.msrb.mxu2 %v13705_v12  ;;  %7769 = vmatmul.bf16.gmra.mxu3 %v17320_v46  ;;  %v13465_v12 = vor.u32 %v16236_v55, %v13464_v52  ;;  %v14352_v52 = vld [vmem:[#allocation5 + $0x1aa0] sm:$0xf]  ;;  %v14545_v55 = vor.u32 %v16506_v33, %v14544_v32  ;;  %v15574_v63 = vld [vmem:[%s17187_s12 + $0x94] sm:$0xf0] }
  0xc7   : > { %7836 = vmatpush.bf16.msrb.mxu3 %v13897_v31  ;;  %v16560_v31 = vld [vmem:[#allocation5 + $0x1de4] sm:$0xf0] }
  0xc8   : > { %7780 = vmatpush.bf16.msrb.mxu0 %v13297_v35  ;;  %v16410_v35 = vld [vmem:[#allocation5 + $0x1934] sm:$0xf0] }
  0xc9   : > { %7799 = vmatpush.bf16.msrb.mxu1 %v13489_v47  ;;  %v14377_v47 = vor.u32 %v16464_v25, %v14376_v22  ;;  %v17338_v22 = vor.u32 %v15574_v63, %v10808_v62  ;;  %v17340_v25 = vor.u32 %v15562_v2, %v10810_v3  ;;  %v14664_v62 = vld [vmem:[#allocation5 + $0x1d10] sm:$0xf]  ;;  %v16536_v63 = vld [vmem:[#allocation5 + $0x1d24] sm:$0xf0] }
  0xca   : > { %7818 = vmatpush.bf16.msrb.mxu2 %v13681_v34  ;;  %v14160_v34 = vld [vmem:[#allocation5 + $0x1920] sm:$0xf] }
  0xcb   : > { %7837 = vmatpush.bf16.msrb.mxu3 %v13873_v49  ;;  %v14761_v49 = vor.u32 %v16560_v31, %v14760_v30  ;;  %v14161_v58 = vor.u32 %v16410_v35, %v14160_v34  ;;  %18582 = vst [vmem:[#allocation15_spill] sm:$0xff] %v17338_v22  ;;  %v14496_v30 = vld [vmem:[#allocation5 + $0x1bc0] sm:$0xf]  ;;  %v16494_v31 = vld [vmem:[#allocation5 + $0x1bd4] sm:$0xf0] }
  0xcc   : > { %7781 = vmatpush.bf16.msrb.mxu0 %v13273_v60  ;;  %v14736_v60 = vld [vmem:[#allocation5 + $0x1da0] sm:$0xf]  ;;  %18583 = vst [vmem:[#allocation16_spill] sm:$0xff] %v17340_v25  ;;  %v16398_v35 = vld [vmem:[#allocation5 + $0x18d4] sm:$0xf0]  ;;  %v14497_v42 = vor.u32 %v16494_v31, %v14496_v30 }
  0xcd   : > { %7800 = vmatpush.bf16.msrb.mxu1 %v13465_v12  ;;  %v14737_v11 = vor.u32 %v16554_v61, %v14736_v60  ;;  %v14136_v12 = vld [vmem:[#allocation5 + $0x18f0] sm:$0xf]  ;;  %v14112_v34 = vld [vmem:[#allocation5 + $0x18c0] sm:$0xf]  ;;  %v16440_v61 = vld [vmem:[#allocation5 + $0x1a24] sm:$0xf0] }
  0xce   : > { %7819 = vmatpush.bf16.msrb.mxu2 %v13657_v59  ;;  %v16458_v59 = vld [vmem:[#allocation5 + $0x1ab4] sm:$0xf0]  ;;  %v14113_v43 = vor.u32 %v16398_v35, %v14112_v34  ;;  %v14280_v60 = vld [vmem:[#allocation5 + $0x1a10] sm:$0xf]  ;;  %v14640_v30 = vld [vmem:[#allocation5 + $0x1ce0] sm:$0xf] }
  0xcf   : > { %7838 = vmatpush.bf16.msrb.mxu3 %v13849_v15  ;;  %v14353_v10 = vor.u32 %v16458_v59, %v14352_v52  ;;  %v16404_v15 = vld [vmem:[#allocation5 + $0x1904] sm:$0xf0]  ;;  %v16530_v31 = vld [vmem:[#allocation5 + $0x1cf4] sm:$0xf0]  ;;  %v15586_v34 = vld [vmem:[%s17187_s12 + $0xfc] sm:$0xf] }
  0xd0   : > { %7782 = vmatpush.bf16.msrb.mxu0 %v13249_v20  ;;  %v14712_v20 = vld [vmem:[#allocation5 + $0x1d70] sm:$0xf]  ;;  %v16392_v59 = vld [vmem:[#allocation5 + $0x18a4] sm:$0xf0]  ;;  %v10906_v35 = vld [vmem:[%s17187_s12 + $0x158] sm:$0xf0] }
  0xd1   : > { %7801 = vmatpush.bf16.msrb.mxu1 %v13441_v36  ;;  %v14713_v33 = vor.u32 %v16548_v21, %v14712_v20  ;;  %v14304_v36 = vld [vmem:[#allocation5 + $0x1a40] sm:$0xf]  ;;  %v16386_v21 = vld [vmem:[#allocation5 + $0x1874] sm:$0xf0] }
  0xd2   : > { %7820 = vmatpush.bf16.msrb.mxu2 %v13633_v19  ;;  %v16452_v19 = vld [vmem:[#allocation5 + $0x1a84] sm:$0xf0]  ;;  %v14064_v20 = vld [vmem:[#allocation5 + $0x1860] sm:$0xf] }
  0xd3   : > { %7839 = vmatpush.bf16.msrb.mxu3 %v13825_v37  ;;  %v14329_v32 = vor.u32 %v16452_v19, %v14328_v16  ;;  %7783 = vmatmul.bf16.vlgmr.msrb.gmra.mxu0 %v17334_v17  ;;  %v16446_v37 = vld [vmem:[#allocation5 + $0x1a54] sm:$0xf0]  ;;  %v14281_v16 = vor.u32 %v16440_v61, %v14280_v60  ;;  %v14665_v19 = vor.u32 %v16536_v63, %v14664_v62  ;;  %v14616_v60 = vld [vmem:[#allocation5 + $0x1cb0] sm:$0xf]  ;;  %v16524_v61 = vld [vmem:[#allocation5 + $0x1cc4] sm:$0xf0] }
  0xd4   : > { %7851 = vmatpush.bf16.msra.mxu0 %v14185_v27  ;;  %v14137_v27 = vor.u32 %v16404_v15, %v14136_v12  ;;  %7802 = vmatmul.bf16.vlgmr.msrb.gmra.mxu1 %v17336_v18  ;;  %v14305_v52 = vor.u32 %v16446_v37, %v14304_v36  ;;  %v15585_v12 = vld [vmem:[%s17187_s12 + $0xf4] sm:$0xf]  ;;  %v14065_v37 = vor.u32 %v16386_v21, %v14064_v20  ;;  %v14592_v20 = vld [vmem:[#allocation5 + $0x1c80] sm:$0xf]  ;;  %v16518_v21 = vld [vmem:[#allocation5 + $0x1c94] sm:$0xf0] }
  0xd5   : > { %7870 = vmatpush.bf16.msra.mxu1 %v14377_v47  ;;  %7821 = vmatmul.bf16.vlgmr.msrb.gmra.mxu2 %v17338_v22  ;;  %v14472_v47 = vld [vmem:[#allocation5 + $0x1b90] sm:$0xf]  ;;  %v10898_v15 = vld [vmem:[%s17187_s12 + $0x150] sm:$0xf0]  ;;  %v17360_v63 = vor.u32 %v15586_v34, %v10906_v35  ;;  %v16656_v35 = vld [vmem:[#allocation5 + $0x20e4] sm:$0xf0] }
  0xd6   : > { %7889 = vmatpush.bf16.msra.mxu2 %v14569_v26  ;;  %v14521_v26 = vor.u32 %v16500_v7, %v14520_v4  ;;  %7840 = vmatmul.bf16.vlgmr.msrb.gmra.mxu3 %v17340_v25  ;;  %v14448_v4 = vld [vmem:[#allocation5 + $0x1b60] sm:$0xf]  ;;  %v16482_v7 = vld [vmem:[#allocation5 + $0x1b74] sm:$0xf0] }
  0xd7   : > { %7908 = vmatpush.bf16.msra.mxu3 %v14761_v49  ;;  %v16488_v49 = vld [vmem:[#allocation5 + $0x1ba4] sm:$0xf0]  ;;  %v14449_v36 = vor.u32 %v16482_v7, %v14448_v4  ;;  %18587 = vst [vmem:[#allocation20_spill] sm:$0xff] %v17360_v63  ;;  %v16470_v7 = vld [vmem:[#allocation5 + $0x1b14] sm:$0xf0] }
  0xd8   : > { %7852 = vmatpush.bf16.msra.mxu0 %v14161_v58  ;;  %v14088_v58 = vld [vmem:[#allocation5 + $0x1890] sm:$0xf]  ;;  %v14473_v2 = vor.u32 %v16488_v49, %v14472_v47  ;;  %v16380_v49 = vld [vmem:[#allocation5 + $0x1844] sm:$0xf0] }
  0xd9   : > { %7871 = vmatpush.bf16.msra.mxu1 %v14353_v10  ;;  %v14089_v3 = vor.u32 %v16392_v59, %v14088_v58  ;;  %v10896_v10 = vld [vmem:[%s17187_s12 + $0xf0] sm:$0xf]  ;;  %v17356_v58 = vor.u32 %v15585_v12, %v10898_v15  ;;  %v16428_v59 = vld [vmem:[#allocation5 + $0x19c4] sm:$0xf0]  ;;  %v14208_v12 = vld [vmem:[#allocation5 + $0x1980] sm:$0xf] }
  0xda   : > { %7890 = vmatpush.bf16.msra.mxu2 %v14545_v55  ;;  %v14689_v55 = vor.u32 %v16542_v41, %v14688_v38  ;;  %v14424_v38 = vld [vmem:[#allocation5 + $0x1b30] sm:$0xf]  ;;  %v16476_v41 = vld [vmem:[#allocation5 + $0x1b44] sm:$0xf0]  ;;  %v16422_v15 = vld [vmem:[#allocation5 + $0x1994] sm:$0xf0] }
  0xdb   : > { %7909 = vmatpush.bf16.msra.mxu3 %v14737_v11  ;;  %v15597_v11 = vld [vmem:[%s17187_s12 + $0x14c] sm:$0xf0]  ;;  %18585 = vst [vmem:[#allocation18_spill] sm:$0xff] %v17356_v58 }
  0xdc   : > { %7853 = vmatpush.bf16.msra.mxu0 %v14137_v27  ;;  %v16434_v27 = vld [vmem:[#allocation5 + $0x19f4] sm:$0xf0]  ;;  %v14040_v47 = vld [vmem:[#allocation5 + $0x1830] sm:$0xf] }
  0xdd   : > { %7872 = vmatpush.bf16.msra.mxu1 %v14329_v32  ;;  %v10904_v32 = vld [vmem:[%s17187_s12 + $0xf8] sm:$0xf]  ;;  %v14041_v4 = vor.u32 %v16380_v49, %v14040_v47  ;;  %v15312_v49 = vld [vmem:[#allocation5 + $0x2220] sm:$0xf] }
  0xde   : > { %7891 = vmatpush.bf16.msra.mxu2 %v14521_v26  ;;  %v14256_v26 = vld [vmem:[#allocation5 + $0x19e0] sm:$0xf] }
  0xdf   : > { %7910 = vmatpush.bf16.msra.mxu3 %v14713_v33  ;;  %v15598_v33 = vld [vmem:[%s17187_s12 + $0x154] sm:$0xf0] }
  0xe0   : > { %7854 = vmatpush.bf16.msra.mxu0 %v14113_v43  ;;  %v14641_v43 = vor.u32 %v16530_v31, %v14640_v30  ;;  %v17358_v62 = vor.u32 %v15598_v33, %v10904_v32  ;;  %v14952_v30 = vld [vmem:[#allocation5 + $0x1f50] sm:$0xf]  ;;  %v16608_v31 = vld [vmem:[#allocation5 + $0x1f64] sm:$0xf0] }
  0xe1   : > { %7873 = vmatpush.bf16.msra.mxu1 %v14305_v52  ;;  %v14232_v52 = vld [vmem:[#allocation5 + $0x19b0] sm:$0xf]  ;;  %v14953_v47 = vor.u32 %v16608_v31, %v14952_v30  ;;  %v15564_v30 = vld [vmem:[%s17187_s12 + $0x4c] sm:$0xf] }
  0xe2   : > { %7892 = vmatpush.bf16.msra.mxu2 %v14497_v42  ;;  %v14257_v42 = vor.u32 %v16434_v27, %v14256_v26  ;;  %18586 = vst [vmem:[#allocation19_spill] sm:$0xff] %v17358_v62  ;;  %v15336_v26 = vld [vmem:[#allocation5 + $0x2250] sm:$0xf]  ;;  %v16704_v27 = vld [vmem:[#allocation5 + $0x2264] sm:$0xf0] }
  0xe3   : > { %7911 = vmatpush.bf16.msra.mxu3 %v14689_v55  ;;  %v17354_v55 = vor.u32 %v15597_v11, %v10896_v10  ;;  %v14233_v10 = vor.u32 %v16428_v59, %v14232_v52  ;;  %v14617_v11 = vor.u32 %v16524_v61, %v14616_v60  ;;  %v15144_v32 = vld [vmem:[#allocation5 + $0x20d0] sm:$0xf]  ;;  %v16698_v52 = vld [vmem:[#allocation5 + $0x2234] sm:$0xf0]  ;;  %v14928_v61 = vld [vmem:[#allocation5 + $0x1f20] sm:$0xf] }
  0xe4   : > { %7855 = vmatpush.bf16.msra.mxu0 %v14089_v3  ;;  %v14425_v3 = vor.u32 %v16476_v41, %v14424_v38  ;;  %7807 = vmatmul.bf16.gmra.mxu1 %v17356_v58  ;;  %v14209_v38 = vor.u32 %v16422_v15, %v14208_v12  ;;  %v14593_v41 = vor.u32 %v16518_v21, %v14592_v20  ;;  %v15563_v12 = vld [vmem:[%s17187_s12 + $0x44] sm:$0xf] }
  0xe5   : > { %7874 = vmatpush.bf16.msra.mxu1 %v14281_v16  ;;  %18584 = vst [vmem:[#allocation17_spill] sm:$0xff] %v17354_v55  ;;  %v14016_v16 = vld [vmem:[#allocation5 + $0x1800] sm:$0xf]  ;;  %7788 = vmatmul.bf16.gmra.mxu0 %v17354_v55  ;;  %v15145_v59 = vor.u32 %v16656_v35, %v15144_v32  ;;  %v10818_v15 = vld [vmem:[%s17187_s12 + $0xa0] sm:$0xf0]  ;;  %v15313_v20 = vor.u32 %v16698_v52, %v15312_v49 }
  0xe6   : > { %7893 = vmatpush.bf16.msra.mxu2 %v14473_v2  ;;  %v14400_v2 = vld [vmem:[#allocation5 + $0x1b00] sm:$0xf]  ;;  %7845 = vmatmul.bf16.gmra.mxu3 %v17360_v63  ;;  %v16692_v35 = vld [vmem:[#allocation5 + $0x2204] sm:$0xf0]  ;;  %v15480_v49 = vld [vmem:[#allocation5 + $0x2370] sm:$0xf] }
  0xe7   : > { %7912 = vmatpush.bf16.msra.mxu3 %v14665_v19  ;;  %v16374_v19 = vld [vmem:[#allocation5 + $0x1814] sm:$0xf0]  ;;  %7826 = vmatmul.bf16.gmra.mxu2 %v17358_v62  ;;  %v14401_v33 = vor.u32 %v16470_v7, %v14400_v2  ;;  %v15504_v7 = vld [vmem:[#allocation5 + $0x23a0] sm:$0xf]  ;;  %v16740_v52 = vld [vmem:[#allocation5 + $0x2384] sm:$0xf0] }
  0xe8   : > { %7856 = vmatpush.bf16.msra.mxu0 %v14065_v37  ;;  %v14017_v34 = vor.u32 %v16374_v19, %v14016_v16  ;;  %v16752_v37 = vld [vmem:[#allocation5 + $0x23e4] sm:$0xf0]  ;;  %v16602_v2 = vld [vmem:[#allocation5 + $0x1f34] sm:$0xf0]  ;;  %v15000_v63 = vld [vmem:[#allocation5 + $0x1fb0] sm:$0xf] }
  0xe9   : > { %7875 = vmatpush.bf16.msra.mxu1 %v14257_v42  ;;  %v1533_v42 = vld [vmem:[%s18521_s2] sm:$0x3f]  ;;  %v16746_v16 = vld [vmem:[#allocation5 + $0x23b4] sm:$0xf0]  ;;  %v14929_v21 = vor.u32 %v16602_v2, %v14928_v61 }
  0xea   : > { %7894 = vmatpush.bf16.msra.mxu2 %v14449_v36  ;;  %v15528_v36 = vld [vmem:[#allocation5 + $0x23d0] sm:$0xf]  ;;  %v17369_v19 = vperm.slane %v1533_v42, 0  ;;  %v15505_v32 = vor.u32 %v16746_v16, %v15504_v7  ;;  %v15264_v7 = vld [vmem:[#allocation5 + $0x21c0] sm:$0xf] }
  0xeb   : > { %7913 = vmatpush.bf16.msra.mxu3 %v14641_v43  ;;  %v15337_v43 = vor.u32 %v16704_v27, %v15336_v26  ;;  %v15529_v60 = vor.u32 %v16752_v37, %v15528_v36  ;;  %v10824_v26 = vld [vmem:[%s17187_s12 + $0x48] sm:$0xf]  ;;  %v14904_v36 = vld [vmem:[#allocation5 + $0x1ef0] sm:$0xf]  ;;  %v16686_v16 = vld [vmem:[#allocation5 + $0x21d4] sm:$0xf0] }
  0xec   : > { %7857 = vmatpush.bf16.msra.mxu0 %v14041_v4  ;;  %v16650_v4 = vld [vmem:[#allocation5 + $0x20b4] sm:$0xf0]  ;;  %v15576_v27 = vld [vmem:[%s17187_s12 + $0xa4] sm:$0xf0] }
  0xed   : > { %7876 = vmatpush.bf16.msra.mxu1 %v14233_v10  ;;  %v10816_v10 = vld [vmem:[%s17187_s12 + $0x40] sm:$0xf]  ;;  %v16596_v37 = vld [vmem:[#allocation5 + $0x1f04] sm:$0xf0]  ;;  %v17384_v61 = vor.u32 %v15576_v27, %v10824_v26  ;;  %v16638_v26 = vld [vmem:[#allocation5 + $0x2054] sm:$0xf0] }
  0xee   : > { %7895 = vmatpush.bf16.msra.mxu2 %v14425_v3  ;;  %v15120_v3 = vld [vmem:[#allocation5 + $0x20a0] sm:$0xf] }
  0xef   : > { %7914 = vmatpush.bf16.msra.mxu3 %v14617_v11  ;;  %v15575_v11 = vld [vmem:[%s17187_s12 + $0x9c] sm:$0xf0]  ;;  %v15121_v31 = vor.u32 %v16650_v4, %v15120_v3  ;;  %18590 = vst [vmem:[#allocation23_spill] sm:$0xff] %v17384_v61  ;;  %v14905_v4 = vor.u32 %v16596_v37, %v14904_v36 }
  0xf0   : > { %7858 = vmatpush.bf16.msra.mxu0 %v14017_v34  ;;  %v15288_v34 = vld [vmem:[#allocation5 + $0x21f0] sm:$0xf]  ;;  %v17379_v42 = vor.u32 %v15575_v11, %v10816_v10  ;;  %v15456_v27 = vld [vmem:[#allocation5 + $0x2340] sm:$0xf] }
  0xf1   : > { %7877 = vmatpush.bf16.msra.mxu1 %v14209_v38  ;;  %v15096_v38 = vld [vmem:[#allocation5 + $0x2070] sm:$0xf]  ;;  %v15289_v3 = vor.u32 %v16692_v35, %v15288_v34  ;;  %v16680_v34 = vld [vmem:[#allocation5 + $0x21a4] sm:$0xf0] }
  0xf2   : > { %7896 = vmatpush.bf16.msra.mxu2 %v14401_v33  ;;  %v10826_v33 = vld [vmem:[%s17187_s12 + $0xa8] sm:$0xf0]  ;;  %18588 = vst [vmem:[#allocation21_spill] sm:$0xff] %v17379_v42 }
  0xf3   : > { %7915 = vmatpush.bf16.msra.mxu3 %v14593_v41  ;;  %v7556_v41 = vpop.f32.mrf.mxu0  ;;  %v17386_v2 = vor.u32 %v15564_v30, %v10826_v33  ;;  %v16734_v30 = vld [vmem:[#allocation5 + $0x2354] sm:$0xf0]  ;;  %v15240_v33 = vld [vmem:[#allocation5 + $0x2190] sm:$0xf] }
  0xf4   : > { %7927 = vmatpush.bf16.msrb.mxu0 %v14953_v47  ;;  %v16644_v47 = vld [vmem:[#allocation5 + $0x2084] sm:$0xf0]  ;;  %v15457_v37 = vor.u32 %v16734_v30, %v15456_v27  ;;  %v15599_v27 = vld [vmem:[%s17187_s12 + $0x15c] sm:$0xf0]  ;;  %v15587_v30 = vld [vmem:[%s17187_s12 + $0x104] sm:$0xf] }
  0xf5   : > { %7946 = vmatpush.bf16.msrb.mxu1 %v15145_v59  ;;  %v7557_v59 = vadd.f32 %v7556_v41, %v17369_v19  ;;  %18591 = vst [vmem:[#allocation24_spill] sm:$0xff] %v17386_v2  ;;  %v15097_v11 = vor.u32 %v16644_v47, %v15096_v38  ;;  %7859 = vmatmul.bf16.vlgmr.msra.gmra.mxu0 %v17379_v42  ;;  %v14856_v38 = vld [vmem:[#allocation5 + $0x1e90] sm:$0xf]  ;;  %v16584_v41 = vld [vmem:[#allocation5 + $0x1ea4] sm:$0xf0] }
  0xf6   : > { %7965 = vmatpush.bf16.msrb.mxu2 %v15337_v43  ;;  %v17381_v43 = vor.u32 %v15563_v12, %v10818_v15  ;;  %v15481_v12 = vor.u32 %v16740_v52, %v15480_v49  ;;  %v14880_v15 = vld [vmem:[#allocation5 + $0x1ec0] sm:$0xf]  ;;  %7916 = vmatmul.bf16.vlgmr.msra.gmra.mxu3 %v17386_v2  ;;  %v15048_v47 = vld [vmem:[#allocation5 + $0x2010] sm:$0xf]  ;;  %v15600_v2 = vld [vmem:[%s17187_s12 + $0x164] sm:$0xf0] }
  0xf7   : > { %7984 = vmatpush.bf16.msrb.mxu3 %v15529_v60  ;;  %v7575_v60 = vpop.f32.mrf.mxu1  ;;  %7897 = vmatmul.bf16.vlgmr.msra.gmra.mxu2 %v17384_v61  ;;  %v15192_v61 = vld [vmem:[#allocation5 + $0x2130] sm:$0xf] }
  0xf8   : > { %18589 = vst [vmem:[#allocation22_spill] sm:$0xff] %v17381_v43  ;;  %7928 = vmatpush.bf16.msrb.mxu0 %v14929_v21  ;;  %v7576_v10 = vadd.f32 %v7575_v60, %v7557_v59  ;;  %v15072_v21 = vld [vmem:[#allocation5 + $0x2040] sm:$0xf]  ;;  %7878 = vmatmul.bf16.vlgmr.msra.gmra.mxu1 %v17381_v43  ;;  %v7594_v35 = vpop.f32.mrf.mxu2  ;;  %v16632_v60 = vld [vmem:[#allocation5 + $0x2024] sm:$0xf0] }
  0xf9   : > { %7947 = vmatpush.bf16.msrb.mxu1 %v15121_v31  ;;  %v15265_v31 = vor.u32 %v16686_v16, %v15264_v7  ;;  %v15073_v36 = vor.u32 %v16638_v26, %v15072_v21  ;;  %v7613_v52 = vpop.f32.mrf.mxu3  ;;  %v10912_v26 = vld [vmem:[%s17187_s12 + $0x100] sm:$0xf]  ;;  %v16668_v43 = vld [vmem:[#allocation5 + $0x2144] sm:$0xf0] }
  0xfa   : > { %7966 = vmatpush.bf16.msrb.mxu2 %v15313_v20  ;;  %v16590_v20 = vld [vmem:[#allocation5 + $0x1ed4] sm:$0xf0]  ;;  %v7595_v49 = vadd.f32 %v7594_v35, %v7576_v10  ;;  %v10914_v35 = vld [vmem:[%s17187_s12 + $0x160] sm:$0xf0]  ;;  %v17403_v25 = vor.u32 %v15599_v27, %v10912_v26  ;;  %v14784_v27 = vld [vmem:[#allocation5 + $0x1e00] sm:$0xf] }
  0xfb   : > { %7985 = vmatpush.bf16.msrb.mxu3 %v15505_v32  ;;  %v14881_v32 = vor.u32 %v16590_v20, %v14880_v15  ;;  %v7558_v59 = vpop.f32.mrf.mxu0  ;;  %v14857_v15 = vor.u32 %v16584_v41, %v14856_v38  ;;  %v15216_v20 = vld [vmem:[#allocation5 + $0x2160] sm:$0xf]  ;;  %v16674_v10 = vld [vmem:[#allocation5 + $0x2174] sm:$0xf0]  ;;  %v10920_v41 = vld [vmem:[%s17187_s12 + $0x108] sm:$0xf]  ;;  %v17405_v22 = vor.u32 %v15587_v30, %v10914_v35 }
  0xfc   : > { %7929 = vmatpush.bf16.msrb.mxu0 %v14905_v4  ;;  %v16728_v4 = vld [vmem:[#allocation5 + $0x2324] sm:$0xf0]  ;;  %v7559_v7 = vadd.f32 %v7558_v59, %v17369_v19  ;;  %v15049_v59 = vor.u32 %v16632_v60, %v15048_v47  ;;  %v16722_v38 = vld [vmem:[#allocation5 + $0x22f4] sm:$0xf0]  ;;  %18592 = vst [vmem:[#allocation25_spill] sm:$0xff] %v17403_v25 }
  0xfd   : > { %7948 = vmatpush.bf16.msrb.mxu1 %v15097_v11  ;;  %v17393_v11 = vadd.f32 %v7613_v52, %v7595_v49  ;;  %v14832_v52 = vld [vmem:[#allocation5 + $0x1e60] sm:$0xf]  ;;  %18593 = vst [vmem:[#allocation26_spill] sm:$0xff] %v17405_v22  ;;  %v16662_v26 = vld [vmem:[#allocation5 + $0x2114] sm:$0xf0] }
  0xfe   : > { %7967 = vmatpush.bf16.msrb.mxu2 %v15289_v3  ;;  %v15432_v3 = vld [vmem:[#allocation5 + $0x2310] sm:$0xf]  ;;  %v16566_v30 = vld [vmem:[#allocation5 + $0x1e14] sm:$0xf0] }
  0xff   : > { %7986 = vmatpush.bf16.msrb.mxu3 %v15481_v12  ;;  %v7577_v16 = vpop.f32.mrf.mxu1  ;;  %v15241_v12 = vor.u32 %v16680_v34, %v15240_v33  ;;  %v15433_v49 = vor.u32 %v16728_v4, %v15432_v3  ;;  %v16626_v33 = vld [vmem:[#allocation5 + $0x1ff4] sm:$0xf0]  ;;  %v15408_v34 = vld [vmem:[#allocation5 + $0x22e0] sm:$0xf]  ;;  %v14808_v3 = vld [vmem:[#allocation5 + $0x1e30] sm:$0xf] }
 0x100   : > { %7930 = vmatpush.bf16.msrb.mxu0 %v14881_v32  ;;  %v7578_v21 = vadd.f32 %v7577_v16, %v7559_v7  ;;  %v15024_v32 = vld [vmem:[#allocation5 + $0x1fe0] sm:$0xf]  ;;  %v15588_v7 = vld [vmem:[%s17187_s12 + $0x10c] sm:$0xf]  ;;  %v7596_v42 = vpop.f32.mrf.mxu2  ;;  %v15409_v60 = vor.u32 %v16722_v38, %v15408_v34  ;;  %v16572_v4 = vld [vmem:[#allocation5 + $0x1e44] sm:$0xf0] }
 0x101   : > { %7949 = vmatpush.bf16.msrb.mxu1 %v15073_v36  ;;  %v10922_v16 = vld [vmem:[%s17187_s12 + $0x168] sm:$0xf0]  ;;  %v15217_v36 = vor.u32 %v16674_v10, %v15216_v20  ;;  %v15025_v47 = vor.u32 %v16626_v33, %v15024_v32  ;;  %v7615_v58 = vpop.f32.mrf.mxu3  ;;  %v16716_v20 = vld [vmem:[#allocation5 + $0x22c4] sm:$0xf0]  ;;  %v14976_v34 = vld [vmem:[#allocation5 + $0x1f80] sm:$0xf] }
 0x102   : > { %7968 = vmatpush.bf16.msrb.mxu2 %v15265_v31  ;;  %v16578_v31 = vld [vmem:[#allocation5 + $0x1e74] sm:$0xf0]  ;;  %v7597_v62 = vadd.f32 %v7596_v42, %v7578_v21  ;;  %v15193_v42 = vor.u32 %v16668_v43, %v15192_v61  ;;  %v14809_v21 = vor.u32 %v16572_v4, %v14808_v3  ;;  %v15360_v38 = vld [vmem:[#allocation5 + $0x2280] sm:$0xf]  ;;  %v15645_v43 = vld [vmem:[#allocation5 + $0x154] sm:$0xf] }
 0x103   : > { %7987 = vmatpush.bf16.msrb.mxu3 %v15457_v37  ;;  %v14833_v37 = vor.u32 %v16578_v31, %v14832_v52  ;;  %v7561_v55 = vpop.f32.mrf.mxu0  ;;  %v15168_v31 = vld [vmem:[#allocation5 + $0x2100] sm:$0xf]  ;;  %v11114_v61 = vld [vmem:[#allocation5 + $0x168] sm:$0xf0] }
 0x104   : > { %7931 = vmatpush.bf16.msrb.mxu0 %v14857_v15  ;;  %v15384_v15 = vld [vmem:[#allocation5 + $0x22b0] sm:$0xf]  ;;  %v7562_v10 = vadd.f32 %v7561_v55, %v17369_v19  ;;  %v17412_v32 = vadd.f32 %v7615_v58, %v7597_v62  ;;  %v16710_v58 = vld [vmem:[#allocation5 + $0x2294] sm:$0xf0]  ;;  %v15741_v62 = vld [vmem:[#allocation5 + $0x454] sm:$0xf] }
 0x105   : > { %7950 = vmatpush.bf16.msrb.mxu1 %v15049_v59  ;;  %v17408_v59 = vor.u32 %v15600_v2, %v10920_v41  ;;  %v15385_v55 = vor.u32 %v16716_v20, %v15384_v15  ;;  %v16614_v2 = vld [vmem:[#allocation5 + $0x1f94] sm:$0xf0]  ;;  %7864 = vmatmul.bf16.gmra.mxu0 %v17403_v25  ;;  %v11498_v41 = vld [vmem:[#allocation5 + $0x468] sm:$0xf0]  ;;  %v15361_v4 = vor.u32 %v16710_v58, %v15360_v38  ;;  %v10832_v38 = vld [vmem:[%s17187_s12 + $0x50] sm:$0xf] }
 0x106   : > { %7969 = vmatpush.bf16.msrb.mxu2 %v15241_v12  ;;  %v16620_v12 = vld [vmem:[#allocation5 + $0x1fc4] sm:$0xf0]  ;;  %v14977_v3 = vor.u32 %v16614_v2, %v14976_v34  ;;  %v15783_v34 = vld [vmem:[#allocation5 + $0x5a4] sm:$0xf]  ;;  %v15577_v58 = vld [vmem:[%s17187_s12 + $0xac] sm:$0xf0] }
 0x107   : > { %7988 = vmatpush.bf16.msrb.mxu3 %v15433_v49  ;;  %v7580_v52 = vpop.f32.mrf.mxu1  ;;  %18594 = vst [vmem:[#allocation27_spill] sm:$0xff] %v17408_v59  ;;  %v17410_v49 = vor.u32 %v15588_v7, %v10922_v16  ;;  %v15001_v33 = vor.u32 %v16620_v12, %v15000_v63  ;;  %7902 = vmatmul.bf16.gmra.mxu2 %v17408_v59  ;;  %v15693_v7 = vld [vmem:[#allocation5 + $0x2d4] sm:$0xf]  ;;  %v11474_v59 = vld [vmem:[#allocation5 + $0x438] sm:$0xf0] }
 0x108   : > { %7932 = vmatpush.bf16.msrb.mxu0 %v14833_v37  ;;  %v7581_v35 = vadd.f32 %v7580_v52, %v7562_v10  ;;  %7883 = vmatmul.bf16.gmra.mxu1 %v17405_v22  ;;  %v15169_v63 = vor.u32 %v16662_v26, %v15168_v31  ;;  %v14785_v16 = vor.u32 %v16566_v30, %v14784_v27  ;;  %v15789_v37 = vld [vmem:[#allocation5 + $0x5d4] sm:$0xf]  ;;  %v15639_v27 = vld [vmem:[#allocation5 + $0x124] sm:$0xf]  ;;  %v11090_v30 = vld [vmem:[#allocation5 + $0x138] sm:$0xf0] }
 0x109   : > { %18595 = vst [vmem:[#allocation28_spill] sm:$0xff] %v17410_v49  ;;  %7951 = vmatpush.bf16.msrb.mxu1 %v15025_v47  ;;  %7921 = vmatmul.bf16.gmra.mxu3 %v17410_v49  ;;  %v11690_v47 = vld [vmem:[#allocation5 + $0x5e8] sm:$0xf0]  ;;  %v7618_v15 = vpop.f32.mrf.mxu3  ;;  %v11501_v10 = vor.u32 %v15741_v62, %v11498_v41  ;;  %v11117_v52 = vor.u32 %v15645_v43, %v11114_v61  ;;  %v15735_v49 = vld [vmem:[#allocation5 + $0x424] sm:$0xf] }
 0x10a   : > { %7970 = vmatpush.bf16.msrb.mxu2 %v15217_v36  ;;  %v11306_v36 = vld [vmem:[#allocation5 + $0x2e8] sm:$0xf0]  ;;  %v11693_v26 = vor.u32 %v15789_v37, %v11690_v47  ;;  %v15565_v62 = vld [vmem:[%s17187_s12 + $0x54] sm:$0xf]  ;;  %v11477_v43 = vor.u32 %v15735_v49, %v11474_v59  ;;  %v11093_v61 = vor.u32 %v15639_v27, %v11090_v30  ;;  %v10842_v47 = vld [vmem:[%s17187_s12 + $0xb8] sm:$0xf0] }
 0x10b   : > { %7989 = vmatpush.bf16.msrb.mxu3 %v15409_v60  ;;  %v7599_v60 = vpop.f32.mrf.mxu2  ;;  %v7563_v20 = vpop.f32.mrf.mxu0  ;;  %v10834_v41 = vld [vmem:[%s17187_s12 + $0xb0] sm:$0xf0]  ;;  %v11258_v49 = vld [vmem:[#allocation5 + $0x288] sm:$0xf0] }
 0x10c   : > { %7933 = vmatpush.bf16.msrb.mxu0 %v14809_v21  ;;  %v7600_v12 = vadd.f32 %v7599_v60, %v7581_v35  ;;  %v11309_v21 = vor.u32 %v15693_v7, %v11306_v36  ;;  %v11282_v35 = vld [vmem:[#allocation5 + $0x2b8] sm:$0xf0]  ;;  %v10840_v7 = vld [vmem:[%s17187_s12 + $0x58] sm:$0xf]  ;;  %v15729_v60 = vld [vmem:[#allocation5 + $0x3f4] sm:$0xf]  ;;  %v17431_v59 = vor.u32 %v15565_v62, %v10834_v41 }
 0x10d   : > { %7952 = vmatpush.bf16.msrb.mxu1 %v15001_v33  ;;  %v15687_v33 = vld [vmem:[#allocation5 + $0x2a4] sm:$0xf]  ;;  %v11162_v25 = vld [vmem:[#allocation5 + $0x1c8] sm:$0xf0] }
 0x10e   : > { %7971 = vmatpush.bf16.msrb.mxu2 %v15193_v42  ;;  %v7564_v42 = vadd.f32 %v7563_v20, %v17369_v19  ;;  %v11666_v19 = vld [vmem:[#allocation5 + $0x5b8] sm:$0xf0]  ;;  %v11285_v36 = vor.u32 %v15687_v33, %v11282_v35  ;;  %v15681_v20 = vld [vmem:[#allocation5 + $0x274] sm:$0xf]  ;;  %18597 = vst [vmem:[#allocation30_spill] sm:$0xff] %v17431_v59 }
 0x10f   : > { %7990 = vmatpush.bf16.msrb.mxu3 %v15385_v55  ;;  %v7582_v31 = vpop.f32.mrf.mxu1  ;;  %v17419_v55 = vadd.f32 %v7618_v15, %v7600_v12  ;;  %v11669_v37 = vor.u32 %v15783_v34, %v11666_v19  ;;  %v15633_v12 = vld [vmem:[#allocation5 + $0xf4] sm:$0xf]  ;;  %v11066_v15 = vld [vmem:[#allocation5 + $0x108] sm:$0xf0]  ;;  %v11261_v62 = vor.u32 %v15681_v20, %v11258_v49 }
 0x110   : > { %7934 = vmatpush.bf16.msrb.mxu0 %v14785_v16  ;;  %v7583_v2 = vadd.f32 %v7582_v31, %v7564_v42  ;;  %v15566_v16 = vld [vmem:[%s17187_s12 + $0x5c] sm:$0xf]  ;;  %v15669_v20 = vld [vmem:[#allocation5 + $0x214] sm:$0xf]  ;;  %v11210_v49 = vld [vmem:[#allocation5 + $0x228] sm:$0xf0] }
 0x111   : > { %7953 = vmatpush.bf16.msrb.mxu1 %v14977_v3  ;;  %v11450_v3 = vld [vmem:[#allocation5 + $0x408] sm:$0xf0]  ;;  %v7620_v31 = vpop.f32.mrf.mxu3  ;;  %v17435_v33 = vor.u32 %v15566_v16, %v10842_v47  ;;  %v11618_v16 = vld [vmem:[#allocation5 + $0x558] sm:$0xf0] }
 0x112   : > { %7972 = vmatpush.bf16.msrb.mxu2 %v15169_v63  ;;  %v15578_v63 = vld [vmem:[%s17187_s12 + $0xb4] sm:$0xf0]  ;;  %v11453_v19 = vor.u32 %v15729_v60, %v11450_v3  ;;  %v11402_v47 = vld [vmem:[#allocation5 + $0x3a8] sm:$0xf0] }
 0x113   : > { %7991 = vmatpush.bf16.msrb.mxu3 %v15361_v4  ;;  %v7601_v4 = vpop.f32.mrf.mxu2  ;;  %v17433_v30 = vor.u32 %v15578_v63, %v10840_v7  ;;  %18599 = vst [vmem:[#allocation32_spill] sm:$0xff] %v17435_v33  ;;  %v11234_v7 = vld [vmem:[#allocation5 + $0x258] sm:$0xf0]  ;;  %v15771_v63 = vld [vmem:[#allocation5 + $0x544] sm:$0xf] }
 0x114   : > { %8003 = vmatpush.bf16.msra.mxu0 %v11117_v52  ;;  %v7602_v42 = vadd.f32 %v7601_v4, %v7583_v2  ;;  %v15777_v52 = vld [vmem:[#allocation5 + $0x574] sm:$0xf]  ;;  %v11069_v2 = vor.u32 %v15633_v12, %v11066_v15  ;;  %v15675_v4 = vld [vmem:[#allocation5 + $0x244] sm:$0xf]  ;;  %v11621_v3 = vor.u32 %v15771_v63, %v11618_v16  ;;  %v11018_v15 = vld [vmem:[#allocation5 + $0xa8] sm:$0xf0] }
 0x115   : > { %8022 = vmatpush.bf16.msra.mxu1 %v11309_v21  ;;  %v11642_v21 = vld [vmem:[#allocation5 + $0x588] sm:$0xf0]  ;;  %18598 = vst [vmem:[#allocation31_spill] sm:$0xff] %v17433_v30  ;;  %v11237_v60 = vor.u32 %v15675_v4, %v11234_v7  ;;  %v15621_v12 = vld [vmem:[#allocation5 + $0x94] sm:$0xf]  ;;  %v11213_v7 = vor.u32 %v15669_v20, %v11210_v49 }
 0x116   : > { %8041 = vmatpush.bf16.msra.mxu2 %v11501_v10  ;;  %v17429_v10 = vor.u32 %v15577_v58, %v10832_v38  ;;  %v17437_v35 = vadd.f32 %v7620_v31, %v7602_v42  ;;  %v15723_v38 = vld [vmem:[#allocation5 + $0x3c4] sm:$0xf]  ;;  %v11426_v58 = vld [vmem:[#allocation5 + $0x3d8] sm:$0xf0]  ;;  %v11645_v41 = vor.u32 %v15777_v52, %v11642_v21  ;;  %v15765_v52 = vld [vmem:[#allocation5 + $0x514] sm:$0xf] }
 0x117   : > { %8060 = vmatpush.bf16.msra.mxu3 %v11693_v26  ;;  %v7632_v26 = vpop.f32.mrf.mxu0  ;;  %v7651_v27 = vpop.f32.mrf.mxu1  ;;  %7973 = vmatmul.bf16.vlgmr.msrb.gmra.mxu2 %v17433_v30  ;;  %v11594_v21 = vld [vmem:[#allocation5 + $0x528] sm:$0xf0]  ;;  %v10930_v4 = vld [vmem:[%s17187_s12 + $0x170] sm:$0xf0]  ;;  %v15615_v63 = vld [vmem:[#allocation5 + $0x64] sm:$0xf] }
 0x118   : > { %18596 = vst [vmem:[#allocation29_spill] sm:$0xff] %v17429_v10  ;;  %8004 = vmatpush.bf16.msra.mxu0 %v11093_v61  ;;  %v7633_v34 = vadd.f32 %v7632_v26, %v17393_v11  ;;  %v11042_v61 = vld [vmem:[#allocation5 + $0xd8] sm:$0xf0]  ;;  %7954 = vmatmul.bf16.vlgmr.msrb.gmra.mxu1 %v17431_v59  ;;  %v11429_v11 = vor.u32 %v15723_v38, %v11426_v58  ;;  %v15711_v58 = vld [vmem:[#allocation5 + $0x364] sm:$0xf] }
 0x119   : > { %8023 = vmatpush.bf16.msra.mxu1 %v11285_v36  ;;  %7935 = vmatmul.bf16.vlgmr.msrb.gmra.mxu0 %v17429_v10  ;;  %v7689_v31 = vpop.f32.mrf.mxu3  ;;  %v11021_v38 = vor.u32 %v15621_v12, %v11018_v15  ;;  %v10994_v16 = vld [vmem:[#allocation5 + $0x78] sm:$0xf0]  ;;  %v10936_v15 = vld [vmem:[%s17187_s12 + $0x118] sm:$0xf] }
 0x11a   : > { %8042 = vmatpush.bf16.msra.mxu2 %v11477_v43  ;;  %v15627_v43 = vld [vmem:[#allocation5 + $0xc4] sm:$0xf]  ;;  %v7652_v22 = vadd.f32 %v7651_v27, %v7633_v34  ;;  %7992 = vmatmul.bf16.vlgmr.msrb.gmra.mxu3 %v17435_v33  ;;  %v11570_v12 = vld [vmem:[#allocation5 + $0x4f8] sm:$0xf0]  ;;  %v11354_v33 = vld [vmem:[#allocation5 + $0x348] sm:$0xf0] }
 0x11b   : > { %8061 = vmatpush.bf16.msra.mxu3 %v11669_v37  ;;  %v11045_v36 = vor.u32 %v15627_v43, %v11042_v61  ;;  %v15717_v37 = vld [vmem:[#allocation5 + $0x394] sm:$0xf]  ;;  %v7670_v42 = vpop.f32.mrf.mxu2  ;;  %v10928_v43 = vld [vmem:[%s17187_s12 + $0x110] sm:$0xf] }
 0x11c   : > { %8005 = vmatpush.bf16.msra.mxu0 %v11069_v2  ;;  %v7671_v26 = vadd.f32 %v7670_v42, %v7652_v22  ;;  %v11405_v2 = vor.u32 %v15717_v37, %v11402_v47  ;;  %v15601_v22 = vld [vmem:[%s17187_s12 + $0x16c] sm:$0xf0]  ;;  %v15589_v61 = vld [vmem:[%s17187_s12 + $0x114] sm:$0xf]  ;;  %v11186_v37 = vld [vmem:[#allocation5 + $0x1f8] sm:$0xf0] }
 0x11d   : > { %8024 = vmatpush.bf16.msra.mxu1 %v11261_v62  ;;  %v11378_v62 = vld [vmem:[#allocation5 + $0x378] sm:$0xf0]  ;;  %v15759_v47 = vld [vmem:[#allocation5 + $0x4e4] sm:$0xf]  ;;  %v15602_v42 = vld [vmem:[%s17187_s12 + $0x174] sm:$0xf0]  ;;  %v17455_v59 = vor.u32 %v15601_v22, %v10928_v43  ;;  %v17457_v10 = vor.u32 %v15589_v61, %v10930_v4 }
 0x11e   : > { %8043 = vmatpush.bf16.msra.mxu2 %v11453_v19  ;;  %v11573_v49 = vor.u32 %v15759_v47, %v11570_v12  ;;  %v11330_v22 = vld [vmem:[#allocation5 + $0x318] sm:$0xf0]  ;;  %v15603_v61 = vld [vmem:[#allocation5 + $0x4] sm:$0xf] }
 0x11f   : > { %8062 = vmatpush.bf16.msra.mxu3 %v11645_v41  ;;  %v7634_v27 = vpop.f32.mrf.mxu0  ;;  %v7653_v34 = vpop.f32.mrf.mxu1  ;;  %v17445_v41 = vadd.f32 %v7689_v31, %v7671_v26  ;;  %v10938_v31 = vld [vmem:[%s17187_s12 + $0x178] sm:$0xf0]  ;;  %v10997_v26 = vor.u32 %v15615_v63, %v10994_v16  ;;  %18600 = vst [vmem:[#allocation33_spill] sm:$0xff] %v17455_v59  ;;  %v17459_v16 = vor.u32 %v15602_v42, %v10936_v15  ;;  %v15651_v15 = vld [vmem:[#allocation5 + $0x184] sm:$0xf] }
 0x120   : > { %v7635_v19 = vadd.f32 %v7634_v27, %v17412_v32  ;;  %8006 = vmatpush.bf16.msra.mxu0 %v11045_v36  ;;  %v11597_v32 = vor.u32 %v15765_v52, %v11594_v21  ;;  %v15705_v27 = vld [vmem:[#allocation5 + $0x334] sm:$0xf]  ;;  %v10970_v21 = vld [vmem:[#allocation5 + $0x48] sm:$0xf0]  ;;  %18601 = vst [vmem:[#allocation34_spill] sm:$0xff] %v17457_v10 }
 0x121   : > { %8025 = vmatpush.bf16.msra.mxu1 %v11237_v60  ;;  %v15590_v60 = vld [vmem:[%s17187_s12 + $0x11c] sm:$0xf]  ;;  %v15609_v52 = vld [vmem:[#allocation5 + $0x34] sm:$0xf]  ;;  %v7691_v30 = vpop.f32.mrf.mxu3  ;;  %18602 = vst [vmem:[#allocation35_spill] sm:$0xff] %v17459_v16 }
 0x122   : > { %8044 = vmatpush.bf16.msra.mxu2 %v11429_v11  ;;  %v15663_v11 = vld [vmem:[#allocation5 + $0x1e4] sm:$0xf]  ;;  %v7654_v36 = vadd.f32 %v7653_v34, %v7635_v19  ;;  %v15657_v34 = vld [vmem:[#allocation5 + $0x1b4] sm:$0xf]  ;;  %v10973_v43 = vor.u32 %v15609_v52, %v10970_v21  ;;  %v10946_v4 = vld [vmem:[#allocation5 + $0x18] sm:$0xf0] }
 0x123   : > { %8063 = vmatpush.bf16.msra.mxu3 %v11621_v3  ;;  %v11381_v3 = vor.u32 %v15711_v58, %v11378_v62  ;;  %v11189_v20 = vor.u32 %v15663_v11, %v11186_v37  ;;  %v7672_v19 = vpop.f32.mrf.mxu2  ;;  %v11357_v37 = vor.u32 %v15705_v27, %v11354_v33  ;;  %v11138_v42 = vld [vmem:[#allocation5 + $0x198] sm:$0xf0]  ;;  %v15933_v33 = vld [vmem:[#allocation5 + $0xa54] sm:$0xf]  ;;  %v12458_v21 = vld [vmem:[#allocation5 + $0xbe8] sm:$0xf0] }
 0x124   : > { %8007 = vmatpush.bf16.msra.mxu0 %v11021_v38  ;;  %v11546_v38 = vld [vmem:[#allocation5 + $0x4c8] sm:$0xf0]  ;;  %v7673_v58 = vadd.f32 %v7672_v19, %v7654_v36  ;;  %v11165_v36 = vor.u32 %v15657_v34, %v11162_v25  ;;  %v15885_v27 = vld [vmem:[#allocation5 + $0x8d4] sm:$0xf]  ;;  %v11141_v34 = vor.u32 %v15651_v15, %v11138_v42  ;;  %v12434_v15 = vld [vmem:[#allocation5 + $0xbb8] sm:$0xf0] }
 0x125   : > { %8026 = vmatpush.bf16.msra.mxu1 %v11213_v7  ;;  %v17461_v7 = vor.u32 %v15590_v60, %v10938_v31  ;;  %v15747_v60 = vld [vmem:[#allocation5 + $0x484] sm:$0xf]  ;;  %v15981_v52 = vld [vmem:[#allocation5 + $0xbd4] sm:$0xf] }
 0x126   : > { %8045 = vmatpush.bf16.msra.mxu2 %v11405_v2  ;;  %v15753_v2 = vld [vmem:[#allocation5 + $0x4b4] sm:$0xf]  ;;  %v17464_v47 = vadd.f32 %v7691_v30, %v7673_v58 }
 0x127   : > { %8064 = vmatpush.bf16.msra.mxu3 %v11597_v32  ;;  %v7637_v62 = vpop.f32.mrf.mxu0  ;;  %v7656_v63 = vpop.f32.mrf.mxu1  ;;  %18603 = vst [vmem:[#allocation36_spill] sm:$0xff] %v17461_v7  ;;  %v15699_v32 = vld [vmem:[#allocation5 + $0x304] sm:$0xf]  ;;  %v11549_v12 = vor.u32 %v15753_v2, %v11546_v38  ;;  %7978 = vmatmul.bf16.gmra.mxu2 %v17459_v16  ;;  %v15837_v30 = vld [vmem:[#allocation5 + $0x754] sm:$0xf] }
 0x128   : > { %v7638_v11 = vadd.f32 %v7637_v62, %v17419_v55  ;;  %8008 = vmatpush.bf16.msra.mxu0 %v10997_v26  ;;  %7959 = vmatmul.bf16.gmra.mxu1 %v17457_v10  ;;  %v11522_v55 = vld [vmem:[#allocation5 + $0x498] sm:$0xf0]  ;;  %v11882_v26 = vld [vmem:[#allocation5 + $0x768] sm:$0xf0]  ;;  %v11333_v25 = vor.u32 %v15699_v32, %v11330_v22  ;;  %v15831_v32 = vld [vmem:[#allocation5 + $0x724] sm:$0xf] }
 0x129   : > { %8027 = vmatpush.bf16.msra.mxu1 %v11189_v20  ;;  %7940 = vmatmul.bf16.gmra.mxu0 %v17455_v59  ;;  %v10949_v20 = vor.u32 %v15603_v61, %v10946_v4  ;;  %v11525_v19 = vor.u32 %v15747_v60, %v11522_v55  ;;  %v7694_v38 = vpop.f32.mrf.mxu3  ;;  %v11885_v62 = vor.u32 %v15837_v30, %v11882_v26  ;;  %v11858_v22 = vld [vmem:[#allocation5 + $0x738] sm:$0xf0]  ;;  %v15879_v61 = vld [vmem:[#allocation5 + $0x8a4] sm:$0xf]  ;;  %v15921_v30 = vld [vmem:[#allocation5 + $0x9f4] sm:$0xf] }
 0x12a   : > { %8046 = vmatpush.bf16.msra.mxu2 %v11381_v3  ;;  %v7657_v31 = vadd.f32 %v7656_v63, %v7638_v11  ;;  %v12266_v3 = vld [vmem:[#allocation5 + $0xa68] sm:$0xf0]  ;;  %7997 = vmatmul.bf16.gmra.mxu3 %v17461_v7  ;;  %v15927_v63 = vld [vmem:[#allocation5 + $0xa24] sm:$0xf]  ;;  %v12242_v11 = vld [vmem:[#allocation5 + $0xa38] sm:$0xf0]  ;;  %v11861_v55 = vor.u32 %v15831_v32, %v11858_v22 }
 0x12b   : > { %8065 = vmatpush.bf16.msra.mxu3 %v11573_v49  ;;  %v12074_v49 = vld [vmem:[#allocation5 + $0x8e8] sm:$0xf0]  ;;  %v7675_v2 = vpop.f32.mrf.mxu2  ;;  %v12269_v58 = vor.u32 %v15933_v33, %v12266_v3  ;;  %v11810_v32 = vld [vmem:[#allocation5 + $0x6d8] sm:$0xf0]  ;;  %v15867_v22 = vld [vmem:[#allocation5 + $0x844] sm:$0xf] }
 0x12c   : > { %8009 = vmatpush.bf16.msra.mxu0 %v10973_v43  ;;  %v7676_v7 = vadd.f32 %v7675_v2, %v7657_v31  ;;  %v12461_v43 = vor.u32 %v15981_v52, %v12458_v21  ;;  %v12245_v31 = vor.u32 %v15927_v63, %v12242_v11  ;;  %v11834_v26 = vld [vmem:[#allocation5 + $0x708] sm:$0xf0] }
 0x12d   : > { %8028 = vmatpush.bf16.msra.mxu1 %v11165_v36  ;;  %v12050_v36 = vld [vmem:[#allocation5 + $0x8b8] sm:$0xf0] }
 0x12e   : > { %8047 = vmatpush.bf16.msra.mxu2 %v11357_v37  ;;  %v12077_v37 = vor.u32 %v15885_v27, %v12074_v49  ;;  %v17471_v42 = vadd.f32 %v7694_v38, %v7676_v7  ;;  %v12053_v33 = vor.u32 %v15879_v61, %v12050_v36  ;;  %v15873_v27 = vld [vmem:[#allocation5 + $0x874] sm:$0xf]  ;;  %v12026_v7 = vld [vmem:[#allocation5 + $0x888] sm:$0xf0]  ;;  %v15963_v36 = vld [vmem:[#allocation5 + $0xb44] sm:$0xf] }
 0x12f   : > { %8066 = vmatpush.bf16.msra.mxu3 %v11549_v12  ;;  %v7639_v16 = vpop.f32.mrf.mxu0  ;;  %v7658_v10 = vpop.f32.mrf.mxu1  ;;  %v15975_v12 = vld [vmem:[#allocation5 + $0xba4] sm:$0xf]  ;;  %v15969_v49 = vld [vmem:[#allocation5 + $0xb74] sm:$0xf]  ;;  %v12029_v11 = vor.u32 %v15873_v27, %v12026_v7  ;;  %v11978_v27 = vld [vmem:[#allocation5 + $0x828] sm:$0xf0] }
 0x130   : > { %v7640_v4 = vadd.f32 %v7639_v16, %v17437_v35  ;;  %8010 = vmatpush.bf16.msra.mxu0 %v10949_v20  ;;  %v12437_v3 = vor.u32 %v15975_v12, %v12434_v15  ;;  %v12218_v35 = vld [vmem:[#allocation5 + $0xa08] sm:$0xf0]  ;;  %v15825_v16 = vld [vmem:[#allocation5 + $0x6f4] sm:$0xf]  ;;  %v12386_v12 = vld [vmem:[#allocation5 + $0xb58] sm:$0xf0] }
 0x131   : > { %8029 = vmatpush.bf16.msra.mxu1 %v11141_v34  ;;  %v7696_v20 = vpop.f32.mrf.mxu3  ;;  %v12221_v2 = vor.u32 %v15921_v30, %v12218_v35  ;;  %v11837_v38 = vor.u32 %v15825_v16, %v11834_v26  ;;  %v11786_v30 = vld [vmem:[#allocation5 + $0x6a8] sm:$0xf0]  ;;  %v15861_v35 = vld [vmem:[#allocation5 + $0x814] sm:$0xf] }
 0x132   : > { %8048 = vmatpush.bf16.msra.mxu2 %v11333_v25  ;;  %v7659_v60 = vadd.f32 %v7658_v10, %v7640_v4  ;;  %v12410_v10 = vld [vmem:[#allocation5 + $0xb88] sm:$0xf0]  ;;  %v12002_v4 = vld [vmem:[#allocation5 + $0x858] sm:$0xf0] }
 0x133   : > { %8067 = vmatpush.bf16.msra.mxu3 %v11525_v19  ;;  %v7677_v25 = vpop.f32.mrf.mxu2 }
 0x134   : > { %8079 = vmatpush.bf16.msrb.mxu0 %v11885_v62  ;;  %v7678_v52 = vadd.f32 %v7677_v25, %v7659_v60  ;;  %v12194_v62 = vld [vmem:[#allocation5 + $0x9d8] sm:$0xf0]  ;;  %v15909_v60 = vld [vmem:[#allocation5 + $0x994] sm:$0xf] }
 0x135   : > { %8098 = vmatpush.bf16.msrb.mxu1 %v12077_v37  ;;  %v12413_v37 = vor.u32 %v15969_v49, %v12410_v10  ;;  %v15957_v25 = vld [vmem:[#allocation5 + $0xb14] sm:$0xf] }
 0x136   : > { %8117 = vmatpush.bf16.msrb.mxu2 %v12269_v58  ;;  %v15915_v58 = vld [vmem:[#allocation5 + $0x9c4] sm:$0xf]  ;;  %v17474_v63 = vadd.f32 %v7696_v20, %v7678_v52  ;;  %v12362_v20 = vld [vmem:[#allocation5 + $0xb28] sm:$0xf0] }
 0x137   : > { %8136 = vmatpush.bf16.msrb.mxu3 %v12461_v43  ;;  %v7708_v21 = vpop.f32.mrf.mxu0  ;;  %v7727_v34 = vpop.f32.mrf.mxu1  ;;  %v15819_v43 = vld [vmem:[#allocation5 + $0x6c4] sm:$0xf]  ;;  %8049 = vmatmul.bf16.vlgmr.msra.gmra.mxu2 %v17218_v54 }
 0x138   : > { %8080 = vmatpush.bf16.msrb.mxu0 %v11861_v55  ;;  %v7709_v19 = vadd.f32 %v7708_v21, %v17445_v41  ;;  %8030 = vmatmul.bf16.vlgmr.msra.gmra.mxu1 %v17216_v53  ;;  %v12197_v41 = vor.u32 %v15915_v58, %v12194_v62  ;;  %v11813_v15 = vor.u32 %v15819_v43, %v11810_v32  ;;  %v15855_v43 = vld [vmem:[#allocation5 + $0x7e4] sm:$0xf] }
 0x139   : > { %8099 = vmatpush.bf16.msrb.mxu1 %v12053_v33  ;;  %8011 = vmatmul.bf16.vlgmr.msra.gmra.mxu0 %v17214_v48  ;;  %v12005_v55 = vor.u32 %v15867_v22, %v12002_v4  ;;  %v12389_v33 = vor.u32 %v15963_v36, %v12386_v12  ;;  %v7765_v26 = vpop.f32.mrf.mxu3  ;;  %v11981_v58 = vor.u32 %v15861_v35, %v11978_v27  ;;  %v11954_v22 = vld [vmem:[#allocation5 + $0x7f8] sm:$0xf0]  ;;  %v15897_v12 = vld [vmem:[#allocation5 + $0x934] sm:$0xf]  ;;  %v11930_v35 = vld [vmem:[#allocation5 + $0x7c8] sm:$0xf0] }
 0x13a   : > { %8118 = vmatpush.bf16.msrb.mxu2 %v12245_v31  ;;  %v7728_v61 = vadd.f32 %v7727_v34, %v7709_v19  ;;  %8068 = vmatmul.bf16.vlgmr.msra.gmra.mxu3 %v17220_v57  ;;  %v12170_v31 = vld [vmem:[#allocation5 + $0x9a8] sm:$0xf0]  ;;  %v15903_v19 = vld [vmem:[#allocation5 + $0x964] sm:$0xf]  ;;  %v12365_v62 = vor.u32 %v15957_v25, %v12362_v20  ;;  %v12338_v4 = vld [vmem:[#allocation5 + $0xaf8] sm:$0xf0] }
 0x13b   : > { %8137 = vmatpush.bf16.msrb.mxu3 %v12437_v3  ;;  %v15813_v3 = vld [vmem:[#allocation5 + $0x694] sm:$0xf]  ;;  %v7746_v16 = vpop.f32.mrf.mxu2  ;;  %v12173_v21 = vor.u32 %v15909_v60, %v12170_v31 }
 0x13c   : > { %8081 = vmatpush.bf16.msrb.mxu0 %v11837_v38  ;;  %v7747_v7 = vadd.f32 %v7746_v16, %v7728_v61  ;;  %v11789_v34 = vor.u32 %v15813_v3, %v11786_v30  ;;  %v15951_v61 = vld [vmem:[#allocation5 + $0xae4] sm:$0xf]  ;;  %v15801_v31 = vld [vmem:[#allocation5 + $0x634] sm:$0xf] }
 0x13d   : > { %8100 = vmatpush.bf16.msrb.mxu1 %v12029_v11  ;;  %v15807_v11 = vld [vmem:[#allocation5 + $0x664] sm:$0xf]  ;;  %v12341_v60 = vor.u32 %v15951_v61, %v12338_v4  ;;  %v15945_v16 = vld [vmem:[#allocation5 + $0xab4] sm:$0xf]  ;;  %v13034_v61 = vld [vmem:[#allocation5 + $0x1068] sm:$0xf0] }
 0x13e   : > { %8119 = vmatpush.bf16.msrb.mxu2 %v12221_v2  ;;  %v12146_v2 = vld [vmem:[#allocation5 + $0x978] sm:$0xf0]  ;;  %v17481_v38 = vadd.f32 %v7765_v26, %v7747_v7  ;;  %v12314_v26 = vld [vmem:[#allocation5 + $0xac8] sm:$0xf0]  ;;  %v15891_v7 = vld [vmem:[#allocation5 + $0x904] sm:$0xf] }
 0x13f   : > { %8138 = vmatpush.bf16.msrb.mxu3 %v12413_v37  ;;  %v7710_v49 = vpop.f32.mrf.mxu0  ;;  %v7729_v10 = vpop.f32.mrf.mxu1  ;;  %v11762_v37 = vld [vmem:[#allocation5 + $0x678] sm:$0xf0]  ;;  %v16029_v4 = vld [vmem:[#allocation5 + $0xd54] sm:$0xf] }
 0x140   : > { %v7711_v52 = vadd.f32 %v7710_v49, %v17464_v47  ;;  %8082 = vmatpush.bf16.msrb.mxu0 %v11813_v15  ;;  %v12149_v47 = vor.u32 %v15903_v19, %v12146_v2  ;;  %v11765_v36 = vor.u32 %v15807_v11, %v11762_v37  ;;  %v11957_v15 = vor.u32 %v15855_v43, %v11954_v22  ;;  %v11714_v19 = vld [vmem:[#allocation5 + $0x618] sm:$0xf0]  ;;  %v15843_v11 = vld [vmem:[#allocation5 + $0x784] sm:$0xf]  ;;  %v16125_v22 = vld [vmem:[#allocation5 + $0x1054] sm:$0xf] }
 0x141   : > { %8101 = vmatpush.bf16.msrb.mxu1 %v12005_v55  ;;  %v11738_v55 = vld [vmem:[#allocation5 + $0x648] sm:$0xf0]  ;;  %v7767_v30 = vpop.f32.mrf.mxu3  ;;  %v11906_v37 = vld [vmem:[#allocation5 + $0x798] sm:$0xf0]  ;;  %v15939_v43 = vld [vmem:[#allocation5 + $0xa84] sm:$0xf] }
 0x142   : > { %8120 = vmatpush.bf16.msrb.mxu2 %v12197_v41  ;;  %v7730_v32 = vadd.f32 %v7729_v10, %v7711_v52  ;;  %v12122_v41 = vld [vmem:[#allocation5 + $0x948] sm:$0xf0]  ;;  %v11741_v52 = vor.u32 %v15801_v31, %v11738_v55  ;;  %v11909_v55 = vor.u32 %v15843_v11, %v11906_v37  ;;  %v13202_v11 = vld [vmem:[#allocation5 + $0x11b8] sm:$0xf0] }
 0x143   : > { %8139 = vmatpush.bf16.msrb.mxu3 %v12389_v33  ;;  %v15849_v33 = vld [vmem:[#allocation5 + $0x7b4] sm:$0xf]  ;;  %v7748_v3 = vpop.f32.mrf.mxu2  ;;  %v12125_v10 = vor.u32 %v15897_v12, %v12122_v41  ;;  %v13226_v31 = vld [vmem:[#allocation5 + $0x11e8] sm:$0xf0] }
 0x144   : > { %8083 = vmatpush.bf16.msrb.mxu0 %v11789_v34  ;;  %v7749_v27 = vadd.f32 %v7748_v3, %v7730_v32  ;;  %v15795_v34 = vld [vmem:[#allocation5 + $0x604] sm:$0xf] }
 0x145   : > { %8102 = vmatpush.bf16.msrb.mxu1 %v11981_v58  ;;  %v11933_v58 = vor.u32 %v15849_v33, %v11930_v35  ;;  %v11717_v41 = vor.u32 %v15795_v34, %v11714_v19  ;;  %v13037_v35 = vor.u32 %v16125_v22, %v13034_v61  ;;  %v16071_v34 = vld [vmem:[#allocation5 + $0xea4] sm:$0xf] }
 0x146   : > { %8121 = vmatpush.bf16.msrb.mxu2 %v12173_v21  ;;  %v12098_v21 = vld [vmem:[#allocation5 + $0x918] sm:$0xf0]  ;;  %v17484_v2 = vadd.f32 %v7767_v30, %v7749_v27 }
 0x147   : > { %8140 = vmatpush.bf16.msrb.mxu3 %v12365_v62  ;;  %v7713_v25 = vpop.f32.mrf.mxu0  ;;  %v7732_v20 = vpop.f32.mrf.mxu1  ;;  %v12317_v62 = vor.u32 %v15945_v16, %v12314_v26  ;;  %8054 = vmatmul.bf16.gmra.mxu2 %v17238_v51  ;;  %v12101_v12 = vor.u32 %v15891_v7, %v12098_v21  ;;  %v16119_v26 = vld [vmem:[#allocation5 + $0x1024] sm:$0xf]  ;;  %v13010_v27 = vld [vmem:[#allocation5 + $0x1038] sm:$0xf0] }
 0x148   : > { %v7714_v49 = vadd.f32 %v7713_v25, %v17471_v42  ;;  %8084 = vmatpush.bf16.msrb.mxu0 %v11765_v36  ;;  %8035 = vmatmul.bf16.gmra.mxu1 %v17236_v50  ;;  %v12290_v42 = vld [vmem:[#allocation5 + $0xa98] sm:$0xf0]  ;;  %v16077_v36 = vld [vmem:[#allocation5 + $0xed4] sm:$0xf]  ;;  %v16023_v7 = vld [vmem:[#allocation5 + $0xd24] sm:$0xf] }
 0x149   : > { %8103 = vmatpush.bf16.msrb.mxu1 %v11957_v15  ;;  %8016 = vmatmul.bf16.gmra.mxu0 %v17234_v44  ;;  %v12842_v15 = vld [vmem:[#allocation5 + $0xee8] sm:$0xf0]  ;;  %v12293_v33 = vor.u32 %v15939_v43, %v12290_v42  ;;  %v7770_v30 = vpop.f32.mrf.mxu3  ;;  %v12626_v21 = vld [vmem:[#allocation5 + $0xd38] sm:$0xf0] }
 0x14a   : > { %8122 = vmatpush.bf16.msrb.mxu2 %v12149_v47  ;;  %v7733_v32 = vadd.f32 %v7732_v20, %v7714_v49  ;;  %8073 = vmatmul.bf16.gmra.mxu3 %v17240_v56  ;;  %v12650_v47 = vld [vmem:[#allocation5 + $0xd68] sm:$0xf0]  ;;  %v12629_v42 = vor.u32 %v16023_v7, %v12626_v21  ;;  %v12578_v7 = vld [vmem:[#allocation5 + $0xcd8] sm:$0xf0]  ;;  %v16059_v21 = vld [vmem:[#allocation5 + $0xe44] sm:$0xf] }
 0x14b   : > { %8141 = vmatpush.bf16.msrb.mxu3 %v12341_v60  ;;  %v16173_v60 = vld [vmem:[#allocation5 + $0x11d4] sm:$0xf]  ;;  %v7751_v3 = vpop.f32.mrf.mxu2  ;;  %v12653_v16 = vor.u32 %v16029_v4, %v12650_v47 }
 0x14c   : > { %8085 = vmatpush.bf16.msrb.mxu0 %v11741_v52  ;;  %v7752_v25 = vadd.f32 %v7751_v3, %v7733_v32  ;;  %v13229_v52 = vor.u32 %v16173_v60, %v13226_v31  ;;  %v13013_v32 = vor.u32 %v16119_v26, %v13010_v27  ;;  %v16113_v4 = vld [vmem:[#allocation5 + $0xff4] sm:$0xf]  ;;  %v12794_v60 = vld [vmem:[#allocation5 + $0xe88] sm:$0xf0]  ;;  %v16107_v27 = vld [vmem:[#allocation5 + $0xfc4] sm:$0xf] }
 0x14d   : > { %8104 = vmatpush.bf16.msrb.mxu1 %v11933_v58  ;;  %v12818_v58 = vld [vmem:[#allocation5 + $0xeb8] sm:$0xf0]  ;;  %v16017_v47 = vld [vmem:[#allocation5 + $0xcf4] sm:$0xf] }
 0x14e   : > { %8123 = vmatpush.bf16.msrb.mxu2 %v12125_v10  ;;  %v12845_v10 = vor.u32 %v16077_v36, %v12842_v15  ;;  %v17491_v37 = vadd.f32 %v7770_v30, %v7752_v25  ;;  %v12821_v22 = vor.u32 %v16071_v34, %v12818_v58  ;;  %v12602_v36 = vld [vmem:[#allocation5 + $0xd08] sm:$0xf0]  ;;  %v16161_v31 = vld [vmem:[#allocation5 + $0x1174] sm:$0xf]  ;;  %v12962_v25 = vld [vmem:[#allocation5 + $0xfd8] sm:$0xf0] }
 0x14f   : > { %8142 = vmatpush.bf16.msrb.mxu3 %v12317_v62  ;;  %v7715_v20 = vpop.f32.mrf.mxu0  ;;  %v7734_v49 = vpop.f32.mrf.mxu1  ;;  %v16167_v62 = vld [vmem:[#allocation5 + $0x11a4] sm:$0xf]  ;;  %v12605_v26 = vor.u32 %v16017_v47, %v12602_v36 }
 0x150   : > { %v7716_v19 = vadd.f32 %v7715_v20, %v17474_v63  ;;  %8086 = vmatpush.bf16.msrb.mxu0 %v11717_v41  ;;  %v13205_v61 = vor.u32 %v16167_v62, %v13202_v11  ;;  %v12986_v63 = vld [vmem:[#allocation5 + $0x1008] sm:$0xf0]  ;;  %v16155_v58 = vld [vmem:[#allocation5 + $0x1144] sm:$0xf]  ;;  %v13154_v62 = vld [vmem:[#allocation5 + $0x1158] sm:$0xf0] }
 0x151   : > { %8105 = vmatpush.bf16.msrb.mxu1 %v11909_v55  ;;  %v7772_v15 = vpop.f32.mrf.mxu3  ;;  %v13178_v55 = vld [vmem:[#allocation5 + $0x1188] sm:$0xf0] }
 0x152   : > { %8124 = vmatpush.bf16.msrb.mxu2 %v12101_v12  ;;  %v7735_v43 = vadd.f32 %v7734_v49, %v7716_v19  ;;  %v16065_v12 = vld [vmem:[#allocation5 + $0xe74] sm:$0xf]  ;;  %v12770_v19 = vld [vmem:[#allocation5 + $0xe58] sm:$0xf0] }
 0x153   : > { %8143 = vmatpush.bf16.msrb.mxu3 %v12293_v33  ;;  %v7753_v41 = vpop.f32.mrf.mxu2  ;;  %v12797_v49 = vor.u32 %v16065_v12, %v12794_v60  ;;  %v12746_v12 = vld [vmem:[#allocation5 + $0xe28] sm:$0xf0] }
 0x154   : > { %8155 = vmatpush.bf16.msra.mxu0 %v12653_v16  ;;  %v7754_v33 = vadd.f32 %v7753_v41, %v7735_v43  ;;  %v12989_v16 = vor.u32 %v16113_v4, %v12986_v63  ;;  %v16101_v43 = vld [vmem:[#allocation5 + $0xf94] sm:$0xf]  ;;  %v12554_v4 = vld [vmem:[#allocation5 + $0xca8] sm:$0xf0] }
 0x155   : > { %8174 = vmatpush.bf16.msra.mxu1 %v12845_v10  ;;  %v13181_v10 = vor.u32 %v16161_v31, %v13178_v55  ;;  %v16053_v63 = vld [vmem:[#allocation5 + $0xe14] sm:$0xf] }
 0x156   : > { %8193 = vmatpush.bf16.msra.mxu2 %v13037_v35  ;;  %v17494_v20 = vadd.f32 %v7772_v15, %v7754_v33  ;;  %v16149_v41 = vld [vmem:[#allocation5 + $0x1114] sm:$0xf]  ;;  %v13130_v15 = vld [vmem:[#allocation5 + $0x1128] sm:$0xf0] }
 0x157   : > { %8212 = vmatpush.bf16.msra.mxu3 %v13229_v52  ;;  %v7784_v3 = vpop.f32.mrf.mxu0  ;;  %v7803_v30 = vpop.f32.mrf.mxu1  ;;  %v16011_v52 = vld [vmem:[#allocation5 + $0xcc4] sm:$0xf]  ;;  %8125 = vmatmul.bf16.vlgmr.msrb.gmra.mxu2 %v17258_v5 }
 0x158   : > { %8156 = vmatpush.bf16.msra.mxu0 %v12629_v42  ;;  %v7785_v35 = vadd.f32 %v7784_v3, %v17481_v38  ;;  %8106 = vmatmul.bf16.vlgmr.msrb.gmra.mxu1 %v17256_v1  ;;  %v12965_v38 = vor.u32 %v16107_v27, %v12962_v25  ;;  %v12581_v11 = vor.u32 %v16011_v52, %v12578_v7  ;;  %v16047_v52 = vld [vmem:[#allocation5 + $0xde4] sm:$0xf] }
 0x159   : > { %8175 = vmatpush.bf16.msra.mxu1 %v12821_v22  ;;  %8087 = vmatmul.bf16.vlgmr.msrb.gmra.mxu0 %v17254_v0  ;;  %v12773_v42 = vor.u32 %v16059_v21, %v12770_v19  ;;  %v13157_v22 = vor.u32 %v16155_v58, %v13154_v62  ;;  %v7841_v36 = vpop.f32.mrf.mxu3  ;;  %v12749_v27 = vor.u32 %v16053_v63, %v12746_v12  ;;  %v12722_v21 = vld [vmem:[#allocation5 + $0xdf8] sm:$0xf0]  ;;  %v16089_v62 = vld [vmem:[#allocation5 + $0xf34] sm:$0xf]  ;;  %v12698_v63 = vld [vmem:[#allocation5 + $0xdc8] sm:$0xf0] }
 0x15a   : > { %8194 = vmatpush.bf16.msra.mxu2 %v13013_v32  ;;  %v7804_v34 = vadd.f32 %v7803_v30, %v7785_v35  ;;  %8144 = vmatmul.bf16.vlgmr.msrb.gmra.mxu3 %v17260_v6  ;;  %v12938_v32 = vld [vmem:[#allocation5 + $0xfa8] sm:$0xf0]  ;;  %v16095_v35 = vld [vmem:[#allocation5 + $0xf64] sm:$0xf]  ;;  %v13133_v25 = vor.u32 %v16149_v41, %v13130_v15  ;;  %v13106_v19 = vld [vmem:[#allocation5 + $0x10f8] sm:$0xf0] }
 0x15b   : > { %8213 = vmatpush.bf16.msra.mxu3 %v13205_v61  ;;  %v16005_v61 = vld [vmem:[#allocation5 + $0xc94] sm:$0xf]  ;;  %v7822_v47 = vpop.f32.mrf.mxu2  ;;  %v12941_v3 = vor.u32 %v16101_v43, %v12938_v32 }
 0x15c   : > { %8157 = vmatpush.bf16.msra.mxu0 %v12605_v26  ;;  %v7823_v60 = vadd.f32 %v7822_v47, %v7804_v34  ;;  %v12557_v30 = vor.u32 %v16005_v61, %v12554_v4  ;;  %v16143_v34 = vld [vmem:[#allocation5 + $0x10e4] sm:$0xf]  ;;  %v15993_v32 = vld [vmem:[#allocation5 + $0xc34] sm:$0xf] }
 0x15d   : > { %8176 = vmatpush.bf16.msra.mxu1 %v12797_v49  ;;  %v15999_v49 = vld [vmem:[#allocation5 + $0xc64] sm:$0xf]  ;;  %v13109_v43 = vor.u32 %v16143_v34, %v13106_v19  ;;  %v16137_v47 = vld [vmem:[#allocation5 + $0x10b4] sm:$0xf]  ;;  %v13802_v34 = vld [vmem:[#allocation5 + $0x1668] sm:$0xf0] }
 0x15e   : > { %8195 = vmatpush.bf16.msra.mxu2 %v12989_v16  ;;  %v12914_v16 = vld [vmem:[#allocation5 + $0xf78] sm:$0xf0]  ;;  %v17501_v26 = vadd.f32 %v7841_v36, %v7823_v60  ;;  %v13082_v36 = vld [vmem:[#allocation5 + $0x10c8] sm:$0xf0]  ;;  %v16083_v60 = vld [vmem:[#allocation5 + $0xf04] sm:$0xf] }
 0x15f   : > { %8214 = vmatpush.bf16.msra.mxu3 %v13181_v10  ;;  %v7786_v31 = vpop.f32.mrf.mxu0  ;;  %v7805_v55 = vpop.f32.mrf.mxu1  ;;  %v12530_v10 = vld [vmem:[#allocation5 + $0xc78] sm:$0xf0]  ;;  %v16221_v19 = vld [vmem:[#allocation5 + $0x1354] sm:$0xf] }
 0x160   : > { %v7787_v33 = vadd.f32 %v7786_v31, %v17484_v2  ;;  %8158 = vmatpush.bf16.msra.mxu0 %v12581_v11  ;;  %v12917_v2 = vor.u32 %v16095_v35, %v12914_v16  ;;  %v12533_v58 = vor.u32 %v15999_v49, %v12530_v10  ;;  %v12725_v11 = vor.u32 %v16047_v52, %v12722_v21  ;;  %v12482_v35 = vld [vmem:[#allocation5 + $0xc18] sm:$0xf0]  ;;  %v16035_v49 = vld [vmem:[#allocation5 + $0xd84] sm:$0xf]  ;;  %v16317_v21 = vld [vmem:[#allocation5 + $0x1654] sm:$0xf] }
 0x161   : > { %8177 = vmatpush.bf16.msra.mxu1 %v12773_v42  ;;  %v12506_v42 = vld [vmem:[#allocation5 + $0xc48] sm:$0xf0]  ;;  %v7843_v4 = vpop.f32.mrf.mxu3  ;;  %v12674_v10 = vld [vmem:[#allocation5 + $0xd98] sm:$0xf0]  ;;  %v16131_v52 = vld [vmem:[#allocation5 + $0x1084] sm:$0xf] }
 0x162   : > { %8196 = vmatpush.bf16.msra.mxu2 %v12965_v38  ;;  %v7806_v7 = vadd.f32 %v7805_v55, %v7787_v33  ;;  %v12890_v38 = vld [vmem:[#allocation5 + $0xf48] sm:$0xf0]  ;;  %v12509_v33 = vor.u32 %v15993_v32, %v12506_v42  ;;  %v12677_v42 = vor.u32 %v16035_v49, %v12674_v10  ;;  %v13970_v49 = vld [vmem:[#allocation5 + $0x17b8] sm:$0xf0] }
 0x163   : > { %8215 = vmatpush.bf16.msra.mxu3 %v13157_v22  ;;  %v16041_v22 = vld [vmem:[#allocation5 + $0xdb4] sm:$0xf]  ;;  %v7824_v61 = vpop.f32.mrf.mxu2  ;;  %v12893_v55 = vor.u32 %v16089_v62, %v12890_v38  ;;  %v13994_v32 = vld [vmem:[#allocation5 + $0x17e8] sm:$0xf0] }
 0x164   : > { %8159 = vmatpush.bf16.msra.mxu0 %v12557_v30  ;;  %v7825_v12 = vadd.f32 %v7824_v61, %v7806_v7  ;;  %v15987_v30 = vld [vmem:[#allocation5 + $0xc04] sm:$0xf] }
 0x165   : > { %8178 = vmatpush.bf16.msra.mxu1 %v12749_v27  ;;  %v12701_v27 = vor.u32 %v16041_v22, %v12698_v63  ;;  %v12485_v38 = vor.u32 %v15987_v30, %v12482_v35  ;;  %v13805_v63 = vor.u32 %v16317_v21, %v13802_v34  ;;  %v16263_v30 = vld [vmem:[#allocation5 + $0x14a4] sm:$0xf] }
 0x166   : > { %8197 = vmatpush.bf16.msra.mxu2 %v12941_v3  ;;  %v12866_v3 = vld [vmem:[#allocation5 + $0xf18] sm:$0xf0]  ;;  %v17504_v16 = vadd.f32 %v7843_v4, %v7825_v12 }
 0x167   : > { %8216 = vmatpush.bf16.msra.mxu3 %v13133_v25  ;;  %v7789_v41 = vpop.f32.mrf.mxu0  ;;  %v7808_v15 = vpop.f32.mrf.mxu1  ;;  %v13085_v25 = vor.u32 %v16137_v47, %v13082_v36  ;;  %8130 = vmatmul.bf16.gmra.mxu2 %v17278_v13  ;;  %v12869_v62 = vor.u32 %v16083_v60, %v12866_v3  ;;  %v16311_v36 = vld [vmem:[#allocation5 + $0x1624] sm:$0xf]  ;;  %v13778_v12 = vld [vmem:[#allocation5 + $0x1638] sm:$0xf0] }
 0x168   : > { %v7790_v31 = vadd.f32 %v7789_v41, %v17491_v37  ;;  %8160 = vmatpush.bf16.msra.mxu0 %v12533_v58  ;;  %8111 = vmatmul.bf16.gmra.mxu1 %v17276_v9  ;;  %v13058_v37 = vld [vmem:[#allocation5 + $0x1098] sm:$0xf0]  ;;  %v16269_v58 = vld [vmem:[#allocation5 + $0x14d4] sm:$0xf]  ;;  %v16215_v60 = vld [vmem:[#allocation5 + $0x1324] sm:$0xf] }
 0x169   : > { %8179 = vmatpush.bf16.msra.mxu1 %v12725_v11  ;;  %8092 = vmatmul.bf16.gmra.mxu0 %v17274_v8  ;;  %v13610_v11 = vld [vmem:[#allocation5 + $0x14e8] sm:$0xf0]  ;;  %v13061_v22 = vor.u32 %v16131_v52, %v13058_v37  ;;  %v7846_v4 = vpop.f32.mrf.mxu3  ;;  %v13394_v3 = vld [vmem:[#allocation5 + $0x1338] sm:$0xf0] }
 0x16a   : > { %8198 = vmatpush.bf16.msra.mxu2 %v12917_v2  ;;  %v7809_v7 = vadd.f32 %v7808_v15, %v7790_v31  ;;  %8149 = vmatmul.bf16.gmra.mxu3 %v17280_v14  ;;  %v13418_v2 = vld [vmem:[#allocation5 + $0x1368] sm:$0xf0]  ;;  %v13397_v37 = vor.u32 %v16215_v60, %v13394_v3  ;;  %v13346_v60 = vld [vmem:[#allocation5 + $0x12d8] sm:$0xf0]  ;;  %v16251_v3 = vld [vmem:[#allocation5 + $0x1444] sm:$0xf] }
 0x16b   : > { %8217 = vmatpush.bf16.msra.mxu3 %v13109_v43  ;;  %v16365_v43 = vld [vmem:[#allocation5 + $0x17d4] sm:$0xf]  ;;  %v7827_v61 = vpop.f32.mrf.mxu2  ;;  %v13421_v47 = vor.u32 %v16221_v19, %v13418_v2 }
 0x16c   : > { %8161 = vmatpush.bf16.msra.mxu0 %v12509_v33  ;;  %v7828_v41 = vadd.f32 %v7827_v61, %v7809_v7  ;;  %v13997_v33 = vor.u32 %v16365_v43, %v13994_v32  ;;  %v13781_v7 = vor.u32 %v16311_v36, %v13778_v12  ;;  %v16305_v19 = vld [vmem:[#allocation5 + $0x15f4] sm:$0xf]  ;;  %v13562_v43 = vld [vmem:[#allocation5 + $0x1488] sm:$0xf0]  ;;  %v16299_v12 = vld [vmem:[#allocation5 + $0x15c4] sm:$0xf] }
 0x16d   : > { %8180 = vmatpush.bf16.msra.mxu1 %v12701_v27  ;;  %v13586_v27 = vld [vmem:[#allocation5 + $0x14b8] sm:$0xf0]  ;;  %v16209_v2 = vld [vmem:[#allocation5 + $0x12f4] sm:$0xf] }
 0x16e   : > { %8199 = vmatpush.bf16.msra.mxu2 %v12893_v55  ;;  %v13613_v55 = vor.u32 %v16269_v58, %v13610_v11  ;;  %v17511_v10 = vadd.f32 %v7846_v4, %v7828_v41  ;;  %v13589_v21 = vor.u32 %v16263_v30, %v13586_v27  ;;  %v13370_v58 = vld [vmem:[#allocation5 + $0x1308] sm:$0xf0]  ;;  %v16353_v32 = vld [vmem:[#allocation5 + $0x1774] sm:$0xf]  ;;  %v13730_v41 = vld [vmem:[#allocation5 + $0x15d8] sm:$0xf0] }
 0x16f   : > { %8218 = vmatpush.bf16.msra.mxu3 %v13085_v25  ;;  %v7791_v15 = vpop.f32.mrf.mxu0  ;;  %v7810_v31 = vpop.f32.mrf.mxu1  ;;  %v16359_v25 = vld [vmem:[#allocation5 + $0x17a4] sm:$0xf]  ;;  %v13373_v36 = vor.u32 %v16209_v2, %v13370_v58 }
 0x170   : > { %v7792_v35 = vadd.f32 %v7791_v15, %v17494_v20  ;;  %8162 = vmatpush.bf16.msra.mxu0 %v12485_v38  ;;  %v13973_v34 = vor.u32 %v16359_v25, %v13970_v49  ;;  %v13754_v20 = vld [vmem:[#allocation5 + $0x1608] sm:$0xf0]  ;;  %v16347_v27 = vld [vmem:[#allocation5 + $0x1744] sm:$0xf]  ;;  %v13922_v25 = vld [vmem:[#allocation5 + $0x1758] sm:$0xf0] }
 0x171   : > { %8181 = vmatpush.bf16.msra.mxu1 %v12677_v42  ;;  %v7848_v11 = vpop.f32.mrf.mxu3  ;;  %v13946_v42 = vld [vmem:[#allocation5 + $0x1788] sm:$0xf0] }
 0x172   : > { %8200 = vmatpush.bf16.msra.mxu2 %v12869_v62  ;;  %v7811_v52 = vadd.f32 %v7810_v31, %v7792_v35  ;;  %v16257_v62 = vld [vmem:[#allocation5 + $0x1474] sm:$0xf]  ;;  %v13538_v35 = vld [vmem:[#allocation5 + $0x1458] sm:$0xf0] }
 0x173   : > { %8219 = vmatpush.bf16.msra.mxu3 %v13061_v22  ;;  %v7829_v38 = vpop.f32.mrf.mxu2  ;;  %v13565_v31 = vor.u32 %v16257_v62, %v13562_v43  ;;  %v13514_v62 = vld [vmem:[#allocation5 + $0x1428] sm:$0xf0] }
 0x174   : > { %8231 = vmatpush.bf16.msrb.mxu0 %v13421_v47  ;;  %v7830_v22 = vadd.f32 %v7829_v38, %v7811_v52  ;;  %v13757_v47 = vor.u32 %v16305_v19, %v13754_v20  ;;  %v16293_v52 = vld [vmem:[#allocation5 + $0x1594] sm:$0xf]  ;;  %v13322_v19 = vld [vmem:[#allocation5 + $0x12a8] sm:$0xf0] }
 0x175   : > { %8250 = vmatpush.bf16.msrb.mxu1 %v13613_v55  ;;  %v13949_v55 = vor.u32 %v16353_v32, %v13946_v42  ;;  %v16245_v20 = vld [vmem:[#allocation5 + $0x1414] sm:$0xf] }
 0x176   : > { %8269 = vmatpush.bf16.msrb.mxu2 %v13805_v63  ;;  %v17514_v15 = vadd.f32 %v7848_v11, %v7830_v22  ;;  %v16341_v38 = vld [vmem:[#allocation5 + $0x1714] sm:$0xf]  ;;  %v13898_v11 = vld [vmem:[#allocation5 + $0x1728] sm:$0xf0] }
 0x177   : > { %8288 = vmatpush.bf16.msrb.mxu3 %v13997_v33  ;;  %v7860_v61 = vpop.f32.mrf.mxu0  ;;  %v7879_v4 = vpop.f32.mrf.mxu1  ;;  %v16203_v33 = vld [vmem:[#allocation5 + $0x12c4] sm:$0xf]  ;;  %8201 = vmatmul.bf16.vlgmr.msra.gmra.mxu2 %v17298_v28 }
 0x178   : > { %8232 = vmatpush.bf16.msrb.mxu0 %v13397_v37  ;;  %v7861_v63 = vadd.f32 %v7860_v61, %v17501_v26  ;;  %8182 = vmatmul.bf16.vlgmr.msra.gmra.mxu1 %v17296_v24  ;;  %v13733_v26 = vor.u32 %v16299_v12, %v13730_v41  ;;  %v13349_v49 = vor.u32 %v16203_v33, %v13346_v60  ;;  %v16239_v33 = vld [vmem:[#allocation5 + $0x13e4] sm:$0xf] }
 0x179   : > { %8251 = vmatpush.bf16.msrb.mxu1 %v13589_v21  ;;  %8163 = vmatmul.bf16.vlgmr.msra.gmra.mxu0 %v17294_v23  ;;  %v13541_v37 = vor.u32 %v16251_v3, %v13538_v35  ;;  %v13925_v21 = vor.u32 %v16347_v27, %v13922_v25  ;;  %v7917_v58 = vpop.f32.mrf.mxu3  ;;  %v13517_v12 = vor.u32 %v16245_v20, %v13514_v62  ;;  %v13490_v3 = vld [vmem:[#allocation5 + $0x13f8] sm:$0xf0]  ;;  %v16281_v25 = vld [vmem:[#allocation5 + $0x1534] sm:$0xf]  ;;  %v13466_v20 = vld [vmem:[#allocation5 + $0x13c8] sm:$0xf0] }
 0x17a   : > { %8270 = vmatpush.bf16.msrb.mxu2 %v13781_v7  ;;  %v7880_v30 = vadd.f32 %v7879_v4, %v7861_v63  ;;  %8220 = vmatmul.bf16.vlgmr.msra.gmra.mxu3 %v17300_v29  ;;  %v13706_v7 = vld [vmem:[#allocation5 + $0x15a8] sm:$0xf0]  ;;  %v16287_v63 = vld [vmem:[#allocation5 + $0x1564] sm:$0xf]  ;;  %v13901_v41 = vor.u32 %v16341_v38, %v13898_v11  ;;  %v13874_v35 = vld [vmem:[#allocation5 + $0x16f8] sm:$0xf0] }
 0x17b   : > { %8289 = vmatpush.bf16.msrb.mxu3 %v13973_v34  ;;  %v16197_v34 = vld [vmem:[#allocation5 + $0x1294] sm:$0xf]  ;;  %v7898_v2 = vpop.f32.mrf.mxu2  ;;  %v13709_v61 = vor.u32 %v16293_v52, %v13706_v7 }
 0x17c   : > { %8233 = vmatpush.bf16.msrb.mxu0 %v13373_v36  ;;  %v7899_v43 = vadd.f32 %v7898_v2, %v7880_v30  ;;  %v13325_v4 = vor.u32 %v16197_v34, %v13322_v19  ;;  %v16335_v30 = vld [vmem:[#allocation5 + $0x16e4] sm:$0xf]  ;;  %v16185_v7 = vld [vmem:[#allocation5 + $0x1234] sm:$0xf] }
 0x17d   : > { %8252 = vmatpush.bf16.msrb.mxu1 %v13565_v31  ;;  %v16191_v31 = vld [vmem:[#allocation5 + $0x1264] sm:$0xf]  ;;  %v13877_v52 = vor.u32 %v16335_v30, %v13874_v35  ;;  %v16329_v2 = vld [vmem:[#allocation5 + $0x16b4] sm:$0xf]  ;;  %v14570_v30 = vld [vmem:[#allocation5 + $0x1c68] sm:$0xf0] }
 0x17e   : > { %8271 = vmatpush.bf16.msrb.mxu2 %v13757_v47  ;;  %v13682_v47 = vld [vmem:[#allocation5 + $0x1578] sm:$0xf0]  ;;  %v17521_v36 = vadd.f32 %v7917_v58, %v7899_v43  ;;  %v13850_v58 = vld [vmem:[#allocation5 + $0x16c8] sm:$0xf0]  ;;  %v16275_v43 = vld [vmem:[#allocation5 + $0x1504] sm:$0xf] }
 0x17f   : > { %8290 = vmatpush.bf16.msrb.mxu3 %v13949_v55  ;;  %v7862_v32 = vpop.f32.mrf.mxu0  ;;  %v7881_v42 = vpop.f32.mrf.mxu1  ;;  %v13298_v55 = vld [vmem:[#allocation5 + $0x1278] sm:$0xf0]  ;;  %v16413_v35 = vld [vmem:[#allocation5 + $0x1954] sm:$0xf] }
 0x180   : > { %v7863_v22 = vadd.f32 %v7862_v32, %v17504_v16  ;;  %8234 = vmatpush.bf16.msrb.mxu0 %v13349_v49  ;;  %v13685_v16 = vor.u32 %v16287_v63, %v13682_v47  ;;  %v13301_v27 = vor.u32 %v16191_v31, %v13298_v55  ;;  %v13493_v49 = vor.u32 %v16239_v33, %v13490_v3  ;;  %v13250_v63 = vld [vmem:[#allocation5 + $0x1218] sm:$0xf0]  ;;  %v16227_v31 = vld [vmem:[#allocation5 + $0x1384] sm:$0xf]  ;;  %v16509_v3 = vld [vmem:[#allocation5 + $0x1c54] sm:$0xf] }
 0x181   : > { %8253 = vmatpush.bf16.msrb.mxu1 %v13541_v37  ;;  %v13274_v37 = vld [vmem:[#allocation5 + $0x1248] sm:$0xf0]  ;;  %v7919_v19 = vpop.f32.mrf.mxu3  ;;  %v13442_v55 = vld [vmem:[#allocation5 + $0x1398] sm:$0xf0]  ;;  %v16323_v33 = vld [vmem:[#allocation5 + $0x1684] sm:$0xf] }
 0x182   : > { %8272 = vmatpush.bf16.msrb.mxu2 %v13733_v26  ;;  %v7882_v60 = vadd.f32 %v7881_v42, %v7863_v22  ;;  %v13658_v26 = vld [vmem:[#allocation5 + $0x1548] sm:$0xf0]  ;;  %v13277_v22 = vor.u32 %v16185_v7, %v13274_v37  ;;  %v13445_v37 = vor.u32 %v16227_v31, %v13442_v55  ;;  %v14738_v31 = vld [vmem:[#allocation5 + $0x1db8] sm:$0xf0] }
 0x183   : > { %8291 = vmatpush.bf16.msrb.mxu3 %v13925_v21  ;;  %v16233_v21 = vld [vmem:[#allocation5 + $0x13b4] sm:$0xf]  ;;  %v7900_v34 = vpop.f32.mrf.mxu2  ;;  %v13661_v42 = vor.u32 %v16281_v25, %v13658_v26  ;;  %v14762_v7 = vld [vmem:[#allocation5 + $0x1de8] sm:$0xf0] }
 0x184   : > { %8235 = vmatpush.bf16.msrb.mxu0 %v13325_v4  ;;  %v7901_v62 = vadd.f32 %v7900_v34, %v7882_v60  ;;  %v16179_v4 = vld [vmem:[#allocation5 + $0x1204] sm:$0xf] }
 0x185   : > { %8254 = vmatpush.bf16.msrb.mxu1 %v13517_v12  ;;  %v13469_v12 = vor.u32 %v16233_v21, %v13466_v20  ;;  %v13253_v26 = vor.u32 %v16179_v4, %v13250_v63  ;;  %v14573_v20 = vor.u32 %v16509_v3, %v14570_v30  ;;  %v16455_v4 = vld [vmem:[#allocation5 + $0x1aa4] sm:$0xf] }
 0x186   : > { %8273 = vmatpush.bf16.msrb.mxu2 %v13709_v61  ;;  %v13634_v61 = vld [vmem:[#allocation5 + $0x1518] sm:$0xf0]  ;;  %v17524_v47 = vadd.f32 %v7919_v19, %v7901_v62 }
 0x187   : > { %8292 = vmatpush.bf16.msrb.mxu3 %v13901_v41  ;;  %v7865_v38 = vpop.f32.mrf.mxu0  ;;  %v7884_v11 = vpop.f32.mrf.mxu1  ;;  %v13853_v41 = vor.u32 %v16329_v2, %v13850_v58  ;;  %8206 = vmatmul.bf16.gmra.mxu2 %v17318_v45  ;;  %v13637_v25 = vor.u32 %v16275_v43, %v13634_v61  ;;  %v16503_v58 = vld [vmem:[#allocation5 + $0x1c24] sm:$0xf]  ;;  %v14546_v62 = vld [vmem:[#allocation5 + $0x1c38] sm:$0xf0] }
 0x188   : > { %v7866_v32 = vadd.f32 %v7865_v38, %v17511_v10  ;;  %8236 = vmatpush.bf16.msrb.mxu0 %v13301_v27  ;;  %8187 = vmatmul.bf16.gmra.mxu1 %v17316_v40  ;;  %v13826_v10 = vld [vmem:[#allocation5 + $0x1698] sm:$0xf0]  ;;  %v16461_v27 = vld [vmem:[#allocation5 + $0x1ad4] sm:$0xf]  ;;  %v16407_v43 = vld [vmem:[#allocation5 + $0x1924] sm:$0xf] }
 0x189   : > { %8255 = vmatpush.bf16.msrb.mxu1 %v13493_v49  ;;  %8168 = vmatmul.bf16.gmra.mxu0 %v17314_v39  ;;  %v14378_v49 = vld [vmem:[#allocation5 + $0x1ae8] sm:$0xf0]  ;;  %v13829_v21 = vor.u32 %v16323_v33, %v13826_v10  ;;  %v14162_v61 = vld [vmem:[#allocation5 + $0x1938] sm:$0xf0] }
 0x18a   : > { %8274 = vmatpush.bf16.msrb.mxu2 %v13685_v16  ;;  %v7885_v60 = vadd.f32 %v7884_v11, %v7866_v32  ;;  %8225 = vmatmul.bf16.gmra.mxu3 %v17320_v46  ;;  %v14186_v16 = vld [vmem:[#allocation5 + $0x1968] sm:$0xf0]  ;;  %v14165_v10 = vor.u32 %v16407_v43, %v14162_v61  ;;  %v14114_v43 = vld [vmem:[#allocation5 + $0x18d8] sm:$0xf0]  ;;  %v16443_v61 = vld [vmem:[#allocation5 + $0x1a44] sm:$0xf] }
 0x18b   : > { %8293 = vmatpush.bf16.msrb.mxu3 %v13877_v52  ;;  %v16557_v52 = vld [vmem:[#allocation5 + $0x1dd4] sm:$0xf]  ;;  %v7903_v34 = vpop.f32.mrf.mxu2  ;;  %v14189_v2 = vor.u32 %v16413_v35, %v14186_v16 }
 0x18c   : > { %8237 = vmatpush.bf16.msrb.mxu0 %v13277_v22  ;;  %v7922_v19 = vpop.f32.mrf.mxu3  ;;  %v7904_v38 = vadd.f32 %v7903_v34, %v7885_v60  ;;  %v14765_v22 = vor.u32 %v16557_v52, %v14762_v7  ;;  %v14549_v60 = vor.u32 %v16503_v58, %v14546_v62  ;;  %v16497_v35 = vld [vmem:[#allocation5 + $0x1bf4] sm:$0xf]  ;;  %v14330_v52 = vld [vmem:[#allocation5 + $0x1a88] sm:$0xf0]  ;;  %v16491_v62 = vld [vmem:[#allocation5 + $0x1bc4] sm:$0xf] }
 0x18d   : > { %8256 = vmatpush.bf16.msrb.mxu1 %v13469_v12  ;;  %v14354_v12 = vld [vmem:[#allocation5 + $0x1ab8] sm:$0xf0]  ;;  %v16401_v16 = vld [vmem:[#allocation5 + $0x18f4] sm:$0xf] }
 0x18e   : > { %8275 = vmatpush.bf16.msrb.mxu2 %v13661_v42  ;;  %v14381_v42 = vor.u32 %v16461_v27, %v14378_v49  ;;  %v17531_v55 = vadd.f32 %v7922_v19, %v7904_v38  ;;  %v14357_v3 = vor.u32 %v16455_v4, %v14354_v12  ;;  %v14138_v27 = vld [vmem:[#allocation5 + $0x1908] sm:$0xf0]  ;;  %v16545_v7 = vld [vmem:[#allocation5 + $0x1d74] sm:$0xf]  ;;  %v14498_v38 = vld [vmem:[#allocation5 + $0x1bd8] sm:$0xf0] }
 0x18f   : > { %8294 = vmatpush.bf16.msrb.mxu3 %v13853_v41  ;;  %v7867_v11 = vpop.f32.mrf.mxu0  ;;  %v7886_v32 = vpop.f32.mrf.mxu1  ;;  %v16551_v41 = vld [vmem:[#allocation5 + $0x1da4] sm:$0xf]  ;;  %v14141_v58 = vor.u32 %v16401_v16, %v14138_v27  ;;  %v14090_v16 = vld [vmem:[#allocation5 + $0x18a8] sm:$0xf0]  ;;  %v16437_v27 = vld [vmem:[#allocation5 + $0x1a14] sm:$0xf] }
 0x190   : > { %v7868_v63 = vadd.f32 %v7867_v11, %v17514_v15  ;;  %8238 = vmatpush.bf16.msrb.mxu0 %v13253_v26  ;;  %v14741_v30 = vor.u32 %v16551_v41, %v14738_v31  ;;  %v14522_v15 = vld [vmem:[#allocation5 + $0x1c08] sm:$0xf0]  ;;  %v16539_v12 = vld [vmem:[#allocation5 + $0x1d44] sm:$0xf]  ;;  %v14690_v41 = vld [vmem:[#allocation5 + $0x1d58] sm:$0xf0] }
 0x191   : > { %8257 = vmatpush.bf16.msrb.mxu1 %v13445_v37  ;;  %v14714_v37 = vld [vmem:[#allocation5 + $0x1d88] sm:$0xf0] }
 0x192   : > { %8276 = vmatpush.bf16.msrb.mxu2 %v13637_v25  ;;  %v7887_v33 = vadd.f32 %v7886_v32, %v7868_v63  ;;  %v16449_v25 = vld [vmem:[#allocation5 + $0x1a74] sm:$0xf]  ;;  %v14306_v63 = vld [vmem:[#allocation5 + $0x1a58] sm:$0xf0]  ;;  %v18605_v31 = vld [vmem:[#allocation16_spill] sm:$0xff] }
 0x193   : > { %8295 = vmatpush.bf16.msrb.mxu3 %v13829_v21  ;;  %v7905_v26 = vpop.f32.mrf.mxu2  ;;  %v14333_v32 = vor.u32 %v16449_v25, %v14330_v52  ;;  %v16533_v52 = vld [vmem:[#allocation5 + $0x1d14] sm:$0xf] }
 0x194   : > { %8307 = vmatpush.bf16.msra.mxu0 %v14189_v2  ;;  %v7924_v49 = vpop.f32.mrf.mxu3  ;;  %v7906_v21 = vadd.f32 %v7905_v26, %v7887_v33  ;;  %v14525_v2 = vor.u32 %v16497_v35, %v14522_v15  ;;  %v14501_v33 = vor.u32 %v16491_v62, %v14498_v38  ;;  %v14693_v35 = vor.u32 %v16539_v12, %v14690_v41  ;;  %v16389_v15 = vld [vmem:[#allocation5 + $0x1894] sm:$0xf]  ;;  %v14450_v62 = vld [vmem:[#allocation5 + $0x1b78] sm:$0xf0]  ;;  %v16527_v12 = vld [vmem:[#allocation5 + $0x1ce4] sm:$0xf] }
 0x195   : > { %8326 = vmatpush.bf16.msra.mxu1 %v14381_v42  ;;  %v14717_v42 = vor.u32 %v16545_v7, %v14714_v37  ;;  %v14666_v7 = vld [vmem:[#allocation5 + $0x1d28] sm:$0xf0]  ;;  %v14642_v41 = vld [vmem:[#allocation5 + $0x1cf8] sm:$0xf0] }
 0x196   : > { %8345 = vmatpush.bf16.msra.mxu2 %v14573_v20  ;;  %v17534_v11 = vadd.f32 %v7924_v49, %v7906_v21  ;;  %v14282_v49 = vld [vmem:[#allocation5 + $0x1a28] sm:$0xf0] }
 0x197   : > { %8364 = vmatpush.bf16.msra.mxu3 %v14765_v22  ;;  %v7936_v34 = vpop.f32.mrf.mxu0  ;;  %v7955_v19 = vpop.f32.mrf.mxu1  ;;  %v16395_v22 = vld [vmem:[#allocation5 + $0x18c4] sm:$0xf] }
 0x198   : > { %8308 = vmatpush.bf16.msra.mxu0 %v14165_v10  ;;  %v7937_v20 = vadd.f32 %v7936_v34, %v17521_v36  ;;  %8258 = vmatmul.bf16.vlgmr.msrb.gmra.mxu1 %v17336_v18  ;;  %v18604_v36 = vld [vmem:[#allocation15_spill] sm:$0xff]  ;;  %v16485_v10 = vld [vmem:[#allocation5 + $0x1b94] sm:$0xf] }
 0x199   : > { %8327 = vmatpush.bf16.msra.mxu1 %v14357_v3  ;;  %8239 = vmatmul.bf16.vlgmr.msrb.gmra.mxu0 %v17334_v17  ;;  %v14474_v3 = vld [vmem:[#allocation5 + $0x1ba8] sm:$0xf0] }
 0x19a   : > { %8346 = vmatpush.bf16.msra.mxu2 %v14549_v60  ;;  %v7956_v4 = vadd.f32 %v7955_v19, %v7937_v20  ;;  %8296 = vmatmul.bf16.vlgmr.msrb.gmra.mxu3 %v18605_v31  ;;  %v14117_v60 = vor.u32 %v16395_v22, %v14114_v43  ;;  %v14477_v20 = vor.u32 %v16485_v10, %v14474_v3  ;;  %v16383_v22 = vld [vmem:[#allocation5 + $0x1864] sm:$0xf]  ;;  %v14066_v43 = vld [vmem:[#allocation5 + $0x1878] sm:$0xf0]  ;;  %v14426_v10 = vld [vmem:[#allocation5 + $0x1b48] sm:$0xf0] }
 0x19b   : > { %8365 = vmatpush.bf16.msra.mxu3 %v14741_v30  ;;  %8277 = vmatmul.bf16.vlgmr.msrb.gmra.mxu2 %v18604_v36  ;;  %v14309_v30 = vor.u32 %v16443_v61, %v14306_v63  ;;  %v7974_v25 = vpop.f32.mrf.mxu2  ;;  %v16431_v61 = vld [vmem:[#allocation5 + $0x19e4] sm:$0xf]  ;;  %v14258_v63 = vld [vmem:[#allocation5 + $0x19f8] sm:$0xf0] }
 0x19c   : > { %8309 = vmatpush.bf16.msra.mxu0 %v14141_v58  ;;  %v7975_v37 = vadd.f32 %v7974_v25, %v7956_v4  ;;  %v16479_v58 = vld [vmem:[#allocation5 + $0x1b64] sm:$0xf]  ;;  %v14261_v3 = vor.u32 %v16431_v61, %v14258_v63 }
 0x19d   : > { %8328 = vmatpush.bf16.msra.mxu1 %v14333_v32  ;;  %v7993_v26 = vpop.f32.mrf.mxu3  ;;  %v14285_v32 = vor.u32 %v16437_v27, %v14282_v49  ;;  %v16521_v49 = vld [vmem:[#allocation5 + $0x1cb4] sm:$0xf]  ;;  %v16419_v61 = vld [vmem:[#allocation5 + $0x1984] sm:$0xf] }
 0x19e   : > { %8347 = vmatpush.bf16.msra.mxu2 %v14525_v2  ;;  %v14093_v2 = vor.u32 %v16389_v15, %v14090_v16  ;;  %v17541_v38 = vadd.f32 %v7993_v26, %v7975_v37  ;;  %v14042_v15 = vld [vmem:[#allocation5 + $0x1848] sm:$0xf0]  ;;  %v16425_v16 = vld [vmem:[#allocation5 + $0x19b4] sm:$0xf]  ;;  %v16515_v63 = vld [vmem:[#allocation5 + $0x1c84] sm:$0xf] }
 0x19f   : > { %8366 = vmatpush.bf16.msra.mxu3 %v14717_v42  ;;  %v7938_v21 = vpop.f32.mrf.mxu0  ;;  %v7957_v34 = vpop.f32.mrf.mxu1  ;;  %v14669_v42 = vor.u32 %v16533_v52, %v14666_v7  ;;  %v14234_v26 = vld [vmem:[#allocation5 + $0x19c8] sm:$0xf0] }
 0x1a0   : > { %v7939_v19 = vadd.f32 %v7938_v21, %v17524_v47  ;;  %8310 = vmatpush.bf16.msra.mxu0 %v14117_v60  ;;  %18606 = vst [vmem:[#allocation37_spill] sm:$0xff] %v17541_v38  ;;  %v14453_v47 = vor.u32 %v16479_v58, %v14450_v62  ;;  %v16473_v60 = vld [vmem:[#allocation5 + $0x1b34] sm:$0xf]  ;;  %v14618_v52 = vld [vmem:[#allocation5 + $0x1cc8] sm:$0xf0] }
 0x1a1   : > { %8329 = vmatpush.bf16.msra.mxu1 %v14309_v30  ;;  %v14645_v30 = vor.u32 %v16527_v12, %v14642_v41  ;;  %v14402_v58 = vld [vmem:[#allocation5 + $0x1b18] sm:$0xf0]  ;;  %v16371_v62 = vld [vmem:[#allocation5 + $0x1804] sm:$0xf]  ;;  %v18608_v41 = vld [vmem:[#allocation17_spill] sm:$0xff] }
 0x1a2   : > { %8348 = vmatpush.bf16.msra.mxu2 %v14501_v33  ;;  %v7958_v4 = vadd.f32 %v7957_v34, %v7939_v19  ;;  %v14069_v33 = vor.u32 %v16383_v22, %v14066_v43  ;;  %v16467_v34 = vld [vmem:[#allocation5 + $0x1b04] sm:$0xf]  ;;  %v14237_v22 = vor.u32 %v16425_v16, %v14234_v26  ;;  %v14621_v43 = vor.u32 %v16521_v49, %v14618_v52  ;;  %v16749_v26 = vld [vmem:[#allocation5 + $0x23d4] sm:$0xf]  ;;  %v15530_v49 = vld [vmem:[#allocation5 + $0x23e8] sm:$0xf0] }
 0x1a3   : > { %8367 = vmatpush.bf16.msra.mxu3 %v14693_v35  ;;  %v16377_v35 = vld [vmem:[#allocation5 + $0x1834] sm:$0xf]  ;;  %v7976_v27 = vpop.f32.mrf.mxu2  ;;  %v14405_v16 = vor.u32 %v16467_v34, %v14402_v58  ;;  %v16695_v38 = vld [vmem:[#allocation5 + $0x2224] sm:$0xf]  ;;  %v14930_v58 = vld [vmem:[#allocation5 + $0x1f38] sm:$0xf0] }
 0x1a4   : > { %8311 = vmatpush.bf16.msra.mxu0 %v14093_v2  ;;  %v7977_v7 = vadd.f32 %v7976_v27, %v7958_v4  ;;  %v14045_v2 = vor.u32 %v16377_v35, %v14042_v15  ;;  %v14210_v4 = vld [vmem:[#allocation5 + $0x1998] sm:$0xf0]  ;;  %v18611_v35 = vld [vmem:[#allocation20_spill] sm:$0xff]  ;;  %v16605_v15 = vld [vmem:[#allocation5 + $0x1f54] sm:$0xf] }
 0x1a5   : > { %8330 = vmatpush.bf16.msra.mxu1 %v14285_v32  ;;  %v7995_v25 = vpop.f32.mrf.mxu3  ;;  %v14018_v32 = vld [vmem:[#allocation5 + $0x1818] sm:$0xf0]  ;;  %v14213_v52 = vor.u32 %v16419_v61, %v14210_v4  ;;  %v16599_v34 = vld [vmem:[#allocation5 + $0x1f24] sm:$0xf] }
 0x1a6   : > { %8349 = vmatpush.bf16.msra.mxu2 %v14477_v20  ;;  %v14429_v20 = vor.u32 %v16473_v60, %v14426_v10  ;;  %v15338_v60 = vld [vmem:[#allocation5 + $0x2268] sm:$0xf0]  ;;  %v18610_v10 = vld [vmem:[#allocation19_spill] sm:$0xff]  ;;  %v14021_v27 = vor.u32 %v16371_v62, %v14018_v32  ;;  %v15506_v61 = vld [vmem:[#allocation5 + $0x23b8] sm:$0xf0] }
 0x1a7   : > { %8368 = vmatpush.bf16.msra.mxu3 %v14669_v42  ;;  %v7941_v37 = vpop.f32.mrf.mxu0  ;;  %v7960_v21 = vpop.f32.mrf.mxu1  ;;  %v17544_v42 = vadd.f32 %v7995_v25, %v7977_v7  ;;  %v15146_v25 = vld [vmem:[#allocation5 + $0x20e8] sm:$0xf0]  ;;  %v16647_v62 = vld [vmem:[#allocation5 + $0x20a4] sm:$0xf] }
 0x1a8   : > { %v7942_v19 = vadd.f32 %v7941_v37, %v17531_v55  ;;  %8312 = vmatpush.bf16.msra.mxu0 %v14069_v33  ;;  %v18609_v55 = vld [vmem:[#allocation18_spill] sm:$0xff]  ;;  %v16701_v33 = vld [vmem:[#allocation5 + $0x2254] sm:$0xf] }
 0x1a9   : > { %18607 = vst [vmem:[#allocation38_spill] sm:$0xff] %v17544_v42  ;;  %8331 = vmatpush.bf16.msra.mxu1 %v14261_v3  ;;  %8244 = vmatmul.bf16.gmra.mxu0 %v18608_v41  ;;  %v14954_v3 = vld [vmem:[#allocation5 + $0x1f68] sm:$0xf0] }
 0x1aa   : > { %8350 = vmatpush.bf16.msra.mxu2 %v14453_v47  ;;  %v7961_v12 = vadd.f32 %v7960_v21, %v7942_v19  ;;  %8263 = vmatmul.bf16.gmra.mxu1 %v18609_v55  ;;  %v14594_v47 = vld [vmem:[#allocation5 + $0x1c98] sm:$0xf0]  ;;  %v15341_v19 = vor.u32 %v16701_v33, %v15338_v60  ;;  %v14957_v42 = vor.u32 %v16605_v15, %v14954_v3  ;;  %v16689_v15 = vld [vmem:[#allocation5 + $0x21f4] sm:$0xf] }
 0x1ab   : > { %8369 = vmatpush.bf16.msra.mxu3 %v14645_v30  ;;  %8282 = vmatmul.bf16.gmra.mxu2 %v18610_v10  ;;  %v16653_v30 = vld [vmem:[#allocation5 + $0x20d4] sm:$0xf]  ;;  %v14597_v7 = vor.u32 %v16515_v63, %v14594_v47  ;;  %v7979_v37 = vpop.f32.mrf.mxu2  ;;  %v14933_v47 = vor.u32 %v16599_v34, %v14930_v58  ;;  %v16587_v58 = vld [vmem:[#allocation5 + $0x1ec4] sm:$0xf] }
 0x1ac   : > { %8301 = vmatmul.bf16.gmra.mxu3 %v18611_v35  ;;  %8313 = vmatpush.bf16.msra.mxu0 %v14045_v2  ;;  %v15314_v35 = vld [vmem:[#allocation5 + $0x2238] sm:$0xf0]  ;;  %v7980_v10 = vadd.f32 %v7979_v37, %v7961_v12  ;;  %v15533_v2 = vor.u32 %v16749_v26, %v15530_v49  ;;  %v16593_v3 = vld [vmem:[#allocation5 + $0x1ef4] sm:$0xf] }
 0x1ad   : > { %8332 = vmatpush.bf16.msra.mxu1 %v14237_v22  ;;  %v7998_v21 = vpop.f32.mrf.mxu3  ;;  %v15122_v22 = vld [vmem:[#allocation5 + $0x20b8] sm:$0xf0]  ;;  %v15317_v12 = vor.u32 %v16695_v38, %v15314_v35  ;;  %v15098_v38 = vld [vmem:[#allocation5 + $0x2088] sm:$0xf0] }
 0x1ae   : > { %8351 = vmatpush.bf16.msra.mxu2 %v14429_v20  ;;  %v15149_v20 = vor.u32 %v16653_v30, %v15146_v25  ;;  %v17551_v4 = vadd.f32 %v7998_v21, %v7980_v10  ;;  %v15125_v33 = vor.u32 %v16647_v62, %v15122_v22  ;;  %v15290_v10 = vld [vmem:[#allocation5 + $0x2208] sm:$0xf0]  ;;  %v16683_v21 = vld [vmem:[#allocation5 + $0x21c4] sm:$0xf]  ;;  %v14882_v62 = vld [vmem:[#allocation5 + $0x1ed8] sm:$0xf0] }
 0x1af   : > { %8370 = vmatpush.bf16.msra.mxu3 %v14621_v43  ;;  %v7943_v55 = vpop.f32.mrf.mxu0  ;;  %v7962_v41 = vpop.f32.mrf.mxu1  ;;  %v16743_v43 = vld [vmem:[#allocation5 + $0x23a4] sm:$0xf]  ;;  %v14906_v30 = vld [vmem:[#allocation5 + $0x1f08] sm:$0xf0] }
 0x1b0   : > { %v7944_v32 = vadd.f32 %v7943_v55, %v17534_v11  ;;  %8314 = vmatpush.bf16.msra.mxu0 %v14021_v27  ;;  %18612 = vst [vmem:[#allocation39_spill] sm:$0xff] %v17551_v4  ;;  %v15509_v60 = vor.u32 %v16743_v43, %v15506_v61  ;;  %v16843_v11 = vld [vmem:[%s18521_s2] sm:$0x3f]  ;;  %v15482_v35 = vld [vmem:[#allocation5 + $0x2388] sm:$0xf0]  ;;  %v14909_v37 = vor.u32 %v16593_v3, %v14906_v30  ;;  %v18614_v43 = vld [vmem:[#allocation21_spill] sm:$0xff] }
 0x1b1   : > { %8333 = vmatpush.bf16.msra.mxu1 %v14213_v52  ;;  %v17556_v55 = vperm.slane %v16843_v11, 1  ;;  %v18615_v61 = vld [vmem:[#allocation22_spill] sm:$0xff]  ;;  %v15242_v3 = vld [vmem:[#allocation5 + $0x21a8] sm:$0xf0]  ;;  %v16719_v4 = vld [vmem:[#allocation5 + $0x22e4] sm:$0xf] }
 0x1b2   : > { %8352 = vmatpush.bf16.msra.mxu2 %v14405_v16  ;;  %v7963_v63 = vadd.f32 %v7962_v41, %v7944_v32  ;;  %v16641_v16 = vld [vmem:[#allocation5 + $0x2074] sm:$0xf]  ;;  %v16635_v32 = vld [vmem:[#allocation5 + $0x2044] sm:$0xf] }
 0x1b3   : > { %8371 = vmatpush.bf16.msra.mxu3 %v14597_v7  ;;  %v7981_v41 = vpop.f32.mrf.mxu2  ;;  %v15293_v7 = vor.u32 %v16689_v15, %v15290_v10  ;;  %v14885_v15 = vor.u32 %v16587_v58, %v14882_v62  ;;  %v16677_v10 = vld [vmem:[#allocation5 + $0x2194] sm:$0xf] }
 0x1b4   : > { %8383 = vmatpush.bf16.msrb.mxu0 %v14957_v42  ;;  %v16737_v42 = vld [vmem:[#allocation5 + $0x2374] sm:$0xf]  ;;  %v7982_v25 = vadd.f32 %v7981_v41, %v7963_v63  ;;  %v15074_v63 = vld [vmem:[#allocation5 + $0x2058] sm:$0xf0] }
 0x1b5   : > { %8402 = vmatpush.bf16.msrb.mxu1 %v15149_v20  ;;  %v8000_v27 = vpop.f32.mrf.mxu3  ;;  %v15485_v34 = vor.u32 %v16737_v42, %v15482_v35  ;;  %v15077_v30 = vor.u32 %v16635_v32, %v15074_v63  ;;  %v16581_v41 = vld [vmem:[#allocation5 + $0x1e94] sm:$0xf]  ;;  %v16575_v63 = vld [vmem:[#allocation5 + $0x1e64] sm:$0xf] }
 0x1b6   : > { %8421 = vmatpush.bf16.msrb.mxu2 %v15341_v19  ;;  %v15266_v19 = vld [vmem:[#allocation5 + $0x21d8] sm:$0xf0]  ;;  %v17559_v20 = vadd.f32 %v8000_v27, %v7982_v25  ;;  %v14858_v27 = vld [vmem:[#allocation5 + $0x1ea8] sm:$0xf0] }
 0x1b7   : > { %8440 = vmatpush.bf16.msrb.mxu3 %v15533_v2  ;;  %v8012_v26 = vpop.f32.mrf.mxu0  ;;  %v8031_v49 = vpop.f32.mrf.mxu1  ;;  %v15101_v2 = vor.u32 %v16641_v16, %v15098_v38  ;;  %v15269_v11 = vor.u32 %v16683_v21, %v15266_v19  ;;  %v16629_v38 = vld [vmem:[#allocation5 + $0x2014] sm:$0xf]  ;;  %v15050_v25 = vld [vmem:[#allocation5 + $0x2028] sm:$0xf0]  ;;  %v15245_v21 = vor.u32 %v16677_v10, %v15242_v3  ;;  %v14861_v19 = vor.u32 %v16581_v41, %v14858_v27 }
 0x1b8   : > { %8384 = vmatpush.bf16.msrb.mxu0 %v14933_v47  ;;  %v8013_v52 = vadd.f32 %v8012_v26, %v17556_v55  ;;  %18613 = vst [vmem:[#allocation40_spill] sm:$0xff] %v17559_v20  ;;  %v15458_v47 = vld [vmem:[#allocation5 + $0x2358] sm:$0xf0]  ;;  %v16725_v26 = vld [vmem:[#allocation5 + $0x2314] sm:$0xf]  ;;  %v15053_v62 = vor.u32 %v16629_v38, %v15050_v25 }
 0x1b9   : > { %8403 = vmatpush.bf16.msrb.mxu1 %v15125_v33  ;;  %8315 = vmatmul.bf16.vlgmr.msra.gmra.mxu0 %v18614_v43  ;;  %v18616_v33 = vld [vmem:[#allocation23_spill] sm:$0xff]  ;;  %v15194_v10 = vld [vmem:[#allocation5 + $0x2148] sm:$0xf0]  ;;  %v16617_v27 = vld [vmem:[#allocation5 + $0x1fb4] sm:$0xf] }
 0x1ba   : > { %8422 = vmatpush.bf16.msrb.mxu2 %v15317_v12  ;;  %v8032_v22 = vadd.f32 %v8031_v49, %v8013_v52  ;;  %8334 = vmatmul.bf16.vlgmr.msra.gmra.mxu1 %v18615_v61  ;;  %v16731_v12 = vld [vmem:[#allocation5 + $0x2344] sm:$0xf]  ;;  %v15434_v49 = vld [vmem:[#allocation5 + $0x2328] sm:$0xf0]  ;;  %v11480_v61 = vld [vmem:[#allocation5 + $0x428] sm:$0xf] }
 0x1bb   : > { %8441 = vmatpush.bf16.msrb.mxu3 %v15509_v60  ;;  %8353 = vmatmul.bf16.vlgmr.msra.gmra.mxu2 %v18616_v33  ;;  %v18617_v60 = vld [vmem:[#allocation24_spill] sm:$0xff]  ;;  %v15461_v16 = vor.u32 %v16731_v12, %v15458_v47  ;;  %v8050_v42 = vpop.f32.mrf.mxu2  ;;  %v15437_v32 = vor.u32 %v16725_v26, %v15434_v49  ;;  %v14834_v12 = vld [vmem:[#allocation5 + $0x1e78] sm:$0xf0]  ;;  %v16623_v47 = vld [vmem:[#allocation5 + $0x1fe4] sm:$0xf] }
 0x1bc   : > { %8372 = vmatmul.bf16.vlgmr.msra.gmra.mxu3 %v18617_v60  ;;  %8385 = vmatpush.bf16.msrb.mxu0 %v14909_v37  ;;  %v8051_v52 = vadd.f32 %v8050_v42, %v8032_v22  ;;  %v15026_v42 = vld [vmem:[#allocation5 + $0x1ff8] sm:$0xf0]  ;;  %v14810_v41 = vld [vmem:[#allocation5 + $0x1e48] sm:$0xf0]  ;;  %v16713_v26 = vld [vmem:[#allocation5 + $0x22b4] sm:$0xf] }
 0x1bd   : > { %8404 = vmatpush.bf16.msrb.mxu1 %v15101_v2  ;;  %v8069_v35 = vpop.f32.mrf.mxu3  ;;  %v16671_v2 = vld [vmem:[#allocation5 + $0x2164] sm:$0xf]  ;;  %v15410_v60 = vld [vmem:[#allocation5 + $0x22f8] sm:$0xf0]  ;;  %v15029_v3 = vor.u32 %v16623_v47, %v15026_v42  ;;  %v15002_v25 = vld [vmem:[#allocation5 + $0x1fc8] sm:$0xf0] }
 0x1be   : > { %8423 = vmatpush.bf16.msrb.mxu2 %v15293_v7  ;;  %v17566_v58 = vadd.f32 %v8069_v35, %v8051_v52  ;;  %v15386_v49 = vld [vmem:[#allocation5 + $0x22c8] sm:$0xf0]  ;;  %v16611_v47 = vld [vmem:[#allocation5 + $0x1f84] sm:$0xf]  ;;  %v18618_v33 = vld [vmem:[#allocation25_spill] sm:$0xff] }
 0x1bf   : > { %8442 = vmatpush.bf16.msrb.mxu3 %v15485_v34  ;;  %v8014_v20 = vpop.f32.mrf.mxu0  ;;  %v8033_v7 = vpop.f32.mrf.mxu1  ;;  %v15218_v34 = vld [vmem:[#allocation5 + $0x2178] sm:$0xf0]  ;;  %v16707_v42 = vld [vmem:[#allocation5 + $0x2284] sm:$0xf] }
 0x1c0   : > { %v8015_v37 = vadd.f32 %v8014_v20, %v17556_v55  ;;  %8386 = vmatpush.bf16.msrb.mxu0 %v14885_v15  ;;  %v15221_v20 = vor.u32 %v16671_v2, %v15218_v34  ;;  %v16665_v15 = vld [vmem:[#allocation5 + $0x2134] sm:$0xf] }
 0x1c1   : > { %8405 = vmatpush.bf16.msrb.mxu1 %v15077_v30  ;;  %v15413_v30 = vor.u32 %v16719_v4, %v15410_v60  ;;  %v15197_v2 = vor.u32 %v16665_v15, %v15194_v10  ;;  %v16563_v4 = vld [vmem:[#allocation5 + $0x1e04] sm:$0xf]  ;;  %v14786_v60 = vld [vmem:[#allocation5 + $0x1e18] sm:$0xf0]  ;;  %v15745_v15 = vld [vmem:[#allocation5 + $0x46c] sm:$0xf0] }
 0x1c2   : > { %8424 = vmatpush.bf16.msrb.mxu2 %v15269_v11  ;;  %v8034_v22 = vadd.f32 %v8033_v7, %v8015_v37  ;;  %v14837_v11 = vor.u32 %v16575_v63, %v14834_v12  ;;  %v15005_v63 = vor.u32 %v16617_v27, %v15002_v25  ;;  %v15389_v12 = vor.u32 %v16713_v26, %v15386_v49  ;;  %v18620_v10 = vld [vmem:[#allocation27_spill] sm:$0xff]  ;;  %v15697_v25 = vld [vmem:[#allocation5 + $0x2ec] sm:$0xf0]  ;;  %v11696_v26 = vld [vmem:[#allocation5 + $0x5d8] sm:$0xf] }
 0x1c3   : > { %8443 = vmatpush.bf16.msrb.mxu3 %v15461_v16  ;;  %v16569_v16 = vld [vmem:[#allocation5 + $0x1e34] sm:$0xf]  ;;  %v8052_v38 = vpop.f32.mrf.mxu2  ;;  %v15793_v49 = vld [vmem:[#allocation5 + $0x5ec] sm:$0xf0] }
 0x1c4   : > { %8387 = vmatpush.bf16.msrb.mxu0 %v14861_v19  ;;  %v8053_v52 = vadd.f32 %v8052_v38, %v8034_v22  ;;  %v14813_v34 = vor.u32 %v16569_v16, %v14810_v41  ;;  %v14978_v22 = vld [vmem:[#allocation5 + $0x1f98] sm:$0xf0]  ;;  %v18621_v16 = vld [vmem:[#allocation28_spill] sm:$0xff]  ;;  %v11120_v41 = vld [vmem:[#allocation5 + $0x158] sm:$0xf] }
 0x1c5   : > { %8406 = vmatpush.bf16.msrb.mxu1 %v15053_v62  ;;  %v8071_v35 = vpop.f32.mrf.mxu3  ;;  %v15170_v62 = vld [vmem:[#allocation5 + $0x2118] sm:$0xf0] }
 0x1c6   : > { %8425 = vmatpush.bf16.msrb.mxu2 %v15245_v21  ;;  %v16659_v21 = vld [vmem:[#allocation5 + $0x2104] sm:$0xf] }
 0x1c7   : > { %8444 = vmatpush.bf16.msrb.mxu3 %v15437_v32  ;;  %v8017_v7 = vpop.f32.mrf.mxu0  ;;  %v8036_v37 = vpop.f32.mrf.mxu1  ;;  %v17569_v32 = vadd.f32 %v8071_v35, %v8053_v52  ;;  %v15173_v27 = vor.u32 %v16659_v21, %v15170_v62  ;;  %v14789_v35 = vor.u32 %v16563_v4, %v14786_v60  ;;  %v14981_v52 = vor.u32 %v16611_v47, %v14978_v22  ;;  %v11096_v21 = vld [vmem:[#allocation5 + $0x128] sm:$0xf]  ;;  %v15643_v62 = vld [vmem:[#allocation5 + $0x13c] sm:$0xf0] }
 0x1c8   : > { %v8018_v19 = vadd.f32 %v8017_v7, %v17556_v55  ;;  %8388 = vmatpush.bf16.msrb.mxu0 %v14837_v11  ;;  %v18619_v7 = vld [vmem:[#allocation26_spill] sm:$0xff]  ;;  %v11288_v4 = vld [vmem:[#allocation5 + $0x2a8] sm:$0xf]  ;;  %v15787_v47 = vld [vmem:[#allocation5 + $0x5bc] sm:$0xf0] }
 0x1c9   : > { %8407 = vmatpush.bf16.msrb.mxu1 %v15029_v3  ;;  %8320 = vmatmul.bf16.gmra.mxu0 %v18618_v33  ;;  %v11504_v11 = vld [vmem:[#allocation5 + $0x458] sm:$0xf]  ;;  %v15649_v3 = vld [vmem:[#allocation5 + $0x16c] sm:$0xf0] }
 0x1ca   : > { %8426 = vmatpush.bf16.msrb.mxu2 %v15221_v20  ;;  %v8037_v38 = vadd.f32 %v8036_v37, %v8018_v19  ;;  %8339 = vmatmul.bf16.gmra.mxu1 %v18619_v7  ;;  %v15362_v20 = vld [vmem:[#allocation5 + $0x2298] sm:$0xf0]  ;;  %v11505_v33 = vor.u32 %v15745_v15, %v11504_v11 }
 0x1cb   : > { %8445 = vmatpush.bf16.msrb.mxu3 %v15413_v30  ;;  %8358 = vmatmul.bf16.gmra.mxu2 %v18620_v10  ;;  %v11312_v30 = vld [vmem:[#allocation5 + $0x2d8] sm:$0xf]  ;;  %v15365_v37 = vor.u32 %v16707_v42, %v15362_v20  ;;  %v8055_v19 = vpop.f32.mrf.mxu2  ;;  %v11121_v10 = vor.u32 %v15649_v3, %v11120_v41  ;;  %v11097_v20 = vor.u32 %v15643_v62, %v11096_v21  ;;  %v15637_v3 = vld [vmem:[#allocation5 + $0x10c] sm:$0xf0]  ;;  %v15631_v21 = vld [vmem:[#allocation5 + $0xdc] sm:$0xf0] }
 0x1cc   : > { %8377 = vmatmul.bf16.gmra.mxu3 %v18621_v16  ;;  %8389 = vmatpush.bf16.msrb.mxu0 %v14813_v34  ;;  %v15739_v16 = vld [vmem:[#allocation5 + $0x43c] sm:$0xf0]  ;;  %v8056_v43 = vadd.f32 %v8055_v19, %v8037_v38  ;;  %v11697_v34 = vor.u32 %v15793_v49, %v11696_v26  ;;  %v11456_v41 = vld [vmem:[#allocation5 + $0x3f8] sm:$0xf]  ;;  %v11432_v49 = vld [vmem:[#allocation5 + $0x3c8] sm:$0xf] }
 0x1cd   : > { %8408 = vmatpush.bf16.msrb.mxu1 %v15005_v63  ;;  %v8074_v7 = vpop.f32.mrf.mxu3  ;;  %v15691_v63 = vld [vmem:[#allocation5 + $0x2bc] sm:$0xf0]  ;;  %v11481_v38 = vor.u32 %v15739_v16, %v11480_v61  ;;  %v11240_v62 = vld [vmem:[#allocation5 + $0x248] sm:$0xf] }
 0x1ce   : > { %8427 = vmatpush.bf16.msrb.mxu2 %v15197_v2  ;;  %v11313_v2 = vor.u32 %v15697_v25, %v11312_v30  ;;  %v17576_v22 = vadd.f32 %v8074_v7, %v8056_v43  ;;  %v11289_v11 = vor.u32 %v15691_v63, %v11288_v4  ;;  %v11264_v30 = vld [vmem:[#allocation5 + $0x278] sm:$0xf]  ;;  %v15685_v43 = vld [vmem:[#allocation5 + $0x28c] sm:$0xf0] }
 0x1cf   : > { %8446 = vmatpush.bf16.msrb.mxu3 %v15389_v12  ;;  %v8019_v31 = vpop.f32.mrf.mxu0  ;;  %v8038_v36 = vpop.f32.mrf.mxu1  ;;  %v11672_v12 = vld [vmem:[#allocation5 + $0x5a8] sm:$0xf]  ;;  %v11648_v7 = vld [vmem:[#allocation5 + $0x578] sm:$0xf]  ;;  %v11265_v19 = vor.u32 %v15685_v43, %v11264_v30  ;;  %v15625_v30 = vld [vmem:[#allocation5 + $0xac] sm:$0xf0] }
 0x1d0   : > { %v8020_v60 = vadd.f32 %v8019_v31, %v17556_v55  ;;  %8390 = vmatpush.bf16.msrb.mxu0 %v14789_v35  ;;  %v11673_v15 = vor.u32 %v15787_v47, %v11672_v12  ;;  %v15733_v31 = vld [vmem:[#allocation5 + $0x40c] sm:$0xf0]  ;;  %v11072_v55 = vld [vmem:[#allocation5 + $0xf8] sm:$0xf]  ;;  %v15679_v12 = vld [vmem:[#allocation5 + $0x25c] sm:$0xf0] }
 0x1d1   : > { %8409 = vmatpush.bf16.msrb.mxu1 %v14981_v52  ;;  %v11457_v25 = vor.u32 %v15733_v31, %v11456_v41  ;;  %v11073_v26 = vor.u32 %v15637_v3, %v11072_v55  ;;  %v15727_v52 = vld [vmem:[#allocation5 + $0x3dc] sm:$0xf0]  ;;  %v18623_v63 = vld [vmem:[#allocation30_spill] sm:$0xff]  ;;  %v11624_v47 = vld [vmem:[#allocation5 + $0x548] sm:$0xf]  ;;  %v11241_v31 = vor.u32 %v15679_v12, %v11240_v62 }
 0x1d2   : > { %8428 = vmatpush.bf16.msrb.mxu2 %v15173_v27  ;;  %v8039_v42 = vadd.f32 %v8038_v36, %v8020_v60  ;;  %v15781_v36 = vld [vmem:[#allocation5 + $0x58c] sm:$0xf0]  ;;  %v11024_v3 = vld [vmem:[#allocation5 + $0x98] sm:$0xf]  ;;  %v11000_v62 = vld [vmem:[#allocation5 + $0x68] sm:$0xf] }
 0x1d3   : > { %8447 = vmatpush.bf16.msrb.mxu3 %v15365_v37  ;;  %v8057_v27 = vpop.f32.mrf.mxu2  ;;  %v18622_v60 = vld [vmem:[#allocation29_spill] sm:$0xff]  ;;  %v15619_v12 = vld [vmem:[#allocation5 + $0x7c] sm:$0xf0] }
 0x1d4   : > { %8459 = vmatpush.bf16.msra.mxu0 %v11121_v10  ;;  %v15721_v41 = vld [vmem:[#allocation5 + $0x3ac] sm:$0xf0] }
 0x1d5   : > { %8478 = vmatpush.bf16.msra.mxu1 %v11313_v2  ;;  %v8076_v35 = vpop.f32.mrf.mxu3  ;;  %v11649_v2 = vor.u32 %v15781_v36, %v11648_v7  ;;  %v15673_v7 = vld [vmem:[#allocation5 + $0x22c] sm:$0xf0]  ;;  %v11600_v36 = vld [vmem:[#allocation5 + $0x518] sm:$0xf] }
 0x1d6   : > { %8497 = vmatpush.bf16.msra.mxu2 %v11505_v33  ;;  %v8058_v33 = vadd.f32 %v8057_v27, %v8039_v42  ;;  %v15775_v42 = vld [vmem:[#allocation5 + $0x55c] sm:$0xf0]  ;;  %v11216_v27 = vld [vmem:[#allocation5 + $0x218] sm:$0xf] }
 0x1d7   : > { %8516 = vmatpush.bf16.msra.mxu3 %v11697_v34  ;;  %v8088_v10 = vpop.f32.mrf.mxu0  ;;  %v8107_v61 = vpop.f32.mrf.mxu1  ;;  %v11048_v34 = vld [vmem:[#allocation5 + $0xc8] sm:$0xf]  ;;  %v11625_v55 = vor.u32 %v15775_v42, %v11624_v47  ;;  %v15667_v42 = vld [vmem:[#allocation5 + $0x1fc] sm:$0xf0] }
 0x1d8   : > { %8460 = vmatpush.bf16.msra.mxu0 %v11097_v20  ;;  %v8089_v16 = vadd.f32 %v8088_v10, %v17566_v58  ;;  %v17579_v37 = vadd.f32 %v8076_v35, %v8058_v33  ;;  %v18624_v58 = vld [vmem:[#allocation31_spill] sm:$0xff]  ;;  %v11433_v20 = vor.u32 %v15727_v52, %v11432_v49  ;;  %v15769_v33 = vld [vmem:[#allocation5 + $0x52c] sm:$0xf0]  ;;  %v11025_v49 = vor.u32 %v15625_v30, %v11024_v3  ;;  %v11384_v52 = vld [vmem:[#allocation5 + $0x368] sm:$0xf] }
 0x1d9   : > { %8479 = vmatpush.bf16.msra.mxu1 %v11289_v11  ;;  %8391 = vmatmul.bf16.vlgmr.msrb.gmra.mxu0 %v18622_v60  ;;  %v11049_v11 = vor.u32 %v15631_v21, %v11048_v34  ;;  %v11217_v34 = vor.u32 %v15673_v7, %v11216_v27  ;;  %v11601_v21 = vor.u32 %v15769_v33, %v11600_v36  ;;  %v11192_v47 = vld [vmem:[#allocation5 + $0x1e8] sm:$0xf]  ;;  %v15613_v3 = vld [vmem:[#allocation5 + $0x4c] sm:$0xf0]  ;;  %v11168_v30 = vld [vmem:[#allocation5 + $0x1b8] sm:$0xf] }
 0x1da   : > { %8498 = vmatpush.bf16.msra.mxu2 %v11481_v38  ;;  %v8108_v4 = vadd.f32 %v8107_v61, %v8089_v16  ;;  %8410 = vmatmul.bf16.vlgmr.msrb.gmra.mxu1 %v18623_v63  ;;  %v18625_v38 = vld [vmem:[#allocation32_spill] sm:$0xff]  ;;  %v15661_v7 = vld [vmem:[#allocation5 + $0x1cc] sm:$0xf0]  ;;  %v11552_v36 = vld [vmem:[#allocation5 + $0x4b8] sm:$0xf] }
 0x1db   : > { %8517 = vmatpush.bf16.msra.mxu3 %v11673_v15  ;;  %8429 = vmatmul.bf16.vlgmr.msrb.gmra.mxu2 %v18624_v58  ;;  %v11408_v15 = vld [vmem:[#allocation5 + $0x398] sm:$0xf]  ;;  %v8126_v35 = vpop.f32.mrf.mxu2  ;;  %v15757_v33 = vld [vmem:[#allocation5 + $0x4cc] sm:$0xf0] }
 0x1dc   : > { %8448 = vmatmul.bf16.vlgmr.msrb.gmra.mxu3 %v18625_v38  ;;  %8461 = vmatpush.bf16.msra.mxu0 %v11073_v26  ;;  %v8127_v10 = vadd.f32 %v8126_v35, %v8108_v4  ;;  %v11409_v26 = vor.u32 %v15721_v41, %v11408_v15  ;;  %v11576_v35 = vld [vmem:[#allocation5 + $0x4e8] sm:$0xf]  ;;  %v15763_v38 = vld [vmem:[#allocation5 + $0x4fc] sm:$0xf0]  ;;  %v15709_v15 = vld [vmem:[#allocation5 + $0x34c] sm:$0xf0]  ;;  %v11193_v41 = vor.u32 %v15667_v42, %v11192_v47 }
 0x1dd   : > { %8480 = vmatpush.bf16.msra.mxu1 %v11265_v19  ;;  %v8145_v43 = vpop.f32.mrf.mxu3  ;;  %v15715_v19 = vld [vmem:[#allocation5 + $0x37c] sm:$0xf0]  ;;  %v11144_v47 = vld [vmem:[#allocation5 + $0x188] sm:$0xf] }
 0x1de   : > { %8499 = vmatpush.bf16.msra.mxu2 %v11457_v25  ;;  %v11528_v42 = vld [vmem:[#allocation5 + $0x488] sm:$0xf] }
 0x1df   : > { %8518 = vmatpush.bf16.msra.mxu3 %v11649_v2  ;;  %v8090_v61 = vpop.f32.mrf.mxu0  ;;  %v8109_v16 = vpop.f32.mrf.mxu1  ;;  %v17586_v2 = vadd.f32 %v8145_v43, %v8127_v10 }
 0x1e0   : > { %v8091_v25 = vadd.f32 %v8090_v61, %v17569_v32  ;;  %8462 = vmatpush.bf16.msra.mxu0 %v11049_v11  ;;  %v11385_v32 = vor.u32 %v15715_v19, %v11384_v52  ;;  %v11360_v11 = vld [vmem:[#allocation5 + $0x338] sm:$0xf]  ;;  %v15703_v19 = vld [vmem:[#allocation5 + $0x31c] sm:$0xf0] }
 0x1e1   : > { %8481 = vmatpush.bf16.msra.mxu1 %v11241_v31  ;;  %v11577_v31 = vor.u32 %v15763_v38, %v11576_v35  ;;  %v10952_v38 = vld [vmem:[#allocation5 + $0x8] sm:$0xf] }
 0x1e2   : > { %8500 = vmatpush.bf16.msra.mxu2 %v11433_v20  ;;  %v8110_v4 = vadd.f32 %v8109_v16, %v8091_v25  ;;  %v11001_v20 = vor.u32 %v15619_v12, %v11000_v62  ;;  %v11336_v25 = vld [vmem:[#allocation5 + $0x308] sm:$0xf]  ;;  %v11169_v62 = vor.u32 %v15661_v7, %v11168_v30  ;;  %v11553_v12 = vor.u32 %v15757_v33, %v11552_v36  ;;  %v12464_v7 = vld [vmem:[#allocation5 + $0xbd8] sm:$0xf]  ;;  %v15985_v36 = vld [vmem:[#allocation5 + $0xbec] sm:$0xf0] }
 0x1e3   : > { %8519 = vmatpush.bf16.msra.mxu3 %v11625_v55  ;;  %v10976_v55 = vld [vmem:[#allocation5 + $0x38] sm:$0xf]  ;;  %v8128_v27 = vpop.f32.mrf.mxu2  ;;  %v11337_v30 = vor.u32 %v15703_v19, %v11336_v25  ;;  %v11864_v25 = vld [vmem:[#allocation5 + $0x728] sm:$0xf]  ;;  %v15835_v19 = vld [vmem:[#allocation5 + $0x73c] sm:$0xf0] }
 0x1e4   : > { %8463 = vmatpush.bf16.msra.mxu0 %v11025_v49  ;;  %v8129_v10 = vadd.f32 %v8128_v27, %v8110_v4  ;;  %v11361_v49 = vor.u32 %v15709_v15, %v11360_v11  ;;  %v10977_v52 = vor.u32 %v15613_v3, %v10976_v55  ;;  %v15655_v4 = vld [vmem:[#allocation5 + $0x19c] sm:$0xf0]  ;;  %v15937_v11 = vld [vmem:[#allocation5 + $0xa6c] sm:$0xf0]  ;;  %v18628_v55 = vld [vmem:[#allocation36_spill] sm:$0xff] }
 0x1e5   : > { %8482 = vmatpush.bf16.msra.mxu1 %v11217_v34  ;;  %v8147_v43 = vpop.f32.mrf.mxu3  ;;  %v15607_v34 = vld [vmem:[#allocation5 + $0x1c] sm:$0xf0]  ;;  %v11888_v3 = vld [vmem:[#allocation5 + $0x758] sm:$0xf]  ;;  %v11145_v33 = vor.u32 %v15655_v4, %v11144_v47 }
 0x1e6   : > { %8501 = vmatpush.bf16.msra.mxu2 %v11409_v26  ;;  %v18627_v15 = vld [vmem:[#allocation35_spill] sm:$0xff]  ;;  %v10953_v27 = vor.u32 %v15607_v34, %v10952_v38  ;;  %v12056_v38 = vld [vmem:[#allocation5 + $0x8a8] sm:$0xf] }
 0x1e7   : > { %8520 = vmatpush.bf16.msra.mxu3 %v11601_v21  ;;  %v8093_v61 = vpop.f32.mrf.mxu0  ;;  %v8112_v16 = vpop.f32.mrf.mxu1  ;;  %v17589_v21 = vadd.f32 %v8147_v43, %v8129_v10  ;;  %v15889_v43 = vld [vmem:[#allocation5 + $0x8ec] sm:$0xf0]  ;;  %v15979_v47 = vld [vmem:[#allocation5 + $0xbbc] sm:$0xf0] }
 0x1e8   : > { %v8094_v26 = vadd.f32 %v8093_v61, %v17576_v22  ;;  %8464 = vmatpush.bf16.msra.mxu0 %v11001_v20  ;;  %v18626_v22 = vld [vmem:[#allocation34_spill] sm:$0xff] }
 0x1e9   : > { %8483 = vmatpush.bf16.msra.mxu1 %v11193_v41  ;;  %8396 = vmatmul.bf16.gmra.mxu0 %v17455_v59  ;;  %v12272_v20 = vld [vmem:[#allocation5 + $0xa58] sm:$0xf]  ;;  %v15841_v41 = vld [vmem:[#allocation5 + $0x76c] sm:$0xf0] }
 0x1ea   : > { %8502 = vmatpush.bf16.msra.mxu2 %v11385_v32  ;;  %v8113_v35 = vadd.f32 %v8112_v16, %v8094_v26  ;;  %8415 = vmatmul.bf16.gmra.mxu1 %v18626_v22  ;;  %v15751_v32 = vld [vmem:[#allocation5 + $0x49c] sm:$0xf0]  ;;  %v12273_v26 = vor.u32 %v15937_v11, %v12272_v20  ;;  %v12248_v22 = vld [vmem:[#allocation5 + $0xa28] sm:$0xf] }
 0x1eb   : > { %8521 = vmatpush.bf16.msra.mxu3 %v11577_v31  ;;  %8434 = vmatmul.bf16.gmra.mxu2 %v18627_v15  ;;  %v12080_v31 = vld [vmem:[#allocation5 + $0x8d8] sm:$0xf]  ;;  %v11529_v10 = vor.u32 %v15751_v32, %v11528_v42  ;;  %v8131_v61 = vpop.f32.mrf.mxu2  ;;  %v11889_v15 = vor.u32 %v15841_v41, %v11888_v3  ;;  %v11865_v32 = vor.u32 %v15835_v19, %v11864_v25  ;;  %v15829_v41 = vld [vmem:[#allocation5 + $0x70c] sm:$0xf0]  ;;  %v15823_v25 = vld [vmem:[#allocation5 + $0x6dc] sm:$0xf0] }
 0x1ec   : > { %8453 = vmatmul.bf16.gmra.mxu3 %v18628_v55  ;;  %8465 = vmatpush.bf16.msra.mxu0 %v10977_v52  ;;  %v15931_v55 = vld [vmem:[#allocation5 + $0xa3c] sm:$0xf0]  ;;  %v8132_v59 = vadd.f32 %v8131_v61, %v8113_v35  ;;  %v12465_v52 = vor.u32 %v15985_v36, %v12464_v7  ;;  %v12224_v3 = vld [vmem:[#allocation5 + $0x9f8] sm:$0xf]  ;;  %v12008_v19 = vld [vmem:[#allocation5 + $0x848] sm:$0xf] }
 0x1ed   : > { %8484 = vmatpush.bf16.msra.mxu1 %v11169_v62  ;;  %v8150_v16 = vpop.f32.mrf.mxu3  ;;  %v15883_v62 = vld [vmem:[#allocation5 + $0x8bc] sm:$0xf0]  ;;  %v12249_v35 = vor.u32 %v15931_v55, %v12248_v22 }
 0x1ee   : > { %8503 = vmatpush.bf16.msra.mxu2 %v11361_v49  ;;  %v12081_v49 = vor.u32 %v15889_v43, %v12080_v31  ;;  %v17596_v4 = vadd.f32 %v8150_v16, %v8132_v59  ;;  %v12057_v20 = vor.u32 %v15883_v62, %v12056_v38  ;;  %v12032_v31 = vld [vmem:[#allocation5 + $0x878] sm:$0xf]  ;;  %v15877_v59 = vld [vmem:[#allocation5 + $0x88c] sm:$0xf0]  ;;  %v15919_v61 = vld [vmem:[#allocation5 + $0x9dc] sm:$0xf0] }
 0x1ef   : > { %8522 = vmatpush.bf16.msra.mxu3 %v11553_v12  ;;  %v8095_v58 = vpop.f32.mrf.mxu0  ;;  %v8114_v63 = vpop.f32.mrf.mxu1  ;;  %v12440_v12 = vld [vmem:[#allocation5 + $0xba8] sm:$0xf]  ;;  %v12416_v43 = vld [vmem:[#allocation5 + $0xb78] sm:$0xf] }
 0x1f0   : > { %v8096_v34 = vadd.f32 %v8095_v58, %v17579_v37  ;;  %8466 = vmatpush.bf16.msra.mxu0 %v10953_v27  ;;  %v12441_v11 = vor.u32 %v15979_v47, %v12440_v12  ;;  %v15925_v37 = vld [vmem:[#allocation5 + $0xa0c] sm:$0xf0]  ;;  %v11840_v58 = vld [vmem:[#allocation5 + $0x6f8] sm:$0xf]  ;;  %v12392_v62 = vld [vmem:[#allocation5 + $0xb48] sm:$0xf] }
 0x1f1   : > { %8485 = vmatpush.bf16.msra.mxu1 %v11145_v33  ;;  %v12225_v36 = vor.u32 %v15925_v37, %v12224_v3  ;;  %v11841_v33 = vor.u32 %v15829_v41, %v11840_v58  ;;  %v15967_v12 = vld [vmem:[#allocation5 + $0xb5c] sm:$0xf0]  ;;  %v15817_v3 = vld [vmem:[#allocation5 + $0x6ac] sm:$0xf0]  ;;  %v11984_v37 = vld [vmem:[#allocation5 + $0x818] sm:$0xf] }
 0x1f2   : > { %8504 = vmatpush.bf16.msra.mxu2 %v11337_v30  ;;  %v8115_v42 = vadd.f32 %v8114_v63, %v8096_v34  ;;  %v15973_v63 = vld [vmem:[#allocation5 + $0xb8c] sm:$0xf0]  ;;  %v15871_v34 = vld [vmem:[#allocation5 + $0x85c] sm:$0xf0] }
 0x1f3   : > { %8523 = vmatpush.bf16.msra.mxu3 %v11529_v10  ;;  %v8133_v30 = vpop.f32.mrf.mxu2  ;;  %v12200_v10 = vld [vmem:[#allocation5 + $0x9c8] sm:$0xf] }
 0x1f4   : > { %8535 = vmatpush.bf16.msrb.mxu0 %v11889_v15  ;;  %v8134_v7 = vadd.f32 %v8133_v30, %v8115_v42  ;;  %v12176_v42 = vld [vmem:[#allocation5 + $0x998] sm:$0xf] }
 0x1f5   : > { %8554 = vmatpush.bf16.msrb.mxu1 %v12081_v49  ;;  %v8152_v27 = vpop.f32.mrf.mxu3  ;;  %v12417_v49 = vor.u32 %v15973_v63, %v12416_v43  ;;  %v12368_v30 = vld [vmem:[#allocation5 + $0xb18] sm:$0xf] }
 0x1f6   : > { %8573 = vmatpush.bf16.msrb.mxu2 %v12273_v26  ;;  %v17599_v16 = vadd.f32 %v8152_v27, %v8134_v7  ;;  %v12033_v26 = vor.u32 %v15877_v59, %v12032_v31  ;;  %v15865_v31 = vld [vmem:[#allocation5 + $0x82c] sm:$0xf0] }
 0x1f7   : > { %8592 = vmatpush.bf16.msrb.mxu3 %v12465_v52  ;;  %v8164_v15 = vpop.f32.mrf.mxu0  ;;  %v8183_v22 = vpop.f32.mrf.mxu1  ;;  %v11816_v52 = vld [vmem:[#allocation5 + $0x6c8] sm:$0xf]  ;;  %v15961_v27 = vld [vmem:[#allocation5 + $0xb2c] sm:$0xf0] }
 0x1f8   : > { %8536 = vmatpush.bf16.msrb.mxu0 %v11865_v32  ;;  %v8165_v55 = vadd.f32 %v8164_v15, %v17586_v2  ;;  %v12201_v2 = vor.u32 %v15919_v61, %v12200_v10  ;;  %v11817_v47 = vor.u32 %v15823_v25, %v11816_v52  ;;  %v12009_v32 = vor.u32 %v15871_v34, %v12008_v19  ;;  %v11960_v52 = vld [vmem:[#allocation5 + $0x7e8] sm:$0xf]  ;;  %v15859_v19 = vld [vmem:[#allocation5 + $0x7fc] sm:$0xf0] }
 0x1f9   : > { %8555 = vmatpush.bf16.msrb.mxu1 %v12057_v20  ;;  %8467 = vmatmul.bf16.vlgmr.msra.gmra.mxu0 %v17214_v48  ;;  %v12393_v20 = vor.u32 %v15967_v12, %v12392_v62  ;;  %v11985_v10 = vor.u32 %v15865_v31, %v11984_v37  ;;  %v12369_v61 = vor.u32 %v15961_v27, %v12368_v30  ;;  %v15955_v34 = vld [vmem:[#allocation5 + $0xafc] sm:$0xf0]  ;;  %v12128_v12 = vld [vmem:[#allocation5 + $0x938] sm:$0xf]  ;;  %v15853_v37 = vld [vmem:[#allocation5 + $0x7cc] sm:$0xf0] }
 0x1fa   : > { %8574 = vmatpush.bf16.msrb.mxu2 %v12249_v35  ;;  %v8184_v38 = vadd.f32 %v8183_v22, %v8165_v55  ;;  %8486 = vmatmul.bf16.vlgmr.msra.gmra.mxu1 %v17216_v53  ;;  %v15913_v35 = vld [vmem:[#allocation5 + $0x9ac] sm:$0xf0]  ;;  %v12152_v55 = vld [vmem:[#allocation5 + $0x968] sm:$0xf] }
 0x1fb   : > { %8593 = vmatpush.bf16.msrb.mxu3 %v12441_v11  ;;  %8505 = vmatmul.bf16.vlgmr.msra.gmra.mxu2 %v17218_v54  ;;  %v11792_v11 = vld [vmem:[#allocation5 + $0x698] sm:$0xf]  ;;  %v8202_v58 = vpop.f32.mrf.mxu2  ;;  %v12177_v15 = vor.u32 %v15913_v35, %v12176_v42 }
 0x1fc   : > { %8524 = vmatmul.bf16.vlgmr.msra.gmra.mxu3 %v17220_v57  ;;  %8537 = vmatpush.bf16.msrb.mxu0 %v11841_v33  ;;  %v8203_v59 = vadd.f32 %v8202_v58, %v8184_v38  ;;  %v11793_v22 = vor.u32 %v15817_v3, %v11792_v11  ;;  %v12344_v38 = vld [vmem:[#allocation5 + $0xae8] sm:$0xf]  ;;  %v11744_v35 = vld [vmem:[#allocation5 + $0x638] sm:$0xf] }
 0x1fd   : > { %8556 = vmatpush.bf16.msrb.mxu1 %v12033_v26  ;;  %v8221_v41 = vpop.f32.mrf.mxu3  ;;  %v11768_v26 = vld [vmem:[#allocation5 + $0x668] sm:$0xf]  ;;  %v12345_v42 = vor.u32 %v15955_v34, %v12344_v38  ;;  %v12320_v58 = vld [vmem:[#allocation5 + $0xab8] sm:$0xf]  ;;  %v16129_v38 = vld [vmem:[#allocation5 + $0x106c] sm:$0xf0] }
 0x1fe   : > { %8575 = vmatpush.bf16.msrb.mxu2 %v12225_v36  ;;  %v15907_v36 = vld [vmem:[#allocation5 + $0x97c] sm:$0xf0]  ;;  %v17606_v33 = vadd.f32 %v8221_v41, %v8203_v59  ;;  %v15949_v41 = vld [vmem:[#allocation5 + $0xacc] sm:$0xf0]  ;;  %v12104_v59 = vld [vmem:[#allocation5 + $0x908] sm:$0xf] }
 0x1ff   : > { %8594 = vmatpush.bf16.msrb.mxu3 %v12417_v49  ;;  %v8166_v43 = vpop.f32.mrf.mxu0  ;;  %v8185_v63 = vpop.f32.mrf.mxu1  ;;  %v15811_v49 = vld [vmem:[#allocation5 + $0x67c] sm:$0xf0]  ;;  %v12656_v34 = vld [vmem:[#allocation5 + $0xd58] sm:$0xf] }
 0x200   : > { %v8167_v7 = vadd.f32 %v8166_v43, %v17589_v21  ;;  %8538 = vmatpush.bf16.msrb.mxu0 %v11817_v47  ;;  %v12153_v21 = vor.u32 %v15907_v36, %v12152_v55  ;;  %v11769_v62 = vor.u32 %v15811_v49, %v11768_v26  ;;  %v11961_v47 = vor.u32 %v15859_v19, %v11960_v52  ;;  %v15799_v55 = vld [vmem:[#allocation5 + $0x61c] sm:$0xf0]  ;;  %v11912_v26 = vld [vmem:[#allocation5 + $0x788] sm:$0xf]  ;;  %v13040_v19 = vld [vmem:[#allocation5 + $0x1058] sm:$0xf] }
 0x201   : > { %8557 = vmatpush.bf16.msrb.mxu1 %v12009_v32  ;;  %v15805_v32 = vld [vmem:[#allocation5 + $0x64c] sm:$0xf0]  ;;  %v15847_v49 = vld [vmem:[#allocation5 + $0x79c] sm:$0xf0]  ;;  %v12296_v52 = vld [vmem:[#allocation5 + $0xa88] sm:$0xf] }
 0x202   : > { %8576 = vmatpush.bf16.msrb.mxu2 %v12201_v2  ;;  %v8186_v25 = vadd.f32 %v8185_v63, %v8167_v7  ;;  %v15901_v2 = vld [vmem:[#allocation5 + $0x94c] sm:$0xf0]  ;;  %v11745_v7 = vor.u32 %v15805_v32, %v11744_v35  ;;  %v11913_v32 = vor.u32 %v15847_v49, %v11912_v26  ;;  %v16171_v26 = vld [vmem:[#allocation5 + $0x11bc] sm:$0xf0] }
 0x203   : > { %8595 = vmatpush.bf16.msrb.mxu3 %v12393_v20  ;;  %v11936_v20 = vld [vmem:[#allocation5 + $0x7b8] sm:$0xf]  ;;  %v8204_v11 = vpop.f32.mrf.mxu2  ;;  %v12129_v63 = vor.u32 %v15901_v2, %v12128_v12  ;;  %v16177_v35 = vld [vmem:[#allocation5 + $0x11ec] sm:$0xf0] }
 0x204   : > { %8539 = vmatpush.bf16.msrb.mxu0 %v11793_v22  ;;  %v8205_v31 = vadd.f32 %v8204_v11, %v8186_v25  ;;  %v11720_v22 = vld [vmem:[#allocation5 + $0x608] sm:$0xf] }
 0x205   : > { %8558 = vmatpush.bf16.msrb.mxu1 %v11985_v10  ;;  %v8223_v3 = vpop.f32.mrf.mxu3  ;;  %v11937_v10 = vor.u32 %v15853_v37, %v11936_v20  ;;  %v11721_v2 = vor.u32 %v15799_v55, %v11720_v22  ;;  %v13041_v37 = vor.u32 %v16129_v38, %v13040_v19  ;;  %v12824_v22 = vld [vmem:[#allocation5 + $0xea8] sm:$0xf] }
 0x206   : > { %8577 = vmatpush.bf16.msrb.mxu2 %v12177_v15  ;;  %v15895_v15 = vld [vmem:[#allocation5 + $0x91c] sm:$0xf0]  ;;  %v17609_v36 = vadd.f32 %v8223_v3, %v8205_v31 }
 0x207   : > { %8596 = vmatpush.bf16.msrb.mxu3 %v12369_v61  ;;  %v8169_v30 = vpop.f32.mrf.mxu0  ;;  %v8188_v27 = vpop.f32.mrf.mxu1  ;;  %v12321_v61 = vor.u32 %v15949_v41, %v12320_v58  ;;  %v12105_v12 = vor.u32 %v15895_v15, %v12104_v59  ;;  %v13016_v41 = vld [vmem:[#allocation5 + $0x1028] sm:$0xf]  ;;  %v16123_v31 = vld [vmem:[#allocation5 + $0x103c] sm:$0xf0] }
 0x208   : > { %v8170_v43 = vadd.f32 %v8169_v30, %v17596_v4  ;;  %8540 = vmatpush.bf16.msrb.mxu0 %v11769_v62  ;;  %v15943_v4 = vld [vmem:[#allocation5 + $0xa9c] sm:$0xf0]  ;;  %v12848_v62 = vld [vmem:[#allocation5 + $0xed8] sm:$0xf]  ;;  %v12632_v59 = vld [vmem:[#allocation5 + $0xd28] sm:$0xf] }
 0x209   : > { %8559 = vmatpush.bf16.msrb.mxu1 %v11961_v47  ;;  %8472 = vmatmul.bf16.gmra.mxu0 %v17234_v44  ;;  %v16081_v47 = vld [vmem:[#allocation5 + $0xeec] sm:$0xf0]  ;;  %v12297_v20 = vor.u32 %v15943_v4, %v12296_v52  ;;  %v16027_v15 = vld [vmem:[#allocation5 + $0xd3c] sm:$0xf0] }
 0x20a   : > { %8578 = vmatpush.bf16.msrb.mxu2 %v12153_v21  ;;  %v8189_v25 = vadd.f32 %v8188_v27, %v8170_v43  ;;  %8491 = vmatmul.bf16.gmra.mxu1 %v17236_v50  ;;  %v16033_v21 = vld [vmem:[#allocation5 + $0xd6c] sm:$0xf0]  ;;  %v12633_v4 = vor.u32 %v16027_v15, %v12632_v59  ;;  %v16015_v59 = vld [vmem:[#allocation5 + $0xcdc] sm:$0xf0]  ;;  %v12776_v15 = vld [vmem:[#allocation5 + $0xe48] sm:$0xf] }
 0x20b   : > { %8597 = vmatpush.bf16.msrb.mxu3 %v12345_v42  ;;  %8510 = vmatmul.bf16.gmra.mxu2 %v17238_v51  ;;  %v13232_v42 = vld [vmem:[#allocation5 + $0x11d8] sm:$0xf]  ;;  %v8207_v11 = vpop.f32.mrf.mxu2  ;;  %v12657_v58 = vor.u32 %v16033_v21, %v12656_v34 }
 0x20c   : > { %8529 = vmatmul.bf16.gmra.mxu3 %v17240_v56  ;;  %8541 = vmatpush.bf16.msrb.mxu0 %v11745_v7  ;;  %v8208_v30 = vadd.f32 %v8207_v11, %v8189_v25  ;;  %v13233_v7 = vor.u32 %v16177_v35, %v13232_v42  ;;  %v13017_v25 = vor.u32 %v16123_v31, %v13016_v41  ;;  %v12992_v34 = vld [vmem:[#allocation5 + $0xff8] sm:$0xf]  ;;  %v16069_v42 = vld [vmem:[#allocation5 + $0xe8c] sm:$0xf0]  ;;  %v12968_v31 = vld [vmem:[#allocation5 + $0xfc8] sm:$0xf] }
 0x20d   : > { %8560 = vmatpush.bf16.msrb.mxu1 %v11937_v10  ;;  %v8226_v3 = vpop.f32.mrf.mxu3  ;;  %v16075_v10 = vld [vmem:[#allocation5 + $0xebc] sm:$0xf0]  ;;  %v12608_v21 = vld [vmem:[#allocation5 + $0xcf8] sm:$0xf] }
 0x20e   : > { %8579 = vmatpush.bf16.msrb.mxu2 %v12129_v63  ;;  %v12849_v63 = vor.u32 %v16081_v47, %v12848_v62  ;;  %v17616_v49 = vadd.f32 %v8226_v3, %v8208_v30  ;;  %v12825_v19 = vor.u32 %v16075_v10, %v12824_v22  ;;  %v16021_v62 = vld [vmem:[#allocation5 + $0xd0c] sm:$0xf0]  ;;  %v13184_v35 = vld [vmem:[#allocation5 + $0x1178] sm:$0xf]  ;;  %v16111_v30 = vld [vmem:[#allocation5 + $0xfdc] sm:$0xf0] }
 0x20f   : > { %8598 = vmatpush.bf16.msrb.mxu3 %v12321_v61  ;;  %v8171_v27 = vpop.f32.mrf.mxu0  ;;  %v8190_v43 = vpop.f32.mrf.mxu1  ;;  %v13208_v61 = vld [vmem:[#allocation5 + $0x11a8] sm:$0xf]  ;;  %v12609_v41 = vor.u32 %v16021_v62, %v12608_v21 }
 0x210   : > { %v8172_v55 = vadd.f32 %v8171_v27, %v17599_v16  ;;  %8542 = vmatpush.bf16.msrb.mxu0 %v11721_v2  ;;  %v13209_v38 = vor.u32 %v16171_v26, %v13208_v61  ;;  %v16117_v16 = vld [vmem:[#allocation5 + $0x100c] sm:$0xf0]  ;;  %v13160_v10 = vld [vmem:[#allocation5 + $0x1148] sm:$0xf]  ;;  %v16159_v61 = vld [vmem:[#allocation5 + $0x115c] sm:$0xf0] }
 0x211   : > { %8561 = vmatpush.bf16.msrb.mxu1 %v11913_v32  ;;  %v16165_v32 = vld [vmem:[#allocation5 + $0x118c] sm:$0xf0] }
 0x212   : > { %8580 = vmatpush.bf16.msrb.mxu2 %v12105_v12  ;;  %v8191_v52 = vadd.f32 %v8190_v43, %v8172_v55  ;;  %v12800_v12 = vld [vmem:[#allocation5 + $0xe78] sm:$0xf]  ;;  %v16063_v55 = vld [vmem:[#allocation5 + $0xe5c] sm:$0xf0] }
 0x213   : > { %8599 = vmatpush.bf16.msrb.mxu3 %v12297_v20  ;;  %v8209_v2 = vpop.f32.mrf.mxu2  ;;  %v12801_v43 = vor.u32 %v16069_v42, %v12800_v12  ;;  %v16057_v12 = vld [vmem:[#allocation5 + $0xe2c] sm:$0xf0] }
 0x214   : > { %8611 = vmatpush.bf16.msra.mxu0 %v12657_v58  ;;  %v8210_v20 = vadd.f32 %v8209_v2, %v8191_v52  ;;  %v12993_v58 = vor.u32 %v16117_v16, %v12992_v34  ;;  %v12944_v52 = vld [vmem:[#allocation5 + $0xf98] sm:$0xf]  ;;  %v16009_v34 = vld [vmem:[#allocation5 + $0xcac] sm:$0xf0] }
 0x215   : > { %8630 = vmatpush.bf16.msra.mxu1 %v12849_v63  ;;  %v8228_v47 = vpop.f32.mrf.mxu3  ;;  %v13185_v63 = vor.u32 %v16165_v32, %v13184_v35  ;;  %v12752_v16 = vld [vmem:[#allocation5 + $0xe18] sm:$0xf] }
 0x216   : > { %8649 = vmatpush.bf16.msra.mxu2 %v13041_v37  ;;  %v17619_v27 = vadd.f32 %v8228_v47, %v8210_v20  ;;  %v13136_v2 = vld [vmem:[#allocation5 + $0x1118] sm:$0xf]  ;;  %v16153_v47 = vld [vmem:[#allocation5 + $0x112c] sm:$0xf0] }
 0x217   : > { %8668 = vmatpush.bf16.msra.mxu3 %v13233_v7  ;;  %v8240_v11 = vpop.f32.mrf.mxu0  ;;  %v8259_v3 = vpop.f32.mrf.mxu1  ;;  %v12584_v7 = vld [vmem:[#allocation5 + $0xcc8] sm:$0xf] }
 0x218   : > { %8612 = vmatpush.bf16.msra.mxu0 %v12633_v4  ;;  %v8241_v37 = vadd.f32 %v8240_v11, %v17606_v33  ;;  %v12969_v33 = vor.u32 %v16111_v30, %v12968_v31  ;;  %v12585_v26 = vor.u32 %v16015_v59, %v12584_v7  ;;  %v12777_v4 = vor.u32 %v16063_v55, %v12776_v15  ;;  %v12728_v7 = vld [vmem:[#allocation5 + $0xde8] sm:$0xf]  ;;  %v16051_v15 = vld [vmem:[#allocation5 + $0xdfc] sm:$0xf0] }
 0x219   : > { %8631 = vmatpush.bf16.msra.mxu1 %v12825_v19  ;;  %8543 = vmatmul.bf16.vlgmr.msrb.gmra.mxu0 %v17254_v0  ;;  %v13161_v19 = vor.u32 %v16159_v61, %v13160_v10  ;;  %v12753_v31 = vor.u32 %v16057_v12, %v12752_v16  ;;  %v13137_v30 = vor.u32 %v16153_v47, %v13136_v2  ;;  %v16147_v55 = vld [vmem:[#allocation5 + $0x10fc] sm:$0xf0]  ;;  %v12896_v61 = vld [vmem:[#allocation5 + $0xf38] sm:$0xf]  ;;  %v16045_v16 = vld [vmem:[#allocation5 + $0xdcc] sm:$0xf0] }
 0x21a   : > { %8650 = vmatpush.bf16.msra.mxu2 %v13017_v25  ;;  %v8260_v22 = vadd.f32 %v8259_v3, %v8241_v37  ;;  %8562 = vmatmul.bf16.vlgmr.msrb.gmra.mxu1 %v17256_v1  ;;  %v16105_v25 = vld [vmem:[#allocation5 + $0xfac] sm:$0xf0]  ;;  %v12920_v37 = vld [vmem:[#allocation5 + $0xf68] sm:$0xf] }
 0x21b   : > { %8669 = vmatpush.bf16.msra.mxu3 %v13209_v38  ;;  %8581 = vmatmul.bf16.vlgmr.msrb.gmra.mxu2 %v17258_v5  ;;  %v12560_v38 = vld [vmem:[#allocation5 + $0xc98] sm:$0xf]  ;;  %v12945_v11 = vor.u32 %v16105_v25, %v12944_v52 }
 0x21c   : > { %8600 = vmatmul.bf16.vlgmr.msrb.gmra.mxu3 %v17260_v6  ;;  %8613 = vmatpush.bf16.msra.mxu0 %v12609_v41  ;;  %v12561_v3 = vor.u32 %v16009_v34, %v12560_v38  ;;  %v12512_v25 = vld [vmem:[#allocation5 + $0xc38] sm:$0xf] }
 0x21d   : > { %8632 = vmatpush.bf16.msra.mxu1 %v12801_v43  ;;  %v8297_v62 = vpop.f32.mrf.mxu3  ;;  %v12536_v43 = vld [vmem:[#allocation5 + $0xc68] sm:$0xf] }
 0x21e   : > { %8651 = vmatpush.bf16.msra.mxu2 %v12993_v58  ;;  %v8278_v21 = vpop.f32.mrf.mxu2  ;;  %v16099_v58 = vld [vmem:[#allocation5 + $0xf7c] sm:$0xf0] }
 0x21f   : > { %8670 = vmatpush.bf16.msra.mxu3 %v13185_v63  ;;  %v8279_v42 = vadd.f32 %v8278_v21, %v8260_v22  ;;  %v8242_v35 = vpop.f32.mrf.mxu0  ;;  %v8261_v32 = vpop.f32.mrf.mxu1  ;;  %v16003_v63 = vld [vmem:[#allocation5 + $0xc7c] sm:$0xf0]  ;;  %v13112_v22 = vld [vmem:[#allocation5 + $0x10e8] sm:$0xf]  ;;  %v13088_v21 = vld [vmem:[#allocation5 + $0x10b8] sm:$0xf] }
 0x220   : > { %v8243_v20 = vadd.f32 %v8242_v35, %v17609_v36  ;;  %8614 = vmatpush.bf16.msra.mxu0 %v12585_v26  ;;  %v12921_v36 = vor.u32 %v16099_v58, %v12920_v37  ;;  %v12537_v10 = vor.u32 %v16003_v63, %v12536_v43  ;;  %v12729_v26 = vor.u32 %v16051_v15, %v12728_v7  ;;  %v15991_v37 = vld [vmem:[#allocation5 + $0xc1c] sm:$0xf0]  ;;  %v12680_v43 = vld [vmem:[#allocation5 + $0xd88] sm:$0xf]  ;;  %v13808_v15 = vld [vmem:[#allocation5 + $0x1658] sm:$0xf] }
 0x221   : > { %v17626_v41 = vadd.f32 %v8297_v62, %v8279_v42  ;;  %8633 = vmatpush.bf16.msra.mxu1 %v12777_v4  ;;  %v13113_v52 = vor.u32 %v16147_v55, %v13112_v22  ;;  %v15997_v4 = vld [vmem:[#allocation5 + $0xc4c] sm:$0xf0]  ;;  %v12872_v42 = vld [vmem:[#allocation5 + $0xf08] sm:$0xf]  ;;  %v16039_v63 = vld [vmem:[#allocation5 + $0xd9c] sm:$0xf0] }
 0x222   : > { %8652 = vmatpush.bf16.msra.mxu2 %v12969_v33  ;;  %v8262_v59 = vadd.f32 %v8261_v32, %v8243_v20  ;;  %v16093_v33 = vld [vmem:[#allocation5 + $0xf4c] sm:$0xf0]  ;;  %v12513_v20 = vor.u32 %v15997_v4, %v12512_v25  ;;  %v13064_v7 = vld [vmem:[#allocation5 + $0x1088] sm:$0xf]  ;;  %v13424_v55 = vld [vmem:[#allocation5 + $0x1358] sm:$0xf]  ;;  %v12681_v4 = vor.u32 %v16039_v63, %v12680_v43 }
 0x223   : > { %8671 = vmatpush.bf16.msra.mxu3 %v13161_v19  ;;  %v12704_v19 = vld [vmem:[#allocation5 + $0xdb8] sm:$0xf]  ;;  %v16141_v62 = vld [vmem:[#allocation5 + $0x10cc] sm:$0xf0]  ;;  %v12897_v32 = vor.u32 %v16093_v33, %v12896_v61  ;;  %v16363_v43 = vld [vmem:[#allocation5 + $0x17bc] sm:$0xf0] }
 0x224   : > { %8615 = vmatpush.bf16.msra.mxu0 %v12561_v3  ;;  %v12488_v3 = vld [vmem:[#allocation5 + $0xc08] sm:$0xf]  ;;  %v16321_v22 = vld [vmem:[#allocation5 + $0x166c] sm:$0xf0] }
 0x225   : > { %8634 = vmatpush.bf16.msra.mxu1 %v12753_v31  ;;  %v8299_v34 = vpop.f32.mrf.mxu3  ;;  %v12705_v31 = vor.u32 %v16045_v16, %v12704_v19  ;;  %v12489_v33 = vor.u32 %v15991_v37, %v12488_v3  ;;  %v16369_v25 = vld [vmem:[#allocation5 + $0x17ec] sm:$0xf0]  ;;  %v13809_v16 = vor.u32 %v16321_v22, %v13808_v15  ;;  %v13592_v3 = vld [vmem:[#allocation5 + $0x14a8] sm:$0xf] }
 0x226   : > { %8653 = vmatpush.bf16.msra.mxu2 %v12945_v11  ;;  %v8280_v38 = vpop.f32.mrf.mxu2  ;;  %v16087_v11 = vld [vmem:[#allocation5 + $0xf1c] sm:$0xf0] }
 0x227   : > { %8672 = vmatpush.bf16.msra.mxu3 %v13137_v30  ;;  %v8281_v12 = vadd.f32 %v8280_v38, %v8262_v59  ;;  %v8245_v2 = vpop.f32.mrf.mxu0  ;;  %v8264_v47 = vpop.f32.mrf.mxu1  ;;  %v13089_v30 = vor.u32 %v16141_v62, %v13088_v21  ;;  %v12873_v61 = vor.u32 %v16087_v11, %v12872_v42  ;;  %v13784_v62 = vld [vmem:[#allocation5 + $0x1628] sm:$0xf]  ;;  %v16219_v11 = vld [vmem:[#allocation5 + $0x133c] sm:$0xf0] }
 0x228   : > { %v8246_v35 = vadd.f32 %v8245_v2, %v17616_v49  ;;  %8616 = vmatpush.bf16.msra.mxu0 %v12537_v10  ;;  %v16135_v49 = vld [vmem:[#allocation5 + $0x109c] sm:$0xf0]  ;;  %v13616_v10 = vld [vmem:[#allocation5 + $0x14d8] sm:$0xf]  ;;  %v13400_v42 = vld [vmem:[#allocation5 + $0x1328] sm:$0xf] }
 0x229   : > { %v17629_v58 = vadd.f32 %v8299_v34, %v8281_v12  ;;  %8635 = vmatpush.bf16.msra.mxu1 %v12729_v26  ;;  %8548 = vmatmul.bf16.gmra.mxu0 %v17274_v8  ;;  %v16273_v26 = vld [vmem:[#allocation5 + $0x14ec] sm:$0xf0]  ;;  %v13065_v19 = vor.u32 %v16135_v49, %v13064_v7  ;;  %v16315_v12 = vld [vmem:[#allocation5 + $0x163c] sm:$0xf0]  ;;  %v13401_v49 = vor.u32 %v16219_v11, %v13400_v42  ;;  %v13544_v11 = vld [vmem:[#allocation5 + $0x1448] sm:$0xf] }
 0x22a   : > { %8654 = vmatpush.bf16.msra.mxu2 %v12921_v36  ;;  %v8265_v59 = vadd.f32 %v8264_v47, %v8246_v35  ;;  %8567 = vmatmul.bf16.gmra.mxu1 %v17276_v9  ;;  %v16225_v36 = vld [vmem:[#allocation5 + $0x136c] sm:$0xf0]  ;;  %v16207_v42 = vld [vmem:[#allocation5 + $0x12dc] sm:$0xf0] }
 0x22b   : > { %8673 = vmatpush.bf16.msra.mxu3 %v13113_v52  ;;  %8586 = vmatmul.bf16.gmra.mxu2 %v17278_v13  ;;  %v14000_v52 = vld [vmem:[#allocation5 + $0x17d8] sm:$0xf]  ;;  %v13425_v21 = vor.u32 %v16225_v36, %v13424_v55 }
 0x22c   : > { %8605 = vmatmul.bf16.gmra.mxu3 %v17280_v14  ;;  %8617 = vmatpush.bf16.msra.mxu0 %v12513_v20  ;;  %v14001_v20 = vor.u32 %v16369_v25, %v14000_v52  ;;  %v13760_v55 = vld [vmem:[#allocation5 + $0x15f8] sm:$0xf]  ;;  %v16261_v52 = vld [vmem:[#allocation5 + $0x148c] sm:$0xf0] }
 0x22d   : > { %8636 = vmatpush.bf16.msra.mxu1 %v12705_v31  ;;  %v16267_v31 = vld [vmem:[#allocation5 + $0x14bc] sm:$0xf0]  ;;  %v13376_v36 = vld [vmem:[#allocation5 + $0x12f8] sm:$0xf] }
 0x22e   : > { %8655 = vmatpush.bf16.msra.mxu2 %v12897_v32  ;;  %v8283_v38 = vpop.f32.mrf.mxu2  ;;  %v13617_v32 = vor.u32 %v16273_v26, %v13616_v10  ;;  %v13593_v15 = vor.u32 %v16267_v31, %v13592_v3  ;;  %v16213_v10 = vld [vmem:[#allocation5 + $0x130c] sm:$0xf0]  ;;  %v13952_v25 = vld [vmem:[#allocation5 + $0x1778] sm:$0xf]  ;;  %v13928_v31 = vld [vmem:[#allocation5 + $0x1748] sm:$0xf] }
 0x22f   : > { %8674 = vmatpush.bf16.msra.mxu3 %v13089_v30  ;;  %v8302_v34 = vpop.f32.mrf.mxu3  ;;  %v8284_v2 = vadd.f32 %v8283_v38, %v8265_v59  ;;  %v8247_v47 = vpop.f32.mrf.mxu0  ;;  %v13976_v30 = vld [vmem:[#allocation5 + $0x17a8] sm:$0xf]  ;;  %v13785_v59 = vor.u32 %v16315_v12, %v13784_v62  ;;  %v13377_v62 = vor.u32 %v16213_v10, %v13376_v36 }
 0x230   : > { %v8266_v35 = vpop.f32.mrf.mxu1  ;;  %v8248_v37 = vadd.f32 %v8247_v47, %v17619_v27  ;;  %8618 = vmatpush.bf16.msra.mxu0 %v12489_v33  ;;  %v13977_v22 = vor.u32 %v16363_v43, %v13976_v30  ;;  %v16309_v27 = vld [vmem:[#allocation5 + $0x160c] sm:$0xf0]  ;;  %v13736_v12 = vld [vmem:[#allocation5 + $0x15c8] sm:$0xf]  ;;  %v16351_v30 = vld [vmem:[#allocation5 + $0x175c] sm:$0xf0] }
 0x231   : > { %v17636_v63 = vadd.f32 %v8302_v34, %v8284_v2  ;;  %8637 = vmatpush.bf16.msra.mxu1 %v12681_v4  ;;  %v16357_v4 = vld [vmem:[#allocation5 + $0x178c] sm:$0xf0]  ;;  %v16303_v2 = vld [vmem:[#allocation5 + $0x15dc] sm:$0xf0] }
 0x232   : > { %8656 = vmatpush.bf16.msra.mxu2 %v12873_v61  ;;  %v8267_v7 = vadd.f32 %v8266_v35, %v8248_v37  ;;  %v13568_v61 = vld [vmem:[#allocation5 + $0x1478] sm:$0xf]  ;;  %v16255_v37 = vld [vmem:[#allocation5 + $0x145c] sm:$0xf0] }
 0x233   : > { %8675 = vmatpush.bf16.msra.mxu3 %v13065_v19  ;;  %v13569_v35 = vor.u32 %v16261_v52, %v13568_v61  ;;  %v16249_v61 = vld [vmem:[#allocation5 + $0x142c] sm:$0xf0] }
 0x234   : > { %8687 = vmatpush.bf16.msrb.mxu0 %v13425_v21  ;;  %v13761_v21 = vor.u32 %v16309_v27, %v13760_v55  ;;  %v16201_v55 = vld [vmem:[#allocation5 + $0x12ac] sm:$0xf0]  ;;  %v13520_v27 = vld [vmem:[#allocation5 + $0x1418] sm:$0xf] }
 0x235   : > { %8706 = vmatpush.bf16.msrb.mxu1 %v13617_v32  ;;  %v13953_v32 = vor.u32 %v16357_v4, %v13952_v25 }
 0x236   : > { %8725 = vmatpush.bf16.msrb.mxu2 %v13809_v16  ;;  %v8285_v33 = vpop.f32.mrf.mxu2 }
 0x237   : > { %8744 = vmatpush.bf16.msrb.mxu3 %v14001_v20  ;;  %v8304_v26 = vpop.f32.mrf.mxu3  ;;  %v8286_v19 = vadd.f32 %v8285_v33, %v8267_v7  ;;  %v8316_v38 = vpop.f32.mrf.mxu0  ;;  %v13352_v20 = vld [vmem:[#allocation5 + $0x12c8] sm:$0xf]  ;;  %v13712_v7 = vld [vmem:[#allocation5 + $0x1598] sm:$0xf] }
 0x238   : > { %8688 = vmatpush.bf16.msrb.mxu0 %v13401_v49  ;;  %v8335_v34 = vpop.f32.mrf.mxu1  ;;  %v8317_v16 = vadd.f32 %v8316_v38, %v17626_v41  ;;  %v13737_v41 = vor.u32 %v16303_v2, %v13736_v12  ;;  %v13353_v43 = vor.u32 %v16207_v42, %v13352_v20  ;;  %v13545_v49 = vor.u32 %v16255_v37, %v13544_v11  ;;  %v13904_v33 = vld [vmem:[#allocation5 + $0x1718] sm:$0xf]  ;;  %v13496_v20 = vld [vmem:[#allocation5 + $0x13e8] sm:$0xf]  ;;  %v16243_v11 = vld [vmem:[#allocation5 + $0x13fc] sm:$0xf0] }
 0x239   : > { %8707 = vmatpush.bf16.msrb.mxu1 %v13593_v15  ;;  %v17639_v47 = vadd.f32 %v8304_v26, %v8286_v19  ;;  %8619 = vmatmul.bf16.vlgmr.msra.gmra.mxu0 %v17294_v23  ;;  %v13929_v15 = vor.u32 %v16351_v30, %v13928_v31  ;;  %v16345_v26 = vld [vmem:[#allocation5 + $0x172c] sm:$0xf0]  ;;  %v13521_v12 = vor.u32 %v16249_v61, %v13520_v27  ;;  %v16339_v37 = vld [vmem:[#allocation5 + $0x16fc] sm:$0xf0]  ;;  %v13664_v30 = vld [vmem:[#allocation5 + $0x1538] sm:$0xf] }
 0x23a   : > { %8726 = vmatpush.bf16.msrb.mxu2 %v13785_v59  ;;  %v8336_v3 = vadd.f32 %v8335_v34, %v8317_v16  ;;  %8638 = vmatmul.bf16.vlgmr.msra.gmra.mxu1 %v17296_v24  ;;  %v16297_v59 = vld [vmem:[#allocation5 + $0x15ac] sm:$0xf0]  ;;  %v13688_v16 = vld [vmem:[#allocation5 + $0x1568] sm:$0xf]  ;;  %v13905_v2 = vor.u32 %v16345_v26, %v13904_v33 }
 0x23b   : > { %8745 = vmatpush.bf16.msrb.mxu3 %v13977_v22  ;;  %8657 = vmatmul.bf16.vlgmr.msra.gmra.mxu2 %v17298_v28  ;;  %v13328_v22 = vld [vmem:[#allocation5 + $0x1298] sm:$0xf]  ;;  %v13713_v38 = vor.u32 %v16297_v59, %v13712_v7  ;;  %v16237_v27 = vld [vmem:[#allocation5 + $0x13cc] sm:$0xf0] }
 0x23c   : > { %8676 = vmatmul.bf16.vlgmr.msra.gmra.mxu3 %v17300_v29  ;;  %8689 = vmatpush.bf16.msrb.mxu0 %v13377_v62  ;;  %v13329_v34 = vor.u32 %v16201_v55, %v13328_v22  ;;  %v13280_v59 = vld [vmem:[#allocation5 + $0x1238] sm:$0xf] }
 0x23d   : > { %8708 = vmatpush.bf16.msrb.mxu1 %v13569_v35  ;;  %v13304_v35 = vld [vmem:[#allocation5 + $0x1268] sm:$0xf] }
 0x23e   : > { %8727 = vmatpush.bf16.msrb.mxu2 %v13761_v21  ;;  %v8354_v36 = vpop.f32.mrf.mxu2  ;;  %v16291_v21 = vld [vmem:[#allocation5 + $0x157c] sm:$0xf0] }
 0x23f   : > { %8746 = vmatpush.bf16.msrb.mxu3 %v13953_v32  ;;  %v8373_v10 = vpop.f32.mrf.mxu3  ;;  %v8355_v52 = vadd.f32 %v8354_v36, %v8336_v3  ;;  %v8318_v25 = vpop.f32.mrf.mxu0  ;;  %v16195_v32 = vld [vmem:[#allocation5 + $0x127c] sm:$0xf0]  ;;  %v13880_v3 = vld [vmem:[#allocation5 + $0x16e8] sm:$0xf]  ;;  %v13856_v36 = vld [vmem:[#allocation5 + $0x16b8] sm:$0xf] }
 0x240   : > { %v8337_v4 = vpop.f32.mrf.mxu1  ;;  %v8319_v19 = vadd.f32 %v8318_v25, %v17629_v58  ;;  %8690 = vmatpush.bf16.msrb.mxu0 %v13353_v43  ;;  %v13689_v58 = vor.u32 %v16291_v21, %v13688_v16  ;;  %v13305_v31 = vor.u32 %v16195_v32, %v13304_v35  ;;  %v13497_v43 = vor.u32 %v16243_v11, %v13496_v20  ;;  %v16183_v16 = vld [vmem:[#allocation5 + $0x121c] sm:$0xf0]  ;;  %v13448_v35 = vld [vmem:[#allocation5 + $0x1388] sm:$0xf]  ;;  %v14576_v11 = vld [vmem:[#allocation5 + $0x1c58] sm:$0xf] }
 0x241   : > { %v17646_v62 = vadd.f32 %v8373_v10, %v8355_v52  ;;  %8709 = vmatpush.bf16.msrb.mxu1 %v13545_v49  ;;  %v13881_v7 = vor.u32 %v16339_v37, %v13880_v3  ;;  %v16189_v49 = vld [vmem:[#allocation5 + $0x124c] sm:$0xf0]  ;;  %v13640_v52 = vld [vmem:[#allocation5 + $0x1508] sm:$0xf]  ;;  %v16231_v32 = vld [vmem:[#allocation5 + $0x139c] sm:$0xf0] }
 0x242   : > { %8728 = vmatpush.bf16.msrb.mxu2 %v13737_v41  ;;  %v8338_v42 = vadd.f32 %v8337_v4, %v8319_v19  ;;  %v16285_v41 = vld [vmem:[#allocation5 + $0x154c] sm:$0xf0]  ;;  %v13281_v19 = vor.u32 %v16189_v49, %v13280_v59  ;;  %v13832_v20 = vld [vmem:[#allocation5 + $0x1688] sm:$0xf]  ;;  %v14192_v37 = vld [vmem:[#allocation5 + $0x1958] sm:$0xf]  ;;  %v13449_v49 = vor.u32 %v16231_v32, %v13448_v35 }
 0x243   : > { %8747 = vmatpush.bf16.msrb.mxu3 %v13929_v15  ;;  %v13472_v15 = vld [vmem:[#allocation5 + $0x13b8] sm:$0xf]  ;;  %v16333_v10 = vld [vmem:[#allocation5 + $0x16cc] sm:$0xf0]  ;;  %v13665_v4 = vor.u32 %v16285_v41, %v13664_v30  ;;  %v16555_v35 = vld [vmem:[#allocation5 + $0x1dbc] sm:$0xf0] }
 0x244   : > { %8691 = vmatpush.bf16.msrb.mxu0 %v13329_v34  ;;  %v13256_v34 = vld [vmem:[#allocation5 + $0x1208] sm:$0xf]  ;;  %v16513_v3 = vld [vmem:[#allocation5 + $0x1c6c] sm:$0xf0] }
 0x245   : > { %8710 = vmatpush.bf16.msrb.mxu1 %v13521_v12  ;;  %v13473_v12 = vor.u32 %v16237_v27, %v13472_v15  ;;  %v13257_v41 = vor.u32 %v16183_v16, %v13256_v34  ;;  %v16561_v59 = vld [vmem:[#allocation5 + $0x1dec] sm:$0xf0]  ;;  %v14577_v27 = vor.u32 %v16513_v3, %v14576_v11  ;;  %v14360_v34 = vld [vmem:[#allocation5 + $0x1aa8] sm:$0xf] }
 0x246   : > { %8729 = vmatpush.bf16.msrb.mxu2 %v13713_v38  ;;  %v8356_v22 = vpop.f32.mrf.mxu2  ;;  %v16279_v38 = vld [vmem:[#allocation5 + $0x151c] sm:$0xf0] }
 0x247   : > { %8748 = vmatpush.bf16.msrb.mxu3 %v13905_v2  ;;  %v8375_v55 = vpop.f32.mrf.mxu3  ;;  %v8357_v61 = vadd.f32 %v8356_v22, %v8338_v42  ;;  %v8321_v33 = vpop.f32.mrf.mxu0  ;;  %v13857_v2 = vor.u32 %v16333_v10, %v13856_v36  ;;  %v13641_v30 = vor.u32 %v16279_v38, %v13640_v52  ;;  %v14552_v10 = vld [vmem:[#allocation5 + $0x1c28] sm:$0xf]  ;;  %v16411_v38 = vld [vmem:[#allocation5 + $0x193c] sm:$0xf0] }
 0x248   : > { %v8340_v26 = vpop.f32.mrf.mxu1  ;;  %v8322_v25 = vadd.f32 %v8321_v33, %v17636_v63  ;;  %8692 = vmatpush.bf16.msrb.mxu0 %v13305_v31  ;;  %v16327_v63 = vld [vmem:[#allocation5 + $0x169c] sm:$0xf0]  ;;  %v14384_v31 = vld [vmem:[#allocation5 + $0x1ad8] sm:$0xf]  ;;  %v14168_v52 = vld [vmem:[#allocation5 + $0x1928] sm:$0xf] }
 0x249   : > { %v17649_v21 = vadd.f32 %v8375_v55, %v8357_v61  ;;  %8711 = vmatpush.bf16.msrb.mxu1 %v13497_v43  ;;  %8624 = vmatmul.bf16.gmra.mxu0 %v17314_v39  ;;  %v16465_v43 = vld [vmem:[#allocation5 + $0x1aec] sm:$0xf0]  ;;  %v13833_v15 = vor.u32 %v16327_v63, %v13832_v20  ;;  %v16507_v61 = vld [vmem:[#allocation5 + $0x1c3c] sm:$0xf0]  ;;  %v14169_v63 = vor.u32 %v16411_v38, %v14168_v52  ;;  %v14312_v38 = vld [vmem:[#allocation5 + $0x1a48] sm:$0xf] }
 0x24a   : > { %8730 = vmatpush.bf16.msrb.mxu2 %v13689_v58  ;;  %v8341_v42 = vadd.f32 %v8340_v26, %v8322_v25  ;;  %8643 = vmatmul.bf16.gmra.mxu1 %v17316_v40  ;;  %v16417_v58 = vld [vmem:[#allocation5 + $0x196c] sm:$0xf0]  ;;  %v16399_v52 = vld [vmem:[#allocation5 + $0x18dc] sm:$0xf0] }
 0x24b   : > { %8749 = vmatpush.bf16.msrb.mxu3 %v13881_v7  ;;  %8662 = vmatmul.bf16.gmra.mxu2 %v17318_v45  ;;  %v14768_v7 = vld [vmem:[#allocation5 + $0x1dd8] sm:$0xf]  ;;  %v14193_v36 = vor.u32 %v16417_v58, %v14192_v37 }
 0x24c   : > { %8681 = vmatmul.bf16.gmra.mxu3 %v17320_v46  ;;  %8693 = vmatpush.bf16.msrb.mxu0 %v13281_v19  ;;  %v14769_v19 = vor.u32 %v16561_v59, %v14768_v7  ;;  %v14528_v37 = vld [vmem:[#allocation5 + $0x1bf8] sm:$0xf]  ;;  %v16453_v7 = vld [vmem:[#allocation5 + $0x1a8c] sm:$0xf0] }
 0x24d   : > { %8712 = vmatpush.bf16.msrb.mxu1 %v13473_v12  ;;  %v16459_v12 = vld [vmem:[#allocation5 + $0x1abc] sm:$0xf0]  ;;  %v14144_v58 = vld [vmem:[#allocation5 + $0x18f8] sm:$0xf] }
 0x24e   : > { %8731 = vmatpush.bf16.msrb.mxu2 %v13665_v4  ;;  %v8359_v22 = vpop.f32.mrf.mxu2  ;;  %v14385_v4 = vor.u32 %v16465_v43, %v14384_v31  ;;  %v14361_v11 = vor.u32 %v16459_v12, %v14360_v34  ;;  %v16405_v31 = vld [vmem:[#allocation5 + $0x190c] sm:$0xf0]  ;;  %v14720_v59 = vld [vmem:[#allocation5 + $0x1d78] sm:$0xf]  ;;  %v14696_v12 = vld [vmem:[#allocation5 + $0x1d48] sm:$0xf] }
 0x24f   : > { %8750 = vmatpush.bf16.msrb.mxu3 %v13857_v2  ;;  %v8378_v55 = vpop.f32.mrf.mxu3  ;;  %v8360_v33 = vadd.f32 %v8359_v22, %v8341_v42  ;;  %v8323_v26 = vpop.f32.mrf.mxu0  ;;  %v14744_v2 = vld [vmem:[#allocation5 + $0x1da8] sm:$0xf]  ;;  %v14553_v42 = vor.u32 %v16507_v61, %v14552_v10  ;;  %v14145_v10 = vor.u32 %v16405_v31, %v14144_v58  ;;  %v16393_v58 = vld [vmem:[#allocation5 + $0x18ac] sm:$0xf0]  ;;  %v14288_v31 = vld [vmem:[#allocation5 + $0x1a18] sm:$0xf] }
 0x250   : > { %v8342_v25 = vpop.f32.mrf.mxu1  ;;  %v8324_v16 = vadd.f32 %v8323_v26, %v17639_v47  ;;  %8694 = vmatpush.bf16.msrb.mxu0 %v13257_v41  ;;  %v14745_v3 = vor.u32 %v16555_v35, %v14744_v2  ;;  %v16501_v47 = vld [vmem:[#allocation5 + $0x1c0c] sm:$0xf0]  ;;  %v14504_v61 = vld [vmem:[#allocation5 + $0x1bc8] sm:$0xf]  ;;  %v16543_v2 = vld [vmem:[#allocation5 + $0x1d5c] sm:$0xf0] }
 0x251   : > { %v17656_v32 = vadd.f32 %v8378_v55, %v8360_v33  ;;  %8713 = vmatpush.bf16.msrb.mxu1 %v13449_v49  ;;  %v16549_v49 = vld [vmem:[#allocation5 + $0x1d8c] sm:$0xf0]  ;;  %v16495_v33 = vld [vmem:[#allocation5 + $0x1bdc] sm:$0xf0]  ;;  %v18630_v35 = vld [vmem:[#allocation16_spill] sm:$0xff] }
 0x252   : > { %8732 = vmatpush.bf16.msrb.mxu2 %v13641_v30  ;;  %v8343_v20 = vadd.f32 %v8342_v25, %v8324_v16  ;;  %v14336_v30 = vld [vmem:[#allocation5 + $0x1a78] sm:$0xf]  ;;  %v16447_v16 = vld [vmem:[#allocation5 + $0x1a5c] sm:$0xf0] }
 0x253   : > { %8751 = vmatpush.bf16.msrb.mxu3 %v13833_v15  ;;  %v14337_v25 = vor.u32 %v16453_v7, %v14336_v30  ;;  %v14672_v7 = vld [vmem:[#allocation5 + $0x1d18] sm:$0xf] }
 0x254   : > { %8763 = vmatpush.bf16.msra.mxu0 %v14193_v36  ;;  %v14529_v36 = vor.u32 %v16501_v47, %v14528_v37  ;;  %v14697_v37 = vor.u32 %v16543_v2, %v14696_v12  ;;  %v14096_v47 = vld [vmem:[#allocation5 + $0x1898] sm:$0xf]  ;;  %v14648_v12 = vld [vmem:[#allocation5 + $0x1ce8] sm:$0xf]  ;;  %v16531_v2 = vld [vmem:[#allocation5 + $0x1cfc] sm:$0xf0] }
 0x255   : > { %8782 = vmatpush.bf16.msra.mxu1 %v14385_v4  ;;  %v14721_v4 = vor.u32 %v16549_v49, %v14720_v59  ;;  %v16537_v59 = vld [vmem:[#allocation5 + $0x1d2c] sm:$0xf0] }
 0x256   : > { %8801 = vmatpush.bf16.msra.mxu2 %v14577_v27  ;;  %v8361_v41 = vpop.f32.mrf.mxu2 }
 0x257   : > { %8820 = vmatpush.bf16.msra.mxu3 %v14769_v19  ;;  %v8380_v43 = vpop.f32.mrf.mxu3  ;;  %v8362_v15 = vadd.f32 %v8361_v41, %v8343_v20  ;;  %v8392_v22 = vpop.f32.mrf.mxu0  ;;  %v14120_v19 = vld [vmem:[#allocation5 + $0x18c8] sm:$0xf]  ;;  %v14505_v20 = vor.u32 %v16495_v33, %v14504_v61  ;;  %v16483_v61 = vld [vmem:[#allocation5 + $0x1b7c] sm:$0xf0] }
 0x258   : > { %8764 = vmatpush.bf16.msra.mxu0 %v14169_v63  ;;  %v8411_v55 = vpop.f32.mrf.mxu1  ;;  %v8393_v27 = vadd.f32 %v8392_v22, %v17646_v62  ;;  %v18629_v62 = vld [vmem:[#allocation15_spill] sm:$0xff]  ;;  %v14480_v63 = vld [vmem:[#allocation5 + $0x1b98] sm:$0xf] }
 0x259   : > { %8783 = vmatpush.bf16.msra.mxu1 %v14361_v11  ;;  %v17659_v26 = vadd.f32 %v8380_v43, %v8362_v15  ;;  %8695 = vmatmul.bf16.vlgmr.msrb.gmra.mxu0 %v17334_v17  ;;  %v16489_v11 = vld [vmem:[#allocation5 + $0x1bac] sm:$0xf0] }
 0x25a   : > { %8802 = vmatpush.bf16.msra.mxu2 %v14553_v42  ;;  %v8412_v34 = vadd.f32 %v8411_v55, %v8393_v27  ;;  %8714 = vmatmul.bf16.vlgmr.msrb.gmra.mxu1 %v17336_v18  ;;  %v14121_v42 = vor.u32 %v16399_v52, %v14120_v19  ;;  %v16441_v43 = vld [vmem:[#allocation5 + $0x1a2c] sm:$0xf0]  ;;  %v14481_v27 = vor.u32 %v16489_v11, %v14480_v63  ;;  %v14072_v19 = vld [vmem:[#allocation5 + $0x1868] sm:$0xf]  ;;  %v16387_v52 = vld [vmem:[#allocation5 + $0x187c] sm:$0xf0] }
 0x25b   : > { %8821 = vmatpush.bf16.msra.mxu3 %v14745_v3  ;;  %8733 = vmatmul.bf16.vlgmr.msrb.gmra.mxu2 %v18629_v62  ;;  %v14313_v3 = vor.u32 %v16447_v16, %v14312_v38  ;;  %v14264_v38 = vld [vmem:[#allocation5 + $0x19e8] sm:$0xf]  ;;  %v16435_v16 = vld [vmem:[#allocation5 + $0x19fc] sm:$0xf0]  ;;  %v16477_v63 = vld [vmem:[#allocation5 + $0x1b4c] sm:$0xf0] }
 0x25c   : > { %8752 = vmatmul.bf16.vlgmr.msrb.gmra.mxu3 %v18630_v35  ;;  %8765 = vmatpush.bf16.msra.mxu0 %v14145_v10  ;;  %v14456_v10 = vld [vmem:[#allocation5 + $0x1b68] sm:$0xf]  ;;  %v14265_v11 = vor.u32 %v16435_v16, %v14264_v38 }
 0x25d   : > { %8784 = vmatpush.bf16.msra.mxu1 %v14337_v25  ;;  %v14289_v25 = vor.u32 %v16441_v43, %v14288_v31  ;;  %v14624_v43 = vld [vmem:[#allocation5 + $0x1cb8] sm:$0xf]  ;;  %v14216_v38 = vld [vmem:[#allocation5 + $0x1988] sm:$0xf] }
 0x25e   : > { %8803 = vmatpush.bf16.msra.mxu2 %v14529_v36  ;;  %v8430_v30 = vpop.f32.mrf.mxu2  ;;  %v14097_v36 = vor.u32 %v16393_v58, %v14096_v47  ;;  %v16381_v47 = vld [vmem:[#allocation5 + $0x184c] sm:$0xf0]  ;;  %v14240_v58 = vld [vmem:[#allocation5 + $0x19b8] sm:$0xf]  ;;  %v14600_v16 = vld [vmem:[#allocation5 + $0x1c88] sm:$0xf] }
 0x25f   : > { %8822 = vmatpush.bf16.msra.mxu3 %v14721_v4  ;;  %v8449_v41 = vpop.f32.mrf.mxu3  ;;  %v8431_v49 = vadd.f32 %v8430_v30, %v8412_v34  ;;  %v8394_v15 = vpop.f32.mrf.mxu0  ;;  %v14673_v4 = vor.u32 %v16537_v59, %v14672_v7  ;;  %v16525_v7 = vld [vmem:[#allocation5 + $0x1ccc] sm:$0xf0] }
 0x260   : > { %v8413_v22 = vpop.f32.mrf.mxu1  ;;  %v8395_v55 = vadd.f32 %v8394_v15, %v17649_v21  ;;  %8766 = vmatpush.bf16.msra.mxu0 %v14121_v42  ;;  %v14457_v21 = vor.u32 %v16483_v61, %v14456_v10  ;;  %v14432_v42 = vld [vmem:[#allocation5 + $0x1b38] sm:$0xf]  ;;  %v16471_v10 = vld [vmem:[#allocation5 + $0x1b1c] sm:$0xf0]  ;;  %v14024_v61 = vld [vmem:[#allocation5 + $0x1808] sm:$0xf] }
 0x261   : > { %v17666_v33 = vadd.f32 %v8449_v41, %v8431_v49  ;;  %8785 = vmatpush.bf16.msra.mxu1 %v14313_v3  ;;  %v14649_v3 = vor.u32 %v16531_v2, %v14648_v12  ;;  %v16429_v41 = vld [vmem:[#allocation5 + $0x19cc] sm:$0xf0] }
 0x262   : > { %8804 = vmatpush.bf16.msra.mxu2 %v14505_v20  ;;  %v8414_v34 = vadd.f32 %v8413_v22, %v8395_v55  ;;  %v14073_v20 = vor.u32 %v16387_v52, %v14072_v19  ;;  %v14408_v22 = vld [vmem:[#allocation5 + $0x1b08] sm:$0xf]  ;;  %v14241_v19 = vor.u32 %v16429_v41, %v14240_v58  ;;  %v14625_v52 = vor.u32 %v16525_v7, %v14624_v43  ;;  %v18633_v2 = vld [vmem:[#allocation17_spill] sm:$0xff]  ;;  %v15536_v41 = vld [vmem:[#allocation5 + $0x23d8] sm:$0xf] }
 0x263   : > { %18631 = vst [vmem:[#allocation29_spill] sm:$0xff] %v17666_v33  ;;  %8823 = vmatpush.bf16.msra.mxu3 %v14697_v37  ;;  %v14048_v37 = vld [vmem:[#allocation5 + $0x1838] sm:$0xf]  ;;  %v14409_v58 = vor.u32 %v16471_v10, %v14408_v22  ;;  %v16753_v43 = vld [vmem:[#allocation5 + $0x23ec] sm:$0xf0] }
 0x264   : > { %8767 = vmatpush.bf16.msra.mxu0 %v14097_v36  ;;  %v14049_v36 = vor.u32 %v16381_v47, %v14048_v37  ;;  %v18636_v37 = vld [vmem:[#allocation20_spill] sm:$0xff]  ;;  %v14960_v47 = vld [vmem:[#allocation5 + $0x1f58] sm:$0xf]  ;;  %v16603_v10 = vld [vmem:[#allocation5 + $0x1f3c] sm:$0xf0] }
 0x265   : > { %8786 = vmatpush.bf16.msra.mxu1 %v14289_v25  ;;  %v16375_v25 = vld [vmem:[#allocation5 + $0x181c] sm:$0xf0]  ;;  %v15320_v33 = vld [vmem:[#allocation5 + $0x2228] sm:$0xf] }
 0x266   : > { %8805 = vmatpush.bf16.msra.mxu2 %v14481_v27  ;;  %v8432_v31 = vpop.f32.mrf.mxu2  ;;  %v14433_v27 = vor.u32 %v16477_v63, %v14432_v42  ;;  %v16705_v42 = vld [vmem:[#allocation5 + $0x226c] sm:$0xf0]  ;;  %v18635_v63 = vld [vmem:[#allocation19_spill] sm:$0xff]  ;;  %v14936_v22 = vld [vmem:[#allocation5 + $0x1f28] sm:$0xf] }
 0x267   : > { %8824 = vmatpush.bf16.msra.mxu3 %v14673_v4  ;;  %v8451_v30 = vpop.f32.mrf.mxu3  ;;  %v8433_v59 = vadd.f32 %v8432_v31, %v8414_v34  ;;  %v8397_v49 = vpop.f32.mrf.mxu0  ;;  %v16423_v34 = vld [vmem:[#allocation5 + $0x199c] sm:$0xf0]  ;;  %v14025_v31 = vor.u32 %v16375_v25, %v14024_v61  ;;  %v15128_v61 = vld [vmem:[#allocation5 + $0x20a8] sm:$0xf] }
 0x268   : > { %v8416_v15 = vpop.f32.mrf.mxu1  ;;  %v8398_v55 = vadd.f32 %v8397_v49, %v17656_v32  ;;  %8768 = vmatpush.bf16.msra.mxu0 %v14073_v20  ;;  %v18634_v32 = vld [vmem:[#allocation18_spill] sm:$0xff]  ;;  %v14217_v7 = vor.u32 %v16423_v34, %v14216_v38  ;;  %v16747_v38 = vld [vmem:[#allocation5 + $0x23bc] sm:$0xf0] }
 0x269   : > { %v17669_v4 = vadd.f32 %v8451_v30, %v8433_v59  ;;  %8787 = vmatpush.bf16.msra.mxu1 %v14265_v11  ;;  %8700 = vmatmul.bf16.gmra.mxu0 %v18633_v2  ;;  %v15344_v20 = vld [vmem:[#allocation5 + $0x2258] sm:$0xf]  ;;  %v16609_v11 = vld [vmem:[#allocation5 + $0x1f6c] sm:$0xf0] }
 0x26a   : > { %8806 = vmatpush.bf16.msra.mxu2 %v14457_v21  ;;  %v8417_v12 = vadd.f32 %v8416_v15, %v8398_v55  ;;  %8719 = vmatmul.bf16.gmra.mxu1 %v18634_v32  ;;  %v16519_v21 = vld [vmem:[#allocation5 + $0x1c9c] sm:$0xf0]  ;;  %v16657_v30 = vld [vmem:[#allocation5 + $0x20ec] sm:$0xf0]  ;;  %v15345_v55 = vor.u32 %v16705_v42, %v15344_v20 }
 0x26b   : > { %18632 = vst [vmem:[#allocation41_spill] sm:$0xff] %v17669_v4  ;;  %8825 = vmatpush.bf16.msra.mxu3 %v14649_v3  ;;  %8738 = vmatmul.bf16.gmra.mxu2 %v18635_v63  ;;  %v15152_v3 = vld [vmem:[#allocation5 + $0x20d8] sm:$0xf]  ;;  %v14601_v59 = vor.u32 %v16519_v21, %v14600_v16  ;;  %v14961_v4 = vor.u32 %v16609_v11, %v14960_v47 }
 0x26c   : > { %8757 = vmatmul.bf16.gmra.mxu3 %v18636_v37  ;;  %8769 = vmatpush.bf16.msra.mxu0 %v14049_v36  ;;  %v16699_v37 = vld [vmem:[#allocation5 + $0x223c] sm:$0xf0]  ;;  %v15537_v36 = vor.u32 %v16753_v43, %v15536_v41  ;;  %v14937_v21 = vor.u32 %v16603_v10, %v14936_v22  ;;  %v15296_v47 = vld [vmem:[#allocation5 + $0x21f8] sm:$0xf]  ;;  %v14888_v10 = vld [vmem:[#allocation5 + $0x1ec8] sm:$0xf] }
 0x26d   : > { %8788 = vmatpush.bf16.msra.mxu1 %v14241_v19  ;;  %v16651_v19 = vld [vmem:[#allocation5 + $0x20bc] sm:$0xf0]  ;;  %v14912_v11 = vld [vmem:[#allocation5 + $0x1ef8] sm:$0xf] }
 0x26e   : > { %8807 = vmatpush.bf16.msra.mxu2 %v14433_v27  ;;  %v8435_v49 = vpop.f32.mrf.mxu2  ;;  %v15153_v27 = vor.u32 %v16657_v30, %v15152_v3  ;;  %v15129_v20 = vor.u32 %v16651_v19, %v15128_v61  ;;  %v16597_v3 = vld [vmem:[#allocation5 + $0x1f0c] sm:$0xf0]  ;;  %v16591_v61 = vld [vmem:[#allocation5 + $0x1edc] sm:$0xf0] }
 0x26f   : > { %8826 = vmatpush.bf16.msra.mxu3 %v14625_v52  ;;  %v8454_v15 = vpop.f32.mrf.mxu3  ;;  %v8436_v63 = vadd.f32 %v8435_v49, %v8417_v12  ;;  %v8399_v32 = vpop.f32.mrf.mxu0  ;;  %v15512_v52 = vld [vmem:[#allocation5 + $0x23a8] sm:$0xf]  ;;  %v15321_v12 = vor.u32 %v16699_v37, %v15320_v33  ;;  %v16645_v33 = vld [vmem:[#allocation5 + $0x208c] sm:$0xf0]  ;;  %v14913_v49 = vor.u32 %v16597_v3, %v14912_v11 }
 0x270   : > { %v8418_v2 = vpop.f32.mrf.mxu1  ;;  %v8400_v25 = vadd.f32 %v8399_v32, %v17659_v26  ;;  %8770 = vmatpush.bf16.msra.mxu0 %v14025_v31  ;;  %v15513_v42 = vor.u32 %v16747_v38, %v15512_v52  ;;  %v16844_v26 = vld [vmem:[%s18521_s2] sm:$0x3f]  ;;  %v16741_v37 = vld [vmem:[#allocation5 + $0x238c] sm:$0xf0]  ;;  %v18640_v38 = vld [vmem:[#allocation22_spill] sm:$0xff] }
 0x271   : > { %v17676_v34 = vadd.f32 %v8454_v15, %v8436_v63  ;;  %8789 = vmatpush.bf16.msra.mxu1 %v14217_v7  ;;  %v17681_v32 = vperm.slane %v16844_v26, 2  ;;  %v16693_v63 = vld [vmem:[#allocation5 + $0x220c] sm:$0xf0]  ;;  %v15272_v15 = vld [vmem:[#allocation5 + $0x21c8] sm:$0xf] }
 0x272   : > { %8808 = vmatpush.bf16.msra.mxu2 %v14409_v58  ;;  %v8419_v16 = vadd.f32 %v8418_v2, %v8400_v25  ;;  %v15104_v58 = vld [vmem:[#allocation5 + $0x2078] sm:$0xf]  ;;  %v15080_v25 = vld [vmem:[#allocation5 + $0x2048] sm:$0xf]  ;;  %v18639_v52 = vld [vmem:[#allocation21_spill] sm:$0xff] }
 0x273   : > { %18637 = vst [vmem:[#allocation42_spill] sm:$0xff] %v17676_v34  ;;  %8827 = vmatpush.bf16.msra.mxu3 %v14601_v59  ;;  %v15297_v59 = vor.u32 %v16693_v63, %v15296_v47  ;;  %v14889_v47 = vor.u32 %v16591_v61, %v14888_v10  ;;  %v15248_v63 = vld [vmem:[#allocation5 + $0x2198] sm:$0xf]  ;;  %v16681_v11 = vld [vmem:[#allocation5 + $0x21ac] sm:$0xf0] }
 0x274   : > { %8839 = vmatpush.bf16.msrb.mxu0 %v14961_v4  ;;  %v15488_v4 = vld [vmem:[#allocation5 + $0x2378] sm:$0xf]  ;;  %v15416_v34 = vld [vmem:[#allocation5 + $0x22e8] sm:$0xf] }
 0x275   : > { %8858 = vmatpush.bf16.msrb.mxu1 %v15153_v27  ;;  %v15489_v22 = vor.u32 %v16741_v37, %v15488_v4 }
 0x276   : > { %8877 = vmatpush.bf16.msrb.mxu2 %v15345_v55  ;;  %v8437_v2 = vpop.f32.mrf.mxu2  ;;  %v16687_v55 = vld [vmem:[#allocation5 + $0x21dc] sm:$0xf0] }
 0x277   : > { %8896 = vmatpush.bf16.msrb.mxu3 %v15537_v36  ;;  %v8456_v31 = vpop.f32.mrf.mxu3  ;;  %v8438_v30 = vadd.f32 %v8437_v2, %v8419_v16  ;;  %v8468_v41 = vpop.f32.mrf.mxu0  ;;  %v15105_v36 = vor.u32 %v16645_v33, %v15104_v58  ;;  %v16639_v16 = vld [vmem:[#allocation5 + $0x205c] sm:$0xf0]  ;;  %v15273_v26 = vor.u32 %v16687_v55, %v15272_v15  ;;  %v14864_v2 = vld [vmem:[#allocation5 + $0x1e98] sm:$0xf]  ;;  %v15249_v15 = vor.u32 %v16681_v11, %v15248_v63  ;;  %v16669_v63 = vld [vmem:[#allocation5 + $0x214c] sm:$0xf0] }
 0x278   : > { %8840 = vmatpush.bf16.msrb.mxu0 %v14937_v21  ;;  %v8487_v43 = vpop.f32.mrf.mxu1  ;;  %v8469_v7 = vadd.f32 %v8468_v41, %v17681_v32  ;;  %v16735_v21 = vld [vmem:[#allocation5 + $0x235c] sm:$0xf0]  ;;  %v15081_v3 = vor.u32 %v16639_v16, %v15080_v25  ;;  %v15056_v33 = vld [vmem:[#allocation5 + $0x2018] sm:$0xf]  ;;  %v14840_v16 = vld [vmem:[#allocation5 + $0x1e68] sm:$0xf] }
 0x279   : > { %8859 = vmatpush.bf16.msrb.mxu1 %v15129_v20  ;;  %v17684_v27 = vadd.f32 %v8456_v31, %v8438_v30  ;;  %8771 = vmatmul.bf16.vlgmr.msra.gmra.mxu0 %v18639_v52  ;;  %v18641_v20 = vld [vmem:[#allocation23_spill] sm:$0xff]  ;;  %v16585_v31 = vld [vmem:[#allocation5 + $0x1eac] sm:$0xf0]  ;;  %v15440_v41 = vld [vmem:[#allocation5 + $0x2318] sm:$0xf] }
 0x27a   : > { %8878 = vmatpush.bf16.msrb.mxu2 %v15321_v12  ;;  %v8488_v19 = vadd.f32 %v8487_v43, %v8469_v7  ;;  %8790 = vmatmul.bf16.vlgmr.msra.gmra.mxu1 %v18640_v38  ;;  %v15464_v12 = vld [vmem:[#allocation5 + $0x2348] sm:$0xf]  ;;  %v16633_v30 = vld [vmem:[#allocation5 + $0x202c] sm:$0xf0]  ;;  %v14865_v55 = vor.u32 %v16585_v31, %v14864_v2  ;;  %v15008_v31 = vld [vmem:[#allocation5 + $0x1fb8] sm:$0xf] }
 0x27b   : > { %8897 = vmatpush.bf16.msrb.mxu3 %v15513_v42  ;;  %18638 = vst [vmem:[#allocation43_spill] sm:$0xff] %v17684_v27  ;;  %8809 = vmatmul.bf16.vlgmr.msra.gmra.mxu2 %v18641_v20  ;;  %v18642_v42 = vld [vmem:[#allocation24_spill] sm:$0xff]  ;;  %v15465_v58 = vor.u32 %v16735_v21, %v15464_v12  ;;  %v16729_v43 = vld [vmem:[#allocation5 + $0x232c] sm:$0xf0]  ;;  %v15057_v61 = vor.u32 %v16633_v30, %v15056_v33  ;;  %v16579_v12 = vld [vmem:[#allocation5 + $0x1e7c] sm:$0xf0] }
 0x27c   : > { %8828 = vmatmul.bf16.vlgmr.msra.gmra.mxu3 %v18642_v42  ;;  %8841 = vmatpush.bf16.msrb.mxu0 %v14913_v49  ;;  %v15441_v25 = vor.u32 %v16729_v43, %v15440_v41  ;;  %v15032_v21 = vld [vmem:[#allocation5 + $0x1fe8] sm:$0xf]  ;;  %v16723_v42 = vld [vmem:[#allocation5 + $0x22fc] sm:$0xf0]  ;;  %v16573_v2 = vld [vmem:[#allocation5 + $0x1e4c] sm:$0xf0] }
 0x27d   : > { %8860 = vmatpush.bf16.msrb.mxu1 %v15105_v36  ;;  %v15224_v36 = vld [vmem:[#allocation5 + $0x2168] sm:$0xf]  ;;  %v16621_v30 = vld [vmem:[#allocation5 + $0x1fcc] sm:$0xf0]  ;;  %v15392_v41 = vld [vmem:[#allocation5 + $0x22b8] sm:$0xf] }
 0x27e   : > { %8879 = vmatpush.bf16.msrb.mxu2 %v15297_v59  ;;  %v8506_v4 = vpop.f32.mrf.mxu2  ;;  %v16717_v43 = vld [vmem:[#allocation5 + $0x22cc] sm:$0xf0]  ;;  %v15736_v38 = vld [vmem:[#allocation5 + $0x42c] sm:$0xf] }
 0x27f   : > { %8898 = vmatpush.bf16.msrb.mxu3 %v15489_v22  ;;  %v8525_v37 = vpop.f32.mrf.mxu3  ;;  %v8507_v7 = vadd.f32 %v8506_v4, %v8488_v19  ;;  %v8470_v27 = vpop.f32.mrf.mxu0  ;;  %v16675_v22 = vld [vmem:[#allocation5 + $0x217c] sm:$0xf0]  ;;  %v18643_v20 = vld [vmem:[#allocation25_spill] sm:$0xff] }
 0x280   : > { %v8489_v59 = vpop.f32.mrf.mxu1  ;;  %v8471_v49 = vadd.f32 %v8470_v27, %v17681_v32  ;;  %8842 = vmatpush.bf16.msrb.mxu0 %v14889_v47  ;;  %v16627_v4 = vld [vmem:[#allocation5 + $0x1ffc] sm:$0xf0]  ;;  %v15225_v27 = vor.u32 %v16675_v22, %v15224_v36  ;;  %v15200_v47 = vld [vmem:[#allocation5 + $0x2138] sm:$0xf] }
 0x281   : > { %v17691_v10 = vadd.f32 %v8525_v37, %v8507_v7  ;;  %8861 = vmatpush.bf16.msrb.mxu1 %v15081_v3  ;;  %v15033_v11 = vor.u32 %v16627_v4, %v15032_v21  ;;  %v15417_v3 = vor.u32 %v16723_v42, %v15416_v34  ;;  %v15201_v36 = vor.u32 %v16669_v63, %v15200_v47  ;;  %v14792_v34 = vld [vmem:[#allocation5 + $0x1e08] sm:$0xf]  ;;  %v16567_v42 = vld [vmem:[#allocation5 + $0x1e1c] sm:$0xf0]  ;;  %v11506_v47 = vld [vmem:[#allocation5 + $0x470] sm:$0xf0] }
 0x282   : > { %8880 = vmatpush.bf16.msrb.mxu2 %v15273_v26  ;;  %v8490_v19 = vadd.f32 %v8489_v59, %v8471_v49  ;;  %v14841_v26 = vor.u32 %v16579_v12, %v14840_v16  ;;  %v15009_v16 = vor.u32 %v16621_v30, %v15008_v31  ;;  %v15393_v12 = vor.u32 %v16717_v43, %v15392_v41  ;;  %v14984_v21 = vld [vmem:[#allocation5 + $0x1f88] sm:$0xf]  ;;  %v18645_v63 = vld [vmem:[#allocation27_spill] sm:$0xff]  ;;  %v11314_v30 = vld [vmem:[#allocation5 + $0x2f0] sm:$0xf0] }
 0x283   : > { %8899 = vmatpush.bf16.msrb.mxu3 %v15465_v58  ;;  %v14816_v58 = vld [vmem:[#allocation5 + $0x1e38] sm:$0xf]  ;;  %v15368_v4 = vld [vmem:[#allocation5 + $0x2288] sm:$0xf]  ;;  %v15790_v41 = vld [vmem:[#allocation5 + $0x5dc] sm:$0xf] }
 0x284   : > { %8843 = vmatpush.bf16.msrb.mxu0 %v14865_v55  ;;  %v14817_v22 = vor.u32 %v16573_v2, %v14816_v58  ;;  %v18646_v58 = vld [vmem:[#allocation28_spill] sm:$0xff]  ;;  %v15646_v2 = vld [vmem:[#allocation5 + $0x15c] sm:$0xf]  ;;  %v11698_v43 = vld [vmem:[#allocation5 + $0x5f0] sm:$0xf0] }
 0x285   : > { %8862 = vmatpush.bf16.msrb.mxu1 %v15057_v61  ;;  %v16663_v61 = vld [vmem:[#allocation5 + $0x211c] sm:$0xf0] }
 0x286   : > { %8881 = vmatpush.bf16.msrb.mxu2 %v15249_v15  ;;  %v8508_v33 = vpop.f32.mrf.mxu2  ;;  %v15176_v15 = vld [vmem:[#allocation5 + $0x2108] sm:$0xf] }
 0x287   : > { %8900 = vmatpush.bf16.msrb.mxu3 %v15441_v25  ;;  %v8527_v37 = vpop.f32.mrf.mxu3  ;;  %v8509_v7 = vadd.f32 %v8508_v33, %v8490_v19  ;;  %v8473_v59 = vpop.f32.mrf.mxu0  ;;  %v16615_v19 = vld [vmem:[#allocation5 + $0x1f9c] sm:$0xf0]  ;;  %v15177_v31 = vor.u32 %v16663_v61, %v15176_v15  ;;  %v15640_v15 = vld [vmem:[#allocation5 + $0x12c] sm:$0xf]  ;;  %v11098_v61 = vld [vmem:[#allocation5 + $0x140] sm:$0xf0] }
 0x288   : > { %v8492_v49 = vpop.f32.mrf.mxu1  ;;  %v8474_v55 = vadd.f32 %v8473_v59, %v17681_v32  ;;  %8844 = vmatpush.bf16.msrb.mxu0 %v14841_v26  ;;  %v18644_v59 = vld [vmem:[#allocation26_spill] sm:$0xff] }
 0x289   : > { %v17694_v25 = vadd.f32 %v8527_v37, %v8509_v7  ;;  %8863 = vmatpush.bf16.msrb.mxu1 %v15033_v11  ;;  %8776 = vmatmul.bf16.gmra.mxu0 %v18643_v20  ;;  %v15742_v26 = vld [vmem:[#allocation5 + $0x45c] sm:$0xf]  ;;  %v11122_v11 = vld [vmem:[#allocation5 + $0x170] sm:$0xf0]  ;;  %v14793_v37 = vor.u32 %v16567_v42, %v14792_v34  ;;  %v14985_v7 = vor.u32 %v16615_v19, %v14984_v21  ;;  %v15688_v34 = vld [vmem:[#allocation5 + $0x2ac] sm:$0xf] }
 0x28a   : > { %8882 = vmatpush.bf16.msrb.mxu2 %v15225_v27  ;;  %v8493_v33 = vadd.f32 %v8492_v49, %v8474_v55  ;;  %8795 = vmatmul.bf16.gmra.mxu1 %v18644_v59  ;;  %v16711_v27 = vld [vmem:[#allocation5 + $0x229c] sm:$0xf0]  ;;  %v11509_v20 = vor.u32 %v15742_v26, %v11506_v47  ;;  %v11674_v21 = vld [vmem:[#allocation5 + $0x5c0] sm:$0xf0] }
 0x28b   : > { %8901 = vmatpush.bf16.msrb.mxu3 %v15417_v3  ;;  %8814 = vmatmul.bf16.gmra.mxu2 %v18645_v63  ;;  %v15694_v3 = vld [vmem:[#allocation5 + $0x2dc] sm:$0xf]  ;;  %v15369_v49 = vor.u32 %v16711_v27, %v15368_v4  ;;  %v11125_v63 = vor.u32 %v15646_v2, %v11122_v11  ;;  %v11101_v27 = vor.u32 %v15640_v15, %v11098_v61  ;;  %v11074_v11 = vld [vmem:[#allocation5 + $0x110] sm:$0xf0]  ;;  %v11050_v15 = vld [vmem:[#allocation5 + $0xe0] sm:$0xf0] }
 0x28c   : > { %8833 = vmatmul.bf16.gmra.mxu3 %v18646_v58  ;;  %8845 = vmatpush.bf16.msrb.mxu0 %v14817_v22  ;;  %v11482_v58 = vld [vmem:[#allocation5 + $0x440] sm:$0xf0]  ;;  %v11701_v22 = vor.u32 %v15790_v41, %v11698_v43  ;;  %v15730_v2 = vld [vmem:[#allocation5 + $0x3fc] sm:$0xf]  ;;  %v15724_v43 = vld [vmem:[#allocation5 + $0x3cc] sm:$0xf] }
 0x28d   : > { %8864 = vmatpush.bf16.msrb.mxu1 %v15009_v16  ;;  %v11290_v16 = vld [vmem:[#allocation5 + $0x2c0] sm:$0xf0]  ;;  %v15676_v61 = vld [vmem:[#allocation5 + $0x24c] sm:$0xf] }
 0x28e   : > { %8883 = vmatpush.bf16.msrb.mxu2 %v15201_v36  ;;  %v8511_v55 = vpop.f32.mrf.mxu2  ;;  %v11317_v36 = vor.u32 %v15694_v3, %v11314_v30  ;;  %v11293_v26 = vor.u32 %v15688_v34, %v11290_v16  ;;  %v15682_v3 = vld [vmem:[#allocation5 + $0x27c] sm:$0xf]  ;;  %v11242_v16 = vld [vmem:[#allocation5 + $0x260] sm:$0xf0] }
 0x28f   : > { %8902 = vmatpush.bf16.msrb.mxu3 %v15393_v12  ;;  %v8530_v59 = vpop.f32.mrf.mxu3  ;;  %v8512_v52 = vadd.f32 %v8511_v55, %v8493_v33  ;;  %v8475_v35 = vpop.f32.mrf.mxu0  ;;  %v15784_v12 = vld [vmem:[#allocation5 + $0x5ac] sm:$0xf]  ;;  %v11485_v33 = vor.u32 %v15736_v38, %v11482_v58 }
 0x290   : > { %v8494_v62 = vpop.f32.mrf.mxu1  ;;  %v8476_v42 = vadd.f32 %v8475_v35, %v17681_v32  ;;  %8846 = vmatpush.bf16.msrb.mxu0 %v14793_v37  ;;  %v11677_v47 = vor.u32 %v15784_v12, %v11674_v21  ;;  %v11458_v35 = vld [vmem:[#allocation5 + $0x410] sm:$0xf0]  ;;  %v15634_v32 = vld [vmem:[#allocation5 + $0xfc] sm:$0xf]  ;;  %v15772_v12 = vld [vmem:[#allocation5 + $0x54c] sm:$0xf] }
 0x291   : > { %v17701_v19 = vadd.f32 %v8530_v59, %v8512_v52  ;;  %8865 = vmatpush.bf16.msrb.mxu1 %v14985_v7  ;;  %v11266_v52 = vld [vmem:[#allocation5 + $0x290] sm:$0xf0]  ;;  %v15778_v59 = vld [vmem:[#allocation5 + $0x57c] sm:$0xf]  ;;  %v11461_v30 = vor.u32 %v15730_v2, %v11458_v35  ;;  %v11077_v41 = vor.u32 %v15634_v32, %v11074_v11  ;;  %v11434_v7 = vld [vmem:[#allocation5 + $0x3e0] sm:$0xf0]  ;;  %v11245_v2 = vor.u32 %v15676_v61, %v11242_v16 }
 0x292   : > { %8884 = vmatpush.bf16.msrb.mxu2 %v15177_v31  ;;  %v8495_v4 = vadd.f32 %v8494_v62, %v8476_v42  ;;  %v11650_v62 = vld [vmem:[#allocation5 + $0x590] sm:$0xf0]  ;;  %v11269_v55 = vor.u32 %v15682_v3, %v11266_v52  ;;  %v18647_v42 = vld [vmem:[#allocation30_spill] sm:$0xff]  ;;  %v11626_v21 = vld [vmem:[#allocation5 + $0x560] sm:$0xf0] }
 0x293   : > { %8903 = vmatpush.bf16.msrb.mxu3 %v15369_v49  ;;  %v11629_v35 = vor.u32 %v15772_v12, %v11626_v21  ;;  %v15622_v32 = vld [vmem:[#allocation5 + $0x9c] sm:$0xf]  ;;  %v11026_v11 = vld [vmem:[#allocation5 + $0xb0] sm:$0xf0]  ;;  %v11002_v61 = vld [vmem:[#allocation5 + $0x80] sm:$0xf0] }
 0x294   : > { %8915 = vmatpush.bf16.msra.mxu0 %v11125_v63  ;;  %v15670_v3 = vld [vmem:[#allocation5 + $0x21c] sm:$0xf]  ;;  %v11218_v52 = vld [vmem:[#allocation5 + $0x230] sm:$0xf0]  ;;  %v15664_v16 = vld [vmem:[#allocation5 + $0x1ec] sm:$0xf] }
 0x295   : > { %8934 = vmatpush.bf16.msra.mxu1 %v11317_v36  ;;  %v11653_v36 = vor.u32 %v15778_v59, %v11650_v62  ;;  %v15766_v59 = vld [vmem:[#allocation5 + $0x51c] sm:$0xf]  ;;  %v11602_v62 = vld [vmem:[#allocation5 + $0x530] sm:$0xf0]  ;;  %v11194_v12 = vld [vmem:[#allocation5 + $0x200] sm:$0xf0] }
 0x296   : > { %8953 = vmatpush.bf16.msra.mxu2 %v11509_v20  ;;  %v8513_v31 = vpop.f32.mrf.mxu2  ;;  %v15760_v21 = vld [vmem:[#allocation5 + $0x4ec] sm:$0xf] }
 0x297   : > { %8972 = vmatpush.bf16.msra.mxu3 %v11701_v22  ;;  %v8532_v37 = vpop.f32.mrf.mxu3  ;;  %v8514_v20 = vadd.f32 %v8513_v31, %v8495_v4  ;;  %v8544_v63 = vpop.f32.mrf.mxu0  ;;  %v15628_v22 = vld [vmem:[#allocation5 + $0xcc] sm:$0xf] }
 0x298   : > { %8916 = vmatpush.bf16.msra.mxu0 %v11101_v27  ;;  %v8563_v38 = vpop.f32.mrf.mxu1  ;;  %v8545_v58 = vadd.f32 %v8544_v63, %v17691_v10  ;;  %v18648_v10 = vld [vmem:[#allocation31_spill] sm:$0xff]  ;;  %v18649_v4 = vld [vmem:[#allocation32_spill] sm:$0xff]  ;;  %v11053_v27 = vor.u32 %v15628_v22, %v11050_v15  ;;  %v11605_v22 = vor.u32 %v15766_v59, %v11602_v62  ;;  %v15754_v59 = vld [vmem:[#allocation5 + $0x4bc] sm:$0xf] }
 0x299   : > { %8935 = vmatpush.bf16.msra.mxu1 %v11293_v26  ;;  %v17704_v49 = vadd.f32 %v8532_v37, %v8514_v20  ;;  %8847 = vmatmul.bf16.vlgmr.msrb.gmra.mxu0 %v18622_v60  ;;  %v15718_v26 = vld [vmem:[#allocation5 + $0x39c] sm:$0xf]  ;;  %v15616_v15 = vld [vmem:[#allocation5 + $0x6c] sm:$0xf]  ;;  %v11554_v62 = vld [vmem:[#allocation5 + $0x4d0] sm:$0xf0] }
 0x29a   : > { %8954 = vmatpush.bf16.msra.mxu2 %v11485_v33  ;;  %v8564_v34 = vadd.f32 %v8563_v38, %v8545_v58  ;;  %8866 = vmatmul.bf16.vlgmr.msrb.gmra.mxu1 %v18647_v42  ;;  %v11437_v33 = vor.u32 %v15724_v43, %v11434_v7  ;;  %v15712_v43 = vld [vmem:[#allocation5 + $0x36c] sm:$0xf]  ;;  %v11386_v7 = vld [vmem:[#allocation5 + $0x380] sm:$0xf0] }
 0x29b   : > { %8973 = vmatpush.bf16.msra.mxu3 %v11677_v47  ;;  %8885 = vmatmul.bf16.vlgmr.msrb.gmra.mxu2 %v18648_v10  ;;  %v11410_v47 = vld [vmem:[#allocation5 + $0x3b0] sm:$0xf0] }
 0x29c   : > { %8904 = vmatmul.bf16.vlgmr.msrb.gmra.mxu3 %v18649_v4  ;;  %8917 = vmatpush.bf16.msra.mxu0 %v11077_v41  ;;  %v11029_v41 = vor.u32 %v15622_v32, %v11026_v11  ;;  %v10978_v32 = vld [vmem:[#allocation5 + $0x50] sm:$0xf0]  ;;  %v15658_v11 = vld [vmem:[#allocation5 + $0x1bc] sm:$0xf] }
 0x29d   : > { %8936 = vmatpush.bf16.msra.mxu1 %v11269_v55 }
 0x29e   : > { %8955 = vmatpush.bf16.msra.mxu2 %v11461_v30  ;;  %v8582_v31 = vpop.f32.mrf.mxu2  ;;  %v11413_v30 = vor.u32 %v15718_v26, %v11410_v47  ;;  %v11362_v26 = vld [vmem:[#allocation5 + $0x350] sm:$0xf0]  ;;  %v11197_v47 = vor.u32 %v15664_v16, %v11194_v12  ;;  %v11557_v16 = vor.u32 %v15754_v59, %v11554_v62  ;;  %v15652_v12 = vld [vmem:[#allocation5 + $0x18c] sm:$0xf]  ;;  %v15982_v59 = vld [vmem:[#allocation5 + $0xbdc] sm:$0xf] }
 0x29f   : > { %8974 = vmatpush.bf16.msra.mxu3 %v11653_v36  ;;  %v8601_v37 = vpop.f32.mrf.mxu3  ;;  %v8583_v20 = vadd.f32 %v8582_v31, %v8564_v34  ;;  %v8546_v63 = vpop.f32.mrf.mxu0  ;;  %v11221_v36 = vor.u32 %v15670_v3, %v11218_v52  ;;  %v11578_v31 = vld [vmem:[#allocation5 + $0x500] sm:$0xf0]  ;;  %v11170_v52 = vld [vmem:[#allocation5 + $0x1d0] sm:$0xf0] }
 0x2a0   : > { %v8565_v38 = vpop.f32.mrf.mxu1  ;;  %v8547_v58 = vadd.f32 %v8546_v63, %v17694_v25  ;;  %8918 = vmatpush.bf16.msra.mxu0 %v11053_v27  ;;  %v11389_v25 = vor.u32 %v15712_v43, %v11386_v7  ;;  %v15706_v27 = vld [vmem:[#allocation5 + $0x33c] sm:$0xf]  ;;  %v11338_v7 = vld [vmem:[#allocation5 + $0x320] sm:$0xf0]  ;;  %v12466_v62 = vld [vmem:[#allocation5 + $0xbf0] sm:$0xf0] }
 0x2a1   : > { %v17711_v55 = vadd.f32 %v8601_v37, %v8583_v20  ;;  %8937 = vmatpush.bf16.msra.mxu1 %v11245_v2  ;;  %v11581_v2 = vor.u32 %v15760_v21, %v11578_v31  ;;  %v15748_v21 = vld [vmem:[#allocation5 + $0x48c] sm:$0xf] }
 0x2a2   : > { %8956 = vmatpush.bf16.msra.mxu2 %v11437_v33  ;;  %v8566_v34 = vadd.f32 %v8565_v38, %v8547_v58  ;;  %v11005_v33 = vor.u32 %v15616_v15, %v11002_v61  ;;  %v15700_v58 = vld [vmem:[#allocation5 + $0x30c] sm:$0xf]  ;;  %v11173_v61 = vor.u32 %v15658_v11, %v11170_v52  ;;  %v12082_v52 = vld [vmem:[#allocation5 + $0x8f0] sm:$0xf0] }
 0x2a3   : > { %8975 = vmatpush.bf16.msra.mxu3 %v11629_v35  ;;  %v15610_v35 = vld [vmem:[#allocation5 + $0x3c] sm:$0xf]  ;;  %v11341_v11 = vor.u32 %v15700_v58, %v11338_v7  ;;  %v15832_v58 = vld [vmem:[#allocation5 + $0x72c] sm:$0xf]  ;;  %v11866_v7 = vld [vmem:[#allocation5 + $0x740] sm:$0xf0] }
 0x2a4   : > { %8919 = vmatpush.bf16.msra.mxu0 %v11029_v41  ;;  %v11365_v41 = vor.u32 %v15706_v27, %v11362_v26  ;;  %v10981_v43 = vor.u32 %v15610_v35, %v10978_v32  ;;  %v12274_v27 = vld [vmem:[#allocation5 + $0xa70] sm:$0xf0]  ;;  %v18652_v26 = vld [vmem:[#allocation35_spill] sm:$0xff]  ;;  %v18653_v35 = vld [vmem:[#allocation36_spill] sm:$0xff] }
 0x2a5   : > { %8938 = vmatpush.bf16.msra.mxu1 %v11221_v36  ;;  %v15604_v36 = vld [vmem:[#allocation5 + $0xc] sm:$0xf]  ;;  %v15838_v32 = vld [vmem:[#allocation5 + $0x75c] sm:$0xf] }
 0x2a6   : > { %8957 = vmatpush.bf16.msra.mxu2 %v11413_v30  ;;  %v8584_v3 = vpop.f32.mrf.mxu2 }
 0x2a7   : > { %8976 = vmatpush.bf16.msra.mxu3 %v11605_v22  ;;  %v8603_v37 = vpop.f32.mrf.mxu3  ;;  %v8585_v20 = vadd.f32 %v8584_v3, %v8566_v34  ;;  %v8549_v63 = vpop.f32.mrf.mxu0  ;;  %v10954_v22 = vld [vmem:[#allocation5 + $0x20] sm:$0xf0]  ;;  %v18650_v3 = vld [vmem:[#allocation33_spill] sm:$0xff] }
 0x2a8   : > { %v8568_v38 = vpop.f32.mrf.mxu1  ;;  %v8550_v30 = vadd.f32 %v8549_v63, %v17701_v19  ;;  %8920 = vmatpush.bf16.msra.mxu0 %v11005_v33  ;;  %v11146_v34 = vld [vmem:[#allocation5 + $0x1a0] sm:$0xf0]  ;;  %v18651_v19 = vld [vmem:[#allocation34_spill] sm:$0xff] }
 0x2a9   : > { %v17714_v15 = vadd.f32 %v8603_v37, %v8585_v20  ;;  %8939 = vmatpush.bf16.msra.mxu1 %v11197_v47  ;;  %8852 = vmatmul.bf16.gmra.mxu0 %v18650_v3  ;;  %v15934_v33 = vld [vmem:[#allocation5 + $0xa5c] sm:$0xf]  ;;  %v11890_v47 = vld [vmem:[#allocation5 + $0x770] sm:$0xf0]  ;;  %v10957_v37 = vor.u32 %v15604_v36, %v10954_v22  ;;  %v11149_v20 = vor.u32 %v15652_v12, %v11146_v34  ;;  %v15928_v3 = vld [vmem:[#allocation5 + $0xa2c] sm:$0xf] }
 0x2aa   : > { %8958 = vmatpush.bf16.msra.mxu2 %v11389_v25  ;;  %v8569_v31 = vadd.f32 %v8568_v38, %v8550_v30  ;;  %8871 = vmatmul.bf16.gmra.mxu1 %v18651_v19  ;;  %v11530_v25 = vld [vmem:[#allocation5 + $0x4a0] sm:$0xf0]  ;;  %v12277_v19 = vor.u32 %v15934_v33, %v12274_v27  ;;  %v15880_v36 = vld [vmem:[#allocation5 + $0x8ac] sm:$0xf] }
 0x2ab   : > { %8977 = vmatpush.bf16.msra.mxu3 %v11581_v2  ;;  %8890 = vmatmul.bf16.gmra.mxu2 %v18652_v26  ;;  %v15886_v2 = vld [vmem:[#allocation5 + $0x8dc] sm:$0xf]  ;;  %v11533_v63 = vor.u32 %v15748_v21, %v11530_v25  ;;  %v11893_v26 = vor.u32 %v15838_v32, %v11890_v47  ;;  %v12442_v12 = vld [vmem:[#allocation5 + $0xbc0] sm:$0xf0]  ;;  %v11869_v25 = vor.u32 %v15832_v58, %v11866_v7  ;;  %v11842_v47 = vld [vmem:[#allocation5 + $0x710] sm:$0xf0] }
 0x2ac   : > { %8909 = vmatmul.bf16.gmra.mxu3 %v18653_v35  ;;  %8921 = vmatpush.bf16.msra.mxu0 %v10981_v43  ;;  %v12250_v35 = vld [vmem:[#allocation5 + $0xa40] sm:$0xf0]  ;;  %v12469_v43 = vor.u32 %v15982_v59, %v12466_v62  ;;  %v15922_v32 = vld [vmem:[#allocation5 + $0x9fc] sm:$0xf]  ;;  %v15868_v7 = vld [vmem:[#allocation5 + $0x84c] sm:$0xf] }
 0x2ad   : > { %8940 = vmatpush.bf16.msra.mxu1 %v11173_v61  ;;  %v12058_v61 = vld [vmem:[#allocation5 + $0x8c0] sm:$0xf0] }
 0x2ae   : > { %8959 = vmatpush.bf16.msra.mxu2 %v11365_v41  ;;  %v8587_v38 = vpop.f32.mrf.mxu2  ;;  %v12085_v41 = vor.u32 %v15886_v2, %v12082_v52  ;;  %v12061_v33 = vor.u32 %v15880_v36, %v12058_v61  ;;  %v15874_v2 = vld [vmem:[#allocation5 + $0x87c] sm:$0xf]  ;;  %v11818_v58 = vld [vmem:[#allocation5 + $0x6e0] sm:$0xf0]  ;;  %v15964_v61 = vld [vmem:[#allocation5 + $0xb4c] sm:$0xf] }
 0x2af   : > { %8978 = vmatpush.bf16.msra.mxu3 %v11557_v16  ;;  %v8606_v30 = vpop.f32.mrf.mxu3  ;;  %v8588_v4 = vadd.f32 %v8587_v38, %v8569_v31  ;;  %v8551_v10 = vpop.f32.mrf.mxu0  ;;  %v15976_v16 = vld [vmem:[#allocation5 + $0xbac] sm:$0xf]  ;;  %v12253_v31 = vor.u32 %v15928_v3, %v12250_v35  ;;  %v15970_v52 = vld [vmem:[#allocation5 + $0xb7c] sm:$0xf] }
 0x2b0   : > { %v8570_v42 = vpop.f32.mrf.mxu1  ;;  %v8552_v22 = vadd.f32 %v8551_v10, %v17704_v49  ;;  %8922 = vmatpush.bf16.msra.mxu0 %v10957_v37  ;;  %v12445_v27 = vor.u32 %v15976_v16, %v12442_v12  ;;  %v12226_v49 = vld [vmem:[#allocation5 + $0xa10] sm:$0xf0]  ;;  %v15826_v10 = vld [vmem:[#allocation5 + $0x6fc] sm:$0xf]  ;;  %v12394_v16 = vld [vmem:[#allocation5 + $0xb60] sm:$0xf0] }
 0x2b1   : > { %v17721_v34 = vadd.f32 %v8606_v30, %v8588_v4  ;;  %8941 = vmatpush.bf16.msra.mxu1 %v11149_v20  ;;  %v12034_v4 = vld [vmem:[#allocation5 + $0x890] sm:$0xf0]  ;;  %v12229_v59 = vor.u32 %v15922_v32, %v12226_v49  ;;  %v11845_v62 = vor.u32 %v15826_v10, %v11842_v47  ;;  %v15916_v20 = vld [vmem:[#allocation5 + $0x9cc] sm:$0xf]  ;;  %v15862_v49 = vld [vmem:[#allocation5 + $0x81c] sm:$0xf] }
 0x2b2   : > { %8960 = vmatpush.bf16.msra.mxu2 %v11341_v11  ;;  %v8571_v21 = vadd.f32 %v8570_v42, %v8552_v22  ;;  %v12418_v42 = vld [vmem:[#allocation5 + $0xb90] sm:$0xf0]  ;;  %v12037_v30 = vor.u32 %v15874_v2, %v12034_v4  ;;  %v12010_v22 = vld [vmem:[#allocation5 + $0x860] sm:$0xf0] }
 0x2b3   : > { %8979 = vmatpush.bf16.msra.mxu3 %v11533_v63  ;;  %v12202_v63 = vld [vmem:[#allocation5 + $0x9e0] sm:$0xf0]  ;;  %v11794_v32 = vld [vmem:[#allocation5 + $0x6b0] sm:$0xf0] }
 0x2b4   : > { %8991 = vmatpush.bf16.msrb.mxu0 %v11893_v26  ;;  %v11986_v2 = vld [vmem:[#allocation5 + $0x830] sm:$0xf0] }
 0x2b5   : > { %9010 = vmatpush.bf16.msrb.mxu1 %v12085_v41  ;;  %v12421_v41 = vor.u32 %v15970_v52, %v12418_v42 }
 0x2b6   : > { %9029 = vmatpush.bf16.msrb.mxu2 %v12277_v19  ;;  %v8589_v11 = vpop.f32.mrf.mxu2 }
 0x2b7   : > { %9048 = vmatpush.bf16.msrb.mxu3 %v12469_v43  ;;  %v8608_v37 = vpop.f32.mrf.mxu3  ;;  %v8590_v19 = vadd.f32 %v8589_v11, %v8571_v21  ;;  %v8620_v26 = vpop.f32.mrf.mxu0  ;;  %v15820_v43 = vld [vmem:[#allocation5 + $0x6cc] sm:$0xf]  ;;  %v15910_v21 = vld [vmem:[#allocation5 + $0x99c] sm:$0xf] }
 0x2b8   : > { %8992 = vmatpush.bf16.msrb.mxu0 %v11869_v25  ;;  %v8639_v3 = vpop.f32.mrf.mxu1  ;;  %v8621_v35 = vadd.f32 %v8620_v26, %v17711_v55  ;;  %v12205_v55 = vor.u32 %v15916_v20, %v12202_v63  ;;  %v11821_v12 = vor.u32 %v15820_v43, %v11818_v58  ;;  %v12013_v25 = vor.u32 %v15868_v7, %v12010_v22  ;;  %v15958_v11 = vld [vmem:[#allocation5 + $0xb1c] sm:$0xf]  ;;  %v15856_v43 = vld [vmem:[#allocation5 + $0x7ec] sm:$0xf]  ;;  %v11962_v7 = vld [vmem:[#allocation5 + $0x800] sm:$0xf0] }
 0x2b9   : > { %9011 = vmatpush.bf16.msrb.mxu1 %v12061_v33  ;;  %v17724_v38 = vadd.f32 %v8608_v37, %v8590_v19  ;;  %8923 = vmatmul.bf16.vlgmr.msra.gmra.mxu0 %v17214_v48  ;;  %v12397_v33 = vor.u32 %v15964_v61, %v12394_v16  ;;  %v12370_v37 = vld [vmem:[#allocation5 + $0xb30] sm:$0xf0]  ;;  %v11989_v20 = vor.u32 %v15862_v49, %v11986_v2  ;;  %v12346_v22 = vld [vmem:[#allocation5 + $0xb00] sm:$0xf0]  ;;  %v15898_v16 = vld [vmem:[#allocation5 + $0x93c] sm:$0xf] }
 0x2ba   : > { %9030 = vmatpush.bf16.msrb.mxu2 %v12253_v31  ;;  %v8640_v36 = vadd.f32 %v8639_v3, %v8621_v35  ;;  %8942 = vmatmul.bf16.vlgmr.msra.gmra.mxu1 %v17216_v53  ;;  %v12178_v31 = vld [vmem:[#allocation5 + $0x9b0] sm:$0xf0]  ;;  %v15904_v35 = vld [vmem:[#allocation5 + $0x96c] sm:$0xf]  ;;  %v12373_v63 = vor.u32 %v15958_v11, %v12370_v37 }
 0x2bb   : > { %9049 = vmatpush.bf16.msrb.mxu3 %v12445_v27  ;;  %8961 = vmatmul.bf16.vlgmr.msra.gmra.mxu2 %v17218_v54  ;;  %v15814_v27 = vld [vmem:[#allocation5 + $0x69c] sm:$0xf]  ;;  %v12181_v26 = vor.u32 %v15910_v21, %v12178_v31  ;;  %v11938_v49 = vld [vmem:[#allocation5 + $0x7d0] sm:$0xf0] }
 0x2bc   : > { %8980 = vmatmul.bf16.vlgmr.msra.gmra.mxu3 %v17220_v57  ;;  %8993 = vmatpush.bf16.msrb.mxu0 %v11845_v62  ;;  %v11797_v3 = vor.u32 %v15814_v27, %v11794_v32  ;;  %v15802_v31 = vld [vmem:[#allocation5 + $0x63c] sm:$0xf] }
 0x2bd   : > { %9012 = vmatpush.bf16.msrb.mxu1 %v12037_v30  ;;  %v15808_v30 = vld [vmem:[#allocation5 + $0x66c] sm:$0xf] }
 0x2be   : > { %9031 = vmatpush.bf16.msrb.mxu2 %v12229_v59  ;;  %v8658_v10 = vpop.f32.mrf.mxu2  ;;  %v12154_v59 = vld [vmem:[#allocation5 + $0x980] sm:$0xf0] }
 0x2bf   : > { %9050 = vmatpush.bf16.msrb.mxu3 %v12421_v41  ;;  %v8677_v47 = vpop.f32.mrf.mxu3  ;;  %v8659_v4 = vadd.f32 %v8658_v10, %v8640_v36  ;;  %v8622_v52 = vpop.f32.mrf.mxu0  ;;  %v11770_v41 = vld [vmem:[#allocation5 + $0x680] sm:$0xf0]  ;;  %v15952_v36 = vld [vmem:[#allocation5 + $0xaec] sm:$0xf]  ;;  %v15946_v10 = vld [vmem:[#allocation5 + $0xabc] sm:$0xf] }
 0x2c0   : > { %v8641_v42 = vpop.f32.mrf.mxu1  ;;  %v8623_v19 = vadd.f32 %v8622_v52, %v17714_v15  ;;  %8994 = vmatpush.bf16.msrb.mxu0 %v11821_v12  ;;  %v12157_v15 = vor.u32 %v15904_v35, %v12154_v59  ;;  %v11773_v61 = vor.u32 %v15808_v30, %v11770_v41  ;;  %v11965_v12 = vor.u32 %v15856_v43, %v11962_v7  ;;  %v11722_v35 = vld [vmem:[#allocation5 + $0x620] sm:$0xf0]  ;;  %v15844_v30 = vld [vmem:[#allocation5 + $0x78c] sm:$0xf]  ;;  %v16126_v7 = vld [vmem:[#allocation5 + $0x105c] sm:$0xf] }
 0x2c1   : > { %v17731_v62 = vadd.f32 %v8677_v47, %v8659_v4  ;;  %9013 = vmatpush.bf16.msrb.mxu1 %v12013_v25  ;;  %v12349_v21 = vor.u32 %v15952_v36, %v12346_v22  ;;  %v11746_v25 = vld [vmem:[#allocation5 + $0x650] sm:$0xf0]  ;;  %v15892_v4 = vld [vmem:[#allocation5 + $0x90c] sm:$0xf]  ;;  %v11914_v41 = vld [vmem:[#allocation5 + $0x7a0] sm:$0xf0] }
 0x2c2   : > { %9032 = vmatpush.bf16.msrb.mxu2 %v12205_v55  ;;  %v8642_v58 = vadd.f32 %v8641_v42, %v8623_v19  ;;  %v12130_v55 = vld [vmem:[#allocation5 + $0x950] sm:$0xf0]  ;;  %v11749_v19 = vor.u32 %v15802_v31, %v11746_v25  ;;  %v15940_v43 = vld [vmem:[#allocation5 + $0xa8c] sm:$0xf]  ;;  %v16030_v22 = vld [vmem:[#allocation5 + $0xd5c] sm:$0xf]  ;;  %v11917_v25 = vor.u32 %v15844_v30, %v11914_v41 }
 0x2c3   : > { %9051 = vmatpush.bf16.msrb.mxu3 %v12397_v33  ;;  %v15850_v33 = vld [vmem:[#allocation5 + $0x7bc] sm:$0xf]  ;;  %v12322_v47 = vld [vmem:[#allocation5 + $0xad0] sm:$0xf0]  ;;  %v12133_v42 = vor.u32 %v15898_v16, %v12130_v55  ;;  %v13210_v30 = vld [vmem:[#allocation5 + $0x11c0] sm:$0xf0] }
 0x2c4   : > { %8995 = vmatpush.bf16.msrb.mxu0 %v11797_v3  ;;  %v15796_v3 = vld [vmem:[#allocation5 + $0x60c] sm:$0xf]  ;;  %v13042_v36 = vld [vmem:[#allocation5 + $0x1070] sm:$0xf0] }
 0x2c5   : > { %9014 = vmatpush.bf16.msrb.mxu1 %v11989_v20  ;;  %v11941_v20 = vor.u32 %v15850_v33, %v11938_v49  ;;  %v11725_v55 = vor.u32 %v15796_v3, %v11722_v35  ;;  %v13234_v31 = vld [vmem:[#allocation5 + $0x11f0] sm:$0xf0]  ;;  %v13045_v49 = vor.u32 %v16126_v7, %v13042_v36  ;;  %v16072_v3 = vld [vmem:[#allocation5 + $0xeac] sm:$0xf] }
 0x2c6   : > { %9033 = vmatpush.bf16.msrb.mxu2 %v12181_v26  ;;  %v8660_v27 = vpop.f32.mrf.mxu2  ;;  %v12106_v26 = vld [vmem:[#allocation5 + $0x920] sm:$0xf0] }
 0x2c7   : > { %9052 = vmatpush.bf16.msrb.mxu3 %v12373_v63  ;;  %v8679_v32 = vpop.f32.mrf.mxu3  ;;  %v8661_v2 = vadd.f32 %v8660_v27, %v8642_v58  ;;  %v8625_v11 = vpop.f32.mrf.mxu0  ;;  %v12325_v63 = vor.u32 %v15946_v10, %v12322_v47  ;;  %v12109_v16 = vor.u32 %v15892_v4, %v12106_v26  ;;  %v16120_v47 = vld [vmem:[#allocation5 + $0x102c] sm:$0xf]  ;;  %v12634_v26 = vld [vmem:[#allocation5 + $0xd40] sm:$0xf0] }
 0x2c8   : > { %v8644_v37 = vpop.f32.mrf.mxu1  ;;  %v8626_v52 = vadd.f32 %v8625_v11, %v17721_v34  ;;  %8996 = vmatpush.bf16.msrb.mxu0 %v11773_v61  ;;  %v12298_v34 = vld [vmem:[#allocation5 + $0xaa0] sm:$0xf0]  ;;  %v16078_v61 = vld [vmem:[#allocation5 + $0xedc] sm:$0xf]  ;;  %v16024_v4 = vld [vmem:[#allocation5 + $0xd2c] sm:$0xf] }
 0x2c9   : > { %v17734_v59 = vadd.f32 %v8679_v32, %v8661_v2  ;;  %9015 = vmatpush.bf16.msrb.mxu1 %v11965_v12  ;;  %8928 = vmatmul.bf16.gmra.mxu0 %v17234_v44  ;;  %v12850_v12 = vld [vmem:[#allocation5 + $0xef0] sm:$0xf0]  ;;  %v12301_v33 = vor.u32 %v15940_v43, %v12298_v34  ;;  %v13018_v2 = vld [vmem:[#allocation5 + $0x1040] sm:$0xf0]  ;;  %v12637_v34 = vor.u32 %v16024_v4, %v12634_v26  ;;  %v16060_v26 = vld [vmem:[#allocation5 + $0xe4c] sm:$0xf] }
 0x2ca   : > { %9034 = vmatpush.bf16.msrb.mxu2 %v12157_v15  ;;  %v8645_v58 = vadd.f32 %v8644_v37, %v8626_v52  ;;  %8947 = vmatmul.bf16.gmra.mxu1 %v17236_v50  ;;  %v12658_v15 = vld [vmem:[#allocation5 + $0xd70] sm:$0xf0]  ;;  %v12586_v4 = vld [vmem:[#allocation5 + $0xce0] sm:$0xf0] }
 0x2cb   : > { %9053 = vmatpush.bf16.msrb.mxu3 %v12349_v21  ;;  %8966 = vmatmul.bf16.gmra.mxu2 %v17238_v51  ;;  %v16174_v21 = vld [vmem:[#allocation5 + $0x11dc] sm:$0xf]  ;;  %v12661_v10 = vor.u32 %v16030_v22, %v12658_v15 }
 0x2cc   : > { %8985 = vmatmul.bf16.gmra.mxu3 %v17240_v56  ;;  %8997 = vmatpush.bf16.msrb.mxu0 %v11749_v19  ;;  %v13237_v19 = vor.u32 %v16174_v21, %v13234_v31  ;;  %v16114_v22 = vld [vmem:[#allocation5 + $0xffc] sm:$0xf]  ;;  %v12802_v21 = vld [vmem:[#allocation5 + $0xe90] sm:$0xf0] }
 0x2cd   : > { %9016 = vmatpush.bf16.msrb.mxu1 %v11941_v20  ;;  %v12826_v20 = vld [vmem:[#allocation5 + $0xec0] sm:$0xf0]  ;;  %v16018_v15 = vld [vmem:[#allocation5 + $0xcfc] sm:$0xf] }
 0x2ce   : > { %9035 = vmatpush.bf16.msrb.mxu2 %v12133_v42  ;;  %v8663_v27 = vpop.f32.mrf.mxu2  ;;  %v12853_v42 = vor.u32 %v16078_v61, %v12850_v12  ;;  %v12829_v7 = vor.u32 %v16072_v3, %v12826_v20  ;;  %v12610_v61 = vld [vmem:[#allocation5 + $0xd10] sm:$0xf0]  ;;  %v16162_v31 = vld [vmem:[#allocation5 + $0x117c] sm:$0xf]  ;;  %v16156_v20 = vld [vmem:[#allocation5 + $0x114c] sm:$0xf] }
 0x2cf   : > { %9054 = vmatpush.bf16.msrb.mxu3 %v12325_v63  ;;  %v8682_v32 = vpop.f32.mrf.mxu3  ;;  %v8664_v11 = vadd.f32 %v8663_v27, %v8645_v58  ;;  %v8627_v37 = vpop.f32.mrf.mxu0  ;;  %v16168_v63 = vld [vmem:[#allocation5 + $0x11ac] sm:$0xf]  ;;  %v13021_v58 = vor.u32 %v16120_v47, %v13018_v2  ;;  %v12613_v47 = vor.u32 %v16018_v15, %v12610_v61 }
 0x2d0   : > { %v8646_v52 = vpop.f32.mrf.mxu1  ;;  %v8628_v35 = vadd.f32 %v8627_v37, %v17724_v38  ;;  %8998 = vmatpush.bf16.msrb.mxu0 %v11725_v55  ;;  %v13213_v36 = vor.u32 %v16168_v63, %v13210_v30  ;;  %v12994_v38 = vld [vmem:[#allocation5 + $0x1010] sm:$0xf0]  ;;  %v16108_v2 = vld [vmem:[#allocation5 + $0xfcc] sm:$0xf]  ;;  %v13162_v63 = vld [vmem:[#allocation5 + $0x1160] sm:$0xf0] }
 0x2d1   : > { %v17741_v41 = vadd.f32 %v8682_v32, %v8664_v11  ;;  %9017 = vmatpush.bf16.msrb.mxu1 %v11917_v25  ;;  %v13186_v25 = vld [vmem:[#allocation5 + $0x1190] sm:$0xf0]  ;;  %v12970_v11 = vld [vmem:[#allocation5 + $0xfe0] sm:$0xf0] }
 0x2d2   : > { %9036 = vmatpush.bf16.msrb.mxu2 %v12109_v16  ;;  %v8647_v43 = vadd.f32 %v8646_v52, %v8628_v35  ;;  %v16066_v16 = vld [vmem:[#allocation5 + $0xe7c] sm:$0xf]  ;;  %v12778_v35 = vld [vmem:[#allocation5 + $0xe60] sm:$0xf0] }
 0x2d3   : > { %9055 = vmatpush.bf16.msrb.mxu3 %v12301_v33  ;;  %v12805_v52 = vor.u32 %v16066_v16, %v12802_v21  ;;  %v12754_v16 = vld [vmem:[#allocation5 + $0xe30] sm:$0xf0] }
 0x2d4   : > { %9067 = vmatpush.bf16.msra.mxu0 %v12661_v10  ;;  %v12997_v10 = vor.u32 %v16114_v22, %v12994_v38  ;;  %v12562_v22 = vld [vmem:[#allocation5 + $0xcb0] sm:$0xf0]  ;;  %v16054_v38 = vld [vmem:[#allocation5 + $0xe1c] sm:$0xf] }
 0x2d5   : > { %9086 = vmatpush.bf16.msra.mxu1 %v12853_v42  ;;  %v13189_v42 = vor.u32 %v16162_v31, %v13186_v25 }
 0x2d6   : > { %9105 = vmatpush.bf16.msra.mxu2 %v13045_v49  ;;  %v8665_v55 = vpop.f32.mrf.mxu2 }
 0x2d7   : > { %9124 = vmatpush.bf16.msra.mxu3 %v13237_v19  ;;  %v8684_v12 = vpop.f32.mrf.mxu3  ;;  %v8666_v33 = vadd.f32 %v8665_v55, %v8647_v43  ;;  %v8696_v27 = vpop.f32.mrf.mxu0  ;;  %v16012_v19 = vld [vmem:[#allocation5 + $0xccc] sm:$0xf]  ;;  %v16102_v43 = vld [vmem:[#allocation5 + $0xf9c] sm:$0xf] }
 0x2d8   : > { %9068 = vmatpush.bf16.msra.mxu0 %v12637_v34  ;;  %v8715_v32 = vpop.f32.mrf.mxu1  ;;  %v8697_v49 = vadd.f32 %v8696_v27, %v17731_v62  ;;  %v12973_v62 = vor.u32 %v16108_v2, %v12970_v11  ;;  %v12589_v30 = vor.u32 %v16012_v19, %v12586_v4  ;;  %v12781_v34 = vor.u32 %v16060_v26, %v12778_v35  ;;  %v16150_v55 = vld [vmem:[#allocation5 + $0x111c] sm:$0xf]  ;;  %v16048_v19 = vld [vmem:[#allocation5 + $0xdec] sm:$0xf]  ;;  %v12730_v26 = vld [vmem:[#allocation5 + $0xe00] sm:$0xf0] }
 0x2d9   : > { %9087 = vmatpush.bf16.msra.mxu1 %v12829_v7  ;;  %v17744_v37 = vadd.f32 %v8684_v12, %v8666_v33  ;;  %8999 = vmatmul.bf16.vlgmr.msrb.gmra.mxu0 %v17254_v0  ;;  %v13165_v7 = vor.u32 %v16156_v20, %v13162_v63  ;;  %v13138_v12 = vld [vmem:[#allocation5 + $0x1130] sm:$0xf0]  ;;  %v12757_v2 = vor.u32 %v16054_v38, %v12754_v16  ;;  %v13114_v35 = vld [vmem:[#allocation5 + $0x1100] sm:$0xf0]  ;;  %v16090_v63 = vld [vmem:[#allocation5 + $0xf3c] sm:$0xf] }
 0x2da   : > { %9106 = vmatpush.bf16.msra.mxu2 %v13021_v58  ;;  %v8716_v3 = vadd.f32 %v8715_v32, %v8697_v49  ;;  %9018 = vmatmul.bf16.vlgmr.msrb.gmra.mxu1 %v17256_v1  ;;  %v12946_v58 = vld [vmem:[#allocation5 + $0xfb0] sm:$0xf0]  ;;  %v16096_v49 = vld [vmem:[#allocation5 + $0xf6c] sm:$0xf]  ;;  %v13141_v11 = vor.u32 %v16150_v55, %v13138_v12 }
 0x2db   : > { %9125 = vmatpush.bf16.msra.mxu3 %v13213_v36  ;;  %9037 = vmatmul.bf16.vlgmr.msrb.gmra.mxu2 %v17258_v5  ;;  %v16006_v36 = vld [vmem:[#allocation5 + $0xc9c] sm:$0xf]  ;;  %v12949_v27 = vor.u32 %v16102_v43, %v12946_v58  ;;  %v12706_v38 = vld [vmem:[#allocation5 + $0xdd0] sm:$0xf0] }
 0x2dc   : > { %9056 = vmatmul.bf16.vlgmr.msrb.gmra.mxu3 %v17260_v6  ;;  %9069 = vmatpush.bf16.msra.mxu0 %v12613_v47  ;;  %v12565_v32 = vor.u32 %v16006_v36, %v12562_v22  ;;  %v15994_v58 = vld [vmem:[#allocation5 + $0xc3c] sm:$0xf] }
 0x2dd   : > { %9088 = vmatpush.bf16.msra.mxu1 %v12805_v52  ;;  %v16000_v52 = vld [vmem:[#allocation5 + $0xc6c] sm:$0xf] }
 0x2de   : > { %9107 = vmatpush.bf16.msra.mxu2 %v12997_v10  ;;  %v8734_v15 = vpop.f32.mrf.mxu2  ;;  %v12922_v10 = vld [vmem:[#allocation5 + $0xf80] sm:$0xf0] }
 0x2df   : > { %9126 = vmatpush.bf16.msra.mxu3 %v13189_v42  ;;  %v8753_v61 = vpop.f32.mrf.mxu3  ;;  %v8735_v21 = vadd.f32 %v8734_v15, %v8716_v3  ;;  %v8698_v31 = vpop.f32.mrf.mxu0  ;;  %v12538_v42 = vld [vmem:[#allocation5 + $0xc80] sm:$0xf0]  ;;  %v16144_v3 = vld [vmem:[#allocation5 + $0x10ec] sm:$0xf]  ;;  %v16138_v15 = vld [vmem:[#allocation5 + $0x10bc] sm:$0xf] }
 0x2e0   : > { %v8717_v25 = vpop.f32.mrf.mxu1  ;;  %v8699_v33 = vadd.f32 %v8698_v31, %v17734_v59  ;;  %9070 = vmatpush.bf16.msra.mxu0 %v12589_v30  ;;  %v12925_v59 = vor.u32 %v16096_v49, %v12922_v10  ;;  %v12541_v20 = vor.u32 %v16000_v52, %v12538_v42  ;;  %v12733_v30 = vor.u32 %v16048_v19, %v12730_v26  ;;  %v12490_v49 = vld [vmem:[#allocation5 + $0xc20] sm:$0xf0]  ;;  %v16036_v52 = vld [vmem:[#allocation5 + $0xd8c] sm:$0xf]  ;;  %v16318_v26 = vld [vmem:[#allocation5 + $0x165c] sm:$0xf] }
 0x2e1   : > { %v17751_v47 = vadd.f32 %v8753_v61, %v8735_v21  ;;  %9089 = vmatpush.bf16.msra.mxu1 %v12781_v34  ;;  %v13117_v43 = vor.u32 %v16144_v3, %v13114_v35  ;;  %v12514_v34 = vld [vmem:[#allocation5 + $0xc50] sm:$0xf0]  ;;  %v16084_v21 = vld [vmem:[#allocation5 + $0xf0c] sm:$0xf]  ;;  %v12682_v42 = vld [vmem:[#allocation5 + $0xda0] sm:$0xf0] }
 0x2e2   : > { %9108 = vmatpush.bf16.msra.mxu2 %v12973_v62  ;;  %v8718_v4 = vadd.f32 %v8717_v25, %v8699_v33  ;;  %v12898_v62 = vld [vmem:[#allocation5 + $0xf50] sm:$0xf0]  ;;  %v12517_v33 = vor.u32 %v15994_v58, %v12514_v34  ;;  %v16132_v19 = vld [vmem:[#allocation5 + $0x108c] sm:$0xf]  ;;  %v16222_v35 = vld [vmem:[#allocation5 + $0x135c] sm:$0xf]  ;;  %v12685_v34 = vor.u32 %v16036_v52, %v12682_v42 }
 0x2e3   : > { %9127 = vmatpush.bf16.msra.mxu3 %v13165_v7  ;;  %v16042_v7 = vld [vmem:[#allocation5 + $0xdbc] sm:$0xf]  ;;  %v13090_v61 = vld [vmem:[#allocation5 + $0x10d0] sm:$0xf0]  ;;  %v12901_v25 = vor.u32 %v16090_v63, %v12898_v62  ;;  %v13978_v52 = vld [vmem:[#allocation5 + $0x17c0] sm:$0xf0] }
 0x2e4   : > { %9071 = vmatpush.bf16.msra.mxu0 %v12565_v32  ;;  %v15988_v32 = vld [vmem:[#allocation5 + $0xc0c] sm:$0xf]  ;;  %v13810_v3 = vld [vmem:[#allocation5 + $0x1670] sm:$0xf0] }
 0x2e5   : > { %9090 = vmatpush.bf16.msra.mxu1 %v12757_v2  ;;  %v12709_v2 = vor.u32 %v16042_v7, %v12706_v38  ;;  %v12493_v62 = vor.u32 %v15988_v32, %v12490_v49  ;;  %v14002_v58 = vld [vmem:[#allocation5 + $0x17f0] sm:$0xf0]  ;;  %v13813_v38 = vor.u32 %v16318_v26, %v13810_v3  ;;  %v16264_v32 = vld [vmem:[#allocation5 + $0x14ac] sm:$0xf] }
 0x2e6   : > { %9109 = vmatpush.bf16.msra.mxu2 %v12949_v27  ;;  %v8736_v36 = vpop.f32.mrf.mxu2  ;;  %v12874_v27 = vld [vmem:[#allocation5 + $0xf20] sm:$0xf0] }
 0x2e7   : > { %9128 = vmatpush.bf16.msra.mxu3 %v13141_v11  ;;  %v8755_v22 = vpop.f32.mrf.mxu3  ;;  %v8737_v16 = vadd.f32 %v8736_v36, %v8718_v4  ;;  %v8701_v55 = vpop.f32.mrf.mxu0  ;;  %v13093_v11 = vor.u32 %v16138_v15, %v13090_v61  ;;  %v12877_v63 = vor.u32 %v16084_v21, %v12874_v27  ;;  %v16312_v61 = vld [vmem:[#allocation5 + $0x162c] sm:$0xf]  ;;  %v13402_v27 = vld [vmem:[#allocation5 + $0x1340] sm:$0xf0] }
 0x2e8   : > { %v8720_v12 = vpop.f32.mrf.mxu1  ;;  %v8702_v31 = vadd.f32 %v8701_v55, %v17741_v41  ;;  %9072 = vmatpush.bf16.msra.mxu0 %v12541_v20  ;;  %v13066_v41 = vld [vmem:[#allocation5 + $0x10a0] sm:$0xf0]  ;;  %v16270_v20 = vld [vmem:[#allocation5 + $0x14dc] sm:$0xf]  ;;  %v16216_v21 = vld [vmem:[#allocation5 + $0x132c] sm:$0xf] }
 0x2e9   : > { %v17754_v10 = vadd.f32 %v8755_v22, %v8737_v16  ;;  %9091 = vmatpush.bf16.msra.mxu1 %v12733_v30  ;;  %9004 = vmatmul.bf16.gmra.mxu0 %v17274_v8  ;;  %v13618_v30 = vld [vmem:[#allocation5 + $0x14f0] sm:$0xf0]  ;;  %v13069_v7 = vor.u32 %v16132_v19, %v13066_v41  ;;  %v13786_v16 = vld [vmem:[#allocation5 + $0x1640] sm:$0xf0]  ;;  %v13405_v41 = vor.u32 %v16216_v21, %v13402_v27  ;;  %v16252_v27 = vld [vmem:[#allocation5 + $0x144c] sm:$0xf] }
 0x2ea   : > { %9110 = vmatpush.bf16.msra.mxu2 %v12925_v59  ;;  %v8721_v4 = vadd.f32 %v8720_v12, %v8702_v31  ;;  %9023 = vmatmul.bf16.gmra.mxu1 %v17276_v9  ;;  %v13426_v59 = vld [vmem:[#allocation5 + $0x1370] sm:$0xf0]  ;;  %v13354_v21 = vld [vmem:[#allocation5 + $0x12e0] sm:$0xf0] }
 0x2eb   : > { %9129 = vmatpush.bf16.msra.mxu3 %v13117_v43  ;;  %9042 = vmatmul.bf16.gmra.mxu2 %v17278_v13  ;;  %v16366_v43 = vld [vmem:[#allocation5 + $0x17dc] sm:$0xf]  ;;  %v13429_v15 = vor.u32 %v16222_v35, %v13426_v59 }
 0x2ec   : > { %9061 = vmatmul.bf16.gmra.mxu3 %v17280_v14  ;;  %9073 = vmatpush.bf16.msra.mxu0 %v12517_v33  ;;  %v14005_v33 = vor.u32 %v16366_v43, %v14002_v58  ;;  %v16306_v35 = vld [vmem:[#allocation5 + $0x15fc] sm:$0xf]  ;;  %v13570_v43 = vld [vmem:[#allocation5 + $0x1490] sm:$0xf0] }
 0x2ed   : > { %9092 = vmatpush.bf16.msra.mxu1 %v12709_v2  ;;  %v13594_v2 = vld [vmem:[#allocation5 + $0x14c0] sm:$0xf0]  ;;  %v16210_v59 = vld [vmem:[#allocation5 + $0x12fc] sm:$0xf] }
 0x2ee   : > { %9111 = vmatpush.bf16.msra.mxu2 %v12901_v25  ;;  %v8739_v36 = vpop.f32.mrf.mxu2  ;;  %v13621_v25 = vor.u32 %v16270_v20, %v13618_v30  ;;  %v13597_v26 = vor.u32 %v16264_v32, %v13594_v2  ;;  %v13378_v20 = vld [vmem:[#allocation5 + $0x1310] sm:$0xf0]  ;;  %v16354_v58 = vld [vmem:[#allocation5 + $0x177c] sm:$0xf]  ;;  %v16348_v2 = vld [vmem:[#allocation5 + $0x174c] sm:$0xf] }
 0x2ef   : > { %9130 = vmatpush.bf16.msra.mxu3 %v13093_v11  ;;  %v8758_v22 = vpop.f32.mrf.mxu3  ;;  %v8740_v55 = vadd.f32 %v8739_v36, %v8721_v4  ;;  %v8703_v12 = vpop.f32.mrf.mxu0  ;;  %v16360_v11 = vld [vmem:[#allocation5 + $0x17ac] sm:$0xf]  ;;  %v13789_v4 = vor.u32 %v16312_v61, %v13786_v16  ;;  %v13381_v61 = vor.u32 %v16210_v59, %v13378_v20 }
 0x2f0   : > { %v8722_v31 = vpop.f32.mrf.mxu1  ;;  %v8704_v49 = vadd.f32 %v8703_v12, %v17744_v37  ;;  %9074 = vmatpush.bf16.msra.mxu0 %v12493_v62  ;;  %v13981_v3 = vor.u32 %v16360_v11, %v13978_v52  ;;  %v13762_v37 = vld [vmem:[#allocation5 + $0x1610] sm:$0xf0]  ;;  %v16300_v16 = vld [vmem:[#allocation5 + $0x15cc] sm:$0xf]  ;;  %v13930_v11 = vld [vmem:[#allocation5 + $0x1760] sm:$0xf0] }
 0x2f1   : > { %v17761_v42 = vadd.f32 %v8758_v22, %v8740_v55  ;;  %9093 = vmatpush.bf16.msra.mxu1 %v12685_v34  ;;  %v13954_v34 = vld [vmem:[#allocation5 + $0x1790] sm:$0xf0]  ;;  %v13738_v55 = vld [vmem:[#allocation5 + $0x15e0] sm:$0xf0] }
 0x2f2   : > { %9112 = vmatpush.bf16.msra.mxu2 %v12877_v63  ;;  %v8723_v19 = vadd.f32 %v8722_v31, %v8704_v49  ;;  %v16258_v63 = vld [vmem:[#allocation5 + $0x147c] sm:$0xf]  ;;  %v13546_v49 = vld [vmem:[#allocation5 + $0x1460] sm:$0xf0] }
 0x2f3   : > { %9131 = vmatpush.bf16.msra.mxu3 %v13069_v7  ;;  %v13573_v31 = vor.u32 %v16258_v63, %v13570_v43  ;;  %v13522_v63 = vld [vmem:[#allocation5 + $0x1430] sm:$0xf0] }
 0x2f4   : > { %9143 = vmatpush.bf16.msrb.mxu0 %v13429_v15  ;;  %v13765_v15 = vor.u32 %v16306_v35, %v13762_v37  ;;  %v13330_v35 = vld [vmem:[#allocation5 + $0x12b0] sm:$0xf0]  ;;  %v16246_v37 = vld [vmem:[#allocation5 + $0x141c] sm:$0xf] }
 0x2f5   : > { %9162 = vmatpush.bf16.msrb.mxu1 %v13621_v25  ;;  %v13957_v25 = vor.u32 %v16354_v58, %v13954_v34 }
 0x2f6   : > { %9181 = vmatpush.bf16.msrb.mxu2 %v13813_v38  ;;  %v8741_v62 = vpop.f32.mrf.mxu2 }
 0x2f7   : > { %9200 = vmatpush.bf16.msrb.mxu3 %v14005_v33  ;;  %v8760_v30 = vpop.f32.mrf.mxu3  ;;  %v8742_v7 = vadd.f32 %v8741_v62, %v8723_v19  ;;  %v8772_v36 = vpop.f32.mrf.mxu0  ;;  %v16204_v33 = vld [vmem:[#allocation5 + $0x12cc] sm:$0xf]  ;;  %v16294_v19 = vld [vmem:[#allocation5 + $0x159c] sm:$0xf] }
 0x2f8   : > { %9144 = vmatpush.bf16.msrb.mxu0 %v13405_v41  ;;  %v8791_v22 = vpop.f32.mrf.mxu1  ;;  %v8773_v38 = vadd.f32 %v8772_v36, %v17751_v47  ;;  %v13741_v47 = vor.u32 %v16300_v16, %v13738_v55  ;;  %v13357_v52 = vor.u32 %v16204_v33, %v13354_v21  ;;  %v13549_v41 = vor.u32 %v16252_v27, %v13546_v49  ;;  %v16342_v62 = vld [vmem:[#allocation5 + $0x171c] sm:$0xf]  ;;  %v16240_v33 = vld [vmem:[#allocation5 + $0x13ec] sm:$0xf]  ;;  %v13498_v27 = vld [vmem:[#allocation5 + $0x1400] sm:$0xf0] }
 0x2f9   : > { %9163 = vmatpush.bf16.msrb.mxu1 %v13597_v26  ;;  %v17764_v12 = vadd.f32 %v8760_v30, %v8742_v7  ;;  %9075 = vmatmul.bf16.vlgmr.msra.gmra.mxu0 %v17294_v23  ;;  %v13933_v26 = vor.u32 %v16348_v2, %v13930_v11  ;;  %v13906_v30 = vld [vmem:[#allocation5 + $0x1730] sm:$0xf0]  ;;  %v13525_v16 = vor.u32 %v16246_v37, %v13522_v63  ;;  %v13882_v49 = vld [vmem:[#allocation5 + $0x1700] sm:$0xf0]  ;;  %v16282_v11 = vld [vmem:[#allocation5 + $0x153c] sm:$0xf] }
 0x2fa   : > { %9182 = vmatpush.bf16.msrb.mxu2 %v13789_v4  ;;  %v8792_v32 = vadd.f32 %v8791_v22, %v8773_v38  ;;  %9094 = vmatmul.bf16.vlgmr.msra.gmra.mxu1 %v17296_v24  ;;  %v13714_v4 = vld [vmem:[#allocation5 + $0x15b0] sm:$0xf0]  ;;  %v16288_v38 = vld [vmem:[#allocation5 + $0x156c] sm:$0xf]  ;;  %v13909_v55 = vor.u32 %v16342_v62, %v13906_v30 }
 0x2fb   : > { %9201 = vmatpush.bf16.msrb.mxu3 %v13981_v3  ;;  %9113 = vmatmul.bf16.vlgmr.msra.gmra.mxu2 %v17298_v28  ;;  %v16198_v3 = vld [vmem:[#allocation5 + $0x129c] sm:$0xf]  ;;  %v13717_v36 = vor.u32 %v16294_v19, %v13714_v4  ;;  %v13474_v37 = vld [vmem:[#allocation5 + $0x13d0] sm:$0xf0] }
 0x2fc   : > { %9132 = vmatmul.bf16.vlgmr.msra.gmra.mxu3 %v17300_v29  ;;  %9145 = vmatpush.bf16.msrb.mxu0 %v13381_v61  ;;  %v13333_v22 = vor.u32 %v16198_v3, %v13330_v35  ;;  %v16186_v4 = vld [vmem:[#allocation5 + $0x123c] sm:$0xf] }
 0x2fd   : > { %9164 = vmatpush.bf16.msrb.mxu1 %v13573_v31  ;;  %v16192_v31 = vld [vmem:[#allocation5 + $0x126c] sm:$0xf] }
 0x2fe   : > { %9183 = vmatpush.bf16.msrb.mxu2 %v13765_v15  ;;  %v8810_v59 = vpop.f32.mrf.mxu2  ;;  %v13690_v15 = vld [vmem:[#allocation5 + $0x1580] sm:$0xf0] }
 0x2ff   : > { %9202 = vmatpush.bf16.msrb.mxu3 %v13957_v25  ;;  %v8829_v20 = vpop.f32.mrf.mxu3  ;;  %v8811_v43 = vadd.f32 %v8810_v59, %v8792_v32  ;;  %v8774_v58 = vpop.f32.mrf.mxu0  ;;  %v13306_v25 = vld [vmem:[#allocation5 + $0x1280] sm:$0xf0]  ;;  %v16336_v32 = vld [vmem:[#allocation5 + $0x16ec] sm:$0xf]  ;;  %v16330_v59 = vld [vmem:[#allocation5 + $0x16bc] sm:$0xf] }
 0x300   : > { %v8793_v34 = vpop.f32.mrf.mxu1  ;;  %v8775_v7 = vadd.f32 %v8774_v58, %v17754_v10  ;;  %9146 = vmatpush.bf16.msrb.mxu0 %v13357_v52  ;;  %v13693_v10 = vor.u32 %v16288_v38, %v13690_v15  ;;  %v13309_v2 = vor.u32 %v16192_v31, %v13306_v25  ;;  %v13501_v52 = vor.u32 %v16240_v33, %v13498_v27  ;;  %v13258_v38 = vld [vmem:[#allocation5 + $0x1220] sm:$0xf0]  ;;  %v16228_v31 = vld [vmem:[#allocation5 + $0x138c] sm:$0xf]  ;;  %v16510_v27 = vld [vmem:[#allocation5 + $0x1c5c] sm:$0xf] }
 0x301   : > { %v17771_v61 = vadd.f32 %v8829_v20, %v8811_v43  ;;  %9165 = vmatpush.bf16.msrb.mxu1 %v13549_v41  ;;  %v13885_v19 = vor.u32 %v16336_v32, %v13882_v49  ;;  %v13282_v41 = vld [vmem:[#allocation5 + $0x1250] sm:$0xf0]  ;;  %v16276_v43 = vld [vmem:[#allocation5 + $0x150c] sm:$0xf]  ;;  %v13450_v25 = vld [vmem:[#allocation5 + $0x13a0] sm:$0xf0] }
 0x302   : > { %9184 = vmatpush.bf16.msrb.mxu2 %v13741_v47  ;;  %v8794_v21 = vadd.f32 %v8793_v34, %v8775_v7  ;;  %v13666_v47 = vld [vmem:[#allocation5 + $0x1550] sm:$0xf0]  ;;  %v13285_v7 = vor.u32 %v16186_v4, %v13282_v41  ;;  %v16324_v33 = vld [vmem:[#allocation5 + $0x168c] sm:$0xf]  ;;  %v16414_v49 = vld [vmem:[#allocation5 + $0x195c] sm:$0xf]  ;;  %v13453_v41 = vor.u32 %v16228_v31, %v13450_v25 }
 0x303   : > { %9203 = vmatpush.bf16.msrb.mxu3 %v13933_v26  ;;  %v16234_v26 = vld [vmem:[#allocation5 + $0x13bc] sm:$0xf]  ;;  %v13858_v20 = vld [vmem:[#allocation5 + $0x16d0] sm:$0xf0]  ;;  %v13669_v34 = vor.u32 %v16282_v11, %v13666_v47  ;;  %v14746_v31 = vld [vmem:[#allocation5 + $0x1dc0] sm:$0xf0] }
 0x304   : > { %9147 = vmatpush.bf16.msrb.mxu0 %v13333_v22  ;;  %v16180_v22 = vld [vmem:[#allocation5 + $0x120c] sm:$0xf]  ;;  %v14578_v32 = vld [vmem:[#allocation5 + $0x1c70] sm:$0xf0] }
 0x305   : > { %9166 = vmatpush.bf16.msrb.mxu1 %v13525_v16  ;;  %v13477_v16 = vor.u32 %v16234_v26, %v13474_v37  ;;  %v13261_v47 = vor.u32 %v16180_v22, %v13258_v38  ;;  %v14770_v4 = vld [vmem:[#allocation5 + $0x1df0] sm:$0xf0]  ;;  %v14581_v37 = vor.u32 %v16510_v27, %v14578_v32  ;;  %v16456_v22 = vld [vmem:[#allocation5 + $0x1aac] sm:$0xf] }
 0x306   : > { %9185 = vmatpush.bf16.msrb.mxu2 %v13717_v36  ;;  %v8812_v3 = vpop.f32.mrf.mxu2  ;;  %v13642_v36 = vld [vmem:[#allocation5 + $0x1520] sm:$0xf0] }
 0x307   : > { %9204 = vmatpush.bf16.msrb.mxu3 %v13909_v55  ;;  %v8831_v35 = vpop.f32.mrf.mxu3  ;;  %v8813_v63 = vadd.f32 %v8812_v3, %v8794_v21  ;;  %v8777_v62 = vpop.f32.mrf.mxu0  ;;  %v13861_v55 = vor.u32 %v16330_v59, %v13858_v20  ;;  %v13645_v11 = vor.u32 %v16276_v43, %v13642_v36  ;;  %v16504_v20 = vld [vmem:[#allocation5 + $0x1c2c] sm:$0xf]  ;;  %v14170_v36 = vld [vmem:[#allocation5 + $0x1940] sm:$0xf0] }
 0x308   : > { %v8796_v30 = vpop.f32.mrf.mxu1  ;;  %v8778_v58 = vadd.f32 %v8777_v62, %v17761_v42  ;;  %9148 = vmatpush.bf16.msrb.mxu0 %v13309_v2  ;;  %v13834_v42 = vld [vmem:[#allocation5 + $0x16a0] sm:$0xf0]  ;;  %v16462_v2 = vld [vmem:[#allocation5 + $0x1adc] sm:$0xf]  ;;  %v16408_v43 = vld [vmem:[#allocation5 + $0x192c] sm:$0xf] }
 0x309   : > { %v17774_v15 = vadd.f32 %v8831_v35, %v8813_v63  ;;  %9167 = vmatpush.bf16.msrb.mxu1 %v13501_v52  ;;  %9080 = vmatmul.bf16.gmra.mxu0 %v17314_v39  ;;  %v14386_v52 = vld [vmem:[#allocation5 + $0x1af0] sm:$0xf0]  ;;  %v13837_v26 = vor.u32 %v16324_v33, %v13834_v42  ;;  %v14554_v63 = vld [vmem:[#allocation5 + $0x1c40] sm:$0xf0]  ;;  %v14173_v42 = vor.u32 %v16408_v43, %v14170_v36  ;;  %v16444_v36 = vld [vmem:[#allocation5 + $0x1a4c] sm:$0xf] }
 0x30a   : > { %9186 = vmatpush.bf16.msrb.mxu2 %v13693_v10  ;;  %v8797_v21 = vadd.f32 %v8796_v30, %v8778_v58  ;;  %9099 = vmatmul.bf16.gmra.mxu1 %v17316_v40  ;;  %v14194_v10 = vld [vmem:[#allocation5 + $0x1970] sm:$0xf0]  ;;  %v14122_v43 = vld [vmem:[#allocation5 + $0x18e0] sm:$0xf0] }
 0x30b   : > { %9205 = vmatpush.bf16.msrb.mxu3 %v13885_v19  ;;  %9118 = vmatmul.bf16.gmra.mxu2 %v17318_v45  ;;  %v16558_v19 = vld [vmem:[#allocation5 + $0x1ddc] sm:$0xf]  ;;  %v14197_v59 = vor.u32 %v16414_v49, %v14194_v10 }
 0x30c   : > { %9137 = vmatmul.bf16.gmra.mxu3 %v17320_v46  ;;  %9149 = vmatpush.bf16.msrb.mxu0 %v13285_v7  ;;  %v14773_v7 = vor.u32 %v16558_v19, %v14770_v4  ;;  %v16498_v49 = vld [vmem:[#allocation5 + $0x1bfc] sm:$0xf]  ;;  %v14338_v19 = vld [vmem:[#allocation5 + $0x1a90] sm:$0xf0] }
 0x30d   : > { %9168 = vmatpush.bf16.msrb.mxu1 %v13477_v16  ;;  %v14362_v16 = vld [vmem:[#allocation5 + $0x1ac0] sm:$0xf0]  ;;  %v16402_v10 = vld [vmem:[#allocation5 + $0x18fc] sm:$0xf] }
 0x30e   : > { %9187 = vmatpush.bf16.msrb.mxu2 %v13669_v34  ;;  %v8815_v3 = vpop.f32.mrf.mxu2  ;;  %v14389_v34 = vor.u32 %v16462_v2, %v14386_v52  ;;  %v14365_v27 = vor.u32 %v16456_v22, %v14362_v16  ;;  %v14146_v2 = vld [vmem:[#allocation5 + $0x1910] sm:$0xf0]  ;;  %v16546_v4 = vld [vmem:[#allocation5 + $0x1d7c] sm:$0xf]  ;;  %v16540_v16 = vld [vmem:[#allocation5 + $0x1d4c] sm:$0xf] }
 0x30f   : > { %9206 = vmatpush.bf16.msrb.mxu3 %v13861_v55  ;;  %v8834_v35 = vpop.f32.mrf.mxu3  ;;  %v8816_v62 = vadd.f32 %v8815_v3, %v8797_v21  ;;  %v8779_v30 = vpop.f32.mrf.mxu0  ;;  %v16552_v55 = vld [vmem:[#allocation5 + $0x1dac] sm:$0xf]  ;;  %v14557_v21 = vor.u32 %v16504_v20, %v14554_v63  ;;  %v14149_v20 = vor.u32 %v16402_v10, %v14146_v2  ;;  %v14098_v10 = vld [vmem:[#allocation5 + $0x18b0] sm:$0xf0]  ;;  %v16438_v2 = vld [vmem:[#allocation5 + $0x1a1c] sm:$0xf] }
 0x310   : > { %v8798_v58 = vpop.f32.mrf.mxu1  ;;  %v8780_v38 = vadd.f32 %v8779_v30, %v17764_v12  ;;  %9150 = vmatpush.bf16.msrb.mxu0 %v13261_v47  ;;  %v14749_v32 = vor.u32 %v16552_v55, %v14746_v31  ;;  %v14530_v12 = vld [vmem:[#allocation5 + $0x1c10] sm:$0xf0]  ;;  %v16492_v63 = vld [vmem:[#allocation5 + $0x1bcc] sm:$0xf]  ;;  %v14698_v55 = vld [vmem:[#allocation5 + $0x1d60] sm:$0xf0] }
 0x311   : > { %v17781_v25 = vadd.f32 %v8834_v35, %v8816_v62  ;;  %9169 = vmatpush.bf16.msrb.mxu1 %v13453_v41  ;;  %v14722_v41 = vld [vmem:[#allocation5 + $0x1d90] sm:$0xf0]  ;;  %v14506_v62 = vld [vmem:[#allocation5 + $0x1be0] sm:$0xf0]  ;;  %v18655_v31 = vld [vmem:[#allocation16_spill] sm:$0xff] }
 0x312   : > { %9188 = vmatpush.bf16.msrb.mxu2 %v13645_v11  ;;  %v8799_v33 = vadd.f32 %v8798_v58, %v8780_v38  ;;  %v16450_v11 = vld [vmem:[#allocation5 + $0x1a7c] sm:$0xf]  ;;  %v14314_v38 = vld [vmem:[#allocation5 + $0x1a60] sm:$0xf0] }
 0x313   : > { %9207 = vmatpush.bf16.msrb.mxu3 %v13837_v26  ;;  %v14341_v58 = vor.u32 %v16450_v11, %v14338_v19  ;;  %v16534_v19 = vld [vmem:[#allocation5 + $0x1d1c] sm:$0xf] }
 0x314   : > { %9219 = vmatpush.bf16.msra.mxu0 %v14197_v59  ;;  %v14533_v59 = vor.u32 %v16498_v49, %v14530_v12  ;;  %v14701_v49 = vor.u32 %v16540_v16, %v14698_v55  ;;  %v16390_v12 = vld [vmem:[#allocation5 + $0x189c] sm:$0xf]  ;;  %v16528_v16 = vld [vmem:[#allocation5 + $0x1cec] sm:$0xf]  ;;  %v14650_v55 = vld [vmem:[#allocation5 + $0x1d00] sm:$0xf0] }
 0x315   : > { %9238 = vmatpush.bf16.msra.mxu1 %v14389_v34  ;;  %v14725_v34 = vor.u32 %v16546_v4, %v14722_v41  ;;  %v14674_v4 = vld [vmem:[#allocation5 + $0x1d30] sm:$0xf0] }
 0x316   : > { %9257 = vmatpush.bf16.msra.mxu2 %v14581_v37  ;;  %v8817_v47 = vpop.f32.mrf.mxu2 }
 0x317   : > { %9276 = vmatpush.bf16.msra.mxu3 %v14773_v7  ;;  %v8836_v52 = vpop.f32.mrf.mxu3  ;;  %v8818_v26 = vadd.f32 %v8817_v47, %v8799_v33  ;;  %v8848_v3 = vpop.f32.mrf.mxu0  ;;  %v16396_v7 = vld [vmem:[#allocation5 + $0x18cc] sm:$0xf]  ;;  %v14509_v33 = vor.u32 %v16492_v63, %v14506_v62  ;;  %v14458_v63 = vld [vmem:[#allocation5 + $0x1b80] sm:$0xf0] }
 0x318   : > { %9220 = vmatpush.bf16.msra.mxu0 %v14173_v42  ;;  %v8867_v35 = vpop.f32.mrf.mxu1  ;;  %v8849_v37 = vadd.f32 %v8848_v3, %v17771_v61  ;;  %v18654_v61 = vld [vmem:[#allocation15_spill] sm:$0xff]  ;;  %v16486_v42 = vld [vmem:[#allocation5 + $0x1b9c] sm:$0xf] }
 0x319   : > { %9239 = vmatpush.bf16.msra.mxu1 %v14365_v27  ;;  %v17784_v30 = vadd.f32 %v8836_v52, %v8818_v26  ;;  %9151 = vmatmul.bf16.vlgmr.msrb.gmra.mxu0 %v17334_v17  ;;  %v14482_v27 = vld [vmem:[#allocation5 + $0x1bb0] sm:$0xf0] }
 0x31a   : > { %9258 = vmatpush.bf16.msra.mxu2 %v14557_v21  ;;  %v8868_v22 = vadd.f32 %v8867_v35, %v8849_v37  ;;  %9170 = vmatmul.bf16.vlgmr.msrb.gmra.mxu1 %v17336_v18  ;;  %v14125_v21 = vor.u32 %v16396_v7, %v14122_v43  ;;  %v14290_v52 = vld [vmem:[#allocation5 + $0x1a30] sm:$0xf0]  ;;  %v14485_v37 = vor.u32 %v16486_v42, %v14482_v27  ;;  %v16384_v7 = vld [vmem:[#allocation5 + $0x186c] sm:$0xf]  ;;  %v14074_v43 = vld [vmem:[#allocation5 + $0x1880] sm:$0xf0] }
 0x31b   : > { %9277 = vmatpush.bf16.msra.mxu3 %v14749_v32  ;;  %9189 = vmatmul.bf16.vlgmr.msrb.gmra.mxu2 %v18654_v61  ;;  %v14317_v32 = vor.u32 %v16444_v36, %v14314_v38  ;;  %v16432_v36 = vld [vmem:[#allocation5 + $0x19ec] sm:$0xf]  ;;  %v14266_v38 = vld [vmem:[#allocation5 + $0x1a00] sm:$0xf0]  ;;  %v14434_v42 = vld [vmem:[#allocation5 + $0x1b50] sm:$0xf0] }
 0x31c   : > { %9208 = vmatmul.bf16.vlgmr.msrb.gmra.mxu3 %v18655_v31  ;;  %9221 = vmatpush.bf16.msra.mxu0 %v14149_v20  ;;  %v16480_v20 = vld [vmem:[#allocation5 + $0x1b6c] sm:$0xf]  ;;  %v14269_v27 = vor.u32 %v16432_v36, %v14266_v38 }
 0x31d   : > { %9240 = vmatpush.bf16.msra.mxu1 %v14341_v58  ;;  %v14293_v58 = vor.u32 %v16438_v2, %v14290_v52  ;;  %v16522_v52 = vld [vmem:[#allocation5 + $0x1cbc] sm:$0xf]  ;;  %v16420_v36 = vld [vmem:[#allocation5 + $0x198c] sm:$0xf] }
 0x31e   : > { %9259 = vmatpush.bf16.msra.mxu2 %v14533_v59  ;;  %v8886_v11 = vpop.f32.mrf.mxu2  ;;  %v14101_v59 = vor.u32 %v16390_v12, %v14098_v10  ;;  %v14050_v12 = vld [vmem:[#allocation5 + $0x1850] sm:$0xf0]  ;;  %v16426_v10 = vld [vmem:[#allocation5 + $0x19bc] sm:$0xf]  ;;  %v16516_v38 = vld [vmem:[#allocation5 + $0x1c8c] sm:$0xf] }
 0x31f   : > { %9278 = vmatpush.bf16.msra.mxu3 %v14725_v34  ;;  %v8905_v47 = vpop.f32.mrf.mxu3  ;;  %v8887_v41 = vadd.f32 %v8886_v11, %v8868_v22  ;;  %v8850_v26 = vpop.f32.mrf.mxu0  ;;  %v14677_v34 = vor.u32 %v16534_v19, %v14674_v4  ;;  %v14626_v19 = vld [vmem:[#allocation5 + $0x1cd0] sm:$0xf0] }
 0x320   : > { %v8869_v3 = vpop.f32.mrf.mxu1  ;;  %v8851_v35 = vadd.f32 %v8850_v26, %v17774_v15  ;;  %9222 = vmatpush.bf16.msra.mxu0 %v14125_v21  ;;  %v14461_v15 = vor.u32 %v16480_v20, %v14458_v63  ;;  %v16474_v21 = vld [vmem:[#allocation5 + $0x1b3c] sm:$0xf]  ;;  %v14410_v20 = vld [vmem:[#allocation5 + $0x1b20] sm:$0xf0]  ;;  %v16372_v63 = vld [vmem:[#allocation5 + $0x180c] sm:$0xf] }
 0x321   : > { %v17791_v62 = vadd.f32 %v8905_v47, %v8887_v41  ;;  %9241 = vmatpush.bf16.msra.mxu1 %v14317_v32  ;;  %v14653_v32 = vor.u32 %v16528_v16, %v14650_v55  ;;  %v14242_v47 = vld [vmem:[#allocation5 + $0x19d0] sm:$0xf0] }
 0x322   : > { %9260 = vmatpush.bf16.msra.mxu2 %v14509_v33  ;;  %v8870_v22 = vadd.f32 %v8869_v3, %v8851_v35  ;;  %v14077_v33 = vor.u32 %v16384_v7, %v14074_v43  ;;  %v16468_v3 = vld [vmem:[#allocation5 + $0x1b0c] sm:$0xf]  ;;  %v14245_v7 = vor.u32 %v16426_v10, %v14242_v47  ;;  %v14629_v43 = vor.u32 %v16522_v52, %v14626_v19  ;;  %v18658_v55 = vld [vmem:[#allocation17_spill] sm:$0xff]  ;;  %v16750_v47 = vld [vmem:[#allocation5 + $0x23dc] sm:$0xf] }
 0x323   : > { %18656 = vst [vmem:[#allocation44_spill] sm:$0xff] %v17791_v62  ;;  %9279 = vmatpush.bf16.msra.mxu3 %v14701_v49  ;;  %v16378_v49 = vld [vmem:[#allocation5 + $0x183c] sm:$0xf]  ;;  %v14413_v10 = vor.u32 %v16468_v3, %v14410_v20  ;;  %v15538_v52 = vld [vmem:[#allocation5 + $0x23f0] sm:$0xf0] }
 0x324   : > { %9223 = vmatpush.bf16.msra.mxu0 %v14101_v59  ;;  %v14053_v59 = vor.u32 %v16378_v49, %v14050_v12  ;;  %v18661_v49 = vld [vmem:[#allocation20_spill] sm:$0xff]  ;;  %v16606_v12 = vld [vmem:[#allocation5 + $0x1f5c] sm:$0xf]  ;;  %v14938_v20 = vld [vmem:[#allocation5 + $0x1f40] sm:$0xf0] }
 0x325   : > { %9242 = vmatpush.bf16.msra.mxu1 %v14293_v58  ;;  %v14026_v58 = vld [vmem:[#allocation5 + $0x1820] sm:$0xf0]  ;;  %v16696_v62 = vld [vmem:[#allocation5 + $0x222c] sm:$0xf] }
 0x326   : > { %9261 = vmatpush.bf16.msra.mxu2 %v14485_v37  ;;  %v8888_v2 = vpop.f32.mrf.mxu2  ;;  %v14437_v37 = vor.u32 %v16474_v21, %v14434_v42  ;;  %v15346_v21 = vld [vmem:[#allocation5 + $0x2270] sm:$0xf0]  ;;  %v18660_v42 = vld [vmem:[#allocation19_spill] sm:$0xff]  ;;  %v16600_v3 = vld [vmem:[#allocation5 + $0x1f2c] sm:$0xf] }
 0x327   : > { %9280 = vmatpush.bf16.msra.mxu3 %v14677_v34  ;;  %v8907_v11 = vpop.f32.mrf.mxu3  ;;  %v8889_v4 = vadd.f32 %v8888_v2, %v8870_v22  ;;  %v8853_v41 = vpop.f32.mrf.mxu0  ;;  %v14218_v22 = vld [vmem:[#allocation5 + $0x19a0] sm:$0xf0]  ;;  %v14029_v2 = vor.u32 %v16372_v63, %v14026_v58  ;;  %v16648_v63 = vld [vmem:[#allocation5 + $0x20ac] sm:$0xf] }
 0x328   : > { %v8872_v26 = vpop.f32.mrf.mxu1  ;;  %v8854_v35 = vadd.f32 %v8853_v41, %v17781_v25  ;;  %9224 = vmatpush.bf16.msra.mxu0 %v14077_v33  ;;  %v18659_v25 = vld [vmem:[#allocation18_spill] sm:$0xff]  ;;  %v14221_v19 = vor.u32 %v16420_v36, %v14218_v22  ;;  %v15514_v36 = vld [vmem:[#allocation5 + $0x23c0] sm:$0xf0] }
 0x329   : > { %v17794_v34 = vadd.f32 %v8907_v11, %v8889_v4  ;;  %9243 = vmatpush.bf16.msra.mxu1 %v14269_v27  ;;  %9156 = vmatmul.bf16.gmra.mxu0 %v18658_v55  ;;  %v16702_v33 = vld [vmem:[#allocation5 + $0x225c] sm:$0xf]  ;;  %v14962_v27 = vld [vmem:[#allocation5 + $0x1f70] sm:$0xf0] }
 0x32a   : > { %9262 = vmatpush.bf16.msra.mxu2 %v14461_v15  ;;  %v8873_v16 = vadd.f32 %v8872_v26, %v8854_v35  ;;  %9175 = vmatmul.bf16.gmra.mxu1 %v18659_v25  ;;  %v14602_v15 = vld [vmem:[#allocation5 + $0x1ca0] sm:$0xf0]  ;;  %v15154_v11 = vld [vmem:[#allocation5 + $0x20f0] sm:$0xf0]  ;;  %v15349_v35 = vor.u32 %v16702_v33, %v15346_v21 }
 0x32b   : > { %18657 = vst [vmem:[#allocation45_spill] sm:$0xff] %v17794_v34  ;;  %9281 = vmatpush.bf16.msra.mxu3 %v14653_v32  ;;  %9194 = vmatmul.bf16.gmra.mxu2 %v18660_v42  ;;  %v16654_v32 = vld [vmem:[#allocation5 + $0x20dc] sm:$0xf]  ;;  %v14605_v4 = vor.u32 %v16516_v38, %v14602_v15  ;;  %v14965_v34 = vor.u32 %v16606_v12, %v14962_v27 }
 0x32c   : > { %9213 = vmatmul.bf16.gmra.mxu3 %v18661_v49  ;;  %9225 = vmatpush.bf16.msra.mxu0 %v14053_v59  ;;  %v15322_v49 = vld [vmem:[#allocation5 + $0x2240] sm:$0xf0]  ;;  %v15541_v59 = vor.u32 %v16750_v47, %v15538_v52  ;;  %v14941_v15 = vor.u32 %v16600_v3, %v14938_v20  ;;  %v16690_v12 = vld [vmem:[#allocation5 + $0x21fc] sm:$0xf]  ;;  %v16588_v20 = vld [vmem:[#allocation5 + $0x1ecc] sm:$0xf] }
 0x32d   : > { %9244 = vmatpush.bf16.msra.mxu1 %v14245_v7  ;;  %v15130_v7 = vld [vmem:[#allocation5 + $0x20c0] sm:$0xf0]  ;;  %v16594_v27 = vld [vmem:[#allocation5 + $0x1efc] sm:$0xf] }
 0x32e   : > { %9263 = vmatpush.bf16.msra.mxu2 %v14437_v37  ;;  %v8891_v41 = vpop.f32.mrf.mxu2  ;;  %v15157_v37 = vor.u32 %v16654_v32, %v15154_v11  ;;  %v15133_v33 = vor.u32 %v16648_v63, %v15130_v7  ;;  %v14914_v32 = vld [vmem:[#allocation5 + $0x1f10] sm:$0xf0]  ;;  %v14890_v63 = vld [vmem:[#allocation5 + $0x1ee0] sm:$0xf0] }
 0x32f   : > { %9282 = vmatpush.bf16.msra.mxu3 %v14629_v43  ;;  %v8910_v26 = vpop.f32.mrf.mxu3  ;;  %v8892_v42 = vadd.f32 %v8891_v41, %v8873_v16  ;;  %v8855_v25 = vpop.f32.mrf.mxu0  ;;  %v16744_v43 = vld [vmem:[#allocation5 + $0x23ac] sm:$0xf]  ;;  %v15325_v16 = vor.u32 %v16696_v62, %v15322_v49  ;;  %v15106_v62 = vld [vmem:[#allocation5 + $0x2090] sm:$0xf0]  ;;  %v14917_v41 = vor.u32 %v16594_v27, %v14914_v32 }
 0x330   : > { %v8874_v55 = vpop.f32.mrf.mxu1  ;;  %v8856_v58 = vadd.f32 %v8855_v25, %v17784_v30  ;;  %9226 = vmatpush.bf16.msra.mxu0 %v14029_v2  ;;  %v15517_v21 = vor.u32 %v16744_v43, %v15514_v36  ;;  %v16845_v30 = vld [vmem:[%s18521_s2] sm:$0x3f]  ;;  %v15490_v49 = vld [vmem:[#allocation5 + $0x2390] sm:$0xf0]  ;;  %v18665_v36 = vld [vmem:[#allocation22_spill] sm:$0xff] }
 0x331   : > { %v17801_v22 = vadd.f32 %v8910_v26, %v8892_v42  ;;  %9245 = vmatpush.bf16.msra.mxu1 %v14221_v19  ;;  %v17806_v25 = vperm.slane %v16845_v30, 3  ;;  %v15298_v42 = vld [vmem:[#allocation5 + $0x2210] sm:$0xf0]  ;;  %v16684_v26 = vld [vmem:[#allocation5 + $0x21cc] sm:$0xf] }
 0x332   : > { %9264 = vmatpush.bf16.msra.mxu2 %v14413_v10  ;;  %v8875_v38 = vadd.f32 %v8874_v55, %v8856_v58  ;;  %v16642_v10 = vld [vmem:[#allocation5 + $0x207c] sm:$0xf]  ;;  %v16636_v58 = vld [vmem:[#allocation5 + $0x204c] sm:$0xf]  ;;  %v18664_v43 = vld [vmem:[#allocation21_spill] sm:$0xff] }
 0x333   : > { %18662 = vst [vmem:[#allocation46_spill] sm:$0xff] %v17801_v22  ;;  %9283 = vmatpush.bf16.msra.mxu3 %v14605_v4  ;;  %v15301_v4 = vor.u32 %v16690_v12, %v15298_v42  ;;  %v14893_v12 = vor.u32 %v16588_v20, %v14890_v63  ;;  %v16678_v42 = vld [vmem:[#allocation5 + $0x219c] sm:$0xf]  ;;  %v15250_v27 = vld [vmem:[#allocation5 + $0x21b0] sm:$0xf0] }
 0x334   : > { %9295 = vmatpush.bf16.msrb.mxu0 %v14965_v34  ;;  %v16738_v34 = vld [vmem:[#allocation5 + $0x237c] sm:$0xf]  ;;  %v16720_v22 = vld [vmem:[#allocation5 + $0x22ec] sm:$0xf] }
 0x335   : > { %9314 = vmatpush.bf16.msrb.mxu1 %v15157_v37  ;;  %v15493_v3 = vor.u32 %v16738_v34, %v15490_v49 }
 0x336   : > { %9333 = vmatpush.bf16.msrb.mxu2 %v15349_v35  ;;  %v8893_v55 = vpop.f32.mrf.mxu2  ;;  %v15274_v35 = vld [vmem:[#allocation5 + $0x21e0] sm:$0xf0] }
 0x337   : > { %9352 = vmatpush.bf16.msrb.mxu3 %v15541_v59  ;;  %v8912_v2 = vpop.f32.mrf.mxu3  ;;  %v8894_v11 = vadd.f32 %v8893_v55, %v8875_v38  ;;  %v8924_v47 = vpop.f32.mrf.mxu0  ;;  %v15109_v59 = vor.u32 %v16642_v10, %v15106_v62  ;;  %v15082_v38 = vld [vmem:[#allocation5 + $0x2060] sm:$0xf0]  ;;  %v15277_v30 = vor.u32 %v16684_v26, %v15274_v35  ;;  %v16582_v55 = vld [vmem:[#allocation5 + $0x1e9c] sm:$0xf]  ;;  %v15253_v26 = vor.u32 %v16678_v42, %v15250_v27  ;;  %v15202_v42 = vld [vmem:[#allocation5 + $0x2150] sm:$0xf0] }
 0x338   : > { %9296 = vmatpush.bf16.msrb.mxu0 %v14941_v15  ;;  %v8943_v52 = vpop.f32.mrf.mxu1  ;;  %v8925_v19 = vadd.f32 %v8924_v47, %v17806_v25  ;;  %v15466_v15 = vld [vmem:[#allocation5 + $0x2360] sm:$0xf0]  ;;  %v15085_v32 = vor.u32 %v16636_v58, %v15082_v38  ;;  %v16630_v62 = vld [vmem:[#allocation5 + $0x201c] sm:$0xf]  ;;  %v16576_v38 = vld [vmem:[#allocation5 + $0x1e6c] sm:$0xf] }
 0x339   : > { %9315 = vmatpush.bf16.msrb.mxu1 %v15133_v33  ;;  %v17809_v37 = vadd.f32 %v8912_v2, %v8894_v11  ;;  %9227 = vmatmul.bf16.vlgmr.msra.gmra.mxu0 %v18664_v43  ;;  %v18666_v33 = vld [vmem:[#allocation23_spill] sm:$0xff]  ;;  %v14866_v2 = vld [vmem:[#allocation5 + $0x1eb0] sm:$0xf0]  ;;  %v16726_v47 = vld [vmem:[#allocation5 + $0x231c] sm:$0xf] }
 0x33a   : > { %9334 = vmatpush.bf16.msrb.mxu2 %v15325_v16  ;;  %v8944_v7 = vadd.f32 %v8943_v52, %v8925_v19  ;;  %9246 = vmatmul.bf16.vlgmr.msra.gmra.mxu1 %v18665_v36  ;;  %v16732_v16 = vld [vmem:[#allocation5 + $0x234c] sm:$0xf]  ;;  %v15058_v11 = vld [vmem:[#allocation5 + $0x2030] sm:$0xf0]  ;;  %v14869_v35 = vor.u32 %v16582_v55, %v14866_v2  ;;  %v16618_v2 = vld [vmem:[#allocation5 + $0x1fbc] sm:$0xf] }
 0x33b   : > { %9353 = vmatpush.bf16.msrb.mxu3 %v15517_v21  ;;  %18663 = vst [vmem:[#allocation47_spill] sm:$0xff] %v17809_v37  ;;  %9265 = vmatmul.bf16.vlgmr.msra.gmra.mxu2 %v18666_v33  ;;  %v18667_v21 = vld [vmem:[#allocation24_spill] sm:$0xff]  ;;  %v15469_v10 = vor.u32 %v16732_v16, %v15466_v15  ;;  %v15442_v52 = vld [vmem:[#allocation5 + $0x2330] sm:$0xf0]  ;;  %v15061_v63 = vor.u32 %v16630_v62, %v15058_v11  ;;  %v14842_v16 = vld [vmem:[#allocation5 + $0x1e80] sm:$0xf0] }
 0x33c   : > { %9284 = vmatmul.bf16.vlgmr.msra.gmra.mxu3 %v18667_v21  ;;  %9297 = vmatpush.bf16.msrb.mxu0 %v14917_v41  ;;  %v15445_v58 = vor.u32 %v16726_v47, %v15442_v52  ;;  %v16624_v15 = vld [vmem:[#allocation5 + $0x1fec] sm:$0xf]  ;;  %v15418_v21 = vld [vmem:[#allocation5 + $0x2300] sm:$0xf0]  ;;  %v14818_v55 = vld [vmem:[#allocation5 + $0x1e50] sm:$0xf0] }
 0x33d   : > { %9316 = vmatpush.bf16.msrb.mxu1 %v15109_v59  ;;  %v16672_v59 = vld [vmem:[#allocation5 + $0x216c] sm:$0xf]  ;;  %v15010_v11 = vld [vmem:[#allocation5 + $0x1fd0] sm:$0xf0]  ;;  %v16714_v47 = vld [vmem:[#allocation5 + $0x22bc] sm:$0xf] }
 0x33e   : > { %9335 = vmatpush.bf16.msrb.mxu2 %v15301_v4  ;;  %v8962_v34 = vpop.f32.mrf.mxu2  ;;  %v15394_v52 = vld [vmem:[#allocation5 + $0x22d0] sm:$0xf0]  ;;  %v11488_v36 = vld [vmem:[#allocation5 + $0x430] sm:$0xf] }
 0x33f   : > { %9354 = vmatpush.bf16.msrb.mxu3 %v15493_v3  ;;  %v8981_v49 = vpop.f32.mrf.mxu3  ;;  %v8963_v19 = vadd.f32 %v8962_v34, %v8944_v7  ;;  %v8926_v37 = vpop.f32.mrf.mxu0  ;;  %v15226_v3 = vld [vmem:[#allocation5 + $0x2180] sm:$0xf0]  ;;  %v18668_v33 = vld [vmem:[#allocation25_spill] sm:$0xff] }
 0x340   : > { %v8945_v4 = vpop.f32.mrf.mxu1  ;;  %v8927_v41 = vadd.f32 %v8926_v37, %v17806_v25  ;;  %9298 = vmatpush.bf16.msrb.mxu0 %v14893_v12  ;;  %v15034_v34 = vld [vmem:[#allocation5 + $0x2000] sm:$0xf0]  ;;  %v15229_v37 = vor.u32 %v16672_v59, %v15226_v3  ;;  %v16666_v12 = vld [vmem:[#allocation5 + $0x213c] sm:$0xf] }
 0x341   : > { %v17816_v20 = vadd.f32 %v8981_v49, %v8963_v19  ;;  %9317 = vmatpush.bf16.msrb.mxu1 %v15085_v32  ;;  %v15037_v27 = vor.u32 %v16624_v15, %v15034_v34  ;;  %v15421_v32 = vor.u32 %v16720_v22, %v15418_v21  ;;  %v15205_v59 = vor.u32 %v16666_v12, %v15202_v42  ;;  %v16564_v22 = vld [vmem:[#allocation5 + $0x1e0c] sm:$0xf]  ;;  %v14794_v21 = vld [vmem:[#allocation5 + $0x1e20] sm:$0xf0]  ;;  %v15746_v12 = vld [vmem:[#allocation5 + $0x474] sm:$0xf0] }
 0x342   : > { %9336 = vmatpush.bf16.msrb.mxu2 %v15277_v30  ;;  %v8946_v7 = vadd.f32 %v8945_v4, %v8927_v41  ;;  %v14845_v30 = vor.u32 %v16576_v38, %v14842_v16  ;;  %v15013_v38 = vor.u32 %v16618_v2, %v15010_v11  ;;  %v15397_v16 = vor.u32 %v16714_v47, %v15394_v52  ;;  %v16612_v15 = vld [vmem:[#allocation5 + $0x1f8c] sm:$0xf]  ;;  %v18670_v42 = vld [vmem:[#allocation27_spill] sm:$0xff]  ;;  %v15698_v11 = vld [vmem:[#allocation5 + $0x2f4] sm:$0xf0] }
 0x343   : > { %9355 = vmatpush.bf16.msrb.mxu3 %v15469_v10  ;;  %v16570_v10 = vld [vmem:[#allocation5 + $0x1e3c] sm:$0xf]  ;;  %v16708_v34 = vld [vmem:[#allocation5 + $0x228c] sm:$0xf]  ;;  %v11704_v47 = vld [vmem:[#allocation5 + $0x5e0] sm:$0xf] }
 0x344   : > { %9299 = vmatpush.bf16.msrb.mxu0 %v14869_v35  ;;  %v14821_v3 = vor.u32 %v16570_v10, %v14818_v55  ;;  %v18671_v10 = vld [vmem:[#allocation28_spill] sm:$0xff]  ;;  %v11128_v55 = vld [vmem:[#allocation5 + $0x160] sm:$0xf]  ;;  %v15794_v52 = vld [vmem:[#allocation5 + $0x5f4] sm:$0xf0] }
 0x345   : > { %9318 = vmatpush.bf16.msrb.mxu1 %v15061_v63  ;;  %v15178_v63 = vld [vmem:[#allocation5 + $0x2120] sm:$0xf0] }
 0x346   : > { %9337 = vmatpush.bf16.msrb.mxu2 %v15253_v26  ;;  %v8964_v62 = vpop.f32.mrf.mxu2  ;;  %v16660_v26 = vld [vmem:[#allocation5 + $0x210c] sm:$0xf] }
 0x347   : > { %9356 = vmatpush.bf16.msrb.mxu3 %v15445_v58  ;;  %v8983_v49 = vpop.f32.mrf.mxu3  ;;  %v8965_v19 = vadd.f32 %v8964_v62, %v8946_v7  ;;  %v8929_v4 = vpop.f32.mrf.mxu0  ;;  %v14986_v7 = vld [vmem:[#allocation5 + $0x1fa0] sm:$0xf0]  ;;  %v15181_v2 = vor.u32 %v16660_v26, %v15178_v63  ;;  %v11104_v26 = vld [vmem:[#allocation5 + $0x130] sm:$0xf]  ;;  %v15644_v63 = vld [vmem:[#allocation5 + $0x144] sm:$0xf0] }
 0x348   : > { %v8948_v41 = vpop.f32.mrf.mxu1  ;;  %v8930_v35 = vadd.f32 %v8929_v4, %v17806_v25  ;;  %9300 = vmatpush.bf16.msrb.mxu0 %v14845_v30  ;;  %v18669_v4 = vld [vmem:[#allocation26_spill] sm:$0xff]  ;;  %v11512_v30 = vld [vmem:[#allocation5 + $0x460] sm:$0xf] }
 0x349   : > { %v17819_v58 = vadd.f32 %v8983_v49, %v8965_v19  ;;  %9319 = vmatpush.bf16.msrb.mxu1 %v15037_v27  ;;  %9232 = vmatmul.bf16.gmra.mxu0 %v18668_v33  ;;  %v15650_v27 = vld [vmem:[#allocation5 + $0x174] sm:$0xf0]  ;;  %v14797_v49 = vor.u32 %v16564_v22, %v14794_v21  ;;  %v14989_v19 = vor.u32 %v16612_v15, %v14986_v7  ;;  %v11296_v22 = vld [vmem:[#allocation5 + $0x2b0] sm:$0xf]  ;;  %v15788_v15 = vld [vmem:[#allocation5 + $0x5c4] sm:$0xf0] }
 0x34a   : > { %9338 = vmatpush.bf16.msrb.mxu2 %v15229_v37  ;;  %v8949_v62 = vadd.f32 %v8948_v41, %v8930_v35  ;;  %9251 = vmatmul.bf16.gmra.mxu1 %v18669_v4  ;;  %v15370_v37 = vld [vmem:[#allocation5 + $0x22a0] sm:$0xf0]  ;;  %v11513_v33 = vor.u32 %v15746_v12, %v11512_v30 }
 0x34b   : > { %9357 = vmatpush.bf16.msrb.mxu3 %v15421_v32  ;;  %9270 = vmatmul.bf16.gmra.mxu2 %v18670_v42  ;;  %v11320_v32 = vld [vmem:[#allocation5 + $0x2e0] sm:$0xf]  ;;  %v15373_v41 = vor.u32 %v16708_v34, %v15370_v37  ;;  %v11129_v42 = vor.u32 %v15650_v27, %v11128_v55  ;;  %v11105_v37 = vor.u32 %v15644_v63, %v11104_v26  ;;  %v15638_v27 = vld [vmem:[#allocation5 + $0x114] sm:$0xf0]  ;;  %v15632_v26 = vld [vmem:[#allocation5 + $0xe4] sm:$0xf0] }
 0x34c   : > { %9289 = vmatmul.bf16.gmra.mxu3 %v18671_v10  ;;  %9301 = vmatpush.bf16.msrb.mxu0 %v14821_v3  ;;  %v15740_v10 = vld [vmem:[#allocation5 + $0x444] sm:$0xf0]  ;;  %v11705_v3 = vor.u32 %v15794_v52, %v11704_v47  ;;  %v11464_v55 = vld [vmem:[#allocation5 + $0x400] sm:$0xf]  ;;  %v11440_v52 = vld [vmem:[#allocation5 + $0x3d0] sm:$0xf] }
 0x34d   : > { %9320 = vmatpush.bf16.msrb.mxu1 %v15013_v38  ;;  %v15692_v38 = vld [vmem:[#allocation5 + $0x2c4] sm:$0xf0]  ;;  %v11248_v63 = vld [vmem:[#allocation5 + $0x250] sm:$0xf] }
 0x34e   : > { %9339 = vmatpush.bf16.msrb.mxu2 %v15205_v59  ;;  %v8967_v35 = vpop.f32.mrf.mxu2  ;;  %v11321_v59 = vor.u32 %v15698_v11, %v11320_v32  ;;  %v11297_v30 = vor.u32 %v15692_v38, %v11296_v22  ;;  %v11272_v32 = vld [vmem:[#allocation5 + $0x280] sm:$0xf]  ;;  %v15680_v38 = vld [vmem:[#allocation5 + $0x264] sm:$0xf0] }
 0x34f   : > { %9358 = vmatpush.bf16.msrb.mxu3 %v15397_v16  ;;  %v8986_v4 = vpop.f32.mrf.mxu3  ;;  %v8968_v43 = vadd.f32 %v8967_v35, %v8949_v62  ;;  %v8931_v31 = vpop.f32.mrf.mxu0  ;;  %v11680_v16 = vld [vmem:[#allocation5 + $0x5b0] sm:$0xf]  ;;  %v11489_v62 = vor.u32 %v15740_v10, %v11488_v36 }
 0x350   : > { %v8950_v61 = vpop.f32.mrf.mxu1  ;;  %v8932_v21 = vadd.f32 %v8931_v31, %v17806_v25  ;;  %9302 = vmatpush.bf16.msrb.mxu0 %v14797_v49  ;;  %v11681_v12 = vor.u32 %v15788_v15, %v11680_v16  ;;  %v15734_v31 = vld [vmem:[#allocation5 + $0x414] sm:$0xf0]  ;;  %v11080_v25 = vld [vmem:[#allocation5 + $0x100] sm:$0xf]  ;;  %v11632_v16 = vld [vmem:[#allocation5 + $0x550] sm:$0xf] }
 0x351   : > { %v17826_v7 = vadd.f32 %v8986_v4, %v8968_v43  ;;  %9321 = vmatpush.bf16.msrb.mxu1 %v14989_v19  ;;  %v15686_v43 = vld [vmem:[#allocation5 + $0x294] sm:$0xf0]  ;;  %v11656_v4 = vld [vmem:[#allocation5 + $0x580] sm:$0xf]  ;;  %v11465_v11 = vor.u32 %v15734_v31, %v11464_v55  ;;  %v11081_v47 = vor.u32 %v15638_v27, %v11080_v25  ;;  %v15728_v19 = vld [vmem:[#allocation5 + $0x3e4] sm:$0xf0]  ;;  %v11249_v55 = vor.u32 %v15680_v38, %v11248_v63 }
 0x352   : > { %9340 = vmatpush.bf16.msrb.mxu2 %v15181_v2  ;;  %v8951_v34 = vadd.f32 %v8950_v61, %v8932_v21  ;;  %v15782_v61 = vld [vmem:[#allocation5 + $0x594] sm:$0xf0]  ;;  %v11273_v35 = vor.u32 %v15686_v43, %v11272_v32  ;;  %v15776_v15 = vld [vmem:[#allocation5 + $0x564] sm:$0xf0]  ;;  %v11032_v25 = vld [vmem:[#allocation5 + $0xa0] sm:$0xf] }
 0x353   : > { %9359 = vmatpush.bf16.msrb.mxu3 %v15373_v41  ;;  %v18672_v21 = vld [vmem:[#allocation30_spill] sm:$0xff]  ;;  %v11633_v31 = vor.u32 %v15776_v15, %v11632_v16  ;;  %v11224_v32 = vld [vmem:[#allocation5 + $0x220] sm:$0xf]  ;;  %v15620_v63 = vld [vmem:[#allocation5 + $0x84] sm:$0xf0] }
 0x354   : > { %9371 = vmatpush.bf16.msra.mxu0 %v11129_v42  ;;  %v15626_v27 = vld [vmem:[#allocation5 + $0xb4] sm:$0xf0]  ;;  %v11200_v38 = vld [vmem:[#allocation5 + $0x1f0] sm:$0xf]  ;;  %v15668_v16 = vld [vmem:[#allocation5 + $0x204] sm:$0xf0] }
 0x355   : > { %9390 = vmatpush.bf16.msra.mxu1 %v11321_v59  ;;  %v11657_v59 = vor.u32 %v15782_v61, %v11656_v4  ;;  %v15674_v43 = vld [vmem:[#allocation5 + $0x234] sm:$0xf0]  ;;  %v11608_v4 = vld [vmem:[#allocation5 + $0x520] sm:$0xf]  ;;  %v11584_v15 = vld [vmem:[#allocation5 + $0x4f0] sm:$0xf] }
 0x356   : > { %9409 = vmatpush.bf16.msra.mxu2 %v11513_v33  ;;  %v8969_v2 = vpop.f32.mrf.mxu2  ;;  %v15770_v61 = vld [vmem:[#allocation5 + $0x534] sm:$0xf0] }
 0x357   : > { %9428 = vmatpush.bf16.msra.mxu3 %v11705_v3  ;;  %v8988_v49 = vpop.f32.mrf.mxu3  ;;  %v8970_v33 = vadd.f32 %v8969_v2, %v8951_v34  ;;  %v9000_v42 = vpop.f32.mrf.mxu0  ;;  %v11056_v3 = vld [vmem:[#allocation5 + $0xd0] sm:$0xf]  ;;  %v18674_v34 = vld [vmem:[#allocation32_spill] sm:$0xff] }
 0x358   : > { %9372 = vmatpush.bf16.msra.mxu0 %v11105_v37  ;;  %v9019_v36 = vpop.f32.mrf.mxu1  ;;  %v9001_v10 = vadd.f32 %v9000_v42, %v17816_v20  ;;  %v18673_v20 = vld [vmem:[#allocation31_spill] sm:$0xff]  ;;  %v11057_v37 = vor.u32 %v15632_v26, %v11056_v3  ;;  %v11609_v3 = vor.u32 %v15770_v61, %v11608_v4  ;;  %v11008_v26 = vld [vmem:[#allocation5 + $0x70] sm:$0xf]  ;;  %v15758_v61 = vld [vmem:[#allocation5 + $0x4d4] sm:$0xf0] }
 0x359   : > { %9391 = vmatpush.bf16.msra.mxu1 %v11297_v30  ;;  %v17829_v41 = vadd.f32 %v8988_v49, %v8970_v33  ;;  %9303 = vmatmul.bf16.vlgmr.msrb.gmra.mxu0 %v18622_v60  ;;  %v11416_v30 = vld [vmem:[#allocation5 + $0x3a0] sm:$0xf] }
 0x35a   : > { %9410 = vmatpush.bf16.msra.mxu2 %v11489_v62  ;;  %v9020_v22 = vadd.f32 %v9019_v36, %v9001_v10  ;;  %9322 = vmatmul.bf16.vlgmr.msrb.gmra.mxu1 %v18672_v21  ;;  %v11441_v62 = vor.u32 %v15728_v19, %v11440_v52  ;;  %v11392_v52 = vld [vmem:[#allocation5 + $0x370] sm:$0xf]  ;;  %v15716_v19 = vld [vmem:[#allocation5 + $0x384] sm:$0xf0]  ;;  %v11560_v4 = vld [vmem:[#allocation5 + $0x4c0] sm:$0xf] }
 0x35b   : > { %9429 = vmatpush.bf16.msra.mxu3 %v11681_v12  ;;  %9341 = vmatmul.bf16.vlgmr.msrb.gmra.mxu2 %v18673_v20  ;;  %v15722_v12 = vld [vmem:[#allocation5 + $0x3b4] sm:$0xf0] }
 0x35c   : > { %9360 = vmatmul.bf16.vlgmr.msrb.gmra.mxu3 %v18674_v34  ;;  %9373 = vmatpush.bf16.msra.mxu0 %v11081_v47  ;;  %v11033_v47 = vor.u32 %v15626_v27, %v11032_v25  ;;  %v15614_v25 = vld [vmem:[#allocation5 + $0x54] sm:$0xf0]  ;;  %v11176_v27 = vld [vmem:[#allocation5 + $0x1c0] sm:$0xf] }
 0x35d   : > { %9392 = vmatpush.bf16.msra.mxu1 %v11273_v35 }
 0x35e   : > { %9411 = vmatpush.bf16.msra.mxu2 %v11465_v11  ;;  %v9038_v2 = vpop.f32.mrf.mxu2  ;;  %v11417_v11 = vor.u32 %v15722_v12, %v11416_v30  ;;  %v15710_v30 = vld [vmem:[#allocation5 + $0x354] sm:$0xf0]  ;;  %v11201_v12 = vor.u32 %v15668_v16, %v11200_v38  ;;  %v11561_v38 = vor.u32 %v15758_v61, %v11560_v4  ;;  %v11152_v16 = vld [vmem:[#allocation5 + $0x190] sm:$0xf]  ;;  %v12472_v4 = vld [vmem:[#allocation5 + $0xbe0] sm:$0xf] }
 0x35f   : > { %9430 = vmatpush.bf16.msra.mxu3 %v11657_v59  ;;  %v9057_v49 = vpop.f32.mrf.mxu3  ;;  %v9039_v33 = vadd.f32 %v9038_v2, %v9020_v22  ;;  %v9002_v42 = vpop.f32.mrf.mxu0  ;;  %v11225_v59 = vor.u32 %v15674_v43, %v11224_v32  ;;  %v15764_v2 = vld [vmem:[#allocation5 + $0x504] sm:$0xf0]  ;;  %v15662_v43 = vld [vmem:[#allocation5 + $0x1d4] sm:$0xf0] }
 0x360   : > { %v9021_v36 = vpop.f32.mrf.mxu1  ;;  %v9003_v10 = vadd.f32 %v9002_v42, %v17819_v58  ;;  %9374 = vmatpush.bf16.msra.mxu0 %v11057_v37  ;;  %v11393_v58 = vor.u32 %v15716_v19, %v11392_v52  ;;  %v11368_v37 = vld [vmem:[#allocation5 + $0x340] sm:$0xf]  ;;  %v15704_v19 = vld [vmem:[#allocation5 + $0x324] sm:$0xf0]  ;;  %v15986_v61 = vld [vmem:[#allocation5 + $0xbf4] sm:$0xf0] }
 0x361   : > { %v17836_v35 = vadd.f32 %v9057_v49, %v9039_v33  ;;  %9393 = vmatpush.bf16.msra.mxu1 %v11249_v55  ;;  %v11585_v55 = vor.u32 %v15764_v2, %v11584_v15  ;;  %v11536_v15 = vld [vmem:[#allocation5 + $0x490] sm:$0xf] }
 0x362   : > { %9412 = vmatpush.bf16.msra.mxu2 %v11441_v62  ;;  %v9022_v22 = vadd.f32 %v9021_v36, %v9003_v10  ;;  %v11009_v62 = vor.u32 %v15620_v63, %v11008_v26  ;;  %v11344_v10 = vld [vmem:[#allocation5 + $0x310] sm:$0xf]  ;;  %v11177_v63 = vor.u32 %v15662_v43, %v11176_v27  ;;  %v15890_v43 = vld [vmem:[#allocation5 + $0x8f4] sm:$0xf0] }
 0x363   : > { %9431 = vmatpush.bf16.msra.mxu3 %v11633_v31  ;;  %v10984_v31 = vld [vmem:[#allocation5 + $0x40] sm:$0xf]  ;;  %v11345_v27 = vor.u32 %v15704_v19, %v11344_v10  ;;  %v11872_v10 = vld [vmem:[#allocation5 + $0x730] sm:$0xf]  ;;  %v15836_v19 = vld [vmem:[#allocation5 + $0x744] sm:$0xf0] }
 0x364   : > { %9375 = vmatpush.bf16.msra.mxu0 %v11033_v47  ;;  %v11369_v47 = vor.u32 %v15710_v30, %v11368_v37  ;;  %v10985_v52 = vor.u32 %v15614_v25, %v10984_v31  ;;  %v15938_v37 = vld [vmem:[#allocation5 + $0xa74] sm:$0xf0]  ;;  %v18677_v30 = vld [vmem:[#allocation35_spill] sm:$0xff]  ;;  %v18678_v31 = vld [vmem:[#allocation36_spill] sm:$0xff] }
 0x365   : > { %9394 = vmatpush.bf16.msra.mxu1 %v11225_v59  ;;  %v10960_v59 = vld [vmem:[#allocation5 + $0x10] sm:$0xf]  ;;  %v11896_v25 = vld [vmem:[#allocation5 + $0x760] sm:$0xf] }
 0x366   : > { %9413 = vmatpush.bf16.msra.mxu2 %v11417_v11  ;;  %v9040_v32 = vpop.f32.mrf.mxu2 }
 0x367   : > { %9432 = vmatpush.bf16.msra.mxu3 %v11609_v3  ;;  %v9059_v49 = vpop.f32.mrf.mxu3  ;;  %v9041_v33 = vadd.f32 %v9040_v32, %v9022_v22  ;;  %v9005_v42 = vpop.f32.mrf.mxu0  ;;  %v15608_v3 = vld [vmem:[#allocation5 + $0x24] sm:$0xf0]  ;;  %v18675_v32 = vld [vmem:[#allocation33_spill] sm:$0xff] }
 0x368   : > { %v9024_v36 = vpop.f32.mrf.mxu1  ;;  %v9006_v11 = vadd.f32 %v9005_v42, %v17826_v7  ;;  %9376 = vmatpush.bf16.msra.mxu0 %v11009_v62  ;;  %v15656_v22 = vld [vmem:[#allocation5 + $0x1a4] sm:$0xf0]  ;;  %v18676_v7 = vld [vmem:[#allocation34_spill] sm:$0xff]  ;;  %v12280_v62 = vld [vmem:[#allocation5 + $0xa60] sm:$0xf] }
 0x369   : > { %v17839_v26 = vadd.f32 %v9059_v49, %v9041_v33  ;;  %9395 = vmatpush.bf16.msra.mxu1 %v11201_v12  ;;  %9308 = vmatmul.bf16.gmra.mxu0 %v18675_v32  ;;  %v15842_v12 = vld [vmem:[#allocation5 + $0x774] sm:$0xf0]  ;;  %v10961_v49 = vor.u32 %v15608_v3, %v10960_v59  ;;  %v11153_v33 = vor.u32 %v15656_v22, %v11152_v16  ;;  %v12256_v32 = vld [vmem:[#allocation5 + $0xa30] sm:$0xf]  ;;  %v15980_v16 = vld [vmem:[#allocation5 + $0xbc4] sm:$0xf0] }
 0x36a   : > { %9414 = vmatpush.bf16.msra.mxu2 %v11393_v58  ;;  %v9025_v2 = vadd.f32 %v9024_v36, %v9006_v11  ;;  %9327 = vmatmul.bf16.gmra.mxu1 %v18676_v7  ;;  %v15752_v58 = vld [vmem:[#allocation5 + $0x4a4] sm:$0xf0]  ;;  %v12281_v7 = vor.u32 %v15938_v37, %v12280_v62  ;;  %v12064_v59 = vld [vmem:[#allocation5 + $0x8b0] sm:$0xf] }
 0x36b   : > { %9433 = vmatpush.bf16.msra.mxu3 %v11585_v55  ;;  %9346 = vmatmul.bf16.gmra.mxu2 %v18677_v30  ;;  %v12088_v55 = vld [vmem:[#allocation5 + $0x8e0] sm:$0xf]  ;;  %v11537_v42 = vor.u32 %v15752_v58, %v11536_v15  ;;  %v11897_v30 = vor.u32 %v15842_v12, %v11896_v25  ;;  %v11873_v58 = vor.u32 %v15836_v19, %v11872_v10  ;;  %v15830_v12 = vld [vmem:[#allocation5 + $0x714] sm:$0xf0]  ;;  %v15824_v10 = vld [vmem:[#allocation5 + $0x6e4] sm:$0xf0] }
 0x36c   : > { %9365 = vmatmul.bf16.gmra.mxu3 %v18678_v31  ;;  %9377 = vmatpush.bf16.msra.mxu0 %v10985_v52  ;;  %v15932_v31 = vld [vmem:[#allocation5 + $0xa44] sm:$0xf0]  ;;  %v12473_v52 = vor.u32 %v15986_v61, %v12472_v4  ;;  %v12232_v25 = vld [vmem:[#allocation5 + $0xa00] sm:$0xf]  ;;  %v12016_v19 = vld [vmem:[#allocation5 + $0x850] sm:$0xf] }
 0x36d   : > { %9396 = vmatpush.bf16.msra.mxu1 %v11177_v63  ;;  %v15884_v63 = vld [vmem:[#allocation5 + $0x8c4] sm:$0xf0] }
 0x36e   : > { %9415 = vmatpush.bf16.msra.mxu2 %v11369_v47  ;;  %v9043_v36 = vpop.f32.mrf.mxu2  ;;  %v12089_v47 = vor.u32 %v15890_v43, %v12088_v55  ;;  %v12065_v62 = vor.u32 %v15884_v63, %v12064_v59  ;;  %v12040_v55 = vld [vmem:[#allocation5 + $0x880] sm:$0xf]  ;;  %v12400_v63 = vld [vmem:[#allocation5 + $0xb50] sm:$0xf] }
 0x36f   : > { %9434 = vmatpush.bf16.msra.mxu3 %v11561_v38  ;;  %v9062_v11 = vpop.f32.mrf.mxu3  ;;  %v9044_v34 = vadd.f32 %v9043_v36, %v9025_v2  ;;  %v9007_v20 = vpop.f32.mrf.mxu0  ;;  %v12448_v38 = vld [vmem:[#allocation5 + $0xbb0] sm:$0xf]  ;;  %v12257_v2 = vor.u32 %v15932_v31, %v12256_v32  ;;  %v12424_v43 = vld [vmem:[#allocation5 + $0xb80] sm:$0xf] }
 0x370   : > { %v9026_v21 = vpop.f32.mrf.mxu1  ;;  %v9008_v3 = vadd.f32 %v9007_v20, %v17829_v41  ;;  %9378 = vmatpush.bf16.msra.mxu0 %v10961_v49  ;;  %v12449_v37 = vor.u32 %v15980_v16, %v12448_v38  ;;  %v15926_v41 = vld [vmem:[#allocation5 + $0xa14] sm:$0xf0]  ;;  %v11848_v20 = vld [vmem:[#allocation5 + $0x700] sm:$0xf]  ;;  %v15968_v38 = vld [vmem:[#allocation5 + $0xb64] sm:$0xf0] }
 0x371   : > { %v17846_v22 = vadd.f32 %v9062_v11, %v9044_v34  ;;  %9397 = vmatpush.bf16.msra.mxu1 %v11153_v33  ;;  %v15878_v34 = vld [vmem:[#allocation5 + $0x894] sm:$0xf0]  ;;  %v12233_v4 = vor.u32 %v15926_v41, %v12232_v25  ;;  %v11849_v61 = vor.u32 %v15830_v12, %v11848_v20  ;;  %v12208_v33 = vld [vmem:[#allocation5 + $0x9d0] sm:$0xf]  ;;  %v11992_v41 = vld [vmem:[#allocation5 + $0x820] sm:$0xf] }
 0x372   : > { %9416 = vmatpush.bf16.msra.mxu2 %v11345_v27  ;;  %v9027_v15 = vadd.f32 %v9026_v21, %v9008_v3  ;;  %v15974_v21 = vld [vmem:[#allocation5 + $0xb94] sm:$0xf0]  ;;  %v12041_v11 = vor.u32 %v15878_v34, %v12040_v55  ;;  %v15872_v3 = vld [vmem:[#allocation5 + $0x864] sm:$0xf0] }
 0x373   : > { %9435 = vmatpush.bf16.msra.mxu3 %v11537_v42  ;;  %v15920_v42 = vld [vmem:[#allocation5 + $0x9e4] sm:$0xf0]  ;;  %v15818_v25 = vld [vmem:[#allocation5 + $0x6b4] sm:$0xf0] }
 0x374   : > { %9447 = vmatpush.bf16.msrb.mxu0 %v11897_v30  ;;  %v15866_v55 = vld [vmem:[#allocation5 + $0x834] sm:$0xf0] }
 0x375   : > { %9466 = vmatpush.bf16.msrb.mxu1 %v12089_v47  ;;  %v12425_v47 = vor.u32 %v15974_v21, %v12424_v43 }
 0x376   : > { %9485 = vmatpush.bf16.msrb.mxu2 %v12281_v7  ;;  %v9045_v27 = vpop.f32.mrf.mxu2 }
 0x377   : > { %9504 = vmatpush.bf16.msrb.mxu3 %v12473_v52  ;;  %v9064_v49 = vpop.f32.mrf.mxu3  ;;  %v9046_v7 = vadd.f32 %v9045_v27, %v9027_v15  ;;  %v9076_v30 = vpop.f32.mrf.mxu0  ;;  %v11824_v52 = vld [vmem:[#allocation5 + $0x6d0] sm:$0xf]  ;;  %v12184_v15 = vld [vmem:[#allocation5 + $0x9a0] sm:$0xf] }
 0x378   : > { %9448 = vmatpush.bf16.msrb.mxu0 %v11873_v58  ;;  %v9095_v32 = vpop.f32.mrf.mxu1  ;;  %v9077_v31 = vadd.f32 %v9076_v30, %v17836_v35  ;;  %v12209_v35 = vor.u32 %v15920_v42, %v12208_v33  ;;  %v11825_v16 = vor.u32 %v15824_v10, %v11824_v52  ;;  %v12017_v58 = vor.u32 %v15872_v3, %v12016_v19  ;;  %v12376_v27 = vld [vmem:[#allocation5 + $0xb20] sm:$0xf]  ;;  %v11968_v52 = vld [vmem:[#allocation5 + $0x7f0] sm:$0xf]  ;;  %v15860_v19 = vld [vmem:[#allocation5 + $0x804] sm:$0xf0] }
 0x379   : > { %9467 = vmatpush.bf16.msrb.mxu1 %v12065_v62  ;;  %v17849_v36 = vadd.f32 %v9064_v49, %v9046_v7  ;;  %9379 = vmatmul.bf16.vlgmr.msra.gmra.mxu0 %v17214_v48  ;;  %v12401_v62 = vor.u32 %v15968_v38, %v12400_v63  ;;  %v15962_v49 = vld [vmem:[#allocation5 + $0xb34] sm:$0xf0]  ;;  %v11993_v33 = vor.u32 %v15866_v55, %v11992_v41  ;;  %v15956_v3 = vld [vmem:[#allocation5 + $0xb04] sm:$0xf0]  ;;  %v12136_v38 = vld [vmem:[#allocation5 + $0x940] sm:$0xf] }
 0x37a   : > { %9486 = vmatpush.bf16.msrb.mxu2 %v12257_v2  ;;  %v9096_v59 = vadd.f32 %v9095_v32, %v9077_v31  ;;  %9398 = vmatmul.bf16.vlgmr.msra.gmra.mxu1 %v17216_v53  ;;  %v15914_v2 = vld [vmem:[#allocation5 + $0x9b4] sm:$0xf0]  ;;  %v12160_v31 = vld [vmem:[#allocation5 + $0x970] sm:$0xf]  ;;  %v12377_v42 = vor.u32 %v15962_v49, %v12376_v27 }
 0x37b   : > { %9505 = vmatpush.bf16.msrb.mxu3 %v12449_v37  ;;  %9417 = vmatmul.bf16.vlgmr.msra.gmra.mxu2 %v17218_v54  ;;  %v11800_v37 = vld [vmem:[#allocation5 + $0x6a0] sm:$0xf]  ;;  %v12185_v30 = vor.u32 %v15914_v2, %v12184_v15  ;;  %v15854_v41 = vld [vmem:[#allocation5 + $0x7d4] sm:$0xf0] }
 0x37c   : > { %9436 = vmatmul.bf16.vlgmr.msra.gmra.mxu3 %v17220_v57  ;;  %9449 = vmatpush.bf16.msrb.mxu0 %v11849_v61  ;;  %v11801_v32 = vor.u32 %v15818_v25, %v11800_v37  ;;  %v11752_v2 = vld [vmem:[#allocation5 + $0x640] sm:$0xf] }
 0x37d   : > { %9468 = vmatpush.bf16.msrb.mxu1 %v12041_v11  ;;  %v11776_v11 = vld [vmem:[#allocation5 + $0x670] sm:$0xf] }
 0x37e   : > { %9487 = vmatpush.bf16.msrb.mxu2 %v12233_v4  ;;  %v9114_v20 = vpop.f32.mrf.mxu2  ;;  %v15908_v4 = vld [vmem:[#allocation5 + $0x984] sm:$0xf0] }
 0x37f   : > { %9506 = vmatpush.bf16.msrb.mxu3 %v12425_v47  ;;  %v9133_v12 = vpop.f32.mrf.mxu3  ;;  %v9115_v34 = vadd.f32 %v9114_v20, %v9096_v59  ;;  %v9078_v43 = vpop.f32.mrf.mxu0  ;;  %v15812_v47 = vld [vmem:[#allocation5 + $0x684] sm:$0xf0]  ;;  %v12352_v59 = vld [vmem:[#allocation5 + $0xaf0] sm:$0xf]  ;;  %v12328_v20 = vld [vmem:[#allocation5 + $0xac0] sm:$0xf] }
 0x380   : > { %v9097_v21 = vpop.f32.mrf.mxu1  ;;  %v9079_v7 = vadd.f32 %v9078_v43, %v17839_v26  ;;  %9450 = vmatpush.bf16.msrb.mxu0 %v11825_v16  ;;  %v12161_v26 = vor.u32 %v15908_v4, %v12160_v31  ;;  %v11777_v63 = vor.u32 %v15812_v47, %v11776_v11  ;;  %v11969_v16 = vor.u32 %v15860_v19, %v11968_v52  ;;  %v15800_v31 = vld [vmem:[#allocation5 + $0x624] sm:$0xf0]  ;;  %v11920_v11 = vld [vmem:[#allocation5 + $0x790] sm:$0xf]  ;;  %v13048_v19 = vld [vmem:[#allocation5 + $0x1060] sm:$0xf] }
 0x381   : > { %v17856_v61 = vadd.f32 %v9133_v12, %v9115_v34  ;;  %9469 = vmatpush.bf16.msrb.mxu1 %v12017_v58  ;;  %v12353_v15 = vor.u32 %v15956_v3, %v12352_v59  ;;  %v15806_v58 = vld [vmem:[#allocation5 + $0x654] sm:$0xf0]  ;;  %v12112_v34 = vld [vmem:[#allocation5 + $0x910] sm:$0xf]  ;;  %v15848_v47 = vld [vmem:[#allocation5 + $0x7a4] sm:$0xf0] }
 0x382   : > { %9488 = vmatpush.bf16.msrb.mxu2 %v12209_v35  ;;  %v9098_v10 = vadd.f32 %v9097_v21, %v9079_v7  ;;  %v15902_v35 = vld [vmem:[#allocation5 + $0x954] sm:$0xf0]  ;;  %v11753_v7 = vor.u32 %v15806_v58, %v11752_v2  ;;  %v12304_v52 = vld [vmem:[#allocation5 + $0xa90] sm:$0xf]  ;;  %v12664_v3 = vld [vmem:[#allocation5 + $0xd60] sm:$0xf]  ;;  %v11921_v58 = vor.u32 %v15848_v47, %v11920_v11 }
 0x383   : > { %9507 = vmatpush.bf16.msrb.mxu3 %v12401_v62  ;;  %v11944_v62 = vld [vmem:[#allocation5 + $0x7c0] sm:$0xf]  ;;  %v15950_v12 = vld [vmem:[#allocation5 + $0xad4] sm:$0xf0]  ;;  %v12137_v21 = vor.u32 %v15902_v35, %v12136_v38  ;;  %v16172_v11 = vld [vmem:[#allocation5 + $0x11c4] sm:$0xf0] }
 0x384   : > { %9451 = vmatpush.bf16.msrb.mxu0 %v11801_v32  ;;  %v11728_v32 = vld [vmem:[#allocation5 + $0x610] sm:$0xf]  ;;  %v16130_v59 = vld [vmem:[#allocation5 + $0x1074] sm:$0xf0] }
 0x385   : > { %9470 = vmatpush.bf16.msrb.mxu1 %v11993_v33  ;;  %v11945_v33 = vor.u32 %v15854_v41, %v11944_v62  ;;  %v11729_v35 = vor.u32 %v15800_v31, %v11728_v32  ;;  %v16178_v2 = vld [vmem:[#allocation5 + $0x11f4] sm:$0xf0]  ;;  %v13049_v41 = vor.u32 %v16130_v59, %v13048_v19  ;;  %v12832_v32 = vld [vmem:[#allocation5 + $0xeb0] sm:$0xf] }
 0x386   : > { %9489 = vmatpush.bf16.msrb.mxu2 %v12185_v30  ;;  %v9116_v37 = vpop.f32.mrf.mxu2  ;;  %v15896_v30 = vld [vmem:[#allocation5 + $0x924] sm:$0xf0] }
 0x387   : > { %9508 = vmatpush.bf16.msrb.mxu3 %v12377_v42  ;;  %v9135_v25 = vpop.f32.mrf.mxu3  ;;  %v9117_v55 = vadd.f32 %v9116_v37, %v9098_v10  ;;  %v9081_v27 = vpop.f32.mrf.mxu0  ;;  %v12329_v42 = vor.u32 %v15950_v12, %v12328_v20  ;;  %v12113_v38 = vor.u32 %v15896_v30, %v12112_v34  ;;  %v13024_v12 = vld [vmem:[#allocation5 + $0x1030] sm:$0xf]  ;;  %v16028_v30 = vld [vmem:[#allocation5 + $0xd44] sm:$0xf0] }
 0x388   : > { %v9100_v49 = vpop.f32.mrf.mxu1  ;;  %v9082_v43 = vadd.f32 %v9081_v27, %v17846_v22  ;;  %9452 = vmatpush.bf16.msrb.mxu0 %v11777_v63  ;;  %v15944_v22 = vld [vmem:[#allocation5 + $0xaa4] sm:$0xf0]  ;;  %v12856_v63 = vld [vmem:[#allocation5 + $0xee0] sm:$0xf]  ;;  %v12640_v34 = vld [vmem:[#allocation5 + $0xd30] sm:$0xf] }
 0x389   : > { %v17859_v4 = vadd.f32 %v9135_v25, %v9117_v55  ;;  %9471 = vmatpush.bf16.msrb.mxu1 %v11969_v16  ;;  %9384 = vmatmul.bf16.gmra.mxu0 %v17234_v44  ;;  %v16082_v16 = vld [vmem:[#allocation5 + $0xef4] sm:$0xf0]  ;;  %v12305_v62 = vor.u32 %v15944_v22, %v12304_v52  ;;  %v16124_v55 = vld [vmem:[#allocation5 + $0x1044] sm:$0xf0]  ;;  %v12641_v22 = vor.u32 %v16028_v30, %v12640_v34  ;;  %v12784_v30 = vld [vmem:[#allocation5 + $0xe50] sm:$0xf] }
 0x38a   : > { %9490 = vmatpush.bf16.msrb.mxu2 %v12161_v26  ;;  %v9101_v10 = vadd.f32 %v9100_v49, %v9082_v43  ;;  %9403 = vmatmul.bf16.gmra.mxu1 %v17236_v50  ;;  %v16034_v26 = vld [vmem:[#allocation5 + $0xd74] sm:$0xf0]  ;;  %v16016_v34 = vld [vmem:[#allocation5 + $0xce4] sm:$0xf0] }
 0x38b   : > { %9509 = vmatpush.bf16.msrb.mxu3 %v12353_v15  ;;  %9422 = vmatmul.bf16.gmra.mxu2 %v17238_v51  ;;  %v13240_v15 = vld [vmem:[#allocation5 + $0x11e0] sm:$0xf]  ;;  %v12665_v20 = vor.u32 %v16034_v26, %v12664_v3 }
 0x38c   : > { %9441 = vmatmul.bf16.gmra.mxu3 %v17240_v56  ;;  %9453 = vmatpush.bf16.msrb.mxu0 %v11753_v7  ;;  %v13241_v7 = vor.u32 %v16178_v2, %v13240_v15  ;;  %v13000_v3 = vld [vmem:[#allocation5 + $0x1000] sm:$0xf]  ;;  %v16070_v15 = vld [vmem:[#allocation5 + $0xe94] sm:$0xf0] }
 0x38d   : > { %9472 = vmatpush.bf16.msrb.mxu1 %v11945_v33  ;;  %v16076_v33 = vld [vmem:[#allocation5 + $0xec4] sm:$0xf0]  ;;  %v12616_v26 = vld [vmem:[#allocation5 + $0xd00] sm:$0xf] }
 0x38e   : > { %9491 = vmatpush.bf16.msrb.mxu2 %v12137_v21  ;;  %v9119_v37 = vpop.f32.mrf.mxu2  ;;  %v12857_v21 = vor.u32 %v16082_v16, %v12856_v63  ;;  %v12833_v19 = vor.u32 %v16076_v33, %v12832_v32  ;;  %v16022_v63 = vld [vmem:[#allocation5 + $0xd14] sm:$0xf0]  ;;  %v13192_v2 = vld [vmem:[#allocation5 + $0x1180] sm:$0xf]  ;;  %v13168_v33 = vld [vmem:[#allocation5 + $0x1150] sm:$0xf] }
 0x38f   : > { %9510 = vmatpush.bf16.msrb.mxu3 %v12329_v42  ;;  %v9138_v25 = vpop.f32.mrf.mxu3  ;;  %v9120_v27 = vadd.f32 %v9119_v37, %v9101_v10  ;;  %v9083_v49 = vpop.f32.mrf.mxu0  ;;  %v13216_v42 = vld [vmem:[#allocation5 + $0x11b0] sm:$0xf]  ;;  %v13025_v10 = vor.u32 %v16124_v55, %v13024_v12  ;;  %v12617_v12 = vor.u32 %v16022_v63, %v12616_v26 }
 0x390   : > { %v9102_v43 = vpop.f32.mrf.mxu1  ;;  %v9084_v31 = vadd.f32 %v9083_v49, %v17849_v36  ;;  %9454 = vmatpush.bf16.msrb.mxu0 %v11729_v35  ;;  %v13217_v59 = vor.u32 %v16172_v11, %v13216_v42  ;;  %v16118_v36 = vld [vmem:[#allocation5 + $0x1014] sm:$0xf0]  ;;  %v12976_v55 = vld [vmem:[#allocation5 + $0xfd0] sm:$0xf]  ;;  %v16160_v42 = vld [vmem:[#allocation5 + $0x1164] sm:$0xf0] }
 0x391   : > { %v17866_v47 = vadd.f32 %v9138_v25, %v9120_v27  ;;  %9473 = vmatpush.bf16.msrb.mxu1 %v11921_v58  ;;  %v16166_v58 = vld [vmem:[#allocation5 + $0x1194] sm:$0xf0]  ;;  %v16112_v27 = vld [vmem:[#allocation5 + $0xfe4] sm:$0xf0] }
 0x392   : > { %9492 = vmatpush.bf16.msrb.mxu2 %v12113_v38  ;;  %v9103_v52 = vadd.f32 %v9102_v43, %v9084_v31  ;;  %v12808_v38 = vld [vmem:[#allocation5 + $0xe80] sm:$0xf]  ;;  %v16064_v31 = vld [vmem:[#allocation5 + $0xe64] sm:$0xf0] }
 0x393   : > { %9511 = vmatpush.bf16.msrb.mxu3 %v12305_v62  ;;  %v12809_v43 = vor.u32 %v16070_v15, %v12808_v38  ;;  %v16058_v38 = vld [vmem:[#allocation5 + $0xe34] sm:$0xf0] }
 0x394   : > { %9523 = vmatpush.bf16.msra.mxu0 %v12665_v20  ;;  %v13001_v20 = vor.u32 %v16118_v36, %v13000_v3  ;;  %v16010_v3 = vld [vmem:[#allocation5 + $0xcb4] sm:$0xf0]  ;;  %v12760_v36 = vld [vmem:[#allocation5 + $0xe20] sm:$0xf] }
 0x395   : > { %9542 = vmatpush.bf16.msra.mxu1 %v12857_v21  ;;  %v13193_v21 = vor.u32 %v16166_v58, %v13192_v2 }
 0x396   : > { %9561 = vmatpush.bf16.msra.mxu2 %v13049_v41  ;;  %v9121_v35 = vpop.f32.mrf.mxu2 }
 0x397   : > { %9580 = vmatpush.bf16.msra.mxu3 %v13241_v7  ;;  %v9140_v16 = vpop.f32.mrf.mxu3  ;;  %v9122_v62 = vadd.f32 %v9121_v35, %v9103_v52  ;;  %v9152_v37 = vpop.f32.mrf.mxu0  ;;  %v12592_v7 = vld [vmem:[#allocation5 + $0xcd0] sm:$0xf]  ;;  %v12952_v52 = vld [vmem:[#allocation5 + $0xfa0] sm:$0xf] }
 0x398   : > { %9524 = vmatpush.bf16.msra.mxu0 %v12641_v22  ;;  %v9171_v25 = vpop.f32.mrf.mxu1  ;;  %v9153_v41 = vadd.f32 %v9152_v37, %v17856_v61  ;;  %v12977_v61 = vor.u32 %v16112_v27, %v12976_v55  ;;  %v12593_v11 = vor.u32 %v16016_v34, %v12592_v7  ;;  %v12785_v22 = vor.u32 %v16064_v31, %v12784_v30  ;;  %v13144_v35 = vld [vmem:[#allocation5 + $0x1120] sm:$0xf]  ;;  %v12736_v7 = vld [vmem:[#allocation5 + $0xdf0] sm:$0xf]  ;;  %v16052_v30 = vld [vmem:[#allocation5 + $0xe04] sm:$0xf0] }
 0x399   : > { %9543 = vmatpush.bf16.msra.mxu1 %v12833_v19  ;;  %v17869_v49 = vadd.f32 %v9140_v16, %v9122_v62  ;;  %9455 = vmatmul.bf16.vlgmr.msrb.gmra.mxu0 %v17254_v0  ;;  %v13169_v19 = vor.u32 %v16160_v42, %v13168_v33  ;;  %v16154_v16 = vld [vmem:[#allocation5 + $0x1134] sm:$0xf0]  ;;  %v12761_v55 = vor.u32 %v16058_v38, %v12760_v36  ;;  %v16148_v31 = vld [vmem:[#allocation5 + $0x1104] sm:$0xf0]  ;;  %v12904_v42 = vld [vmem:[#allocation5 + $0xf40] sm:$0xf] }
 0x39a   : > { %9562 = vmatpush.bf16.msra.mxu2 %v13025_v10  ;;  %v9172_v32 = vadd.f32 %v9171_v25, %v9153_v41  ;;  %9474 = vmatmul.bf16.vlgmr.msrb.gmra.mxu1 %v17256_v1  ;;  %v16106_v10 = vld [vmem:[#allocation5 + $0xfb4] sm:$0xf0]  ;;  %v12928_v41 = vld [vmem:[#allocation5 + $0xf70] sm:$0xf]  ;;  %v13145_v27 = vor.u32 %v16154_v16, %v13144_v35 }
 0x39b   : > { %9581 = vmatpush.bf16.msra.mxu3 %v13217_v59  ;;  %9493 = vmatmul.bf16.vlgmr.msrb.gmra.mxu2 %v17258_v5  ;;  %v12568_v59 = vld [vmem:[#allocation5 + $0xca0] sm:$0xf]  ;;  %v12953_v37 = vor.u32 %v16106_v10, %v12952_v52  ;;  %v16046_v36 = vld [vmem:[#allocation5 + $0xdd4] sm:$0xf0] }
 0x39c   : > { %9512 = vmatmul.bf16.vlgmr.msrb.gmra.mxu3 %v17260_v6  ;;  %9525 = vmatpush.bf16.msra.mxu0 %v12617_v12  ;;  %v12569_v25 = vor.u32 %v16010_v3, %v12568_v59  ;;  %v12520_v10 = vld [vmem:[#allocation5 + $0xc40] sm:$0xf] }
 0x39d   : > { %9544 = vmatpush.bf16.msra.mxu1 %v12809_v43  ;;  %v12544_v43 = vld [vmem:[#allocation5 + $0xc70] sm:$0xf] }
 0x39e   : > { %9563 = vmatpush.bf16.msra.mxu2 %v13001_v20  ;;  %v9190_v26 = vpop.f32.mrf.mxu2  ;;  %v16100_v20 = vld [vmem:[#allocation5 + $0xf84] sm:$0xf0] }
 0x39f   : > { %9582 = vmatpush.bf16.msra.mxu3 %v13193_v21  ;;  %v9209_v63 = vpop.f32.mrf.mxu3  ;;  %v9191_v15 = vadd.f32 %v9190_v26, %v9172_v32  ;;  %v9154_v2 = vpop.f32.mrf.mxu0  ;;  %v16004_v21 = vld [vmem:[#allocation5 + $0xc84] sm:$0xf0]  ;;  %v13120_v32 = vld [vmem:[#allocation5 + $0x10f0] sm:$0xf]  ;;  %v13096_v26 = vld [vmem:[#allocation5 + $0x10c0] sm:$0xf] }
 0x3a0   : > { %v9173_v58 = vpop.f32.mrf.mxu1  ;;  %v9155_v62 = vadd.f32 %v9154_v2, %v17859_v4  ;;  %9526 = vmatpush.bf16.msra.mxu0 %v12593_v11  ;;  %v12929_v4 = vor.u32 %v16100_v20, %v12928_v41  ;;  %v12545_v33 = vor.u32 %v16004_v21, %v12544_v43  ;;  %v12737_v11 = vor.u32 %v16052_v30, %v12736_v7  ;;  %v15992_v41 = vld [vmem:[#allocation5 + $0xc24] sm:$0xf0]  ;;  %v12688_v43 = vld [vmem:[#allocation5 + $0xd90] sm:$0xf]  ;;  %v13816_v30 = vld [vmem:[#allocation5 + $0x1660] sm:$0xf] }
 0x3a1   : > { %v17876_v12 = vadd.f32 %v9209_v63, %v9191_v15  ;;  %9545 = vmatpush.bf16.msra.mxu1 %v12785_v22  ;;  %v13121_v52 = vor.u32 %v16148_v31, %v13120_v32  ;;  %v15998_v22 = vld [vmem:[#allocation5 + $0xc54] sm:$0xf0]  ;;  %v12880_v15 = vld [vmem:[#allocation5 + $0xf10] sm:$0xf]  ;;  %v16040_v21 = vld [vmem:[#allocation5 + $0xda4] sm:$0xf0] }
 0x3a2   : > { %9564 = vmatpush.bf16.msra.mxu2 %v12977_v61  ;;  %v9174_v34 = vadd.f32 %v9173_v58, %v9155_v62  ;;  %v16094_v61 = vld [vmem:[#allocation5 + $0xf54] sm:$0xf0]  ;;  %v12521_v62 = vor.u32 %v15998_v22, %v12520_v10  ;;  %v13072_v7 = vld [vmem:[#allocation5 + $0x1090] sm:$0xf]  ;;  %v13432_v31 = vld [vmem:[#allocation5 + $0x1360] sm:$0xf]  ;;  %v12689_v22 = vor.u32 %v16040_v21, %v12688_v43 }
 0x3a3   : > { %9583 = vmatpush.bf16.msra.mxu3 %v13169_v19  ;;  %v12712_v19 = vld [vmem:[#allocation5 + $0xdc0] sm:$0xf]  ;;  %v16142_v63 = vld [vmem:[#allocation5 + $0x10d4] sm:$0xf0]  ;;  %v12905_v58 = vor.u32 %v16094_v61, %v12904_v42  ;;  %v16364_v43 = vld [vmem:[#allocation5 + $0x17c4] sm:$0xf0] }
 0x3a4   : > { %9527 = vmatpush.bf16.msra.mxu0 %v12569_v25  ;;  %v12496_v25 = vld [vmem:[#allocation5 + $0xc10] sm:$0xf]  ;;  %v16322_v32 = vld [vmem:[#allocation5 + $0x1674] sm:$0xf0] }
 0x3a5   : > { %9546 = vmatpush.bf16.msra.mxu1 %v12761_v55  ;;  %v12713_v55 = vor.u32 %v16046_v36, %v12712_v19  ;;  %v12497_v61 = vor.u32 %v15992_v41, %v12496_v25  ;;  %v16370_v10 = vld [vmem:[#allocation5 + $0x17f4] sm:$0xf0]  ;;  %v13817_v36 = vor.u32 %v16322_v32, %v13816_v30  ;;  %v13600_v25 = vld [vmem:[#allocation5 + $0x14b0] sm:$0xf] }
 0x3a6   : > { %9565 = vmatpush.bf16.msra.mxu2 %v12953_v37  ;;  %v9192_v59 = vpop.f32.mrf.mxu2  ;;  %v16088_v37 = vld [vmem:[#allocation5 + $0xf24] sm:$0xf0] }
 0x3a7   : > { %9584 = vmatpush.bf16.msra.mxu3 %v13145_v27  ;;  %v9211_v3 = vpop.f32.mrf.mxu3  ;;  %v9193_v38 = vadd.f32 %v9192_v59, %v9174_v34  ;;  %v9157_v35 = vpop.f32.mrf.mxu0  ;;  %v13097_v27 = vor.u32 %v16142_v63, %v13096_v26  ;;  %v12881_v42 = vor.u32 %v16088_v37, %v12880_v15  ;;  %v13792_v63 = vld [vmem:[#allocation5 + $0x1630] sm:$0xf]  ;;  %v16220_v37 = vld [vmem:[#allocation5 + $0x1344] sm:$0xf0] }
 0x3a8   : > { %v9176_v16 = vpop.f32.mrf.mxu1  ;;  %v9158_v2 = vadd.f32 %v9157_v35, %v17866_v47  ;;  %9528 = vmatpush.bf16.msra.mxu0 %v12545_v33  ;;  %v16136_v47 = vld [vmem:[#allocation5 + $0x10a4] sm:$0xf0]  ;;  %v13624_v33 = vld [vmem:[#allocation5 + $0x14e0] sm:$0xf]  ;;  %v13408_v15 = vld [vmem:[#allocation5 + $0x1330] sm:$0xf] }
 0x3a9   : > { %v17879_v20 = vadd.f32 %v9211_v3, %v9193_v38  ;;  %9547 = vmatpush.bf16.msra.mxu1 %v12737_v11  ;;  %9460 = vmatmul.bf16.gmra.mxu0 %v17274_v8  ;;  %v16274_v11 = vld [vmem:[#allocation5 + $0x14f4] sm:$0xf0]  ;;  %v13073_v19 = vor.u32 %v16136_v47, %v13072_v7  ;;  %v16316_v38 = vld [vmem:[#allocation5 + $0x1644] sm:$0xf0]  ;;  %v13409_v47 = vor.u32 %v16220_v37, %v13408_v15  ;;  %v13552_v37 = vld [vmem:[#allocation5 + $0x1450] sm:$0xf] }
 0x3aa   : > { %9566 = vmatpush.bf16.msra.mxu2 %v12929_v4  ;;  %v9177_v34 = vadd.f32 %v9176_v16, %v9158_v2  ;;  %9479 = vmatmul.bf16.gmra.mxu1 %v17276_v9  ;;  %v16226_v4 = vld [vmem:[#allocation5 + $0x1374] sm:$0xf0]  ;;  %v16208_v15 = vld [vmem:[#allocation5 + $0x12e4] sm:$0xf0] }
 0x3ab   : > { %9585 = vmatpush.bf16.msra.mxu3 %v13121_v52  ;;  %9498 = vmatmul.bf16.gmra.mxu2 %v17278_v13  ;;  %v14008_v52 = vld [vmem:[#allocation5 + $0x17e0] sm:$0xf]  ;;  %v13433_v26 = vor.u32 %v16226_v4, %v13432_v31 }
 0x3ac   : > { %9517 = vmatmul.bf16.gmra.mxu3 %v17280_v14  ;;  %9529 = vmatpush.bf16.msra.mxu0 %v12521_v62  ;;  %v14009_v62 = vor.u32 %v16370_v10, %v14008_v52  ;;  %v13768_v31 = vld [vmem:[#allocation5 + $0x1600] sm:$0xf]  ;;  %v16262_v52 = vld [vmem:[#allocation5 + $0x1494] sm:$0xf0] }
 0x3ad   : > { %9548 = vmatpush.bf16.msra.mxu1 %v12713_v55  ;;  %v16268_v55 = vld [vmem:[#allocation5 + $0x14c4] sm:$0xf0]  ;;  %v13384_v4 = vld [vmem:[#allocation5 + $0x1300] sm:$0xf] }
 0x3ae   : > { %9567 = vmatpush.bf16.msra.mxu2 %v12905_v58  ;;  %v9195_v59 = vpop.f32.mrf.mxu2  ;;  %v13625_v58 = vor.u32 %v16274_v11, %v13624_v33  ;;  %v13601_v30 = vor.u32 %v16268_v55, %v13600_v25  ;;  %v16214_v33 = vld [vmem:[#allocation5 + $0x1314] sm:$0xf0]  ;;  %v13960_v10 = vld [vmem:[#allocation5 + $0x1780] sm:$0xf]  ;;  %v13936_v55 = vld [vmem:[#allocation5 + $0x1750] sm:$0xf] }
 0x3af   : > { %9586 = vmatpush.bf16.msra.mxu3 %v13097_v27  ;;  %v9214_v3 = vpop.f32.mrf.mxu3  ;;  %v9196_v35 = vadd.f32 %v9195_v59, %v9177_v34  ;;  %v9159_v16 = vpop.f32.mrf.mxu0  ;;  %v13984_v27 = vld [vmem:[#allocation5 + $0x17b0] sm:$0xf]  ;;  %v13793_v34 = vor.u32 %v16316_v38, %v13792_v63  ;;  %v13385_v63 = vor.u32 %v16214_v33, %v13384_v4 }
 0x3b0   : > { %v9178_v2 = vpop.f32.mrf.mxu1  ;;  %v9160_v41 = vadd.f32 %v9159_v16, %v17869_v49  ;;  %9530 = vmatpush.bf16.msra.mxu0 %v12497_v61  ;;  %v13985_v32 = vor.u32 %v16364_v43, %v13984_v27  ;;  %v16310_v49 = vld [vmem:[#allocation5 + $0x1614] sm:$0xf0]  ;;  %v13744_v38 = vld [vmem:[#allocation5 + $0x15d0] sm:$0xf]  ;;  %v16352_v27 = vld [vmem:[#allocation5 + $0x1764] sm:$0xf0] }
 0x3b1   : > { %v17886_v21 = vadd.f32 %v9214_v3, %v9196_v35  ;;  %9549 = vmatpush.bf16.msra.mxu1 %v12689_v22  ;;  %v16358_v22 = vld [vmem:[#allocation5 + $0x1794] sm:$0xf0]  ;;  %v16304_v35 = vld [vmem:[#allocation5 + $0x15e4] sm:$0xf0] }
 0x3b2   : > { %9568 = vmatpush.bf16.msra.mxu2 %v12881_v42  ;;  %v9179_v7 = vadd.f32 %v9178_v2, %v9160_v41  ;;  %v13576_v42 = vld [vmem:[#allocation5 + $0x1480] sm:$0xf]  ;;  %v16256_v41 = vld [vmem:[#allocation5 + $0x1464] sm:$0xf0] }
 0x3b3   : > { %9587 = vmatpush.bf16.msra.mxu3 %v13073_v19  ;;  %v13577_v2 = vor.u32 %v16262_v52, %v13576_v42  ;;  %v16250_v42 = vld [vmem:[#allocation5 + $0x1434] sm:$0xf0] }
 0x3b4   : > { %9599 = vmatpush.bf16.msrb.mxu0 %v13433_v26  ;;  %v13769_v26 = vor.u32 %v16310_v49, %v13768_v31  ;;  %v16202_v31 = vld [vmem:[#allocation5 + $0x12b4] sm:$0xf0]  ;;  %v13528_v49 = vld [vmem:[#allocation5 + $0x1420] sm:$0xf] }
 0x3b5   : > { %9618 = vmatpush.bf16.msrb.mxu1 %v13625_v58  ;;  %v13961_v58 = vor.u32 %v16358_v22, %v13960_v10 }
 0x3b6   : > { %9637 = vmatpush.bf16.msrb.mxu2 %v13817_v36  ;;  %v9197_v61 = vpop.f32.mrf.mxu2 }
 0x3b7   : > { %9656 = vmatpush.bf16.msrb.mxu3 %v14009_v62  ;;  %v9216_v11 = vpop.f32.mrf.mxu3  ;;  %v9198_v19 = vadd.f32 %v9197_v61, %v9179_v7  ;;  %v9228_v59 = vpop.f32.mrf.mxu0  ;;  %v13360_v62 = vld [vmem:[#allocation5 + $0x12d0] sm:$0xf]  ;;  %v13720_v7 = vld [vmem:[#allocation5 + $0x15a0] sm:$0xf] }
 0x3b8   : > { %9600 = vmatpush.bf16.msrb.mxu0 %v13409_v47  ;;  %v9247_v3 = vpop.f32.mrf.mxu1  ;;  %v9229_v36 = vadd.f32 %v9228_v59, %v17876_v12  ;;  %v13745_v12 = vor.u32 %v16304_v35, %v13744_v38  ;;  %v13361_v43 = vor.u32 %v16208_v15, %v13360_v62  ;;  %v13553_v47 = vor.u32 %v16256_v41, %v13552_v37  ;;  %v13912_v61 = vld [vmem:[#allocation5 + $0x1720] sm:$0xf]  ;;  %v13504_v62 = vld [vmem:[#allocation5 + $0x13f0] sm:$0xf]  ;;  %v16244_v37 = vld [vmem:[#allocation5 + $0x1404] sm:$0xf0] }
 0x3b9   : > { %9619 = vmatpush.bf16.msrb.mxu1 %v13601_v30  ;;  %v17889_v16 = vadd.f32 %v9216_v11, %v9198_v19  ;;  %9531 = vmatmul.bf16.vlgmr.msra.gmra.mxu0 %v17294_v23  ;;  %v13937_v30 = vor.u32 %v16352_v27, %v13936_v55  ;;  %v16346_v11 = vld [vmem:[#allocation5 + $0x1734] sm:$0xf0]  ;;  %v13529_v38 = vor.u32 %v16250_v42, %v13528_v49  ;;  %v16340_v41 = vld [vmem:[#allocation5 + $0x1704] sm:$0xf0]  ;;  %v13672_v27 = vld [vmem:[#allocation5 + $0x1540] sm:$0xf] }
 0x3ba   : > { %9638 = vmatpush.bf16.msrb.mxu2 %v13793_v34  ;;  %v9248_v25 = vadd.f32 %v9247_v3, %v9229_v36  ;;  %9550 = vmatmul.bf16.vlgmr.msra.gmra.mxu1 %v17296_v24  ;;  %v16298_v34 = vld [vmem:[#allocation5 + $0x15b4] sm:$0xf0]  ;;  %v13696_v36 = vld [vmem:[#allocation5 + $0x1570] sm:$0xf]  ;;  %v13913_v35 = vor.u32 %v16346_v11, %v13912_v61 }
 0x3bb   : > { %9657 = vmatpush.bf16.msrb.mxu3 %v13985_v32  ;;  %9569 = vmatmul.bf16.vlgmr.msra.gmra.mxu2 %v17298_v28  ;;  %v13336_v32 = vld [vmem:[#allocation5 + $0x12a0] sm:$0xf]  ;;  %v13721_v59 = vor.u32 %v16298_v34, %v13720_v7  ;;  %v16238_v49 = vld [vmem:[#allocation5 + $0x13d4] sm:$0xf0] }
 0x3bc   : > { %9588 = vmatmul.bf16.vlgmr.msra.gmra.mxu3 %v17300_v29  ;;  %9601 = vmatpush.bf16.msrb.mxu0 %v13385_v63  ;;  %v13337_v3 = vor.u32 %v16202_v31, %v13336_v32  ;;  %v13288_v34 = vld [vmem:[#allocation5 + $0x1240] sm:$0xf] }
 0x3bd   : > { %9620 = vmatpush.bf16.msrb.mxu1 %v13577_v2  ;;  %v13312_v2 = vld [vmem:[#allocation5 + $0x1270] sm:$0xf] }
 0x3be   : > { %9639 = vmatpush.bf16.msrb.mxu2 %v13769_v26  ;;  %v9266_v4 = vpop.f32.mrf.mxu2  ;;  %v16292_v26 = vld [vmem:[#allocation5 + $0x1584] sm:$0xf0] }
 0x3bf   : > { %9658 = vmatpush.bf16.msrb.mxu3 %v13961_v58  ;;  %v9285_v33 = vpop.f32.mrf.mxu3  ;;  %v9267_v52 = vadd.f32 %v9266_v4, %v9248_v25  ;;  %v9230_v10 = vpop.f32.mrf.mxu0  ;;  %v16196_v58 = vld [vmem:[#allocation5 + $0x1284] sm:$0xf0]  ;;  %v13888_v25 = vld [vmem:[#allocation5 + $0x16f0] sm:$0xf]  ;;  %v13864_v4 = vld [vmem:[#allocation5 + $0x16c0] sm:$0xf] }
 0x3c0   : > { %v9249_v22 = vpop.f32.mrf.mxu1  ;;  %v9231_v19 = vadd.f32 %v9230_v10, %v17879_v20  ;;  %9602 = vmatpush.bf16.msrb.mxu0 %v13361_v43  ;;  %v13697_v20 = vor.u32 %v16292_v26, %v13696_v36  ;;  %v13313_v55 = vor.u32 %v16196_v58, %v13312_v2  ;;  %v13505_v43 = vor.u32 %v16244_v37, %v13504_v62  ;;  %v16184_v36 = vld [vmem:[#allocation5 + $0x1224] sm:$0xf0]  ;;  %v13456_v2 = vld [vmem:[#allocation5 + $0x1390] sm:$0xf]  ;;  %v14584_v37 = vld [vmem:[#allocation5 + $0x1c60] sm:$0xf] }
 0x3c1   : > { %v17896_v63 = vadd.f32 %v9285_v33, %v9267_v52  ;;  %9621 = vmatpush.bf16.msrb.mxu1 %v13553_v47  ;;  %v13889_v7 = vor.u32 %v16340_v41, %v13888_v25  ;;  %v16190_v47 = vld [vmem:[#allocation5 + $0x1254] sm:$0xf0]  ;;  %v13648_v52 = vld [vmem:[#allocation5 + $0x1510] sm:$0xf]  ;;  %v16232_v58 = vld [vmem:[#allocation5 + $0x13a4] sm:$0xf0] }
 0x3c2   : > { %9640 = vmatpush.bf16.msrb.mxu2 %v13745_v12  ;;  %v9250_v15 = vadd.f32 %v9249_v22, %v9231_v19  ;;  %v16286_v12 = vld [vmem:[#allocation5 + $0x1554] sm:$0xf0]  ;;  %v13289_v19 = vor.u32 %v16190_v47, %v13288_v34  ;;  %v13840_v62 = vld [vmem:[#allocation5 + $0x1690] sm:$0xf]  ;;  %v14200_v41 = vld [vmem:[#allocation5 + $0x1960] sm:$0xf]  ;;  %v13457_v47 = vor.u32 %v16232_v58, %v13456_v2 }
 0x3c3   : > { %9659 = vmatpush.bf16.msrb.mxu3 %v13937_v30  ;;  %v13480_v30 = vld [vmem:[#allocation5 + $0x13c0] sm:$0xf]  ;;  %v16334_v33 = vld [vmem:[#allocation5 + $0x16d4] sm:$0xf0]  ;;  %v13673_v22 = vor.u32 %v16286_v12, %v13672_v27  ;;  %v16556_v2 = vld [vmem:[#allocation5 + $0x1dc4] sm:$0xf0] }
 0x3c4   : > { %9603 = vmatpush.bf16.msrb.mxu0 %v13337_v3  ;;  %v13264_v3 = vld [vmem:[#allocation5 + $0x1210] sm:$0xf]  ;;  %v16514_v25 = vld [vmem:[#allocation5 + $0x1c74] sm:$0xf0] }
 0x3c5   : > { %9622 = vmatpush.bf16.msrb.mxu1 %v13529_v38  ;;  %v13481_v38 = vor.u32 %v16238_v49, %v13480_v30  ;;  %v13265_v12 = vor.u32 %v16184_v36, %v13264_v3  ;;  %v16562_v34 = vld [vmem:[#allocation5 + $0x1df4] sm:$0xf0]  ;;  %v14585_v49 = vor.u32 %v16514_v25, %v14584_v37  ;;  %v14368_v3 = vld [vmem:[#allocation5 + $0x1ab0] sm:$0xf] }
 0x3c6   : > { %9641 = vmatpush.bf16.msrb.mxu2 %v13721_v59  ;;  %v9268_v32 = vpop.f32.mrf.mxu2  ;;  %v16280_v59 = vld [vmem:[#allocation5 + $0x1524] sm:$0xf0] }
 0x3c7   : > { %9660 = vmatpush.bf16.msrb.mxu3 %v13913_v35  ;;  %v9287_v31 = vpop.f32.mrf.mxu3  ;;  %v9269_v42 = vadd.f32 %v9268_v32, %v9250_v15  ;;  %v9233_v61 = vpop.f32.mrf.mxu0  ;;  %v13865_v35 = vor.u32 %v16334_v33, %v13864_v4  ;;  %v13649_v27 = vor.u32 %v16280_v59, %v13648_v52  ;;  %v14560_v33 = vld [vmem:[#allocation5 + $0x1c30] sm:$0xf]  ;;  %v16412_v59 = vld [vmem:[#allocation5 + $0x1944] sm:$0xf0] }
 0x3c8   : > { %v9252_v11 = vpop.f32.mrf.mxu1  ;;  %v9234_v10 = vadd.f32 %v9233_v61, %v17886_v21  ;;  %9604 = vmatpush.bf16.msrb.mxu0 %v13313_v55  ;;  %v16328_v21 = vld [vmem:[#allocation5 + $0x16a4] sm:$0xf0]  ;;  %v14392_v55 = vld [vmem:[#allocation5 + $0x1ae0] sm:$0xf]  ;;  %v14176_v52 = vld [vmem:[#allocation5 + $0x1930] sm:$0xf] }
 0x3c9   : > { %v17899_v26 = vadd.f32 %v9287_v31, %v9269_v42  ;;  %9623 = vmatpush.bf16.msrb.mxu1 %v13505_v43  ;;  %9536 = vmatmul.bf16.gmra.mxu0 %v17314_v39  ;;  %v16466_v43 = vld [vmem:[#allocation5 + $0x1af4] sm:$0xf0]  ;;  %v13841_v30 = vor.u32 %v16328_v21, %v13840_v62  ;;  %v16508_v42 = vld [vmem:[#allocation5 + $0x1c44] sm:$0xf0]  ;;  %v14177_v21 = vor.u32 %v16412_v59, %v14176_v52  ;;  %v14320_v59 = vld [vmem:[#allocation5 + $0x1a50] sm:$0xf] }
 0x3ca   : > { %9642 = vmatpush.bf16.msrb.mxu2 %v13697_v20  ;;  %v9253_v15 = vadd.f32 %v9252_v11, %v9234_v10  ;;  %9555 = vmatmul.bf16.gmra.mxu1 %v17316_v40  ;;  %v16418_v20 = vld [vmem:[#allocation5 + $0x1974] sm:$0xf0]  ;;  %v16400_v52 = vld [vmem:[#allocation5 + $0x18e4] sm:$0xf0] }
 0x3cb   : > { %9661 = vmatpush.bf16.msrb.mxu3 %v13889_v7  ;;  %9574 = vmatmul.bf16.gmra.mxu2 %v17318_v45  ;;  %v14776_v7 = vld [vmem:[#allocation5 + $0x1de0] sm:$0xf]  ;;  %v14201_v4 = vor.u32 %v16418_v20, %v14200_v41 }
 0x3cc   : > { %9593 = vmatmul.bf16.gmra.mxu3 %v17320_v46  ;;  %9605 = vmatpush.bf16.msrb.mxu0 %v13289_v19  ;;  %v14777_v19 = vor.u32 %v16562_v34, %v14776_v7  ;;  %v14536_v41 = vld [vmem:[#allocation5 + $0x1c00] sm:$0xf]  ;;  %v16454_v7 = vld [vmem:[#allocation5 + $0x1a94] sm:$0xf0] }
 0x3cd   : > { %9624 = vmatpush.bf16.msrb.mxu1 %v13481_v38  ;;  %v16460_v38 = vld [vmem:[#allocation5 + $0x1ac4] sm:$0xf0]  ;;  %v14152_v20 = vld [vmem:[#allocation5 + $0x1900] sm:$0xf] }
 0x3ce   : > { %9643 = vmatpush.bf16.msrb.mxu2 %v13673_v22  ;;  %v9271_v32 = vpop.f32.mrf.mxu2  ;;  %v14393_v22 = vor.u32 %v16466_v43, %v14392_v55  ;;  %v14369_v37 = vor.u32 %v16460_v38, %v14368_v3  ;;  %v16406_v55 = vld [vmem:[#allocation5 + $0x1914] sm:$0xf0]  ;;  %v14728_v34 = vld [vmem:[#allocation5 + $0x1d80] sm:$0xf]  ;;  %v14704_v38 = vld [vmem:[#allocation5 + $0x1d50] sm:$0xf] }
 0x3cf   : > { %9662 = vmatpush.bf16.msrb.mxu3 %v13865_v35  ;;  %v9290_v31 = vpop.f32.mrf.mxu3  ;;  %v9272_v61 = vadd.f32 %v9271_v32, %v9253_v15  ;;  %v9235_v11 = vpop.f32.mrf.mxu0  ;;  %v14752_v35 = vld [vmem:[#allocation5 + $0x1db0] sm:$0xf]  ;;  %v14561_v15 = vor.u32 %v16508_v42, %v14560_v33  ;;  %v14153_v33 = vor.u32 %v16406_v55, %v14152_v20  ;;  %v16394_v20 = vld [vmem:[#allocation5 + $0x18b4] sm:$0xf0]  ;;  %v14296_v55 = vld [vmem:[#allocation5 + $0x1a20] sm:$0xf] }
 0x3d0   : > { %v9254_v10 = vpop.f32.mrf.mxu1  ;;  %v9236_v36 = vadd.f32 %v9235_v11, %v17889_v16  ;;  %9606 = vmatpush.bf16.msrb.mxu0 %v13265_v12  ;;  %v14753_v25 = vor.u32 %v16556_v2, %v14752_v35  ;;  %v16502_v16 = vld [vmem:[#allocation5 + $0x1c14] sm:$0xf0]  ;;  %v14512_v42 = vld [vmem:[#allocation5 + $0x1bd0] sm:$0xf]  ;;  %v16544_v35 = vld [vmem:[#allocation5 + $0x1d64] sm:$0xf0] }
 0x3d1   : > { %v17906_v58 = vadd.f32 %v9290_v31, %v9272_v61  ;;  %9625 = vmatpush.bf16.msrb.mxu1 %v13457_v47  ;;  %v16550_v47 = vld [vmem:[#allocation5 + $0x1d94] sm:$0xf0]  ;;  %v16496_v61 = vld [vmem:[#allocation5 + $0x1be4] sm:$0xf0] }
 0x3d2   : > { %9644 = vmatpush.bf16.msrb.mxu2 %v13649_v27  ;;  %v9255_v62 = vadd.f32 %v9254_v10, %v9236_v36  ;;  %v14344_v27 = vld [vmem:[#allocation5 + $0x1a80] sm:$0xf]  ;;  %v16448_v36 = vld [vmem:[#allocation5 + $0x1a64] sm:$0xf0] }
 0x3d3   : > { %9663 = vmatpush.bf16.msrb.mxu3 %v13841_v30  ;;  %v14345_v10 = vor.u32 %v16454_v7, %v14344_v27  ;;  %v18680_v2 = vld [vmem:[#allocation16_spill] sm:$0xff]  ;;  %v14680_v7 = vld [vmem:[#allocation5 + $0x1d20] sm:$0xf] }
 0x3d4   : > { %9675 = vmatpush.bf16.msra.mxu0 %v14201_v4  ;;  %v14537_v4 = vor.u32 %v16502_v16, %v14536_v41  ;;  %v14705_v41 = vor.u32 %v16544_v35, %v14704_v38  ;;  %v14104_v16 = vld [vmem:[#allocation5 + $0x18a0] sm:$0xf]  ;;  %v14656_v38 = vld [vmem:[#allocation5 + $0x1cf0] sm:$0xf]  ;;  %v16532_v35 = vld [vmem:[#allocation5 + $0x1d04] sm:$0xf0] }
 0x3d5   : > { %9694 = vmatpush.bf16.msra.mxu1 %v14393_v22  ;;  %v14729_v22 = vor.u32 %v16550_v47, %v14728_v34  ;;  %v16538_v34 = vld [vmem:[#allocation5 + $0x1d34] sm:$0xf0] }
 0x3d6   : > { %9713 = vmatpush.bf16.msra.mxu2 %v14585_v49  ;;  %v9273_v12 = vpop.f32.mrf.mxu2 }
 0x3d7   : > { %9732 = vmatpush.bf16.msra.mxu3 %v14777_v19  ;;  %v9292_v43 = vpop.f32.mrf.mxu3  ;;  %v9274_v30 = vadd.f32 %v9273_v12, %v9255_v62  ;;  %v9304_v32 = vpop.f32.mrf.mxu0  ;;  %v14128_v19 = vld [vmem:[#allocation5 + $0x18d0] sm:$0xf]  ;;  %v14513_v62 = vor.u32 %v16496_v61, %v14512_v42  ;;  %v16484_v42 = vld [vmem:[#allocation5 + $0x1b84] sm:$0xf0] }
 0x3d8   : > { %9676 = vmatpush.bf16.msra.mxu0 %v14177_v21  ;;  %v9323_v31 = vpop.f32.mrf.mxu1  ;;  %v9305_v49 = vadd.f32 %v9304_v32, %v17896_v63  ;;  %v18679_v63 = vld [vmem:[#allocation15_spill] sm:$0xff] }
 0x3d9   : > { %9695 = vmatpush.bf16.msra.mxu1 %v14369_v37  ;;  %v17909_v11 = vadd.f32 %v9292_v43, %v9274_v30  ;;  %9607 = vmatmul.bf16.vlgmr.msrb.gmra.mxu0 %v17334_v17  ;;  %v14488_v21 = vld [vmem:[#allocation5 + $0x1ba0] sm:$0xf]  ;;  %v16490_v37 = vld [vmem:[#allocation5 + $0x1bb4] sm:$0xf0] }
 0x3da   : > { %9714 = vmatpush.bf16.msra.mxu2 %v14561_v15  ;;  %v9324_v3 = vadd.f32 %v9323_v31, %v9305_v49  ;;  %9626 = vmatmul.bf16.vlgmr.msrb.gmra.mxu1 %v17336_v18  ;;  %v14129_v15 = vor.u32 %v16400_v52, %v14128_v19  ;;  %v16442_v43 = vld [vmem:[#allocation5 + $0x1a34] sm:$0xf0]  ;;  %v14489_v49 = vor.u32 %v16490_v37, %v14488_v21  ;;  %v14080_v19 = vld [vmem:[#allocation5 + $0x1870] sm:$0xf]  ;;  %v16388_v52 = vld [vmem:[#allocation5 + $0x1884] sm:$0xf0] }
 0x3db   : > { %9733 = vmatpush.bf16.msra.mxu3 %v14753_v25  ;;  %9645 = vmatmul.bf16.vlgmr.msrb.gmra.mxu2 %v18679_v63  ;;  %v14321_v25 = vor.u32 %v16448_v36, %v14320_v59  ;;  %v14272_v59 = vld [vmem:[#allocation5 + $0x19f0] sm:$0xf]  ;;  %v16436_v36 = vld [vmem:[#allocation5 + $0x1a04] sm:$0xf0]  ;;  %v16478_v21 = vld [vmem:[#allocation5 + $0x1b54] sm:$0xf0] }
 0x3dc   : > { %9664 = vmatmul.bf16.vlgmr.msrb.gmra.mxu3 %v18680_v2  ;;  %9677 = vmatpush.bf16.msra.mxu0 %v14153_v33  ;;  %v14464_v33 = vld [vmem:[#allocation5 + $0x1b70] sm:$0xf]  ;;  %v14273_v37 = vor.u32 %v16436_v36, %v14272_v59 }
 0x3dd   : > { %9696 = vmatpush.bf16.msra.mxu1 %v14345_v10  ;;  %v14297_v10 = vor.u32 %v16442_v43, %v14296_v55  ;;  %v14632_v43 = vld [vmem:[#allocation5 + $0x1cc0] sm:$0xf]  ;;  %v14224_v59 = vld [vmem:[#allocation5 + $0x1990] sm:$0xf] }
 0x3de   : > { %9715 = vmatpush.bf16.msra.mxu2 %v14537_v4  ;;  %v9342_v27 = vpop.f32.mrf.mxu2  ;;  %v14105_v4 = vor.u32 %v16394_v20, %v14104_v16  ;;  %v16382_v16 = vld [vmem:[#allocation5 + $0x1854] sm:$0xf0]  ;;  %v14248_v20 = vld [vmem:[#allocation5 + $0x19c0] sm:$0xf]  ;;  %v14608_v36 = vld [vmem:[#allocation5 + $0x1c90] sm:$0xf] }
 0x3df   : > { %9734 = vmatpush.bf16.msra.mxu3 %v14729_v22  ;;  %v9361_v12 = vpop.f32.mrf.mxu3  ;;  %v9343_v47 = vadd.f32 %v9342_v27, %v9324_v3  ;;  %v9306_v30 = vpop.f32.mrf.mxu0  ;;  %v14681_v22 = vor.u32 %v16538_v34, %v14680_v7  ;;  %v16526_v7 = vld [vmem:[#allocation5 + $0x1cd4] sm:$0xf0] }
 0x3e0   : > { %v9325_v32 = vpop.f32.mrf.mxu1  ;;  %v9307_v31 = vadd.f32 %v9306_v30, %v17899_v26  ;;  %9678 = vmatpush.bf16.msra.mxu0 %v14129_v15  ;;  %v14465_v26 = vor.u32 %v16484_v42, %v14464_v33  ;;  %v14440_v15 = vld [vmem:[#allocation5 + $0x1b40] sm:$0xf]  ;;  %v16472_v33 = vld [vmem:[#allocation5 + $0x1b24] sm:$0xf0]  ;;  %v14032_v42 = vld [vmem:[#allocation5 + $0x1810] sm:$0xf] }
 0x3e1   : > { %v17916_v61 = vadd.f32 %v9361_v12, %v9343_v47  ;;  %9697 = vmatpush.bf16.msra.mxu1 %v14321_v25  ;;  %v14657_v25 = vor.u32 %v16532_v35, %v14656_v38  ;;  %v16430_v12 = vld [vmem:[#allocation5 + $0x19d4] sm:$0xf0]  ;;  %v18683_v35 = vld [vmem:[#allocation17_spill] sm:$0xff] }
 0x3e2   : > { %9716 = vmatpush.bf16.msra.mxu2 %v14513_v62  ;;  %v9326_v3 = vadd.f32 %v9325_v32, %v9307_v31  ;;  %v14081_v62 = vor.u32 %v16388_v52, %v14080_v19  ;;  %v14416_v32 = vld [vmem:[#allocation5 + $0x1b10] sm:$0xf]  ;;  %v14249_v19 = vor.u32 %v16430_v12, %v14248_v20  ;;  %v14633_v52 = vor.u32 %v16526_v7, %v14632_v43  ;;  %v15544_v12 = vld [vmem:[#allocation5 + $0x23e0] sm:$0xf]  ;;  %v16754_v43 = vld [vmem:[#allocation5 + $0x23f4] sm:$0xf0] }
 0x3e3   : > { %18681 = vst [vmem:[#allocation48_spill] sm:$0xff] %v17916_v61  ;;  %9735 = vmatpush.bf16.msra.mxu3 %v14705_v41  ;;  %v14056_v41 = vld [vmem:[#allocation5 + $0x1840] sm:$0xf]  ;;  %v14417_v20 = vor.u32 %v16472_v33, %v14416_v32  ;;  %v15328_v61 = vld [vmem:[#allocation5 + $0x2230] sm:$0xf] }
 0x3e4   : > { %9679 = vmatpush.bf16.msra.mxu0 %v14105_v4  ;;  %v14057_v4 = vor.u32 %v16382_v16, %v14056_v41  ;;  %v18686_v41 = vld [vmem:[#allocation20_spill] sm:$0xff]  ;;  %v14968_v16 = vld [vmem:[#allocation5 + $0x1f60] sm:$0xf]  ;;  %v14944_v32 = vld [vmem:[#allocation5 + $0x1f30] sm:$0xf] }
 0x3e5   : > { %9698 = vmatpush.bf16.msra.mxu1 %v14297_v10  ;;  %v16376_v10 = vld [vmem:[#allocation5 + $0x1824] sm:$0xf0] }
 0x3e6   : > { %9717 = vmatpush.bf16.msra.mxu2 %v14489_v49  ;;  %v9344_v55 = vpop.f32.mrf.mxu2  ;;  %v14441_v49 = vor.u32 %v16478_v21, %v14440_v15  ;;  %v16706_v15 = vld [vmem:[#allocation5 + $0x2274] sm:$0xf0]  ;;  %v18685_v21 = vld [vmem:[#allocation19_spill] sm:$0xff]  ;;  %v16604_v33 = vld [vmem:[#allocation5 + $0x1f44] sm:$0xf0] }
 0x3e7   : > { %9736 = vmatpush.bf16.msra.mxu3 %v14681_v22  ;;  %v9363_v27 = vpop.f32.mrf.mxu3  ;;  %v9345_v34 = vadd.f32 %v9344_v55, %v9326_v3  ;;  %v9309_v47 = vpop.f32.mrf.mxu0  ;;  %v16424_v3 = vld [vmem:[#allocation5 + $0x19a4] sm:$0xf0]  ;;  %v14033_v55 = vor.u32 %v16376_v10, %v14032_v42  ;;  %v15136_v42 = vld [vmem:[#allocation5 + $0x20b0] sm:$0xf] }
 0x3e8   : > { %v9328_v30 = vpop.f32.mrf.mxu1  ;;  %v9310_v31 = vadd.f32 %v9309_v47, %v17906_v58  ;;  %9680 = vmatpush.bf16.msra.mxu0 %v14081_v62  ;;  %v18684_v58 = vld [vmem:[#allocation18_spill] sm:$0xff]  ;;  %v15352_v62 = vld [vmem:[#allocation5 + $0x2260] sm:$0xf]  ;;  %v14225_v7 = vor.u32 %v16424_v3, %v14224_v59  ;;  %v16748_v59 = vld [vmem:[#allocation5 + $0x23c4] sm:$0xf0] }
 0x3e9   : > { %v17919_v22 = vadd.f32 %v9363_v27, %v9345_v34  ;;  %9699 = vmatpush.bf16.msra.mxu1 %v14273_v37  ;;  %9612 = vmatmul.bf16.gmra.mxu0 %v18683_v35  ;;  %v16610_v37 = vld [vmem:[#allocation5 + $0x1f74] sm:$0xf0] }
 0x3ea   : > { %9718 = vmatpush.bf16.msra.mxu2 %v14465_v26  ;;  %v9329_v38 = vadd.f32 %v9328_v30, %v9310_v31  ;;  %9631 = vmatmul.bf16.gmra.mxu1 %v18684_v58  ;;  %v16520_v26 = vld [vmem:[#allocation5 + $0x1ca4] sm:$0xf0]  ;;  %v16658_v27 = vld [vmem:[#allocation5 + $0x20f4] sm:$0xf0]  ;;  %v15353_v31 = vor.u32 %v16706_v15, %v15352_v62 }
 0x3eb   : > { %18682 = vst [vmem:[#allocation49_spill] sm:$0xff] %v17919_v22  ;;  %9737 = vmatpush.bf16.msra.mxu3 %v14657_v25  ;;  %9650 = vmatmul.bf16.gmra.mxu2 %v18685_v21  ;;  %v15160_v25 = vld [vmem:[#allocation5 + $0x20e0] sm:$0xf]  ;;  %v14609_v34 = vor.u32 %v16520_v26, %v14608_v36  ;;  %v14969_v22 = vor.u32 %v16610_v37, %v14968_v16 }
 0x3ec   : > { %9669 = vmatmul.bf16.gmra.mxu3 %v18686_v41  ;;  %9681 = vmatpush.bf16.msra.mxu0 %v14057_v4  ;;  %v16700_v41 = vld [vmem:[#allocation5 + $0x2244] sm:$0xf0]  ;;  %v15545_v4 = vor.u32 %v16754_v43, %v15544_v12  ;;  %v14945_v26 = vor.u32 %v16604_v33, %v14944_v32  ;;  %v15304_v16 = vld [vmem:[#allocation5 + $0x2200] sm:$0xf]  ;;  %v14896_v33 = vld [vmem:[#allocation5 + $0x1ed0] sm:$0xf] }
 0x3ed   : > { %9700 = vmatpush.bf16.msra.mxu1 %v14249_v19  ;;  %v16652_v19 = vld [vmem:[#allocation5 + $0x20c4] sm:$0xf0]  ;;  %v14920_v37 = vld [vmem:[#allocation5 + $0x1f00] sm:$0xf] }
 0x3ee   : > { %9719 = vmatpush.bf16.msra.mxu2 %v14441_v49  ;;  %v9347_v47 = vpop.f32.mrf.mxu2  ;;  %v15161_v49 = vor.u32 %v16658_v27, %v15160_v25  ;;  %v15137_v62 = vor.u32 %v16652_v19, %v15136_v42  ;;  %v16598_v25 = vld [vmem:[#allocation5 + $0x1f14] sm:$0xf0]  ;;  %v16592_v42 = vld [vmem:[#allocation5 + $0x1ee4] sm:$0xf0] }
 0x3ef   : > { %9738 = vmatpush.bf16.msra.mxu3 %v14633_v52  ;;  %v9366_v30 = vpop.f32.mrf.mxu3  ;;  %v9348_v21 = vadd.f32 %v9347_v47, %v9329_v38  ;;  %v9311_v58 = vpop.f32.mrf.mxu0  ;;  %v15520_v52 = vld [vmem:[#allocation5 + $0x23b0] sm:$0xf]  ;;  %v15329_v38 = vor.u32 %v16700_v41, %v15328_v61  ;;  %v16646_v61 = vld [vmem:[#allocation5 + $0x2094] sm:$0xf0]  ;;  %v14921_v47 = vor.u32 %v16598_v25, %v14920_v37 }
 0x3f0   : > { %v9330_v35 = vpop.f32.mrf.mxu1  ;;  %v9312_v10 = vadd.f32 %v9311_v58, %v17909_v11  ;;  %9682 = vmatpush.bf16.msra.mxu0 %v14033_v55  ;;  %v15521_v15 = vor.u32 %v16748_v59, %v15520_v52  ;;  %v16846_v11 = vld [vmem:[%s18521_s2] sm:$0x3f]  ;;  %v16742_v41 = vld [vmem:[#allocation5 + $0x2394] sm:$0xf0]  ;;  %v18689_v52 = vld [vmem:[#allocation21_spill] sm:$0xff] }
 0x3f1   : > { %v17926_v3 = vadd.f32 %v9366_v30, %v9348_v21  ;;  %9701 = vmatpush.bf16.msra.mxu1 %v14225_v7  ;;  %v17931_v58 = vperm.slane %v16846_v11, 4  ;;  %v16694_v21 = vld [vmem:[#allocation5 + $0x2214] sm:$0xf0]  ;;  %v15280_v30 = vld [vmem:[#allocation5 + $0x21d0] sm:$0xf] }
 0x3f2   : > { %9720 = vmatpush.bf16.msra.mxu2 %v14417_v20  ;;  %v9331_v36 = vadd.f32 %v9330_v35, %v9312_v10  ;;  %v15112_v20 = vld [vmem:[#allocation5 + $0x2080] sm:$0xf]  ;;  %v15088_v10 = vld [vmem:[#allocation5 + $0x2050] sm:$0xf]  ;;  %v18690_v59 = vld [vmem:[#allocation22_spill] sm:$0xff] }
 0x3f3   : > { %18687 = vst [vmem:[#allocation50_spill] sm:$0xff] %v17926_v3  ;;  %9739 = vmatpush.bf16.msra.mxu3 %v14609_v34  ;;  %v15305_v34 = vor.u32 %v16694_v21, %v15304_v16  ;;  %v14897_v16 = vor.u32 %v16592_v42, %v14896_v33  ;;  %v15256_v21 = vld [vmem:[#allocation5 + $0x21a0] sm:$0xf]  ;;  %v16682_v37 = vld [vmem:[#allocation5 + $0x21b4] sm:$0xf0] }
 0x3f4   : > { %9751 = vmatpush.bf16.msrb.mxu0 %v14969_v22  ;;  %v15496_v22 = vld [vmem:[#allocation5 + $0x2380] sm:$0xf]  ;;  %v15424_v3 = vld [vmem:[#allocation5 + $0x22f0] sm:$0xf] }
 0x3f5   : > { %9770 = vmatpush.bf16.msrb.mxu1 %v15161_v49  ;;  %v15497_v32 = vor.u32 %v16742_v41, %v15496_v22 }
 0x3f6   : > { %9789 = vmatpush.bf16.msrb.mxu2 %v15353_v31  ;;  %v9349_v35 = vpop.f32.mrf.mxu2  ;;  %v16688_v31 = vld [vmem:[#allocation5 + $0x21e4] sm:$0xf0] }
 0x3f7   : > { %9808 = vmatpush.bf16.msrb.mxu3 %v15545_v4  ;;  %v9368_v55 = vpop.f32.mrf.mxu3  ;;  %v9350_v27 = vadd.f32 %v9349_v35, %v9331_v36  ;;  %v9380_v12 = vpop.f32.mrf.mxu0  ;;  %v15113_v4 = vor.u32 %v16646_v61, %v15112_v20  ;;  %v16640_v36 = vld [vmem:[#allocation5 + $0x2064] sm:$0xf0]  ;;  %v15281_v11 = vor.u32 %v16688_v31, %v15280_v30  ;;  %v14872_v35 = vld [vmem:[#allocation5 + $0x1ea0] sm:$0xf]  ;;  %v15257_v30 = vor.u32 %v16682_v37, %v15256_v21  ;;  %v16670_v21 = vld [vmem:[#allocation5 + $0x2154] sm:$0xf0] }
 0x3f8   : > { %9752 = vmatpush.bf16.msrb.mxu0 %v14945_v26  ;;  %v9399_v43 = vpop.f32.mrf.mxu1  ;;  %v9381_v7 = vadd.f32 %v9380_v12, %v17931_v58  ;;  %v16736_v26 = vld [vmem:[#allocation5 + $0x2364] sm:$0xf0]  ;;  %v15089_v25 = vor.u32 %v16640_v36, %v15088_v10  ;;  %v15064_v61 = vld [vmem:[#allocation5 + $0x2020] sm:$0xf]  ;;  %v14848_v36 = vld [vmem:[#allocation5 + $0x1e70] sm:$0xf] }
 0x3f9   : > { %9771 = vmatpush.bf16.msrb.mxu1 %v15137_v62  ;;  %v17934_v49 = vadd.f32 %v9368_v55, %v9350_v27  ;;  %9683 = vmatmul.bf16.vlgmr.msra.gmra.mxu0 %v18689_v52  ;;  %v18691_v62 = vld [vmem:[#allocation23_spill] sm:$0xff]  ;;  %v16586_v55 = vld [vmem:[#allocation5 + $0x1eb4] sm:$0xf0] }
 0x3fa   : > { %9790 = vmatpush.bf16.msrb.mxu2 %v15329_v38  ;;  %v9400_v19 = vadd.f32 %v9399_v43, %v9381_v7  ;;  %9702 = vmatmul.bf16.vlgmr.msra.gmra.mxu1 %v18690_v59  ;;  %v15472_v38 = vld [vmem:[#allocation5 + $0x2350] sm:$0xf]  ;;  %v16634_v27 = vld [vmem:[#allocation5 + $0x2034] sm:$0xf0]  ;;  %v15448_v12 = vld [vmem:[#allocation5 + $0x2320] sm:$0xf]  ;;  %v14873_v31 = vor.u32 %v16586_v55, %v14872_v35 }
 0x3fb   : > { %9809 = vmatpush.bf16.msrb.mxu3 %v15521_v15  ;;  %18688 = vst [vmem:[#allocation51_spill] sm:$0xff] %v17934_v49  ;;  %9721 = vmatmul.bf16.vlgmr.msra.gmra.mxu2 %v18691_v62  ;;  %v18692_v15 = vld [vmem:[#allocation24_spill] sm:$0xff]  ;;  %v15473_v20 = vor.u32 %v16736_v26, %v15472_v38  ;;  %v16730_v43 = vld [vmem:[#allocation5 + $0x2334] sm:$0xf0]  ;;  %v15065_v42 = vor.u32 %v16634_v27, %v15064_v61  ;;  %v15040_v26 = vld [vmem:[#allocation5 + $0x1ff0] sm:$0xf] }
 0x3fc   : > { %9740 = vmatmul.bf16.vlgmr.msra.gmra.mxu3 %v18692_v15  ;;  %9753 = vmatpush.bf16.msrb.mxu0 %v14921_v47  ;;  %v15449_v10 = vor.u32 %v16730_v43, %v15448_v12  ;;  %v16580_v38 = vld [vmem:[#allocation5 + $0x1e84] sm:$0xf0]  ;;  %v16574_v35 = vld [vmem:[#allocation5 + $0x1e54] sm:$0xf0]  ;;  %v15016_v55 = vld [vmem:[#allocation5 + $0x1fc0] sm:$0xf] }
 0x3fd   : > { %9772 = vmatpush.bf16.msrb.mxu1 %v15113_v4  ;;  %v15232_v4 = vld [vmem:[#allocation5 + $0x2170] sm:$0xf]  ;;  %v16724_v15 = vld [vmem:[#allocation5 + $0x2304] sm:$0xf0]  ;;  %v16622_v27 = vld [vmem:[#allocation5 + $0x1fd4] sm:$0xf0] }
 0x3fe   : > { %9791 = vmatpush.bf16.msrb.mxu2 %v15305_v34  ;;  %v9418_v22 = vpop.f32.mrf.mxu2  ;;  %v15400_v12 = vld [vmem:[#allocation5 + $0x22c0] sm:$0xf]  ;;  %v16718_v43 = vld [vmem:[#allocation5 + $0x22d4] sm:$0xf0]  ;;  %v18693_v62 = vld [vmem:[#allocation25_spill] sm:$0xff] }
 0x3ff   : > { %9810 = vmatpush.bf16.msrb.mxu3 %v15497_v32  ;;  %v9437_v41 = vpop.f32.mrf.mxu3  ;;  %v9419_v7 = vadd.f32 %v9418_v22, %v9400_v19  ;;  %v9382_v49 = vpop.f32.mrf.mxu0  ;;  %v16676_v32 = vld [vmem:[#allocation5 + $0x2184] sm:$0xf0]  ;;  %v15737_v59 = vld [vmem:[#allocation5 + $0x434] sm:$0xf] }
 0x400   : > { %v9401_v34 = vpop.f32.mrf.mxu1  ;;  %v9383_v47 = vadd.f32 %v9382_v49, %v17931_v58  ;;  %9754 = vmatpush.bf16.msrb.mxu0 %v14897_v16  ;;  %v16628_v22 = vld [vmem:[#allocation5 + $0x2004] sm:$0xf0]  ;;  %v15233_v49 = vor.u32 %v16676_v32, %v15232_v4  ;;  %v15208_v16 = vld [vmem:[#allocation5 + $0x2140] sm:$0xf] }
 0x401   : > { %v17941_v33 = vadd.f32 %v9437_v41, %v9419_v7  ;;  %9773 = vmatpush.bf16.msrb.mxu1 %v15089_v25  ;;  %v15041_v37 = vor.u32 %v16628_v22, %v15040_v26  ;;  %v15425_v25 = vor.u32 %v16724_v15, %v15424_v3  ;;  %v15209_v4 = vor.u32 %v16670_v21, %v15208_v16  ;;  %v14800_v3 = vld [vmem:[#allocation5 + $0x1e10] sm:$0xf]  ;;  %v16568_v15 = vld [vmem:[#allocation5 + $0x1e24] sm:$0xf0]  ;;  %v11514_v16 = vld [vmem:[#allocation5 + $0x478] sm:$0xf0] }
 0x402   : > { %9792 = vmatpush.bf16.msrb.mxu2 %v15281_v11  ;;  %v9402_v19 = vadd.f32 %v9401_v34, %v9383_v47  ;;  %v14849_v11 = vor.u32 %v16580_v38, %v14848_v36  ;;  %v15017_v36 = vor.u32 %v16622_v27, %v15016_v55  ;;  %v15401_v38 = vor.u32 %v16718_v43, %v15400_v12  ;;  %v14992_v26 = vld [vmem:[#allocation5 + $0x1f90] sm:$0xf]  ;;  %v18695_v21 = vld [vmem:[#allocation27_spill] sm:$0xff]  ;;  %v11322_v27 = vld [vmem:[#allocation5 + $0x2f8] sm:$0xf0] }
 0x403   : > { %9811 = vmatpush.bf16.msrb.mxu3 %v15473_v20  ;;  %v14824_v20 = vld [vmem:[#allocation5 + $0x1e40] sm:$0xf]  ;;  %v15376_v22 = vld [vmem:[#allocation5 + $0x2290] sm:$0xf]  ;;  %v15791_v12 = vld [vmem:[#allocation5 + $0x5e4] sm:$0xf] }
 0x404   : > { %9755 = vmatpush.bf16.msrb.mxu0 %v14873_v31  ;;  %v14825_v32 = vor.u32 %v16574_v35, %v14824_v20  ;;  %v18696_v20 = vld [vmem:[#allocation28_spill] sm:$0xff]  ;;  %v15647_v35 = vld [vmem:[#allocation5 + $0x164] sm:$0xf]  ;;  %v11706_v43 = vld [vmem:[#allocation5 + $0x5f8] sm:$0xf0] }
 0x405   : > { %9774 = vmatpush.bf16.msrb.mxu1 %v15065_v42  ;;  %v16664_v42 = vld [vmem:[#allocation5 + $0x2124] sm:$0xf0] }
 0x406   : > { %9793 = vmatpush.bf16.msrb.mxu2 %v15257_v30  ;;  %v9420_v61 = vpop.f32.mrf.mxu2  ;;  %v15184_v30 = vld [vmem:[#allocation5 + $0x2110] sm:$0xf] }
 0x407   : > { %9812 = vmatpush.bf16.msrb.mxu3 %v15449_v10  ;;  %v9439_v41 = vpop.f32.mrf.mxu3  ;;  %v9421_v7 = vadd.f32 %v9420_v61, %v9402_v19  ;;  %v9385_v34 = vpop.f32.mrf.mxu0  ;;  %v16616_v19 = vld [vmem:[#allocation5 + $0x1fa4] sm:$0xf0]  ;;  %v15185_v55 = vor.u32 %v16664_v42, %v15184_v30  ;;  %v15641_v30 = vld [vmem:[#allocation5 + $0x134] sm:$0xf]  ;;  %v11106_v42 = vld [vmem:[#allocation5 + $0x148] sm:$0xf0] }
 0x408   : > { %v9404_v47 = vpop.f32.mrf.mxu1  ;;  %v9386_v31 = vadd.f32 %v9385_v34, %v17931_v58  ;;  %9756 = vmatpush.bf16.msrb.mxu0 %v14849_v11  ;;  %v18694_v34 = vld [vmem:[#allocation26_spill] sm:$0xff]  ;;  %v15743_v11 = vld [vmem:[#allocation5 + $0x464] sm:$0xf] }
 0x409   : > { %v17944_v10 = vadd.f32 %v9439_v41, %v9421_v7  ;;  %9775 = vmatpush.bf16.msrb.mxu1 %v15041_v37  ;;  %9688 = vmatmul.bf16.gmra.mxu0 %v18693_v62  ;;  %v11130_v37 = vld [vmem:[#allocation5 + $0x178] sm:$0xf0]  ;;  %v14801_v41 = vor.u32 %v16568_v15, %v14800_v3  ;;  %v14993_v7 = vor.u32 %v16616_v19, %v14992_v26  ;;  %v15689_v3 = vld [vmem:[#allocation5 + $0x2b4] sm:$0xf]  ;;  %v11682_v26 = vld [vmem:[#allocation5 + $0x5c8] sm:$0xf0] }
 0x40a   : > { %9794 = vmatpush.bf16.msrb.mxu2 %v15233_v49  ;;  %v9405_v61 = vadd.f32 %v9404_v47, %v9386_v31  ;;  %9707 = vmatmul.bf16.gmra.mxu1 %v18694_v34  ;;  %v16712_v49 = vld [vmem:[#allocation5 + $0x22a4] sm:$0xf0]  ;;  %v11517_v62 = vor.u32 %v15743_v11, %v11514_v16 }
 0x40b   : > { %9813 = vmatpush.bf16.msrb.mxu3 %v15425_v25  ;;  %9726 = vmatmul.bf16.gmra.mxu2 %v18695_v21  ;;  %v15695_v25 = vld [vmem:[#allocation5 + $0x2e4] sm:$0xf]  ;;  %v15377_v47 = vor.u32 %v16712_v49, %v15376_v22  ;;  %v11133_v21 = vor.u32 %v15647_v35, %v11130_v37  ;;  %v11109_v49 = vor.u32 %v15641_v30, %v11106_v42  ;;  %v11082_v37 = vld [vmem:[#allocation5 + $0x118] sm:$0xf0]  ;;  %v11058_v30 = vld [vmem:[#allocation5 + $0xe8] sm:$0xf0] }
 0x40c   : > { %9745 = vmatmul.bf16.gmra.mxu3 %v18696_v20  ;;  %9757 = vmatpush.bf16.msrb.mxu0 %v14825_v32  ;;  %v11490_v20 = vld [vmem:[#allocation5 + $0x448] sm:$0xf0]  ;;  %v11709_v32 = vor.u32 %v15791_v12, %v11706_v43  ;;  %v15731_v35 = vld [vmem:[#allocation5 + $0x404] sm:$0xf]  ;;  %v15725_v43 = vld [vmem:[#allocation5 + $0x3d4] sm:$0xf] }
 0x40d   : > { %9776 = vmatpush.bf16.msrb.mxu1 %v15017_v36  ;;  %v11298_v36 = vld [vmem:[#allocation5 + $0x2c8] sm:$0xf0]  ;;  %v15677_v42 = vld [vmem:[#allocation5 + $0x254] sm:$0xf] }
 0x40e   : > { %9795 = vmatpush.bf16.msrb.mxu2 %v15209_v4  ;;  %v9423_v31 = vpop.f32.mrf.mxu2  ;;  %v11325_v4 = vor.u32 %v15695_v25, %v11322_v27  ;;  %v11301_v11 = vor.u32 %v15689_v3, %v11298_v36  ;;  %v15683_v25 = vld [vmem:[#allocation5 + $0x284] sm:$0xf]  ;;  %v11250_v36 = vld [vmem:[#allocation5 + $0x268] sm:$0xf0] }
 0x40f   : > { %9814 = vmatpush.bf16.msrb.mxu3 %v15401_v38  ;;  %v9442_v34 = vpop.f32.mrf.mxu3  ;;  %v9424_v52 = vadd.f32 %v9423_v31, %v9405_v61  ;;  %v9387_v2 = vpop.f32.mrf.mxu0  ;;  %v15785_v38 = vld [vmem:[#allocation5 + $0x5b4] sm:$0xf]  ;;  %v11493_v61 = vor.u32 %v15737_v59, %v11490_v20 }
 0x410   : > { %v9406_v63 = vpop.f32.mrf.mxu1  ;;  %v9388_v15 = vadd.f32 %v9387_v2, %v17931_v58  ;;  %9758 = vmatpush.bf16.msrb.mxu0 %v14801_v41  ;;  %v11685_v16 = vor.u32 %v15785_v38, %v11682_v26  ;;  %v11466_v2 = vld [vmem:[#allocation5 + $0x418] sm:$0xf0]  ;;  %v15635_v58 = vld [vmem:[#allocation5 + $0x104] sm:$0xf]  ;;  %v15773_v38 = vld [vmem:[#allocation5 + $0x554] sm:$0xf] }
 0x411   : > { %v17951_v19 = vadd.f32 %v9442_v34, %v9424_v52  ;;  %9777 = vmatpush.bf16.msrb.mxu1 %v14993_v7  ;;  %v11274_v52 = vld [vmem:[#allocation5 + $0x298] sm:$0xf0]  ;;  %v15779_v34 = vld [vmem:[#allocation5 + $0x584] sm:$0xf]  ;;  %v11469_v27 = vor.u32 %v15731_v35, %v11466_v2  ;;  %v11085_v12 = vor.u32 %v15635_v58, %v11082_v37  ;;  %v11442_v7 = vld [vmem:[#allocation5 + $0x3e8] sm:$0xf0]  ;;  %v11253_v35 = vor.u32 %v15677_v42, %v11250_v36 }
 0x412   : > { %9796 = vmatpush.bf16.msrb.mxu2 %v15185_v55  ;;  %v9407_v22 = vadd.f32 %v9406_v63, %v9388_v15  ;;  %v11658_v63 = vld [vmem:[#allocation5 + $0x598] sm:$0xf0]  ;;  %v11277_v31 = vor.u32 %v15683_v25, %v11274_v52  ;;  %v11634_v26 = vld [vmem:[#allocation5 + $0x568] sm:$0xf0]  ;;  %v15623_v58 = vld [vmem:[#allocation5 + $0xa4] sm:$0xf] }
 0x413   : > { %9815 = vmatpush.bf16.msrb.mxu3 %v15377_v47  ;;  %v18697_v15 = vld [vmem:[#allocation30_spill] sm:$0xff]  ;;  %v11637_v2 = vor.u32 %v15773_v38, %v11634_v26  ;;  %v15671_v25 = vld [vmem:[#allocation5 + $0x224] sm:$0xf]  ;;  %v11010_v42 = vld [vmem:[#allocation5 + $0x88] sm:$0xf0] }
 0x414   : > { %9827 = vmatpush.bf16.msra.mxu0 %v11133_v21  ;;  %v11034_v37 = vld [vmem:[#allocation5 + $0xb8] sm:$0xf0]  ;;  %v15665_v36 = vld [vmem:[#allocation5 + $0x1f4] sm:$0xf]  ;;  %v11202_v38 = vld [vmem:[#allocation5 + $0x208] sm:$0xf0] }
 0x415   : > { %9846 = vmatpush.bf16.msra.mxu1 %v11325_v4  ;;  %v11661_v4 = vor.u32 %v15779_v34, %v11658_v63  ;;  %v11226_v52 = vld [vmem:[#allocation5 + $0x238] sm:$0xf0]  ;;  %v15767_v34 = vld [vmem:[#allocation5 + $0x524] sm:$0xf]  ;;  %v15761_v26 = vld [vmem:[#allocation5 + $0x4f4] sm:$0xf] }
 0x416   : > { %9865 = vmatpush.bf16.msra.mxu2 %v11517_v62  ;;  %v9425_v55 = vpop.f32.mrf.mxu2  ;;  %v11610_v63 = vld [vmem:[#allocation5 + $0x538] sm:$0xf0] }
 0x417   : > { %9884 = vmatpush.bf16.msra.mxu3 %v11709_v32  ;;  %v9444_v41 = vpop.f32.mrf.mxu3  ;;  %v9426_v62 = vadd.f32 %v9425_v55, %v9407_v22  ;;  %v9456_v21 = vpop.f32.mrf.mxu0  ;;  %v15629_v32 = vld [vmem:[#allocation5 + $0xd4] sm:$0xf]  ;;  %v18699_v22 = vld [vmem:[#allocation32_spill] sm:$0xff] }
 0x418   : > { %9828 = vmatpush.bf16.msra.mxu0 %v11109_v49  ;;  %v9475_v59 = vpop.f32.mrf.mxu1  ;;  %v9457_v20 = vadd.f32 %v9456_v21, %v17941_v33  ;;  %v18698_v33 = vld [vmem:[#allocation31_spill] sm:$0xff]  ;;  %v11061_v49 = vor.u32 %v15629_v32, %v11058_v30  ;;  %v11613_v32 = vor.u32 %v15767_v34, %v11610_v63  ;;  %v15617_v30 = vld [vmem:[#allocation5 + $0x74] sm:$0xf]  ;;  %v11562_v63 = vld [vmem:[#allocation5 + $0x4d8] sm:$0xf0] }
 0x419   : > { %9847 = vmatpush.bf16.msra.mxu1 %v11301_v11  ;;  %v17954_v47 = vadd.f32 %v9444_v41, %v9426_v62  ;;  %9759 = vmatmul.bf16.vlgmr.msrb.gmra.mxu0 %v18622_v60  ;;  %v15719_v11 = vld [vmem:[#allocation5 + $0x3a4] sm:$0xf] }
 0x41a   : > { %9866 = vmatpush.bf16.msra.mxu2 %v11493_v61  ;;  %v9476_v3 = vadd.f32 %v9475_v59, %v9457_v20  ;;  %9778 = vmatmul.bf16.vlgmr.msrb.gmra.mxu1 %v18697_v15  ;;  %v11445_v61 = vor.u32 %v15725_v43, %v11442_v7  ;;  %v15713_v43 = vld [vmem:[#allocation5 + $0x374] sm:$0xf]  ;;  %v11394_v7 = vld [vmem:[#allocation5 + $0x388] sm:$0xf0]  ;;  %v15755_v34 = vld [vmem:[#allocation5 + $0x4c4] sm:$0xf] }
 0x41b   : > { %9885 = vmatpush.bf16.msra.mxu3 %v11685_v16  ;;  %9797 = vmatmul.bf16.vlgmr.msrb.gmra.mxu2 %v18698_v33  ;;  %v11418_v16 = vld [vmem:[#allocation5 + $0x3b8] sm:$0xf0] }
 0x41c   : > { %9816 = vmatmul.bf16.vlgmr.msrb.gmra.mxu3 %v18699_v22  ;;  %9829 = vmatpush.bf16.msra.mxu0 %v11085_v12  ;;  %v11037_v12 = vor.u32 %v15623_v58, %v11034_v37  ;;  %v10986_v58 = vld [vmem:[#allocation5 + $0x58] sm:$0xf0]  ;;  %v15659_v37 = vld [vmem:[#allocation5 + $0x1c4] sm:$0xf] }
 0x41d   : > { %9848 = vmatpush.bf16.msra.mxu1 %v11277_v31 }
 0x41e   : > { %9867 = vmatpush.bf16.msra.mxu2 %v11469_v27  ;;  %v9494_v55 = vpop.f32.mrf.mxu2  ;;  %v11421_v27 = vor.u32 %v15719_v11, %v11418_v16  ;;  %v11370_v11 = vld [vmem:[#allocation5 + $0x358] sm:$0xf0]  ;;  %v11205_v16 = vor.u32 %v15665_v36, %v11202_v38  ;;  %v11565_v36 = vor.u32 %v15755_v34, %v11562_v63  ;;  %v15653_v38 = vld [vmem:[#allocation5 + $0x194] sm:$0xf]  ;;  %v15983_v34 = vld [vmem:[#allocation5 + $0xbe4] sm:$0xf] }
 0x41f   : > { %9886 = vmatpush.bf16.msra.mxu3 %v11661_v4  ;;  %v9513_v41 = vpop.f32.mrf.mxu3  ;;  %v9495_v62 = vadd.f32 %v9494_v55, %v9476_v3  ;;  %v9458_v21 = vpop.f32.mrf.mxu0  ;;  %v11229_v4 = vor.u32 %v15671_v25, %v11226_v52  ;;  %v11586_v55 = vld [vmem:[#allocation5 + $0x508] sm:$0xf0]  ;;  %v11178_v52 = vld [vmem:[#allocation5 + $0x1d8] sm:$0xf0] }
 0x420   : > { %v9477_v59 = vpop.f32.mrf.mxu1  ;;  %v9459_v20 = vadd.f32 %v9458_v21, %v17944_v10  ;;  %9830 = vmatpush.bf16.msra.mxu0 %v11061_v49  ;;  %v11397_v10 = vor.u32 %v15713_v43, %v11394_v7  ;;  %v15707_v49 = vld [vmem:[#allocation5 + $0x344] sm:$0xf]  ;;  %v11346_v7 = vld [vmem:[#allocation5 + $0x328] sm:$0xf0]  ;;  %v12474_v63 = vld [vmem:[#allocation5 + $0xbf8] sm:$0xf0] }
 0x421   : > { %v17961_v31 = vadd.f32 %v9513_v41, %v9495_v62  ;;  %9849 = vmatpush.bf16.msra.mxu1 %v11253_v35  ;;  %v11589_v35 = vor.u32 %v15761_v26, %v11586_v55  ;;  %v15749_v26 = vld [vmem:[#allocation5 + $0x494] sm:$0xf] }
 0x422   : > { %9868 = vmatpush.bf16.msra.mxu2 %v11445_v61  ;;  %v9478_v3 = vadd.f32 %v9477_v59, %v9459_v20  ;;  %v11013_v61 = vor.u32 %v15617_v30, %v11010_v42  ;;  %v15701_v20 = vld [vmem:[#allocation5 + $0x314] sm:$0xf]  ;;  %v11181_v42 = vor.u32 %v15659_v37, %v11178_v52  ;;  %v12090_v52 = vld [vmem:[#allocation5 + $0x8f8] sm:$0xf0] }
 0x423   : > { %9887 = vmatpush.bf16.msra.mxu3 %v11637_v2  ;;  %v15611_v2 = vld [vmem:[#allocation5 + $0x44] sm:$0xf]  ;;  %v11349_v37 = vor.u32 %v15701_v20, %v11346_v7  ;;  %v15833_v20 = vld [vmem:[#allocation5 + $0x734] sm:$0xf]  ;;  %v11874_v7 = vld [vmem:[#allocation5 + $0x748] sm:$0xf0] }
 0x424   : > { %9831 = vmatpush.bf16.msra.mxu0 %v11037_v12  ;;  %v11373_v12 = vor.u32 %v15707_v49, %v11370_v11  ;;  %v10989_v43 = vor.u32 %v15611_v2, %v10986_v58  ;;  %v12282_v49 = vld [vmem:[#allocation5 + $0xa78] sm:$0xf0]  ;;  %v18702_v11 = vld [vmem:[#allocation35_spill] sm:$0xff]  ;;  %v18703_v2 = vld [vmem:[#allocation36_spill] sm:$0xff] }
 0x425   : > { %9850 = vmatpush.bf16.msra.mxu1 %v11229_v4  ;;  %v15605_v4 = vld [vmem:[#allocation5 + $0x14] sm:$0xf]  ;;  %v15839_v58 = vld [vmem:[#allocation5 + $0x764] sm:$0xf] }
 0x426   : > { %9869 = vmatpush.bf16.msra.mxu2 %v11421_v27  ;;  %v9496_v25 = vpop.f32.mrf.mxu2 }
 0x427   : > { %9888 = vmatpush.bf16.msra.mxu3 %v11613_v32  ;;  %v9515_v41 = vpop.f32.mrf.mxu3  ;;  %v9497_v62 = vadd.f32 %v9496_v25, %v9478_v3  ;;  %v9461_v21 = vpop.f32.mrf.mxu0  ;;  %v10962_v32 = vld [vmem:[#allocation5 + $0x28] sm:$0xf0]  ;;  %v18700_v25 = vld [vmem:[#allocation33_spill] sm:$0xff] }
 0x428   : > { %v9480_v59 = vpop.f32.mrf.mxu1  ;;  %v9462_v27 = vadd.f32 %v9461_v21, %v17951_v19  ;;  %9832 = vmatpush.bf16.msra.mxu0 %v11013_v61  ;;  %v11154_v3 = vld [vmem:[#allocation5 + $0x1a8] sm:$0xf0]  ;;  %v18701_v19 = vld [vmem:[#allocation34_spill] sm:$0xff]  ;;  %v15935_v61 = vld [vmem:[#allocation5 + $0xa64] sm:$0xf] }
 0x429   : > { %v17964_v30 = vadd.f32 %v9515_v41, %v9497_v62  ;;  %9851 = vmatpush.bf16.msra.mxu1 %v11205_v16  ;;  %9764 = vmatmul.bf16.gmra.mxu0 %v18700_v25  ;;  %v11898_v16 = vld [vmem:[#allocation5 + $0x778] sm:$0xf0]  ;;  %v10965_v41 = vor.u32 %v15605_v4, %v10962_v32  ;;  %v11157_v62 = vor.u32 %v15653_v38, %v11154_v3  ;;  %v15929_v25 = vld [vmem:[#allocation5 + $0xa34] sm:$0xf]  ;;  %v12450_v38 = vld [vmem:[#allocation5 + $0xbc8] sm:$0xf0] }
 0x42a   : > { %9870 = vmatpush.bf16.msra.mxu2 %v11397_v10  ;;  %v9481_v55 = vadd.f32 %v9480_v59, %v9462_v27  ;;  %9783 = vmatmul.bf16.gmra.mxu1 %v18701_v19  ;;  %v11538_v10 = vld [vmem:[#allocation5 + $0x4a8] sm:$0xf0]  ;;  %v12285_v19 = vor.u32 %v15935_v61, %v12282_v49  ;;  %v15881_v4 = vld [vmem:[#allocation5 + $0x8b4] sm:$0xf] }
 0x42b   : > { %9889 = vmatpush.bf16.msra.mxu3 %v11589_v35  ;;  %9802 = vmatmul.bf16.gmra.mxu2 %v18702_v11  ;;  %v15887_v35 = vld [vmem:[#allocation5 + $0x8e4] sm:$0xf]  ;;  %v11541_v21 = vor.u32 %v15749_v26, %v11538_v10  ;;  %v11901_v11 = vor.u32 %v15839_v58, %v11898_v16  ;;  %v11877_v10 = vor.u32 %v15833_v20, %v11874_v7  ;;  %v11850_v16 = vld [vmem:[#allocation5 + $0x718] sm:$0xf0]  ;;  %v11826_v20 = vld [vmem:[#allocation5 + $0x6e8] sm:$0xf0] }
 0x42c   : > { %9821 = vmatmul.bf16.gmra.mxu3 %v18703_v2  ;;  %9833 = vmatpush.bf16.msra.mxu0 %v10989_v43  ;;  %v12258_v2 = vld [vmem:[#allocation5 + $0xa48] sm:$0xf0]  ;;  %v12477_v43 = vor.u32 %v15983_v34, %v12474_v63  ;;  %v15923_v58 = vld [vmem:[#allocation5 + $0xa04] sm:$0xf]  ;;  %v15869_v7 = vld [vmem:[#allocation5 + $0x854] sm:$0xf] }
 0x42d   : > { %9852 = vmatpush.bf16.msra.mxu1 %v11181_v42  ;;  %v12066_v42 = vld [vmem:[#allocation5 + $0x8c8] sm:$0xf0] }
 0x42e   : > { %9871 = vmatpush.bf16.msra.mxu2 %v11373_v12  ;;  %v9499_v59 = vpop.f32.mrf.mxu2  ;;  %v12093_v12 = vor.u32 %v15887_v35, %v12090_v52  ;;  %v12069_v61 = vor.u32 %v15881_v4, %v12066_v42  ;;  %v15875_v35 = vld [vmem:[#allocation5 + $0x884] sm:$0xf]  ;;  %v15965_v42 = vld [vmem:[#allocation5 + $0xb54] sm:$0xf] }
 0x42f   : > { %9890 = vmatpush.bf16.msra.mxu3 %v11565_v36  ;;  %v9518_v27 = vpop.f32.mrf.mxu3  ;;  %v9500_v22 = vadd.f32 %v9499_v59, %v9481_v55  ;;  %v9463_v33 = vpop.f32.mrf.mxu0  ;;  %v15977_v36 = vld [vmem:[#allocation5 + $0xbb4] sm:$0xf]  ;;  %v12261_v55 = vor.u32 %v15929_v25, %v12258_v2  ;;  %v15971_v52 = vld [vmem:[#allocation5 + $0xb84] sm:$0xf] }
 0x430   : > { %v9482_v15 = vpop.f32.mrf.mxu1  ;;  %v9464_v32 = vadd.f32 %v9463_v33, %v17954_v47  ;;  %9834 = vmatpush.bf16.msra.mxu0 %v10965_v41  ;;  %v12453_v49 = vor.u32 %v15977_v36, %v12450_v38  ;;  %v12234_v47 = vld [vmem:[#allocation5 + $0xa18] sm:$0xf0]  ;;  %v15827_v33 = vld [vmem:[#allocation5 + $0x704] sm:$0xf]  ;;  %v12402_v36 = vld [vmem:[#allocation5 + $0xb68] sm:$0xf0] }
 0x431   : > { %v17971_v3 = vadd.f32 %v9518_v27, %v9500_v22  ;;  %9853 = vmatpush.bf16.msra.mxu1 %v11157_v62  ;;  %v12042_v22 = vld [vmem:[#allocation5 + $0x898] sm:$0xf0]  ;;  %v12237_v34 = vor.u32 %v15923_v58, %v12234_v47  ;;  %v11853_v63 = vor.u32 %v15827_v33, %v11850_v16  ;;  %v15917_v62 = vld [vmem:[#allocation5 + $0x9d4] sm:$0xf]  ;;  %v15959_v16 = vld [vmem:[#allocation5 + $0xb24] sm:$0xf] }
 0x432   : > { %9872 = vmatpush.bf16.msra.mxu2 %v11349_v37  ;;  %v9483_v26 = vadd.f32 %v9482_v15, %v9464_v32  ;;  %v12426_v15 = vld [vmem:[#allocation5 + $0xb98] sm:$0xf0]  ;;  %v12045_v27 = vor.u32 %v15875_v35, %v12042_v22  ;;  %v12018_v32 = vld [vmem:[#allocation5 + $0x868] sm:$0xf0] }
 0x433   : > { %9891 = vmatpush.bf16.msra.mxu3 %v11541_v21  ;;  %v12210_v21 = vld [vmem:[#allocation5 + $0x9e8] sm:$0xf0]  ;;  %v11994_v33 = vld [vmem:[#allocation5 + $0x838] sm:$0xf0] }
 0x434   : > { %9903 = vmatpush.bf16.msrb.mxu0 %v11901_v11 }
 0x435   : > { %9922 = vmatpush.bf16.msrb.mxu1 %v12093_v12  ;;  %v12429_v12 = vor.u32 %v15971_v52, %v12426_v15  ;;  %v15905_v15 = vld [vmem:[#allocation5 + $0x974] sm:$0xf] }
 0x436   : > { %9941 = vmatpush.bf16.msrb.mxu2 %v12285_v19  ;;  %v9501_v37 = vpop.f32.mrf.mxu2 }
 0x437   : > { %9960 = vmatpush.bf16.msrb.mxu3 %v12477_v43  ;;  %v9520_v41 = vpop.f32.mrf.mxu3  ;;  %v9502_v19 = vadd.f32 %v9501_v37, %v9483_v26  ;;  %v9532_v11 = vpop.f32.mrf.mxu0  ;;  %v15821_v43 = vld [vmem:[#allocation5 + $0x6d4] sm:$0xf]  ;;  %v15911_v26 = vld [vmem:[#allocation5 + $0x9a4] sm:$0xf] }
 0x438   : > { %9904 = vmatpush.bf16.msrb.mxu0 %v11877_v10  ;;  %v9551_v25 = vpop.f32.mrf.mxu1  ;;  %v9533_v2 = vadd.f32 %v9532_v11, %v17961_v31  ;;  %v12213_v31 = vor.u32 %v15917_v62, %v12210_v21  ;;  %v11829_v38 = vor.u32 %v15821_v43, %v11826_v20  ;;  %v12021_v10 = vor.u32 %v15869_v7, %v12018_v32  ;;  %v15857_v62 = vld [vmem:[#allocation5 + $0x7f4] sm:$0xf]  ;;  %v12354_v43 = vld [vmem:[#allocation5 + $0xb08] sm:$0xf0]  ;;  %v15899_v7 = vld [vmem:[#allocation5 + $0x944] sm:$0xf] }
 0x439   : > { %9923 = vmatpush.bf16.msrb.mxu1 %v12069_v61  ;;  %v17974_v59 = vadd.f32 %v9520_v41, %v9502_v19  ;;  %9835 = vmatmul.bf16.vlgmr.msra.gmra.mxu0 %v17214_v48  ;;  %v12405_v61 = vor.u32 %v15965_v42, %v12402_v36  ;;  %v15815_v48 = vld [vmem:[#allocation5 + $0x6a4] sm:$0xf]  ;;  %v12162_v19 = vld [vmem:[#allocation5 + $0x988] sm:$0xf0] }
 0x43a   : > { %9942 = vmatpush.bf16.msrb.mxu2 %v12261_v55  ;;  %v9552_v4 = vadd.f32 %v9551_v25, %v9533_v2  ;;  %9854 = vmatmul.bf16.vlgmr.msra.gmra.mxu1 %v17216_v53  ;;  %v12186_v55 = vld [vmem:[#allocation5 + $0x9b8] sm:$0xf0]  ;;  %v15863_v53 = vld [vmem:[#allocation5 + $0x824] sm:$0xf] }
 0x43b   : > { %9961 = vmatpush.bf16.msrb.mxu3 %v12453_v49  ;;  %9873 = vmatmul.bf16.vlgmr.msra.gmra.mxu2 %v17218_v54  ;;  %v11802_v49 = vld [vmem:[#allocation5 + $0x6b8] sm:$0xf0]  ;;  %v12189_v22 = vor.u32 %v15911_v26, %v12186_v55  ;;  %v11997_v25 = vor.u32 %v15863_v53, %v11994_v33  ;;  %v15803_v36 = vld [vmem:[#allocation5 + $0x644] sm:$0xf] }
 0x43c   : > { %9892 = vmatmul.bf16.vlgmr.msra.gmra.mxu3 %v17220_v57  ;;  %9905 = vmatpush.bf16.msrb.mxu0 %v11853_v63  ;;  %v12378_v54 = vld [vmem:[#allocation5 + $0xb38] sm:$0xf0]  ;;  %v11805_v52 = vor.u32 %v15815_v48, %v11802_v49  ;;  %v11778_v63 = vld [vmem:[#allocation5 + $0x688] sm:$0xf0] }
 0x43d   : > { %9924 = vmatpush.bf16.msrb.mxu1 %v12045_v27  ;;  %v12381_v2 = vor.u32 %v15959_v16, %v12378_v54  ;;  %v11970_v27 = vld [vmem:[#allocation5 + $0x808] sm:$0xf0]  ;;  %v12330_v48 = vld [vmem:[#allocation5 + $0xad8] sm:$0xf0] }
 0x43e   : > { %9943 = vmatpush.bf16.msrb.mxu2 %v12237_v34  ;;  %v9570_v58 = vpop.f32.mrf.mxu2  ;;  %v15809_v34 = vld [vmem:[#allocation5 + $0x674] sm:$0xf]  ;;  %v11973_v32 = vor.u32 %v15857_v62, %v11970_v27  ;;  %v16031_v62 = vld [vmem:[#allocation5 + $0xd64] sm:$0xf] }
 0x43f   : > { %9962 = vmatpush.bf16.msrb.mxu3 %v12429_v12  ;;  %v9589_v47 = vpop.f32.mrf.mxu3  ;;  %v9571_v35 = vadd.f32 %v9570_v58, %v9552_v4  ;;  %v9534_v57 = vpop.f32.mrf.mxu0  ;;  %v15953_v12 = vld [vmem:[#allocation5 + $0xaf4] sm:$0xf]  ;;  %v11781_v20 = vor.u32 %v15809_v34, %v11778_v63  ;;  %v12138_v4 = vld [vmem:[#allocation5 + $0x958] sm:$0xf0]  ;;  %v16127_v34 = vld [vmem:[#allocation5 + $0x1064] sm:$0xf] }
 0x440   : > { %v9553_v37 = vpop.f32.mrf.mxu1  ;;  %v9535_v41 = vadd.f32 %v9534_v57, %v17964_v30  ;;  %9906 = vmatpush.bf16.msrb.mxu0 %v11829_v38  ;;  %v12165_v30 = vor.u32 %v15905_v15, %v12162_v19  ;;  %v12357_v42 = vor.u32 %v15953_v12, %v12354_v43  ;;  %v15851_v38 = vld [vmem:[#allocation5 + $0x7c4] sm:$0xf]  ;;  %v12141_v16 = vor.u32 %v15899_v7, %v12138_v4  ;;  %v15797_v57 = vld [vmem:[#allocation5 + $0x614] sm:$0xf]  ;;  %v11922_v19 = vld [vmem:[#allocation5 + $0x7a8] sm:$0xf0] }
 0x441   : > { %v17981_v11 = vadd.f32 %v9589_v47, %v9571_v35  ;;  %9925 = vmatpush.bf16.msrb.mxu1 %v12021_v10  ;;  %v11946_v10 = vld [vmem:[#allocation5 + $0x7d8] sm:$0xf0]  ;;  %v15893_v47 = vld [vmem:[#allocation5 + $0x914] sm:$0xf]  ;;  %v12114_v35 = vld [vmem:[#allocation5 + $0x928] sm:$0xf0] }
 0x442   : > { %9944 = vmatpush.bf16.msrb.mxu2 %v12213_v31  ;;  %v9554_v21 = vadd.f32 %v9553_v37, %v9535_v41  ;;  %v11754_v31 = vld [vmem:[#allocation5 + $0x658] sm:$0xf0]  ;;  %v11730_v37 = vld [vmem:[#allocation5 + $0x628] sm:$0xf0]  ;;  %v15845_v15 = vld [vmem:[#allocation5 + $0x794] sm:$0xf]  ;;  %v12117_v12 = vor.u32 %v15893_v47, %v12114_v35 }
 0x443   : > { %9963 = vmatpush.bf16.msrb.mxu3 %v12405_v61  ;;  %v15947_v61 = vld [vmem:[#allocation5 + $0xac4] sm:$0xf]  ;;  %v11757_v54 = vor.u32 %v15803_v36, %v11754_v31  ;;  %v13050_v63 = vld [vmem:[#allocation5 + $0x1078] sm:$0xf0]  ;;  %v11733_v43 = vor.u32 %v15797_v57, %v11730_v37  ;;  %v16121_v36 = vld [vmem:[#allocation5 + $0x1034] sm:$0xf] }
 0x444   : > { %9907 = vmatpush.bf16.msrb.mxu0 %v11805_v52  ;;  %v12333_v52 = vor.u32 %v15947_v61, %v12330_v48  ;;  %v16079_v27 = vld [vmem:[#allocation5 + $0xee4] sm:$0xf]  ;;  %v13242_v7 = vld [vmem:[#allocation5 + $0x11f8] sm:$0xf0]  ;;  %v16025_v61 = vld [vmem:[#allocation5 + $0xd34] sm:$0xf] }
 0x445   : > { %9926 = vmatpush.bf16.msrb.mxu1 %v11997_v25  ;;  %v15941_v25 = vld [vmem:[#allocation5 + $0xa94] sm:$0xf]  ;;  %v12642_v48 = vld [vmem:[#allocation5 + $0xd48] sm:$0xf0] }
 0x446   : > { %9945 = vmatpush.bf16.msrb.mxu2 %v12189_v22  ;;  %v9572_v26 = vpop.f32.mrf.mxu2  ;;  %v11949_v22 = vor.u32 %v15851_v38, %v11946_v10  ;;  %v16169_v47 = vld [vmem:[#allocation5 + $0x11b4] sm:$0xf]  ;;  %v12645_v57 = vor.u32 %v16025_v61, %v12642_v48  ;;  %v12954_v61 = vld [vmem:[#allocation5 + $0xfb8] sm:$0xf0] }
 0x447   : > { %9964 = vmatpush.bf16.msrb.mxu3 %v12381_v2  ;;  %v9591_v55 = vpop.f32.mrf.mxu3  ;;  %v9573_v49 = vadd.f32 %v9572_v26, %v9554_v21  ;;  %v9537_v53 = vpop.f32.mrf.mxu0  ;;  %v12666_v21 = vld [vmem:[#allocation5 + $0xd78] sm:$0xf0] }
 0x448   : > { %v9556_v58 = vpop.f32.mrf.mxu1  ;;  %v9538_v33 = vadd.f32 %v9537_v53, %v17971_v3  ;;  %9908 = vmatpush.bf16.msrb.mxu0 %v11781_v20  ;;  %v12306_v3 = vld [vmem:[#allocation5 + $0xaa8] sm:$0xf0]  ;;  %v16175_v20 = vld [vmem:[#allocation5 + $0x11e4] sm:$0xf] }
 0x449   : > { %v17984_v41 = vadd.f32 %v9591_v55, %v9573_v49  ;;  %9927 = vmatpush.bf16.msrb.mxu1 %v11973_v32  ;;  %9840 = vmatmul.bf16.gmra.mxu0 %v17234_v44  ;;  %v11925_v44 = vor.u32 %v15845_v15, %v11922_v19  ;;  %v13245_v10 = vor.u32 %v16175_v20, %v13242_v7  ;;  %v16073_v49 = vld [vmem:[#allocation5 + $0xeb4] sm:$0xf]  ;;  %v16019_v15 = vld [vmem:[#allocation5 + $0xd04] sm:$0xf]  ;;  %v12618_v19 = vld [vmem:[#allocation5 + $0xd18] sm:$0xf0] }
 0x44a   : > { %9946 = vmatpush.bf16.msrb.mxu2 %v12165_v30  ;;  %v9557_v2 = vadd.f32 %v9556_v58, %v9538_v33  ;;  %9859 = vmatmul.bf16.gmra.mxu1 %v17236_v50  ;;  %v12858_v30 = vld [vmem:[#allocation5 + $0xef8] sm:$0xf0]  ;;  %v12309_v50 = vor.u32 %v15941_v25, %v12306_v3  ;;  %v12834_v58 = vld [vmem:[#allocation5 + $0xec8] sm:$0xf0]  ;;  %v16067_v25 = vld [vmem:[#allocation5 + $0xe84] sm:$0xf]  ;;  %v12621_v20 = vor.u32 %v16019_v15, %v12618_v19 }
 0x44b   : > { %9965 = vmatpush.bf16.msrb.mxu3 %v12357_v42  ;;  %9878 = vmatmul.bf16.gmra.mxu2 %v17238_v51  ;;  %v13053_v42 = vor.u32 %v16127_v34, %v13050_v63  ;;  %v12669_v51 = vor.u32 %v16031_v62, %v12666_v21  ;;  %v12861_v55 = vor.u32 %v16079_v27, %v12858_v30  ;;  %v13218_v33 = vld [vmem:[#allocation5 + $0x11c8] sm:$0xf0]  ;;  %v12810_v34 = vld [vmem:[#allocation5 + $0xe98] sm:$0xf0]  ;;  %v16163_v63 = vld [vmem:[#allocation5 + $0x1184] sm:$0xf] }
 0x44c   : > { %9897 = vmatmul.bf16.gmra.mxu3 %v17240_v56  ;;  %9909 = vmatpush.bf16.msrb.mxu0 %v11757_v54  ;;  %v13026_v56 = vld [vmem:[#allocation5 + $0x1048] sm:$0xf0]  ;;  %v12837_v37 = vor.u32 %v16073_v49, %v12834_v58  ;;  %v13194_v62 = vld [vmem:[#allocation5 + $0x1198] sm:$0xf0]  ;;  %v16109_v7 = vld [vmem:[#allocation5 + $0xfd4] sm:$0xf] }
 0x44d   : > { %9928 = vmatpush.bf16.msrb.mxu1 %v11949_v22  ;;  %v13029_v35 = vor.u32 %v16121_v36, %v13026_v56  ;;  %v13221_v22 = vor.u32 %v16169_v47, %v13218_v33  ;;  %v16061_v36 = vld [vmem:[#allocation5 + $0xe54] sm:$0xf]  ;;  %v12762_v33 = vld [vmem:[#allocation5 + $0xe38] sm:$0xf0]  ;;  %v12930_v15 = vld [vmem:[#allocation5 + $0xf88] sm:$0xf0] }
 0x44e   : > { %9947 = vmatpush.bf16.msrb.mxu2 %v12141_v16  ;;  %v9575_v4 = vpop.f32.mrf.mxu2 }
 0x44f   : > { %9966 = vmatpush.bf16.msrb.mxu3 %v12333_v52  ;;  %v9594_v32 = vpop.f32.mrf.mxu3  ;;  %v9576_v31 = vadd.f32 %v9575_v4, %v9557_v2  ;;  %v9539_v38 = vpop.f32.mrf.mxu0  ;;  %v16115_v52 = vld [vmem:[#allocation5 + $0x1004] sm:$0xf]  ;;  %v12813_v4 = vor.u32 %v16067_v25, %v12810_v34  ;;  %v12546_v34 = vld [vmem:[#allocation5 + $0xc88] sm:$0xf0] }
 0x450   : > { %v9558_v26 = vpop.f32.mrf.mxu1  ;;  %v9540_v53 = vadd.f32 %v9539_v38, %v17974_v59  ;;  %9910 = vmatpush.bf16.msrb.mxu0 %v11733_v43  ;;  %v13002_v59 = vld [vmem:[#allocation5 + $0x1018] sm:$0xf0]  ;;  %v16157_v38 = vld [vmem:[#allocation5 + $0x1154] sm:$0xf] }
 0x451   : > { %v17991_v16 = vadd.f32 %v9594_v32, %v9576_v31  ;;  %9929 = vmatpush.bf16.msrb.mxu1 %v11925_v44  ;;  %v13005_v30 = vor.u32 %v16115_v52, %v13002_v59  ;;  %v12978_v44 = vld [vmem:[#allocation5 + $0xfe8] sm:$0xf0]  ;;  %v13197_v32 = vor.u32 %v16163_v63, %v13194_v62  ;;  %v16097_v59 = vld [vmem:[#allocation5 + $0xf74] sm:$0xf] }
 0x452   : > { %9948 = vmatpush.bf16.msrb.mxu2 %v12117_v12  ;;  %v9559_v54 = vadd.f32 %v9558_v26, %v9540_v53  ;;  %v12786_v31 = vld [vmem:[#allocation5 + $0xe68] sm:$0xf0]  ;;  %v12570_v53 = vld [vmem:[#allocation5 + $0xcb8] sm:$0xf0]  ;;  %v16049_v63 = vld [vmem:[#allocation5 + $0xdf4] sm:$0xf] }
 0x453   : > { %9967 = vmatpush.bf16.msrb.mxu3 %v12309_v50  ;;  %v13170_v26 = vld [vmem:[#allocation5 + $0x1168] sm:$0xf0]  ;;  %v12789_v48 = vor.u32 %v16061_v36, %v12786_v31  ;;  %v16139_v31 = vld [vmem:[#allocation5 + $0x10c4] sm:$0xf] }
 0x454   : > { %9979 = vmatpush.bf16.msra.mxu0 %v12669_v51  ;;  %v12594_v51 = vld [vmem:[#allocation5 + $0xce8] sm:$0xf0]  ;;  %v13173_v49 = vor.u32 %v16157_v38, %v13170_v26  ;;  %v13098_v38 = vld [vmem:[#allocation5 + $0x10d8] sm:$0xf0] }
 0x455   : > { %9998 = vmatpush.bf16.msra.mxu1 %v12861_v55 }
 0x456   : > { %10017 = vmatpush.bf16.msra.mxu2 %v13053_v42  ;;  %v9577_v2 = vpop.f32.mrf.mxu2  ;;  %v16013_v42 = vld [vmem:[#allocation5 + $0xcd4] sm:$0xf] }
 0x457   : > { %10036 = vmatpush.bf16.msra.mxu3 %v13245_v10  ;;  %v9596_v3 = vpop.f32.mrf.mxu3  ;;  %v9578_v21 = vadd.f32 %v9577_v2, %v9559_v54  ;;  %v9608_v27 = vpop.f32.mrf.mxu0  ;;  %v12597_v55 = vor.u32 %v16013_v42, %v12594_v51  ;;  %v16103_v10 = vld [vmem:[#allocation5 + $0xfa4] sm:$0xf] }
 0x458   : > { %9980 = vmatpush.bf16.msra.mxu0 %v12645_v57  ;;  %v9627_v12 = vpop.f32.mrf.mxu1  ;;  %v9609_v43 = vadd.f32 %v9608_v27, %v17981_v11  ;;  %v12981_v11 = vor.u32 %v16109_v7, %v12978_v44  ;;  %v16151_v54 = vld [vmem:[#allocation5 + $0x1124] sm:$0xf]  ;;  %v16145_v27 = vld [vmem:[#allocation5 + $0x10f4] sm:$0xf] }
 0x459   : > { %9999 = vmatpush.bf16.msra.mxu1 %v12837_v37  ;;  %v17994_v50 = vadd.f32 %v9596_v3, %v9578_v21  ;;  %9911 = vmatmul.bf16.vlgmr.msrb.gmra.mxu0 %v17254_v0  ;;  %v16007_v0 = vld [vmem:[#allocation5 + $0xca4] sm:$0xf]  ;;  %v16001_v3 = vld [vmem:[#allocation5 + $0xc74] sm:$0xf]  ;;  %v12738_v21 = vld [vmem:[#allocation5 + $0xe08] sm:$0xf0] }
 0x45a   : > { %10018 = vmatpush.bf16.msra.mxu2 %v13029_v35  ;;  %v9628_v56 = vadd.f32 %v9627_v12, %v9609_v43  ;;  %9930 = vmatmul.bf16.vlgmr.msrb.gmra.mxu1 %v17256_v1  ;;  %v16055_v1 = vld [vmem:[#allocation5 + $0xe24] sm:$0xf]  ;;  %v12573_v52 = vor.u32 %v16007_v0, %v12570_v53  ;;  %v13122_v12 = vld [vmem:[#allocation5 + $0x1108] sm:$0xf0]  ;;  %v12549_v43 = vor.u32 %v16001_v3, %v12546_v34  ;;  %v15989_v53 = vld [vmem:[#allocation5 + $0xc14] sm:$0xf] }
 0x45b   : > { %10037 = vmatpush.bf16.msra.mxu3 %v13221_v22  ;;  %9949 = vmatmul.bf16.vlgmr.msrb.gmra.mxu2 %v17258_v5  ;;  %v13146_v5 = vld [vmem:[#allocation5 + $0x1138] sm:$0xf0]  ;;  %v12957_v22 = vor.u32 %v16103_v10, %v12954_v61  ;;  %v12765_v25 = vor.u32 %v16055_v1, %v12762_v33  ;;  %v12741_v7 = vor.u32 %v16049_v63, %v12738_v21  ;;  %v16043_v42 = vld [vmem:[#allocation5 + $0xdc4] sm:$0xf]  ;;  %v16085_v10 = vld [vmem:[#allocation5 + $0xf14] sm:$0xf] }
 0x45c   : > { %9968 = vmatmul.bf16.vlgmr.msrb.gmra.mxu3 %v17260_v6  ;;  %9981 = vmatpush.bf16.msra.mxu0 %v12621_v20  ;;  %v13149_v2 = vor.u32 %v16151_v54, %v13146_v5  ;;  %v12906_v20 = vld [vmem:[#allocation5 + $0xf58] sm:$0xf0]  ;;  %v13125_v44 = vor.u32 %v16145_v27, %v13122_v12  ;;  %v12882_v0 = vld [vmem:[#allocation5 + $0xf28] sm:$0xf0]  ;;  %v13101_v33 = vor.u32 %v16139_v31, %v13098_v38  ;;  %v16037_v54 = vld [vmem:[#allocation5 + $0xd94] sm:$0xf] }
 0x45d   : > { %10000 = vmatpush.bf16.msra.mxu1 %v12813_v4  ;;  %v15995_v4 = vld [vmem:[#allocation5 + $0xc44] sm:$0xf]  ;;  %v12498_v1 = vld [vmem:[#allocation5 + $0xc28] sm:$0xf0]  ;;  %v14010_v34 = vld [vmem:[#allocation5 + $0x17f8] sm:$0xf0] }
 0x45e   : > { %10019 = vmatpush.bf16.msra.mxu2 %v13005_v30  ;;  %v9646_v58 = vpop.f32.mrf.mxu2  ;;  %v16091_v30 = vld [vmem:[#allocation5 + $0xf44] sm:$0xf]  ;;  %v12690_v5 = vld [vmem:[#allocation5 + $0xda8] sm:$0xf0]  ;;  %v16313_v27 = vld [vmem:[#allocation5 + $0x1634] sm:$0xf] }
 0x45f   : > { %10038 = vmatpush.bf16.msra.mxu3 %v13197_v32  ;;  %v9665_v47 = vpop.f32.mrf.mxu3  ;;  %v9647_v35 = vadd.f32 %v9646_v58, %v9628_v56  ;;  %v9610_v6 = vpop.f32.mrf.mxu0  ;;  %v12522_v32 = vld [vmem:[#allocation5 + $0xc58] sm:$0xf0]  ;;  %v16367_v3 = vld [vmem:[#allocation5 + $0x17e4] sm:$0xf] }
 0x460   : > { %v9629_v57 = vpop.f32.mrf.mxu1  ;;  %v9611_v37 = vadd.f32 %v9610_v6, %v17984_v41  ;;  %9982 = vmatpush.bf16.msra.mxu0 %v12597_v55  ;;  %v12933_v41 = vor.u32 %v16097_v59, %v12930_v15  ;;  %v12714_v56 = vld [vmem:[#allocation5 + $0xdd8] sm:$0xf0]  ;;  %v16271_v59 = vld [vmem:[#allocation5 + $0x14e4] sm:$0xf]  ;;  %v12885_v15 = vor.u32 %v16085_v10, %v12882_v0 }
 0x461   : > { %v18001_v19 = vadd.f32 %v9665_v47, %v9647_v35  ;;  %10001 = vmatpush.bf16.msra.mxu1 %v12789_v48  ;;  %v12909_v48 = vor.u32 %v16091_v30, %v12906_v20  ;;  %v12717_v47 = vor.u32 %v16043_v42, %v12714_v56  ;;  %v16133_v35 = vld [vmem:[#allocation5 + $0x1094] sm:$0xf]  ;;  %v14013_v20 = vor.u32 %v16367_v3, %v14010_v34  ;;  %v13602_v42 = vld [vmem:[#allocation5 + $0x14c8] sm:$0xf0]  ;;  %v16307_v10 = vld [vmem:[#allocation5 + $0x1604] sm:$0xf] }
 0x462   : > { %10020 = vmatpush.bf16.msra.mxu2 %v12981_v11  ;;  %v9630_v62 = vadd.f32 %v9629_v57, %v9611_v37  ;;  %v16319_v57 = vld [vmem:[#allocation5 + $0x1664] sm:$0xf]  ;;  %v13818_v37 = vld [vmem:[#allocation5 + $0x1678] sm:$0xf0]  ;;  %v16253_v3 = vld [vmem:[#allocation5 + $0x1454] sm:$0xf] }
 0x463   : > { %10039 = vmatpush.bf16.msra.mxu3 %v13173_v49  ;;  %v12525_v49 = vor.u32 %v15995_v4, %v12522_v32  ;;  %v13821_v21 = vor.u32 %v16319_v57, %v13818_v37  ;;  %v16265_v4 = vld [vmem:[#allocation5 + $0x14b4] sm:$0xf] }
 0x464   : > { %9983 = vmatpush.bf16.msra.mxu0 %v12573_v52  ;;  %v13434_v52 = vld [vmem:[#allocation5 + $0x1378] sm:$0xf0]  ;;  %v16301_v37 = vld [vmem:[#allocation5 + $0x15d4] sm:$0xf] }
 0x465   : > { %10002 = vmatpush.bf16.msra.mxu1 %v12765_v25  ;;  %v12501_v25 = vor.u32 %v15989_v53, %v12498_v1  ;;  %v13578_v1 = vld [vmem:[#allocation5 + $0x1498] sm:$0xf0] }
 0x466   : > { %10021 = vmatpush.bf16.msra.mxu2 %v12957_v22  ;;  %v9648_v51 = vpop.f32.mrf.mxu2  ;;  %v16223_v22 = vld [vmem:[#allocation5 + $0x1364] sm:$0xf] }
 0x467   : > { %10040 = vmatpush.bf16.msra.mxu3 %v13149_v2  ;;  %v9667_v36 = vpop.f32.mrf.mxu3  ;;  %v9649_v26 = vadd.f32 %v9648_v51, %v9630_v62  ;;  %v9613_v11 = vpop.f32.mrf.mxu0  ;;  %v13626_v2 = vld [vmem:[#allocation5 + $0x14f8] sm:$0xf0]  ;;  %v16361_v51 = vld [vmem:[#allocation5 + $0x17b4] sm:$0xf] }
 0x468   : > { %v9632_v55 = vpop.f32.mrf.mxu1  ;;  %v9614_v61 = vadd.f32 %v9613_v11, %v17991_v16  ;;  %9984 = vmatpush.bf16.msra.mxu0 %v12549_v43  ;;  %v13074_v16 = vld [vmem:[#allocation5 + $0x10a8] sm:$0xf0]  ;;  %v13629_v30 = vor.u32 %v16271_v59, %v13626_v2  ;;  %v13605_v11 = vor.u32 %v16265_v4, %v13602_v42 }
 0x469   : > { %v18004_v58 = vadd.f32 %v9667_v36, %v9649_v26  ;;  %10003 = vmatpush.bf16.msra.mxu1 %v12741_v7  ;;  %9916 = vmatmul.bf16.gmra.mxu0 %v17274_v8  ;;  %v12693_v8 = vor.u32 %v16037_v54, %v12690_v5  ;;  %v16217_v7 = vld [vmem:[#allocation5 + $0x1334] sm:$0xf]  ;;  %v13986_v36 = vld [vmem:[#allocation5 + $0x17c8] sm:$0xf0] }
 0x46a   : > { %10022 = vmatpush.bf16.msra.mxu2 %v12933_v41  ;;  %v9633_v6 = vadd.f32 %v9632_v55, %v9614_v61  ;;  %9935 = vmatmul.bf16.gmra.mxu1 %v17276_v9  ;;  %v13077_v9 = vor.u32 %v16133_v35, %v13074_v16  ;;  %v13989_v55 = vor.u32 %v16361_v51, %v13986_v36  ;;  %v16211_v61 = vld [vmem:[#allocation5 + $0x1304] sm:$0xf]  ;;  %v13362_v2 = vld [vmem:[#allocation5 + $0x12e8] sm:$0xf0]  ;;  %v16289_v51 = vld [vmem:[#allocation5 + $0x1574] sm:$0xf] }
 0x46b   : > { %10041 = vmatpush.bf16.msra.mxu3 %v13125_v44  ;;  %9954 = vmatmul.bf16.gmra.mxu2 %v17278_v13  ;;  %v13437_v13 = vor.u32 %v16223_v22, %v13434_v52  ;;  %v13410_v44 = vld [vmem:[#allocation5 + $0x1348] sm:$0xf0] }
 0x46c   : > { %9973 = vmatmul.bf16.gmra.mxu3 %v17280_v14  ;;  %9985 = vmatpush.bf16.msra.mxu0 %v12525_v49  ;;  %v13794_v14 = vld [vmem:[#allocation5 + $0x1648] sm:$0xf0]  ;;  %v13413_v26 = vor.u32 %v16217_v7, %v13410_v44  ;;  %v16259_v49 = vld [vmem:[#allocation5 + $0x1484] sm:$0xf] }
 0x46d   : > { %10004 = vmatpush.bf16.msra.mxu1 %v12717_v47  ;;  %v13797_v38 = vor.u32 %v16313_v27, %v13794_v14  ;;  %v16355_v47 = vld [vmem:[#allocation5 + $0x1784] sm:$0xf]  ;;  %v13746_v22 = vld [vmem:[#allocation5 + $0x15e8] sm:$0xf0]  ;;  %v13581_v59 = vor.u32 %v16259_v49, %v13578_v1  ;;  %v13674_v1 = vld [vmem:[#allocation5 + $0x1558] sm:$0xf0] }
 0x46e   : > { %10023 = vmatpush.bf16.msra.mxu2 %v12909_v48  ;;  %v9651_v63 = vpop.f32.mrf.mxu2  ;;  %v13386_v48 = vld [vmem:[#allocation5 + $0x1318] sm:$0xf0]  ;;  %v13698_v36 = vld [vmem:[#allocation5 + $0x1588] sm:$0xf0] }
 0x46f   : > { %10042 = vmatpush.bf16.msra.mxu3 %v13101_v33  ;;  %v9670_v62 = vpop.f32.mrf.mxu3  ;;  %v9652_v12 = vadd.f32 %v9651_v63, %v9633_v6  ;;  %v9615_v41 = vpop.f32.mrf.mxu0  ;;  %v13962_v33 = vld [vmem:[#allocation5 + $0x1798] sm:$0xf0]  ;;  %v13389_v57 = vor.u32 %v16211_v61, %v13386_v48  ;;  %v13938_v63 = vld [vmem:[#allocation5 + $0x1768] sm:$0xf0]  ;;  %v16337_v48 = vld [vmem:[#allocation5 + $0x16f4] sm:$0xf] }
 0x470   : > { %v9634_v43 = vpop.f32.mrf.mxu1  ;;  %v9616_v32 = vadd.f32 %v9615_v41, %v17994_v50  ;;  %9986 = vmatpush.bf16.msra.mxu0 %v12501_v25  ;;  %v13770_v50 = vld [vmem:[#allocation5 + $0x1618] sm:$0xf0]  ;;  %v16205_v25 = vld [vmem:[#allocation5 + $0x12d4] sm:$0xf]  ;;  %v13506_v61 = vld [vmem:[#allocation5 + $0x1408] sm:$0xf0] }
 0x471   : > { %v18011_v56 = vadd.f32 %v9670_v62, %v9652_v12  ;;  %10005 = vmatpush.bf16.msra.mxu1 %v12693_v8  ;;  %v13773_v16 = vor.u32 %v16307_v10, %v13770_v50  ;;  %v13554_v8 = vld [vmem:[#allocation5 + $0x1468] sm:$0xf0]  ;;  %v13365_v62 = vor.u32 %v16205_v25, %v13362_v2  ;;  %v13338_v12 = vld [vmem:[#allocation5 + $0x12b8] sm:$0xf0]  ;;  %v16241_v10 = vld [vmem:[#allocation5 + $0x13f4] sm:$0xf] }
 0x472   : > { %10024 = vmatpush.bf16.msra.mxu2 %v12885_v15  ;;  %v9635_v31 = vadd.f32 %v9634_v43, %v9616_v32  ;;  %v13965_v15 = vor.u32 %v16355_v47, %v13962_v33  ;;  %v13557_v27 = vor.u32 %v16253_v3, %v13554_v8  ;;  %v13890_v49 = vld [vmem:[#allocation5 + $0x1708] sm:$0xf0]  ;;  %v13509_v47 = vor.u32 %v16241_v10, %v13506_v61  ;;  %v16277_v2 = vld [vmem:[#allocation5 + $0x1514] sm:$0xf] }
 0x473   : > { %10043 = vmatpush.bf16.msra.mxu3 %v13077_v9  ;;  %v16349_v9 = vld [vmem:[#allocation5 + $0x1754] sm:$0xf]  ;;  %v13893_v33 = vor.u32 %v16337_v48, %v13890_v49  ;;  %v14178_v61 = vld [vmem:[#allocation5 + $0x1948] sm:$0xf0] }
 0x474   : > { %10055 = vmatpush.bf16.msrb.mxu0 %v13437_v13  ;;  %v13722_v13 = vld [vmem:[#allocation5 + $0x15b8] sm:$0xf0]  ;;  %v13941_v14 = vor.u32 %v16349_v9, %v13938_v63  ;;  %v13650_v9 = vld [vmem:[#allocation5 + $0x1528] sm:$0xf0]  ;;  %v16181_v63 = vld [vmem:[#allocation5 + $0x1214] sm:$0xf] }
 0x475   : > { %10074 = vmatpush.bf16.msrb.mxu1 %v13629_v30  ;;  %v13530_v30 = vld [vmem:[#allocation5 + $0x1438] sm:$0xf0]  ;;  %v16457_v48 = vld [vmem:[#allocation5 + $0x1ab4] sm:$0xf] }
 0x476   : > { %10093 = vmatpush.bf16.msrb.mxu2 %v13821_v21  ;;  %v9653_v0 = vpop.f32.mrf.mxu2  ;;  %v16295_v21 = vld [vmem:[#allocation5 + $0x15a4] sm:$0xf] }
 0x477   : > { %10112 = vmatpush.bf16.msrb.mxu3 %v14013_v20  ;;  %v9672_v53 = vpop.f32.mrf.mxu3  ;;  %v9654_v54 = vadd.f32 %v9653_v0, %v9635_v31  ;;  %v9684_v5 = vpop.f32.mrf.mxu0  ;;  %v16343_v20 = vld [vmem:[#allocation5 + $0x1724] sm:$0xf]  ;;  %v13725_v32 = vor.u32 %v16295_v21, %v13722_v13 }
 0x478   : > { %10056 = vmatpush.bf16.msrb.mxu0 %v13413_v26  ;;  %v9703_v35 = vpop.f32.mrf.mxu1  ;;  %v9685_v6 = vadd.f32 %v9684_v5, %v18001_v19  ;;  %v13749_v19 = vor.u32 %v16301_v37, %v13746_v22  ;;  %v13290_v5 = vld [vmem:[#allocation5 + $0x1258] sm:$0xf0]  ;;  %v16331_v37 = vld [vmem:[#allocation5 + $0x16c4] sm:$0xf] }
 0x479   : > { %10075 = vmatpush.bf16.msrb.mxu1 %v13605_v11  ;;  %v18014_v52 = vadd.f32 %v9672_v53, %v9654_v54  ;;  %9987 = vmatmul.bf16.vlgmr.msra.gmra.mxu0 %v17294_v23  ;;  %v16199_v23 = vld [vmem:[#allocation5 + $0x12a4] sm:$0xf]  ;;  %v16193_v11 = vld [vmem:[#allocation5 + $0x1274] sm:$0xf]  ;;  %v13866_v22 = vld [vmem:[#allocation5 + $0x16d8] sm:$0xf0] }
 0x47a   : > { %10094 = vmatpush.bf16.msrb.mxu2 %v13797_v38  ;;  %v9704_v34 = vadd.f32 %v9703_v35, %v9685_v6  ;;  %10006 = vmatmul.bf16.vlgmr.msra.gmra.mxu1 %v17296_v24  ;;  %v16247_v24 = vld [vmem:[#allocation5 + $0x1424] sm:$0xf]  ;;  %v13341_v42 = vor.u32 %v16199_v23, %v13338_v12  ;;  %v13869_v13 = vor.u32 %v16331_v37, %v13866_v22  ;;  %v16325_v23 = vld [vmem:[#allocation5 + $0x1694] sm:$0xf] }
 0x47b   : > { %10113 = vmatpush.bf16.msrb.mxu3 %v13989_v55  ;;  %10025 = vmatmul.bf16.vlgmr.msra.gmra.mxu2 %v17298_v28  ;;  %v13914_v28 = vld [vmem:[#allocation5 + $0x1738] sm:$0xf0]  ;;  %v13533_v38 = vor.u32 %v16247_v24, %v13530_v30  ;;  %v13314_v55 = vld [vmem:[#allocation5 + $0x1288] sm:$0xf0]  ;;  %v16283_v53 = vld [vmem:[#allocation5 + $0x1544] sm:$0xf] }
 0x47c   : > { %10044 = vmatmul.bf16.vlgmr.msra.gmra.mxu3 %v17300_v29  ;;  %10057 = vmatpush.bf16.msrb.mxu0 %v13389_v57  ;;  %v13917_v26 = vor.u32 %v16343_v20, %v13914_v28  ;;  %v13317_v0 = vor.u32 %v16193_v11, %v13314_v55  ;;  %v16187_v54 = vld [vmem:[#allocation5 + $0x1244] sm:$0xf]  ;;  %v13482_v57 = vld [vmem:[#allocation5 + $0x13d8] sm:$0xf0]  ;;  %v13653_v28 = vor.u32 %v16277_v2, %v13650_v9 }
 0x47d   : > { %10076 = vmatpush.bf16.msrb.mxu1 %v13581_v59  ;;  %v16235_v35 = vld [vmem:[#allocation5 + $0x13c4] sm:$0xf]  ;;  %v13293_v8 = vor.u32 %v16187_v54, %v13290_v5  ;;  %v14202_v30 = vld [vmem:[#allocation5 + $0x1978] sm:$0xf0] }
 0x47e   : > { %10095 = vmatpush.bf16.msrb.mxu2 %v13773_v16  ;;  %v9722_v41 = vpop.f32.mrf.mxu2  ;;  %v13485_v21 = vor.u32 %v16235_v35, %v13482_v57  ;;  %v16511_v24 = vld [vmem:[#allocation5 + $0x1c64] sm:$0xf]  ;;  %v14154_v57 = vld [vmem:[#allocation5 + $0x1918] sm:$0xf0] }
 0x47f   : > { %10114 = vmatpush.bf16.msrb.mxu3 %v13965_v15  ;;  %v9741_v43 = vpop.f32.mrf.mxu3  ;;  %v9723_v7 = vadd.f32 %v9722_v41, %v9704_v34  ;;  %v9686_v29 = vpop.f32.mrf.mxu0  ;;  %v13677_v34 = vor.u32 %v16283_v53, %v13674_v1  ;;  %v14586_v41 = vld [vmem:[#allocation5 + $0x1c78] sm:$0xf0]  ;;  %v16463_v20 = vld [vmem:[#allocation5 + $0x1ae4] sm:$0xf]  ;;  %v14754_v53 = vld [vmem:[#allocation5 + $0x1dc8] sm:$0xf0] }
 0x480   : > { %v9705_v44 = vpop.f32.mrf.mxu1  ;;  %v9687_v4 = vadd.f32 %v9686_v29, %v18004_v58  ;;  %10058 = vmatpush.bf16.msrb.mxu0 %v13365_v62  ;;  %v13701_v58 = vor.u32 %v16289_v51, %v13698_v36  ;;  %v14394_v29 = vld [vmem:[#allocation5 + $0x1af8] sm:$0xf0]  ;;  %v14589_v51 = vor.u32 %v16511_v24, %v14586_v41  ;;  %v16505_v36 = vld [vmem:[#allocation5 + $0x1c34] sm:$0xf]  ;;  %v16451_v37 = vld [vmem:[#allocation5 + $0x1a84] sm:$0xf] }
 0x481   : > { %v18021_v31 = vadd.f32 %v9741_v43, %v9723_v7  ;;  %10077 = vmatpush.bf16.msrb.mxu1 %v13557_v27  ;;  %v16229_v27 = vld [vmem:[#allocation5 + $0x1394] sm:$0xf]  ;;  %v16415_v43 = vld [vmem:[#allocation5 + $0x1964] sm:$0xf]  ;;  %v14397_v55 = vor.u32 %v16463_v20, %v14394_v29  ;;  %v14730_v2 = vld [vmem:[#allocation5 + $0x1d98] sm:$0xf0] }
 0x482   : > { %10096 = vmatpush.bf16.msrb.mxu2 %v13749_v19  ;;  %v9706_v50 = vadd.f32 %v9705_v44, %v9687_v4  ;;  %v13266_v19 = vld [vmem:[#allocation5 + $0x1228] sm:$0xf0]  ;;  %v16559_v44 = vld [vmem:[#allocation5 + $0x1de4] sm:$0xf]  ;;  %v14778_v4 = vld [vmem:[#allocation5 + $0x1df8] sm:$0xf0] }
 0x483   : > { %10115 = vmatpush.bf16.msrb.mxu3 %v13941_v14  ;;  %v13458_v14 = vld [vmem:[#allocation5 + $0x13a8] sm:$0xf0]  ;;  %v13269_v7 = vor.u32 %v16181_v63, %v13266_v19  ;;  %v14781_v10 = vor.u32 %v16559_v44, %v14778_v4  ;;  %v16445_v24 = vld [vmem:[#allocation5 + $0x1a54] sm:$0xf]  ;;  %v16487_v44 = vld [vmem:[#allocation5 + $0x1ba4] sm:$0xf] }
 0x484   : > { %10059 = vmatpush.bf16.msrb.mxu0 %v13341_v42  ;;  %v14706_v20 = vld [vmem:[#allocation5 + $0x1d68] sm:$0xf0]  ;;  %v14490_v4 = vld [vmem:[#allocation5 + $0x1bb8] sm:$0xf0] }
 0x485   : > { %10078 = vmatpush.bf16.msrb.mxu1 %v13533_v38 }
 0x486   : > { %10097 = vmatpush.bf16.msrb.mxu2 %v13725_v32  ;;  %v9724_v6 = vpop.f32.mrf.mxu2 }
 0x487   : > { %10116 = vmatpush.bf16.msrb.mxu3 %v13917_v26  ;;  %v9743_v16 = vpop.f32.mrf.mxu3  ;;  %v9725_v59 = vadd.f32 %v9724_v6, %v9706_v50  ;;  %v9689_v15 = vpop.f32.mrf.mxu0  ;;  %v16409_v50 = vld [vmem:[#allocation5 + $0x1934] sm:$0xf]  ;;  %v16499_v6 = vld [vmem:[#allocation5 + $0x1c04] sm:$0xf] }
 0x488   : > { %v9708_v25 = vpop.f32.mrf.mxu1  ;;  %v9690_v3 = vadd.f32 %v9689_v15, %v18011_v56  ;;  %10060 = vmatpush.bf16.msrb.mxu0 %v13317_v0  ;;  %v13842_v56 = vld [vmem:[#allocation5 + $0x16a8] sm:$0xf0]  ;;  %v16553_v0 = vld [vmem:[#allocation5 + $0x1db4] sm:$0xf]  ;;  %v14181_v54 = vor.u32 %v16409_v50, %v14178_v61  ;;  %v14346_v15 = vld [vmem:[#allocation5 + $0x1a98] sm:$0xf0] }
 0x489   : > { %v18024_v62 = vadd.f32 %v9743_v16, %v9725_v59  ;;  %10079 = vmatpush.bf16.msrb.mxu1 %v13509_v47  ;;  %9992 = vmatmul.bf16.gmra.mxu0 %v17314_v39  ;;  %v13461_v39 = vor.u32 %v16229_v27, %v13458_v14  ;;  %v14757_v35 = vor.u32 %v16553_v0, %v14754_v53  ;;  %v16403_v16 = vld [vmem:[#allocation5 + $0x1904] sm:$0xf]  ;;  %v16481_v61 = vld [vmem:[#allocation5 + $0x1b74] sm:$0xf] }
 0x48a   : > { %10098 = vmatpush.bf16.msrb.mxu2 %v13701_v58  ;;  %v9709_v12 = vadd.f32 %v9708_v25, %v9690_v3  ;;  %10011 = vmatmul.bf16.gmra.mxu1 %v17316_v40  ;;  %v13845_v40 = vor.u32 %v16325_v23, %v13842_v56  ;;  %v14370_v58 = vld [vmem:[#allocation5 + $0x1ac8] sm:$0xf0]  ;;  %v16547_v25 = vld [vmem:[#allocation5 + $0x1d84] sm:$0xf]  ;;  %v14157_v19 = vor.u32 %v16403_v16, %v14154_v57  ;;  %v16385_v53 = vld [vmem:[#allocation5 + $0x1874] sm:$0xf] }
 0x48b   : > { %10117 = vmatpush.bf16.msrb.mxu3 %v13893_v33  ;;  %10030 = vmatmul.bf16.gmra.mxu2 %v17318_v45  ;;  %v14205_v45 = vor.u32 %v16415_v43, %v14202_v30  ;;  %v14373_v5 = vor.u32 %v16457_v48, %v14370_v58  ;;  %v14349_v14 = vor.u32 %v16451_v37, %v14346_v15  ;;  %v14130_v56 = vld [vmem:[#allocation5 + $0x18e8] sm:$0xf0]  ;;  %v16541_v30 = vld [vmem:[#allocation5 + $0x1d54] sm:$0xf]  ;;  %v16475_v16 = vld [vmem:[#allocation5 + $0x1b44] sm:$0xf] }
 0x48c   : > { %10049 = vmatmul.bf16.gmra.mxu3 %v17320_v46  ;;  %10061 = vmatpush.bf16.msrb.mxu0 %v13293_v8  ;;  %v14562_v46 = vld [vmem:[#allocation5 + $0x1c48] sm:$0xf0]  ;;  %v14733_v23 = vor.u32 %v16547_v25, %v14730_v2  ;;  %v14442_v57 = vld [vmem:[#allocation5 + $0x1b58] sm:$0xf0]  ;;  %v16427_v25 = vld [vmem:[#allocation5 + $0x19c4] sm:$0xf] }
 0x48d   : > { %10080 = vmatpush.bf16.msrb.mxu1 %v13485_v21  ;;  %v14565_v33 = vor.u32 %v16505_v36, %v14562_v46  ;;  %v16493_v21 = vld [vmem:[#allocation5 + $0x1bd4] sm:$0xf]  ;;  %v14322_v43 = vld [vmem:[#allocation5 + $0x1a68] sm:$0xf0]  ;;  %v16535_v36 = vld [vmem:[#allocation5 + $0x1d24] sm:$0xf] }
 0x48e   : > { %10099 = vmatpush.bf16.msrb.mxu2 %v13677_v34  ;;  %v9727_v32 = vpop.f32.mrf.mxu2  ;;  %v14682_v46 = vld [vmem:[#allocation5 + $0x1d38] sm:$0xf0]  ;;  %v14466_v48 = vld [vmem:[#allocation5 + $0x1b88] sm:$0xf0] }
 0x48f   : > { %10118 = vmatpush.bf16.msrb.mxu3 %v13869_v13  ;;  %v9746_v42 = vpop.f32.mrf.mxu3  ;;  %v9728_v38 = vadd.f32 %v9727_v32, %v9709_v12  ;;  %v9691_v26 = vpop.f32.mrf.mxu0  ;;  %v14514_v13 = vld [vmem:[#allocation5 + $0x1be8] sm:$0xf0]  ;;  %v16397_v12 = vld [vmem:[#allocation5 + $0x18d4] sm:$0xf]  ;;  %v14106_v32 = vld [vmem:[#allocation5 + $0x18b8] sm:$0xf0]  ;;  %v14685_v0 = vor.u32 %v16535_v36, %v14682_v46 }
 0x490   : > { %v9710_v11 = vpop.f32.mrf.mxu1  ;;  %v9692_v49 = vadd.f32 %v9691_v26, %v18014_v52  ;;  %10062 = vmatpush.bf16.msrb.mxu0 %v13269_v7  ;;  %v14538_v52 = vld [vmem:[#allocation5 + $0x1c18] sm:$0xf0]  ;;  %v14517_v7 = vor.u32 %v16493_v21, %v14514_v13  ;;  %v14133_v29 = vor.u32 %v16397_v12, %v14130_v56  ;;  %v16469_v13 = vld [vmem:[#allocation5 + $0x1b14] sm:$0xf]  ;;  %v14418_v56 = vld [vmem:[#allocation5 + $0x1b28] sm:$0xf0] }
 0x491   : > { %v18031_v1 = vadd.f32 %v9746_v42, %v9728_v38  ;;  %10081 = vmatpush.bf16.msrb.mxu1 %v13461_v39  ;;  %v14541_v63 = vor.u32 %v16499_v6, %v14538_v52  ;;  %v14325_v39 = vor.u32 %v16445_v24, %v14322_v43  ;;  %v14658_v6 = vld [vmem:[#allocation5 + $0x1d08] sm:$0xf0]  ;;  %v14058_v15 = vld [vmem:[#allocation5 + $0x1858] sm:$0xf0]  ;;  %v16373_v24 = vld [vmem:[#allocation5 + $0x1814] sm:$0xf] }
 0x492   : > { %10100 = vmatpush.bf16.msrb.mxu2 %v13653_v28  ;;  %v9711_v47 = vadd.f32 %v9710_v11, %v9692_v49  ;;  %v18705_v28 = vld [vmem:[#allocation16_spill] sm:$0xff]  ;;  %v15162_v46 = vld [vmem:[#allocation5 + $0x20f8] sm:$0xf0] }
 0x493   : > { %10119 = vmatpush.bf16.msrb.mxu3 %v13845_v40  ;;  %v14709_v40 = vor.u32 %v16541_v30, %v14706_v20 }
 0x494   : > { %10131 = vmatpush.bf16.msra.mxu0 %v14205_v45  ;;  %v14298_v45 = vld [vmem:[#allocation5 + $0x1a38] sm:$0xf0] }
 0x495   : > { %10150 = vmatpush.bf16.msra.mxu1 %v14397_v55 }
 0x496   : > { %10169 = vmatpush.bf16.msra.mxu2 %v14589_v51  ;;  %v9729_v22 = vpop.f32.mrf.mxu2 }
 0x497   : > { %10188 = vmatpush.bf16.msra.mxu3 %v14781_v10  ;;  %v9748_v59 = vpop.f32.mrf.mxu3  ;;  %v9730_v3 = vadd.f32 %v9729_v22, %v9711_v47  ;;  %v9760_v34 = vpop.f32.mrf.mxu0  ;;  %v14493_v10 = vor.u32 %v16487_v44, %v14490_v4  ;;  %v14082_v47 = vld [vmem:[#allocation5 + $0x1888] sm:$0xf0]  ;;  %v18706_v44 = vld [vmem:[#allocation17_spill] sm:$0xff] }
 0x498   : > { %10132 = vmatpush.bf16.msra.mxu0 %v14181_v54  ;;  %v9779_v8 = vpop.f32.mrf.mxu1  ;;  %v9761_v9 = vadd.f32 %v9760_v34, %v18021_v31  ;;  %v18704_v31 = vld [vmem:[#allocation15_spill] sm:$0xff]  ;;  %v14085_v52 = vor.u32 %v16385_v53, %v14082_v47  ;;  %v14250_v34 = vld [vmem:[#allocation5 + $0x19d8] sm:$0xf0]  ;;  %v14610_v4 = vld [vmem:[#allocation5 + $0x1ca8] sm:$0xf0] }
 0x499   : > { %10151 = vmatpush.bf16.msra.mxu1 %v14373_v5  ;;  %v18034_v27 = vadd.f32 %v9748_v59, %v9730_v3  ;;  %10063 = vmatmul.bf16.vlgmr.msrb.gmra.mxu0 %v17334_v17  ;;  %v16391_v17 = vld [vmem:[#allocation5 + $0x18a4] sm:$0xf]  ;;  %v14274_v5 = vld [vmem:[#allocation5 + $0x1a08] sm:$0xf0]  ;;  %v14253_v30 = vor.u32 %v16427_v25, %v14250_v34 }
 0x49a   : > { %10170 = vmatpush.bf16.msra.mxu2 %v14565_v33  ;;  %v9780_v41 = vadd.f32 %v9779_v8, %v9761_v9  ;;  %10082 = vmatmul.bf16.vlgmr.msrb.gmra.mxu1 %v17336_v18  ;;  %v16439_v18 = vld [vmem:[#allocation5 + $0x1a24] sm:$0xf]  ;;  %v14109_v50 = vor.u32 %v16391_v17, %v14106_v32  ;;  %v16433_v33 = vld [vmem:[#allocation5 + $0x19f4] sm:$0xf]  ;;  %v14634_v9 = vld [vmem:[#allocation5 + $0x1cd8] sm:$0xf0] }
 0x49b   : > { %10189 = vmatpush.bf16.msra.mxu3 %v14757_v35  ;;  %10101 = vmatmul.bf16.vlgmr.msrb.gmra.mxu2 %v18704_v31  ;;  %v14301_v58 = vor.u32 %v16439_v18, %v14298_v45  ;;  %v16529_v35 = vld [vmem:[#allocation5 + $0x1cf4] sm:$0xf]  ;;  %v14277_v37 = vor.u32 %v16433_v33, %v14274_v5  ;;  %v16379_v59 = vld [vmem:[#allocation5 + $0x1844] sm:$0xf]  ;;  %v18709_v32 = vld [vmem:[#allocation20_spill] sm:$0xff]  ;;  %v14421_v45 = vor.u32 %v16469_v13, %v14418_v56 }
 0x49c   : > { %10120 = vmatmul.bf16.vlgmr.msrb.gmra.mxu3 %v18705_v28  ;;  %10133 = vmatpush.bf16.msra.mxu0 %v14157_v19  ;;  %v14661_v22 = vor.u32 %v16529_v35, %v14658_v6  ;;  %v16523_v8 = vld [vmem:[#allocation5 + $0x1cc4] sm:$0xf]  ;;  %v14061_v12 = vor.u32 %v16379_v59, %v14058_v15  ;;  %v16421_v31 = vld [vmem:[#allocation5 + $0x1994] sm:$0xf]  ;;  %v14226_v28 = vld [vmem:[#allocation5 + $0x19a8] sm:$0xf0] }
 0x49d   : > { %10152 = vmatpush.bf16.msra.mxu1 %v14349_v14  ;;  %v14637_v20 = vor.u32 %v16523_v8, %v14634_v9  ;;  %v18708_v17 = vld [vmem:[#allocation19_spill] sm:$0xff]  ;;  %v16601_v35 = vld [vmem:[#allocation5 + $0x1f34] sm:$0xf]  ;;  %v14946_v6 = vld [vmem:[#allocation5 + $0x1f48] sm:$0xf0] }
 0x49e   : > { %10171 = vmatpush.bf16.msra.mxu2 %v14541_v63  ;;  %v9798_v42 = vpop.f32.mrf.mxu2  ;;  %v16607_v18 = vld [vmem:[#allocation5 + $0x1f64] sm:$0xf]  ;;  %v14949_v25 = vor.u32 %v16601_v35, %v14946_v6  ;;  %v15306_v9 = vld [vmem:[#allocation5 + $0x2218] sm:$0xf0] }
 0x49f   : > { %10190 = vmatpush.bf16.msra.mxu3 %v14733_v23  ;;  %v9817_v51 = vpop.f32.mrf.mxu3  ;;  %v9799_v38 = vadd.f32 %v9798_v42, %v9780_v41  ;;  %v9762_v26 = vpop.f32.mrf.mxu0  ;;  %v14445_v23 = vor.u32 %v16475_v16, %v14442_v57  ;;  %v14034_v41 = vld [vmem:[#allocation5 + $0x1828] sm:$0xf0]  ;;  %v14970_v42 = vld [vmem:[#allocation5 + $0x1f78] sm:$0xf0]  ;;  %v16745_v57 = vld [vmem:[#allocation5 + $0x23b4] sm:$0xf] }
 0x4a0   : > { %v9781_v11 = vpop.f32.mrf.mxu1  ;;  %v9763_v55 = vadd.f32 %v9762_v26, %v18024_v62  ;;  %10134 = vmatpush.bf16.msra.mxu0 %v14133_v29  ;;  %v14469_v62 = vor.u32 %v16481_v61, %v14466_v48  ;;  %v14037_v36 = vor.u32 %v16373_v24, %v14034_v41  ;;  %v15546_v26 = vld [vmem:[#allocation5 + $0x23f8] sm:$0xf0]  ;;  %v14973_v48 = vor.u32 %v16607_v18, %v14970_v42  ;;  %v15138_v16 = vld [vmem:[#allocation5 + $0x20c8] sm:$0xf0]  ;;  %v16691_v8 = vld [vmem:[#allocation5 + $0x2204] sm:$0xf] }
 0x4a1   : > { %v18041_v49 = vadd.f32 %v9817_v51, %v9799_v38  ;;  %10153 = vmatpush.bf16.msra.mxu1 %v14325_v39  ;;  %v16703_v39 = vld [vmem:[#allocation5 + $0x2264] sm:$0xf]  ;;  %v15498_v56 = vld [vmem:[#allocation5 + $0x2398] sm:$0xf0]  ;;  %v18710_v18 = vld [vmem:[#allocation21_spill] sm:$0xff] }
 0x4a2   : > { %10172 = vmatpush.bf16.msra.mxu2 %v14517_v7  ;;  %v9782_v54 = vadd.f32 %v9781_v11, %v9763_v55  ;;  %v16517_v7 = vld [vmem:[#allocation5 + $0x1c94] sm:$0xf]  ;;  %v16655_v51 = vld [vmem:[#allocation5 + $0x20e4] sm:$0xf]  ;;  %v14229_v11 = vor.u32 %v16421_v31, %v14226_v28  ;;  %v15309_v31 = vor.u32 %v16691_v8, %v15306_v9  ;;  %v18711_v42 = vld [vmem:[#allocation22_spill] sm:$0xff] }
 0x4a3   : > { %10191 = vmatpush.bf16.msra.mxu3 %v14709_v40  ;;  %v15354_v40 = vld [vmem:[#allocation5 + $0x2278] sm:$0xf0]  ;;  %v16751_v38 = vld [vmem:[#allocation5 + $0x23e4] sm:$0xf]  ;;  %v14613_v55 = vor.u32 %v16517_v7, %v14610_v4  ;;  %v16685_v7 = vld [vmem:[#allocation5 + $0x21d4] sm:$0xf] }
 0x4a4   : > { %10135 = vmatpush.bf16.msra.mxu0 %v14109_v50  ;;  %v15357_v61 = vor.u32 %v16703_v39, %v15354_v40  ;;  %v15549_v5 = vor.u32 %v16751_v38, %v15546_v26  ;;  %v16589_v39 = vld [vmem:[#allocation5 + $0x1ed4] sm:$0xf]  ;;  %v14898_v40 = vld [vmem:[#allocation5 + $0x1ee8] sm:$0xf0] }
 0x4a5   : > { %10154 = vmatpush.bf16.msra.mxu1 %v14301_v58  ;;  %v16697_v58 = vld [vmem:[#allocation5 + $0x2234] sm:$0xf]  ;;  %v18713_v38 = vld [vmem:[#allocation24_spill] sm:$0xff] }
 0x4a6   : > { %10173 = vmatpush.bf16.msra.mxu2 %v14493_v10  ;;  %v9800_v2 = vpop.f32.mrf.mxu2  ;;  %v16625_v8 = vld [vmem:[#allocation5 + $0x1ff4] sm:$0xf] }
 0x4a7   : > { %10192 = vmatpush.bf16.msra.mxu3 %v14685_v0  ;;  %v9819_v3 = vpop.f32.mrf.mxu3  ;;  %v9801_v63 = vadd.f32 %v9800_v2, %v9782_v54  ;;  %v9765_v19 = vpop.f32.mrf.mxu0  ;;  %v15330_v0 = vld [vmem:[#allocation5 + $0x2248] sm:$0xf0]  ;;  %v15165_v54 = vor.u32 %v16655_v51, %v15162_v46  ;;  %v18712_v46 = vld [vmem:[#allocation23_spill] sm:$0xff] }
 0x4a8   : > { %v9784_v21 = vpop.f32.mrf.mxu1  ;;  %v9766_v14 = vadd.f32 %v9765_v19, %v18031_v1  ;;  %10136 = vmatpush.bf16.msra.mxu0 %v14085_v52  ;;  %v18707_v1 = vld [vmem:[#allocation18_spill] sm:$0xff]  ;;  %v15333_v15 = vor.u32 %v16697_v58, %v15330_v0  ;;  %v15090_v51 = vld [vmem:[#allocation5 + $0x2068] sm:$0xf0]  ;;  %v16631_v0 = vld [vmem:[#allocation5 + $0x2024] sm:$0xf] }
 0x4a9   : > { %v18044_v43 = vadd.f32 %v9819_v3, %v9801_v63  ;;  %10155 = vmatpush.bf16.msra.mxu1 %v14277_v37  ;;  %10068 = vmatmul.bf16.gmra.mxu0 %v18706_v44  ;;  %v15522_v37 = vld [vmem:[#allocation5 + $0x23c8] sm:$0xf0]  ;;  %v16595_v63 = vld [vmem:[#allocation5 + $0x1f04] sm:$0xf]  ;;  %v14922_v19 = vld [vmem:[#allocation5 + $0x1f18] sm:$0xf0] }
 0x4aa   : > { %10174 = vmatpush.bf16.msra.mxu2 %v14469_v62  ;;  %v9785_v29 = vadd.f32 %v9784_v21, %v9766_v14  ;;  %10087 = vmatmul.bf16.gmra.mxu1 %v18707_v1  ;;  %v16649_v62 = vld [vmem:[#allocation5 + $0x20b4] sm:$0xf]  ;;  %v15525_v3 = vor.u32 %v16745_v57, %v15522_v37  ;;  %v16643_v21 = vld [vmem:[#allocation5 + $0x2084] sm:$0xf]  ;;  %v14925_v28 = vor.u32 %v16595_v63, %v14922_v19  ;;  %v14874_v58 = vld [vmem:[#allocation5 + $0x1eb8] sm:$0xf0] }
 0x4ab   : > { %10193 = vmatpush.bf16.msra.mxu3 %v14661_v22  ;;  %10106 = vmatmul.bf16.gmra.mxu2 %v18708_v17  ;;  %v15141_v2 = vor.u32 %v16649_v62, %v15138_v16  ;;  %v16637_v17 = vld [vmem:[#allocation5 + $0x2054] sm:$0xf]  ;;  %v15042_v63 = vld [vmem:[#allocation5 + $0x2008] sm:$0xf0] }
 0x4ac   : > { %10125 = vmatmul.bf16.gmra.mxu3 %v18709_v32  ;;  %10137 = vmatpush.bf16.msra.mxu0 %v14061_v12  ;;  %v16739_v12 = vld [vmem:[#allocation5 + $0x2384] sm:$0xf]  ;;  %v16673_v37 = vld [vmem:[#allocation5 + $0x2174] sm:$0xf] }
 0x4ad   : > { %10156 = vmatpush.bf16.msra.mxu1 %v14253_v30  ;;  %v15501_v4 = vor.u32 %v16739_v12, %v15498_v56  ;;  %v16721_v19 = vld [vmem:[#allocation5 + $0x22f4] sm:$0xf]  ;;  %v15210_v12 = vld [vmem:[#allocation5 + $0x2158] sm:$0xf0]  ;;  %v15045_v56 = vor.u32 %v16625_v8, %v15042_v63 }
 0x4ae   : > { %10175 = vmatpush.bf16.msra.mxu2 %v14445_v23  ;;  %v9803_v10 = vpop.f32.mrf.mxu2  ;;  %v15114_v23 = vld [vmem:[#allocation5 + $0x2098] sm:$0xf0] }
 0x4af   : > { %10194 = vmatpush.bf16.msra.mxu3 %v14637_v20  ;;  %v9822_v50 = vpop.f32.mrf.mxu3  ;;  %v9804_v53 = vadd.f32 %v9803_v10, %v9785_v29  ;;  %v9767_v47 = vpop.f32.mrf.mxu0  ;;  %v15282_v29 = vld [vmem:[#allocation5 + $0x21e8] sm:$0xf0]  ;;  %v15117_v1 = vor.u32 %v16643_v21, %v15114_v23  ;;  %v15258_v10 = vld [vmem:[#allocation5 + $0x21b8] sm:$0xf0]  ;;  %v16667_v23 = vld [vmem:[#allocation5 + $0x2144] sm:$0xf] }
 0x4b0   : > { %v9786_v33 = vpop.f32.mrf.mxu1  ;;  %v9768_v52 = vadd.f32 %v9767_v47, %v18034_v27  ;;  %10138 = vmatpush.bf16.msra.mxu0 %v14037_v36  ;;  %v16847_v27 = vld [vmem:[%s18521_s2] sm:$0x3f]  ;;  %v15474_v36 = vld [vmem:[#allocation5 + $0x2368] sm:$0xf0]  ;;  %v15285_v26 = vor.u32 %v16685_v7, %v15282_v29  ;;  %v15018_v7 = vld [vmem:[#allocation5 + $0x1fd8] sm:$0xf0] }
 0x4b1   : > { %v18051_v22 = vadd.f32 %v9822_v50, %v9804_v53  ;;  %10157 = vmatpush.bf16.msra.mxu1 %v14229_v11  ;;  %v18056_v34 = vperm.slane %v16847_v27, 5  ;;  %v14901_v11 = vor.u32 %v16589_v39, %v14898_v40  ;;  %v15093_v50 = vor.u32 %v16637_v17, %v15090_v51  ;;  %v14850_v27 = vld [vmem:[#allocation5 + $0x1e88] sm:$0xf0]  ;;  %v16715_v29 = vld [vmem:[#allocation5 + $0x22c4] sm:$0xf] }
 0x4b2   : > { %10176 = vmatpush.bf16.msra.mxu2 %v14421_v45  ;;  %v9787_v59 = vadd.f32 %v9786_v33, %v9768_v52  ;;  %v16733_v45 = vld [vmem:[#allocation5 + $0x2354] sm:$0xf]  ;;  %v15066_v33 = vld [vmem:[#allocation5 + $0x2038] sm:$0xf0]  ;;  %v15426_v21 = vld [vmem:[#allocation5 + $0x2308] sm:$0xf0] }
 0x4b3   : > { %10195 = vmatpush.bf16.msra.mxu3 %v14613_v55  ;;  %v16679_v55 = vld [vmem:[#allocation5 + $0x21a4] sm:$0xf]  ;;  %v15186_v51 = vld [vmem:[#allocation5 + $0x2128] sm:$0xf0] }
 0x4b4   : > { %10207 = vmatpush.bf16.msrb.mxu0 %v14973_v48  ;;  %v16583_v48 = vld [vmem:[#allocation5 + $0x1ea4] sm:$0xf]  ;;  %v15261_v16 = vor.u32 %v16679_v55, %v15258_v10  ;;  %v18714_v10 = vld [vmem:[#allocation25_spill] sm:$0xff] }
 0x4b5   : > { %10226 = vmatpush.bf16.msrb.mxu1 %v15165_v54  ;;  %v16727_v54 = vld [vmem:[#allocation5 + $0x2324] sm:$0xf]  ;;  %v14877_v57 = vor.u32 %v16583_v48, %v14874_v58  ;;  %v16709_v48 = vld [vmem:[#allocation5 + $0x2294] sm:$0xf]  ;;  %v15378_v58 = vld [vmem:[#allocation5 + $0x22a8] sm:$0xf0] }
 0x4b6   : > { %10245 = vmatpush.bf16.msrb.mxu2 %v15357_v61  ;;  %v9805_v13 = vpop.f32.mrf.mxu2  ;;  %v15477_v61 = vor.u32 %v16733_v45, %v15474_v36 }
 0x4b7   : > { %10264 = vmatpush.bf16.msrb.mxu3 %v15549_v5  ;;  %v9824_v14 = vpop.f32.mrf.mxu3  ;;  %v9806_v24 = vadd.f32 %v9805_v13, %v9787_v59  ;;  %v9836_v41 = vpop.f32.mrf.mxu0  ;;  %v15450_v5 = vld [vmem:[#allocation5 + $0x2338] sm:$0xf0]  ;;  %v15234_v59 = vld [vmem:[#allocation5 + $0x2188] sm:$0xf0] }
 0x4b8   : > { %10208 = vmatpush.bf16.msrb.mxu0 %v14949_v25  ;;  %v9855_v30 = vpop.f32.mrf.mxu1  ;;  %v9837_v20 = vadd.f32 %v9836_v41, %v18056_v34  ;;  %v15069_v25 = vor.u32 %v16631_v0, %v15066_v33  ;;  %v15237_v13 = vor.u32 %v16673_v37, %v15234_v59  ;;  %v16571_v41 = vld [vmem:[#allocation5 + $0x1e44] sm:$0xf] }
 0x4b9   : > { %10227 = vmatpush.bf16.msrb.mxu1 %v15141_v2  ;;  %v18059_v44 = vadd.f32 %v9824_v14, %v9806_v24  ;;  %10139 = vmatmul.bf16.vlgmr.msra.gmra.mxu0 %v18710_v18  ;;  %v15453_v2 = vor.u32 %v16727_v54, %v15450_v5  ;;  %v15429_v24 = vor.u32 %v16721_v19, %v15426_v21  ;;  %v18716_v0 = vld [vmem:[#allocation27_spill] sm:$0xff]  ;;  %v18718_v21 = vld [vmem:[#allocation30_spill] sm:$0xff] }
 0x4ba   : > { %10246 = vmatpush.bf16.msrb.mxu2 %v15333_v15  ;;  %v9856_v32 = vadd.f32 %v9855_v30, %v9837_v20  ;;  %10158 = vmatmul.bf16.vlgmr.msra.gmra.mxu1 %v18711_v42  ;;  %v14826_v30 = vld [vmem:[#allocation5 + $0x1e58] sm:$0xf0]  ;;  %v16619_v20 = vld [vmem:[#allocation5 + $0x1fc4] sm:$0xf]  ;;  %v16661_v42 = vld [vmem:[#allocation5 + $0x2114] sm:$0xf]  ;;  %v15381_v5 = vor.u32 %v16709_v48, %v15378_v58 }
 0x4bb   : > { %10265 = vmatpush.bf16.msrb.mxu3 %v15525_v3  ;;  %10177 = vmatmul.bf16.vlgmr.msra.gmra.mxu2 %v18712_v46  ;;  %v16577_v3 = vld [vmem:[#allocation5 + $0x1e74] sm:$0xf]  ;;  %v14829_v18 = vor.u32 %v16571_v41, %v14826_v30  ;;  %v15021_v36 = vor.u32 %v16619_v20, %v15018_v7 }
 0x4bc   : > { %10196 = vmatmul.bf16.vlgmr.msra.gmra.mxu3 %v18713_v38  ;;  %10209 = vmatpush.bf16.msrb.mxu0 %v14925_v28  ;;  %v14853_v14 = vor.u32 %v16577_v3, %v14850_v27  ;;  %v16565_v38 = vld [vmem:[#allocation5 + $0x1e14] sm:$0xf] }
 0x4bd   : > { %10228 = vmatpush.bf16.msrb.mxu1 %v15117_v1  ;;  %v15402_v1 = vld [vmem:[#allocation5 + $0x22d8] sm:$0xf0] }
 0x4be   : > { %10247 = vmatpush.bf16.msrb.mxu2 %v15309_v31  ;;  %v9874_v53 = vpop.f32.mrf.mxu2  ;;  %v15405_v46 = vor.u32 %v16715_v29, %v15402_v1 }
 0x4bf   : > { %10266 = vmatpush.bf16.msrb.mxu3 %v15501_v4  ;;  %v9893_v47 = vpop.f32.mrf.mxu3  ;;  %v9875_v35 = vadd.f32 %v9874_v53, %v9856_v32  ;;  %v9838_v6 = vpop.f32.mrf.mxu0  ;;  %v15213_v32 = vor.u32 %v16667_v23, %v15210_v12  ;;  %v18717_v53 = vld [vmem:[#allocation28_spill] sm:$0xff] }
 0x4c0   : > { %v9857_v62 = vpop.f32.mrf.mxu1  ;;  %v9839_v52 = vadd.f32 %v9838_v6, %v18056_v34  ;;  %10210 = vmatpush.bf16.msrb.mxu0 %v14901_v11  ;;  %v16613_v11 = vld [vmem:[#allocation5 + $0x1f94] sm:$0xf] }
 0x4c1   : > { %v18066_v15 = vadd.f32 %v9893_v47, %v9875_v35  ;;  %10229 = vmatpush.bf16.msrb.mxu1 %v15093_v50  ;;  %v18715_v50 = vld [vmem:[#allocation26_spill] sm:$0xff]  ;;  %v15189_v47 = vor.u32 %v16661_v42, %v15186_v51 }
 0x4c2   : > { %10248 = vmatpush.bf16.msrb.mxu2 %v15285_v26  ;;  %v9858_v9 = vadd.f32 %v9857_v62, %v9839_v52  ;;  %v14802_v26 = vld [vmem:[#allocation5 + $0x1e28] sm:$0xf0] }
 0x4c3   : > { %10267 = vmatpush.bf16.msrb.mxu3 %v15477_v61  ;;  %v14994_v61 = vld [vmem:[#allocation5 + $0x1fa8] sm:$0xf0]  ;;  %v14805_v33 = vor.u32 %v16565_v38, %v14802_v26 }
 0x4c4   : > { %10211 = vmatpush.bf16.msrb.mxu0 %v14877_v57  ;;  %v14997_v54 = vor.u32 %v16613_v11, %v14994_v61 }
 0x4c5   : > { %10230 = vmatpush.bf16.msrb.mxu1 %v15069_v25 }
 0x4c6   : > { %10249 = vmatpush.bf16.msrb.mxu2 %v15261_v16  ;;  %v9876_v31 = vpop.f32.mrf.mxu2 }
 0x4c7   : > { %10268 = vmatpush.bf16.msrb.mxu3 %v15453_v2  ;;  %v9895_v28 = vpop.f32.mrf.mxu3  ;;  %v9877_v4 = vadd.f32 %v9876_v31, %v9858_v9  ;;  %v9841_v39 = vpop.f32.mrf.mxu0 }
 0x4c8   : > { %v9860_v40 = vpop.f32.mrf.mxu1  ;;  %v9842_v17 = vadd.f32 %v9841_v39, %v18056_v34  ;;  %10212 = vmatpush.bf16.msrb.mxu0 %v14853_v14  ;;  %v18721_v39 = vld [vmem:[#allocation33_spill] sm:$0xff] }
 0x4c9   : > { %v9896_v45 = vadd.f32 %v9895_v28, %v9877_v4  ;;  %10231 = vmatpush.bf16.msrb.mxu1 %v15045_v56  ;;  %10144 = vmatmul.bf16.gmra.mxu0 %v18714_v10 }
 0x4ca   : > { %10250 = vmatpush.bf16.msrb.mxu2 %v15237_v13  ;;  %v9861_v55 = vadd.f32 %v9860_v40, %v9842_v17  ;;  %10163 = vmatmul.bf16.gmra.mxu1 %v18715_v50  ;;  %v18720_v13 = vld [vmem:[#allocation32_spill] sm:$0xff]  ;;  %v18722_v40 = vld [vmem:[#allocation34_spill] sm:$0xff]  ;;  %v18723_v17 = vld [vmem:[#allocation35_spill] sm:$0xff] }
 0x4cb   : > { %10269 = vmatpush.bf16.msrb.mxu3 %v15429_v24  ;;  %10182 = vmatmul.bf16.gmra.mxu2 %v18716_v0 }
 0x4cc   : > { %10201 = vmatmul.bf16.gmra.mxu3 %v18717_v53  ;;  %10213 = vmatpush.bf16.msrb.mxu0 %v14829_v18 }
 0x4cd   : > { %10232 = vmatpush.bf16.msrb.mxu1 %v15021_v36 }
 0x4ce   : > { %10251 = vmatpush.bf16.msrb.mxu2 %v15213_v32  ;;  %v9879_v35 = vpop.f32.mrf.mxu2  ;;  %v18724_v32 = vld [vmem:[#allocation36_spill] sm:$0xff] }
 0x4cf   : > { %10270 = vmatpush.bf16.msrb.mxu3 %v15405_v46  ;;  %v9898_v6 = vpop.f32.mrf.mxu3  ;;  %v9880_v62 = vadd.f32 %v9879_v35, %v9861_v55  ;;  %v9843_v52 = vpop.f32.mrf.mxu0 }
 0x4d0   : > { %v9862_v16 = vpop.f32.mrf.mxu1  ;;  %v9844_v57 = vadd.f32 %v9843_v52, %v18056_v34  ;;  %10214 = vmatpush.bf16.msrb.mxu0 %v14805_v33  ;;  %v18719_v34 = vld [vmem:[#allocation31_spill] sm:$0xff] }
 0x4d1   : > { %v9899_v37 = vadd.f32 %v9898_v6, %v9880_v62  ;;  %10233 = vmatpush.bf16.msrb.mxu1 %v14997_v54 }
 0x4d2   : > { %10252 = vmatpush.bf16.msrb.mxu2 %v15189_v47  ;;  %v9863_v59 = vadd.f32 %v9862_v16, %v9844_v57 }
 0x4d3   : > { %10271 = vmatpush.bf16.msrb.mxu3 %v15381_v5 }
 0x4d6   : > { %v9881_v25 = vpop.f32.mrf.mxu2 }
 0x4d7   : > { %v9900_v2 = vpop.f32.mrf.mxu3  ;;  %v9882_v3 = vadd.f32 %v9881_v25, %v9863_v59  ;;  %v9912_v27 = vpop.f32.mrf.mxu0 }
 0x4d8   : > { %v9931_v8 = vpop.f32.mrf.mxu1  ;;  %v9913_v9 = vadd.f32 %v9912_v27, %v18066_v15 }
 0x4d9   : > { %v9901_v63 = vadd.f32 %v9900_v2, %v9882_v3  ;;  %10215 = vmatmul.bf16.vlgmr.msrb.gmra.mxu0 %v18622_v60 }
 0x4da   : > { %v9932_v19 = vadd.f32 %v9931_v8, %v9913_v9  ;;  %10234 = vmatmul.bf16.vlgmr.msrb.gmra.mxu1 %v18718_v21 }
 0x4db   : > { %10253 = vmatmul.bf16.vlgmr.msrb.gmra.mxu2 %v18719_v34 }
 0x4dc   : > { %10272 = vmatmul.bf16.vlgmr.msrb.gmra.mxu3 %v18720_v13 }
 0x4de   : > { %v9950_v14 = vpop.f32.mrf.mxu2 }
 0x4df   : > { %v9969_v23 = vpop.f32.mrf.mxu3  ;;  %v9951_v12 = vadd.f32 %v9950_v14, %v9932_v19  ;;  %v9914_v56 = vpop.f32.mrf.mxu0 }
 0x4e0   : > { %v9933_v24 = vpop.f32.mrf.mxu1  ;;  %v9915_v41 = vadd.f32 %v9914_v56, %v9896_v45 }
 0x4e1   : > { %v9970_v30 = vadd.f32 %v9969_v23, %v9951_v12 }
 0x4e2   : > { %v9934_v20 = vadd.f32 %v9933_v24, %v9915_v41 }
 0x4e6   : > { %v9952_v31 = vpop.f32.mrf.mxu2 }
 0x4e7   : > { %v9971_v15 = vpop.f32.mrf.mxu3  ;;  %v9953_v28 = vadd.f32 %v9952_v31, %v9934_v20  ;;  %v9917_v7 = vpop.f32.mrf.mxu0 }
 0x4e8   : > { %v9936_v29 = vpop.f32.mrf.mxu1  ;;  %v9918_v60 = vadd.f32 %v9917_v7, %v9899_v37 }
 0x4e9   : > { %v9972_v1 = vadd.f32 %v9971_v15, %v9953_v28  ;;  %10220 = vmatmul.bf16.gmra.mxu0 %v18721_v39 }
 0x4ea   : > { %v9937_v4 = vadd.f32 %v9936_v29, %v9918_v60  ;;  %10239 = vmatmul.bf16.gmra.mxu1 %v18722_v40 }
 0x4eb   : > { %10258 = vmatmul.bf16.gmra.mxu2 %v18723_v17 }
 0x4ec   : > { %10277 = vmatmul.bf16.gmra.mxu3 %v18724_v32 }
 0x4ee   : > { %v9955_v18 = vpop.f32.mrf.mxu2 }
 0x4ef   : > { %v9974_v42 = vpop.f32.mrf.mxu3  ;;  %v9956_v51 = vadd.f32 %v9955_v18, %v9937_v4  ;;  %v9919_v45 = vpop.f32.mrf.mxu0 }
 0x4f0   : > { %v9938_v36 = vpop.f32.mrf.mxu1  ;;  %v9920_v46 = vadd.f32 %v9919_v45, %v9901_v63 }
 0x4f1   : > { %v9975_v38 = vadd.f32 %v9974_v42, %v9956_v51 }
 0x4f2   : > { %v9939_v26 = vadd.f32 %v9938_v36, %v9920_v46 }
 0x4f6   : > { %v9957_v11 = vpop.f32.mrf.mxu2 }
 0x4f7   : > { %v9976_v55 = vpop.f32.mrf.mxu3  ;;  %v9958_v10 = vadd.f32 %v9957_v11, %v9939_v26  ;;  %v9988_v50 = vpop.f32.mrf.mxu0 }
 0x4f8   : > { %v10007_v61 = vpop.f32.mrf.mxu1  ;;  %v9989_v48 = vadd.f32 %v9988_v50, %v9970_v30 }
 0x4f9   : > { %v9977_v58 = vadd.f32 %v9976_v55, %v9958_v10 }
 0x4fa   : > { %v10008_v0 = vadd.f32 %v10007_v61, %v9989_v48 }
 0x4fe   : > { %v10026_v53 = vpop.f32.mrf.mxu2 }
 0x4ff   : > { %v10045_v47 = vpop.f32.mrf.mxu3  ;;  %v10027_v33 = vadd.f32 %v10026_v53, %v10008_v0  ;;  %v9990_v54 = vpop.f32.mrf.mxu0 }
 0x500   : > { %v10009_v5 = vpop.f32.mrf.mxu1  ;;  %v9991_v35 = vadd.f32 %v9990_v54, %v9972_v1 }
 0x501   : > { %v10046_v6 = vadd.f32 %v10045_v47, %v10027_v33 }
 0x502   : > { %v10010_v62 = vadd.f32 %v10009_v5, %v9991_v35 }
 0x506   : > { %v10028_v52 = vpop.f32.mrf.mxu2 }
 0x507   : > { %v10047_v16 = vpop.f32.mrf.mxu3  ;;  %v10029_v57 = vadd.f32 %v10028_v52, %v10010_v62  ;;  %v9993_v37 = vpop.f32.mrf.mxu0 }
 0x508   : > { %v10012_v59 = vpop.f32.mrf.mxu1  ;;  %v9994_v25 = vadd.f32 %v9993_v37, %v9975_v38 }
 0x509   : > { %v10048_v2 = vadd.f32 %v10047_v16, %v10029_v57  ;;  %v10284_v57 = vld [vmem:[%s17200_s16 + $0x8] sm:$0xff] }
 0x50a   : > { %v10013_v3 = vadd.f32 %v10012_v59, %v9994_v25 }
 0x50e   : > { %v10031_v27 = vpop.f32.mrf.mxu2 }
 0x50f   : > { %v10050_v8 = vpop.f32.mrf.mxu3  ;;  %v10032_v9 = vadd.f32 %v10031_v27, %v10013_v3  ;;  %v9995_v63 = vpop.f32.mrf.mxu0  ;;  %v10283_v3 = vld [vmem:[%s17200_s16] sm:$0xff]  ;;  %v10285_v27 = vld [vmem:[%s17200_s16 + $0x10] sm:$0xff] }
 0x510   : > { %v10014_v19 = vpop.f32.mrf.mxu1  ;;  %v9996_v21 = vadd.f32 %v9995_v63, %v9977_v58 }
 0x511   : > { %v10051_v34 = vadd.f32 %v10050_v8, %v10032_v9 }
 0x512   : > { %v10015_v13 = vadd.f32 %v10014_v19, %v9996_v21  ;;  %v18725_v21 = vld [vmem:[#allocation29_spill] sm:$0xff] }
 0x516   : > { %v10033_v14 = vpop.f32.mrf.mxu2 }
 0x517   : > { %v10052_v23 = vpop.f32.mrf.mxu3  ;;  %v10034_v12 = vadd.f32 %v10033_v14, %v10015_v13  ;;  %v10064_v56 = vpop.f32.mrf.mxu0 }
 0x518   : > { %v10083_v24 = vpop.f32.mrf.mxu1  ;;  %v10065_v38 = vadd.f32 %v10064_v56, %v10046_v6 }
 0x519   : > { %v10053_v41 = vadd.f32 %v10052_v23, %v10034_v12  ;;  %v18726_v12 = vld [vmem:[#allocation37_spill] sm:$0xff] }
 0x51a   : > { %v10084_v26 = vadd.f32 %v10083_v24, %v10065_v38  ;;  %v18100_v56 = vadd.f32 %v10283_v3, %v18726_v12  ;;  %v18727_v24 = vld [vmem:[#allocation44_spill] sm:$0xff]  ;;  %v10293_v3 = vld [vmem:[%s17200_s16 + $0x50] sm:$0xff] }
 0x51e   : > { %v10102_v30 = vpop.f32.mrf.mxu2 }
 0x51f   : > { %v10121_v20 = vpop.f32.mrf.mxu3  ;;  %v10066_v31 = vpop.f32.mrf.mxu0  ;;  %v10103_v10 = vadd.f32 %v10102_v30, %v10084_v26  ;;  %v18103_v30 = vadd.f32 %v10285_v27, %v18727_v24  ;;  %v10296_v27 = vld [vmem:[%s17200_s16 + $0x68] sm:$0xff] }
 0x520   : > { %v10085_v15 = vpop.f32.mrf.mxu1  ;;  %v10067_v48 = vadd.f32 %v10066_v31, %v10048_v2 }
 0x521   : > { %v10122_v58 = vadd.f32 %v10121_v20, %v10103_v10  ;;  %v10286_v20 = vld [vmem:[%s17200_s16 + $0x18] sm:$0xff] }
 0x522   : > { %v10086_v0 = vadd.f32 %v10085_v15, %v10067_v48  ;;  %v18729_v48 = vld [vmem:[#allocation41_spill] sm:$0xff] }
 0x526   : > { %v10104_v28 = vpop.f32.mrf.mxu2 }
 0x527   : > { %v10123_v7 = vpop.f32.mrf.mxu3  ;;  %v10069_v29 = vpop.f32.mrf.mxu0  ;;  %v10105_v54 = vadd.f32 %v10104_v28, %v10086_v0 }
 0x528   : > { %v10088_v60 = vpop.f32.mrf.mxu1  ;;  %v10070_v6 = vadd.f32 %v10069_v29, %v10051_v34  ;;  %v18097_v34 = vadd.f32 %v10284_v57, %v18725_v21  ;;  %v10290_v29 = vld [vmem:[%s17200_s16 + $0x38] sm:$0xff] }
 0x529   : > { %v10124_v52 = vadd.f32 %v10123_v7, %v10105_v54  ;;  %v10287_v7 = vld [vmem:[%s17200_s16 + $0x20] sm:$0xff] }
 0x52a   : > { %v10089_v37 = vadd.f32 %v10088_v60, %v10070_v6  ;;  %v10333_v28 = vadd.f32 %v18097_v34, %v18100_v56  ;;  %v18728_v60 = vld [vmem:[#allocation48_spill] sm:$0xff] }
 0x52e   : > { %v10107_v1 = vpop.f32.mrf.mxu2 }
 0x52f   : > { %v10126_v4 = vpop.f32.mrf.mxu3  ;;  %v10071_v39 = vpop.f32.mrf.mxu0  ;;  %v10108_v8 = vadd.f32 %v10107_v1, %v10089_v37 }
 0x530   : > { %v10090_v40 = vpop.f32.mrf.mxu1  ;;  %v10072_v13 = vadd.f32 %v10071_v39, %v10053_v41  ;;  %v18111_v41 = vadd.f32 %v10286_v20, %v18728_v60 }
 0x531   : > { %v10127_v31 = vadd.f32 %v10126_v4, %v10108_v8  ;;  %v10291_v4 = vld [vmem:[%s17200_s16 + $0x40] sm:$0xff]  ;;  %v18732_v8 = vld [vmem:[#allocation49_spill] sm:$0xff] }
 0x532   : > { %v10091_v1 = vadd.f32 %v10090_v40, %v10072_v13  ;;  %v10295_v13 = vld [vmem:[%s17200_s16 + $0x60] sm:$0xff] }
 0x536   : > { %v10109_v17 = vpop.f32.mrf.mxu2 }
 0x537   : > { %v18083_v32 = vpop.f32.mrf.mxu3  ;;  %v10140_v18 = vpop.f32.mrf.mxu0  ;;  %v10110_v38 = vadd.f32 %v10109_v17, %v10091_v1 }
 0x538   : > { %v10159_v42 = vpop.f32.mrf.mxu1  ;;  %v10141_v53 = vadd.f32 %v10140_v18, %v10122_v58  ;;  %v18120_v58 = vadd.f32 %v10290_v29, %v18729_v48 }
 0x53a   : > { %v10160_v62 = vadd.f32 %v10159_v42, %v10141_v53  ;;  %v10334_v42 = vadd.f32 %v10333_v28, %v18103_v30  ;;  %v10294_v28 = vld [vmem:[%s17200_s16 + $0x58] sm:$0xff] }
 0x53c   : > { %v10335_v6 = vadd.f32 %v10334_v42, %v18111_v41  ;;  %v18735_v42 = vld [vmem:[#allocation46_spill] sm:$0xff] }
 0x53e   : > { %v10178_v51 = vpop.f32.mrf.mxu2 }
 0x53f   : > { %v10197_v45 = vpop.f32.mrf.mxu3  ;;  %v10142_v36 = vpop.f32.mrf.mxu0  ;;  %v10179_v16 = vadd.f32 %v10178_v51, %v10160_v62  ;;  %v18730_v62 = vld [vmem:[#allocation38_spill] sm:$0xff] }
 0x540   : > { %v10161_v46 = vpop.f32.mrf.mxu1  ;;  %v10143_v59 = vadd.f32 %v10142_v36, %v10124_v52  ;;  %v10289_v36 = vld [vmem:[%s17200_s16 + $0x30] sm:$0xff] }
 0x541   : > { %v10198_v9 = vadd.f32 %v10197_v45, %v10179_v16  ;;  %v18125_v52 = vadd.f32 %v10289_v36, %v18730_v62  ;;  %v10129_v16 = vadd.f32 %v18083_v32, %v10110_v38 }
 0x542   : > { %v10162_v14 = vadd.f32 %v10161_v46, %v10143_v59  ;;  %v18117_v46 = vadd.f32 %v10287_v7, %v18041_v49  ;;  %v18731_v49 = vld [vmem:[#allocation45_spill] sm:$0xff] }
 0x543   : > { %v18128_v17 = vadd.f32 %v10291_v4, %v18731_v49  ;;  %v10299_v4 = vld [vmem:[%s17200_s16 + $0x80] sm:$0xff]  ;;  %v10301_v49 = vld [vmem:[%s17200_s16 + $0x90] sm:$0xff] }
 0x544   : > { %v10336_v59 = vadd.f32 %v10335_v6, %v18117_v46 }
 0x546   : > { %v10180_v11 = vpop.f32.mrf.mxu2 }
 0x547   : > { %v10199_v55 = vpop.f32.mrf.mxu3  ;;  %v10145_v50 = vpop.f32.mrf.mxu0  ;;  %v10181_v15 = vadd.f32 %v10180_v11, %v10162_v14 }
 0x548   : > { %v10164_v61 = vpop.f32.mrf.mxu1  ;;  %v10146_v39 = vadd.f32 %v10145_v50, %v10127_v31  ;;  %v10288_v50 = vld [vmem:[%s17200_s16 + $0x28] sm:$0xff]  ;;  %v18733_v31 = vld [vmem:[#allocation42_spill] sm:$0xff] }
 0x549   : > { %v10200_v26 = vadd.f32 %v10199_v55, %v10181_v15  ;;  %v10292_v55 = vld [vmem:[%s17200_s16 + $0x48] sm:$0xff]  ;;  %v10297_v15 = vld [vmem:[%s17200_s16 + $0x70] sm:$0xff] }
 0x54a   : > { %v10165_v0 = vadd.f32 %v10164_v61, %v10146_v39  ;;  %v10340_v61 = vadd.f32 %v18120_v58, %v18125_v52 }
 0x54c   : > { %v10341_v14 = vadd.f32 %v10340_v61, %v18128_v17 }
 0x54e   : > { %v10183_v47 = vpop.f32.mrf.mxu2 }
 0x54f   : > { %v18085_v33 = vpop.f32.mrf.mxu3  ;;  %v10147_v5 = vpop.f32.mrf.mxu0  ;;  %v10184_v57 = vadd.f32 %v10183_v47, %v10165_v0 }
 0x550   : > { %v18087_v35 = vpop.f32.mrf.mxu1 }
 0x551   : > { %v10203_v12 = vadd.f32 %v18085_v33, %v10184_v57  ;;  %v10298_v33 = vld [vmem:[%s17200_s16 + $0x78] sm:$0xff]  ;;  %v18737_v57 = vld [vmem:[#allocation43_spill] sm:$0xff] }
 0x556   : > { %v18090_v25 = vpop.f32.mrf.mxu2 }
 0x557   : > { %v18092_v2 = vpop.f32.mrf.mxu3  ;;  %v10216_v63 = vpop.f32.mrf.mxu0 }
 0x558   : > { %v10235_v19 = vpop.f32.mrf.mxu1  ;;  %v10217_v23 = vadd.f32 %v10216_v63, %v10198_v9  ;;  %v18140_v9 = vadd.f32 %v10292_v55, %v18732_v8  ;;  %v10148_v63 = vadd.f32 %v10147_v5, %v10129_v16  ;;  %v18150_v5 = vadd.f32 %v10296_v27, %v18733_v31  ;;  %v10303_v55 = vld [vmem:[%s17200_s16 + $0xa0] sm:$0xff]  ;;  %v10300_v16 = vld [vmem:[%s17200_s16 + $0x88] sm:$0xff] }
 0x559   : > { %v10304_v8 = vld [vmem:[%s17200_s16 + $0xa8] sm:$0xff] }
 0x55a   : > { %v10236_v18 = vadd.f32 %v10235_v19, %v10217_v23  ;;  %v18146_v23 = vadd.f32 %v10293_v3, %v18044_v43  ;;  %v10167_v7 = vadd.f32 %v18087_v35, %v10148_v63  ;;  %v10342_v1 = vadd.f32 %v10341_v14, %v18140_v9  ;;  %v18734_v43 = vld [vmem:[#allocation39_spill] sm:$0xff]  ;;  %v18738_v63 = vld [vmem:[#allocation40_spill] sm:$0xff] }
 0x55b   : > { %v18157_v39 = vadd.f32 %v10295_v13, %v18734_v43 }
 0x55c   : > { %v10343_v35 = vadd.f32 %v10342_v1, %v18146_v23  ;;  %v10306_v1 = vld [vmem:[%s17200_s16 + $0xb8] sm:$0xff] }
 0x55d   : > { %v10347_v38 = vadd.f32 %v18150_v5, %v18157_v39 }
 0x55e   : > { %v10254_v51 = vpop.f32.mrf.mxu2 }
 0x55f   : > { %v10273_v45 = vpop.f32.mrf.mxu3  ;;  %v10255_v11 = vadd.f32 %v10254_v51, %v10236_v18  ;;  %v10218_v10 = vpop.f32.mrf.mxu0  ;;  %v18161_v51 = vadd.f32 %v10297_v15, %v18735_v42 }
 0x560   : > { %v10237_v40 = vpop.f32.mrf.mxu1  ;;  %v10219_v54 = vadd.f32 %v10218_v10, %v10200_v26  ;;  %v18736_v26 = vld [vmem:[#allocation50_spill] sm:$0xff] }
 0x561   : > { %v10274_v53 = vadd.f32 %v10273_v45, %v10255_v11  ;;  %v10186_v45 = vadd.f32 %v18090_v25, %v10167_v7  ;;  %v18171_v11 = vadd.f32 %v10298_v33, %v18736_v26  ;;  %v10348_v0 = vadd.f32 %v10347_v38, %v18161_v51 }
 0x562   : > { %v10238_v19 = vadd.f32 %v10237_v40, %v10219_v54  ;;  %v10302_v40 = vld [vmem:[%s17200_s16 + $0x98] sm:$0xff] }
 0x563   : > { %v18132_v37 = vadd.f32 %v10288_v50, %v10274_v53  ;;  %v18177_v53 = vadd.f32 %v10299_v4, %v18051_v22  ;;  %v10205_v54 = vadd.f32 %v18092_v2, %v10186_v45  ;;  %v10349_v27 = vadd.f32 %v10348_v0, %v18171_v11 }
 0x564   : > { %v18189_v22 = vadd.f32 %v10301_v49, %v18738_v63 }
 0x565   : > { %v10337_v21 = vadd.f32 %v10336_v59, %v18132_v37  ;;  %v18184_v59 = vadd.f32 %v10302_v40, %v18737_v57 }
 0x566   : > { %v10256_v32 = vpop.f32.mrf.mxu2 }
 0x567   : > { %v10275_v47 = vpop.f32.mrf.mxu3  ;;  %v10257_v24 = vadd.f32 %v10256_v32, %v10238_v19  ;;  %10338 = vadd.xlane.f32.xlu0 %v10337_v21  ;;  %v10221_v20 = vpop.f32.mrf.mxu0  ;;  %v18739_v19 = vld [vmem:[#allocation47_spill] sm:$0xff]  ;;  %v10350_v32 = vadd.f32 %v10349_v27, %v18177_v53  ;;  %v10354_v14 = vadd.f32 %v18184_v59, %v18189_v22 }
 0x568   : > { %v10222_v60 = vadd.f32 %v10221_v20, %v10203_v12  ;;  %v10240_v18 = vpop.f32.mrf.mxu1  ;;  %v18192_v2 = vadd.f32 %v10303_v55, %v18739_v19  ;;  %v18740_v12 = vld [vmem:[#allocation51_spill] sm:$0xff] }
 0x569   : > { %v10276_v29 = vadd.f32 %v10275_v47, %v10257_v24  ;;  %v10305_v47 = vld [vmem:[%s17200_s16 + $0xb0] sm:$0xff]  ;;  %v18201_v24 = vadd.f32 %v10304_v8, %v18740_v12  ;;  %s18397_s16 = scalar_lea.vmem [#allocation8], %s16760_s8  ;;  %s16761_s8 = smul.u32 192, %s17127_s11 }
 0x56a   : > { %v10241_v10 = vadd.f32 %v10240_v18, %v10222_v60  ;;  %v18206_v7 = vadd.f32 %v10305_v47, %v18059_v44  ;;  %s10632_s29 = sshll.u32 %s18397_s16, 4  ;;  %s10633_s29 = int_to_ptr.vmem [resolvable:$true] %s10632_s29 }
 0x56b   : > { %v18164_v36 = vadd.f32 %v10294_v28, %v10276_v29  ;;  %v10355_v28 = vadd.f32 %v10354_v14, %v18192_v2  ;;  %s10631_s19 = scalar_lea.hbm %s18525_s6, %s16761_s8 }
 0x56c   : > { %s10634_s15 = sshll.u32 %s10631_s19, 4  ;;  %s10635_s15 = int_to_ptr.hbm [resolvable:$true] %s10634_s15 }
 0x56d   : > { %v10344_v48 = vadd.f32 %v10343_v35, %v18164_v36  ;;  %v10356_v33 = vadd.f32 %v10355_v28, %v18201_v24  ;;  %v17021_v35 = vmov 768.0   ;;  %s16952_s20 = sshra.s32 %s10635_s15, 4  ;;  %s16953_s20 = int_to_ptr.hbm [resolvable:$true] %s16952_s20 }
 0x56e   : > { %v10259_v25 = vpop.f32.mrf.mxu2  ;;  %16833 = vrcp.f32 %v17021_v35  ;;  %s16954_s10 = scalar_lea.hbm %s16953_s20, 192  ;;  %p16959_p4 = scmp.lt.s32.totalorder %s16953_s20, %s18525_s6 }
 0x56f   : > { %v10278_v50 = vpop.f32.mrf.mxu3  ;;  %v10260_v6 = vadd.f32 %v10259_v25, %v10241_v10  ;;  %10345 = vadd.xlane.f32.xlu0 %v10344_v48  ;;  %v10223_v62 = vpop.f32.mrf.mxu0  ;;  %v10357_v42 = vadd.f32 %v10356_v33, %v18206_v7  ;;  %p16955_p3 = scmp.ne.s32.totalorder %s16953_s20, %s16954_s10  ;;  %p16960_p9 = scmp.lt.s32.totalorder %s16958_s27, %s16954_s10 }
 0x570   : > { %v10224_v3 = vadd.f32 %v10223_v62, %v10205_v54  ;;  %v10242_v13 = vpop.f32.mrf.mxu1 }
 0x571   : > { %v10279_v61 = vadd.f32 %v10278_v50, %v10260_v6  ;;  %p16956_p6 = pnand %p16955_p3, %p17144_p11  ;;  %p16961_p1 = por %p16960_p9, %p16959_p4 }
 0x572   : > { %v10243_v20 = vadd.f32 %v10242_v13, %v10224_v3 }
 0x573   : > { %v18194_v21 = vadd.f32 %v10300_v16, %v10279_v61  ;;  %p16957_p8 = pneg %p16956_p6 }
 0x574   : > { %v16834_v4 = vpop.eup %16833 }
 0x575   : > { %v10351_v31 = vadd.f32 %v10350_v32, %v18194_v21  ;;  %v10362_v38 = vmul.f32 768.0, %v16834_v4  ;;  %vm10366_vm0 = vweird.f32 %v16834_v4  ;;  %p16962_p5 = pnand %p16961_p1, %p16957_p8 }
 0x576   : > { %v10261_v15 = vpop.f32.mrf.mxu2 }
 0x577   : > { %v10262_v29 = vadd.f32 %v10261_v15, %v10243_v20  ;;  %10352 = vadd.xlane.f32.xlu1 %v10351_v31  ;;  %v10280_v60 = vpop.f32.mrf.mxu3  ;;  %v10363_v44 = vsub.f32 1.0, %v10362_v38 }
 0x579   : > { %v10281_v43 = vadd.f32 %v10280_v60, %v10262_v29  ;;  %v10364_v26 = vmul.f32 %v16834_v4, %v10363_v44 }
 0x57b   : > { %v18210_v18 = vadd.f32 %v10306_v1, %v10281_v43  ;;  %v10365_v10 = vadd.f32 %v16834_v4, %v10364_v26 }
 0x57d   : > { %v10358_v45 = vadd.f32 %v10357_v42, %v18210_v18  ;;  %v18214_v48 = vsel %vm10366_vm0, %v16834_v4, %v10365_v10 }
 0x57f   : > { %10359 = vadd.xlane.f32.xlu1 %v10358_v45 }
 0x5da   : > { %v10339_v40 = vpop.xlane.xlu0 %10338 }
 0x5db   : > { %v10368_v25 = vmul.f32 %v18214_v48, %v10339_v40 }
 0x5dd   : > { %v18218_v50 = vsub.f32 %v18100_v56, %v10368_v25  ;;  %v18221_v0 = vsub.f32 %v18097_v34, %v10368_v25  ;;  %v18224_v54 = vsub.f32 %v18103_v30, %v10368_v25  ;;  %v18227_v6 = vsub.f32 %v18111_v41, %v10368_v25 }
 0x5de   : > { %v18234_v55 = vsub.f32 %v18117_v46, %v10368_v25  ;;  %v18239_v30 = vsub.f32 %v18132_v37, %v10368_v25 }
 0x5df   : > { %v10396_v62 = vmul.f32 %v18218_v50, %v18218_v50  ;;  %v10397_v49 = vmul.f32 %v18221_v0, %v18221_v0  ;;  %v10398_v56 = vmul.f32 %v18224_v54, %v18224_v54  ;;  %v10399_v57 = vmul.f32 %v18227_v6, %v18227_v6 }
 0x5e0   : > { %v10400_v3 = vmul.f32 %v18234_v55, %v18234_v55  ;;  %v10401_v37 = vmul.f32 %v18239_v30, %v18239_v30 }
 0x5e1   : > { %v10420_v34 = vadd.f32 %v10397_v49, %v10396_v62 }
 0x5e2   : > { %v10346_v16 = vpop.xlane.xlu0 %10345 }
 0x5e3   : > { %v10369_v41 = vmul.f32 %v18214_v48, %v10346_v16  ;;  %v10421_v61 = vadd.f32 %v10420_v34, %v10398_v56 }
 0x5e5   : > { %v10422_v27 = vadd.f32 %v10421_v61, %v10399_v57  ;;  %v18247_v46 = vsub.f32 %v18125_v52, %v10369_v41  ;;  %v18250_v8 = vsub.f32 %v18120_v58, %v10369_v41  ;;  %v18253_v63 = vsub.f32 %v18128_v17, %v10369_v41 }
 0x5e6   : > { %v18258_v32 = vsub.f32 %v18140_v9, %v10369_v41  ;;  %v18265_v13 = vsub.f32 %v18146_v23, %v10369_v41  ;;  %v18270_v20 = vsub.f32 %v18164_v36, %v10369_v41 }
 0x5e7   : > { %v10423_v19 = vadd.f32 %v10422_v27, %v10400_v3  ;;  %v10402_v47 = vmul.f32 %v18247_v46, %v18247_v46  ;;  %v10403_v52 = vmul.f32 %v18250_v8, %v18250_v8  ;;  %v10404_v17 = vmul.f32 %v18253_v63, %v18253_v63 }
 0x5e8   : > { %v10405_v31 = vmul.f32 %v18258_v32, %v18258_v32  ;;  %v10406_v23 = vmul.f32 %v18265_v13, %v18265_v13  ;;  %v10407_v1 = vmul.f32 %v18270_v20, %v18270_v20 }
 0x5e9   : > { %v10424_v58 = vadd.f32 %v10423_v19, %v10401_v37  ;;  %v10427_v14 = vadd.f32 %v10403_v52, %v10402_v47 }
 0x5ea   : > { %v10353_v12 = vpop.xlane.xlu1 %10352 }
 0x5eb   : > { %v10370_v9 = vmul.f32 %v18214_v48, %v10353_v12  ;;  %10425 = vadd.xlane.f32.xlu2 %v10424_v58  ;;  %v10428_v15 = vadd.f32 %v10427_v14, %v10404_v17 }
 0x5ed   : > { %v10429_v28 = vadd.f32 %v10428_v15, %v10405_v31  ;;  %v18278_v29 = vsub.f32 %v18157_v39, %v10370_v9  ;;  %v18281_v60 = vsub.f32 %v18150_v5, %v10370_v9  ;;  %v18284_v36 = vsub.f32 %v18161_v51, %v10370_v9  ;;  %v10331_v31 = vld [vmem:[%s18523_s4] sm:$0x3f] }
 0x5ee   : > { %v18289_v33 = vsub.f32 %v18171_v11, %v10370_v9  ;;  %v18296_v45 = vsub.f32 %v18177_v53, %v10370_v9  ;;  %v18301_v38 = vsub.f32 %v18194_v21, %v10370_v9 }
 0x5ef   : > { %v10430_v43 = vadd.f32 %v10429_v28, %v10406_v23  ;;  %v10408_v42 = vmul.f32 %v18278_v29, %v18278_v29  ;;  %v10409_v39 = vmul.f32 %v18281_v60, %v18281_v60  ;;  %v10410_v51 = vmul.f32 %v18284_v36, %v18284_v36 }
 0x5f0   : > { %v10411_v44 = vmul.f32 %v18289_v33, %v18289_v33  ;;  %v10412_v53 = vmul.f32 %v18296_v45, %v18296_v45  ;;  %v10413_v62 = vmul.f32 %v18301_v38, %v18301_v38 }
 0x5f1   : > { %v10431_v5 = vadd.f32 %v10430_v43, %v10407_v1  ;;  %v10434_v35 = vadd.f32 %v10409_v39, %v10408_v42  ;;  %v10332_v1 = vld [vmem:[%s18524_s5] sm:$0x3f]  ;;  %v18348_v43 = vperm.slane %v10331_v31, 0  ;;  %v18351_v39 = vperm.slane %v10331_v31, 1 }
 0x5f2   : > { %v10360_v4 = vpop.xlane.xlu1 %10359 }
 0x5f3   : > { %v10371_v11 = vmul.f32 %v18214_v48, %v10360_v4  ;;  %10432 = vadd.xlane.f32.xlu2 %v10431_v5  ;;  %v10435_v26 = vadd.f32 %v10434_v35, %v10410_v51  ;;  %v18353_v5 = vperm.slane %v10331_v31, 2  ;;  %v18355_v4 = vperm.slane %v10331_v31, 3 }
 0x5f5   : > { %v10436_v10 = vadd.f32 %v10435_v26, %v10411_v44  ;;  %v18309_v40 = vsub.f32 %v18189_v22, %v10371_v11  ;;  %v18312_v25 = vsub.f32 %v18184_v59, %v10371_v11  ;;  %v18315_v21 = vsub.f32 %v18192_v2, %v10371_v11 }
 0x5f6   : > { %v18320_v56 = vsub.f32 %v18201_v24, %v10371_v11  ;;  %v18327_v59 = vsub.f32 %v18206_v7, %v10371_v11  ;;  %v18332_v57 = vsub.f32 %v18210_v18, %v10371_v11  ;;  %v18357_v11 = vperm.slane %v10331_v31, 4 }
 0x5f7   : > { %v10437_v49 = vadd.f32 %v10436_v10, %v10412_v53  ;;  %v10414_v34 = vmul.f32 %v18309_v40, %v18309_v40  ;;  %v10415_v22 = vmul.f32 %v18312_v25, %v18312_v25  ;;  %v10416_v2 = vmul.f32 %v18315_v21, %v18315_v21 }
 0x5f8   : > { %v10417_v24 = vmul.f32 %v18320_v56, %v18320_v56  ;;  %v10418_v3 = vmul.f32 %v18327_v59, %v18327_v59  ;;  %v10419_v7 = vmul.f32 %v18332_v57, %v18332_v57  ;;  %v18359_v44 = vperm.slane %v10331_v31, 5 }
 0x5f9   : > { %v10438_v16 = vadd.f32 %v10437_v49, %v10413_v62  ;;  %v10441_v41 = vadd.f32 %v10415_v22, %v10414_v34  ;;  %v18363_v53 = vperm.slane %v10332_v1, 0  ;;  %v18365_v49 = vperm.slane %v10332_v1, 1 }
 0x5fa   : > { %v18367_v34 = vperm.slane %v10332_v1, 2  ;;  %v18369_v22 = vperm.slane %v10332_v1, 3 }
 0x5fb   : > { %10439 = vadd.xlane.f32.xlu0 %v10438_v16  ;;  %v10442_v61 = vadd.f32 %v10441_v41, %v10416_v2  ;;  %v18372_v16 = vperm.slane %v10332_v1, 4  ;;  %v18374_v2 = vperm.slane %v10332_v1, 5 }
 0x5fd   : > { %v10443_v27 = vadd.f32 %v10442_v61, %v10417_v24 }
 0x5ff   : > { %v10444_v37 = vadd.f32 %v10443_v27, %v10418_v3 }
 0x601   : > { %v10445_v19 = vadd.f32 %v10444_v37, %v10419_v7 }
 0x603   : > { %10446 = vadd.xlane.f32.xlu1 %v10445_v19 }
 0x65e   : > { %v10426_v47 = vpop.xlane.xlu2 %10425 }
 0x65f   : > { %v10448_v52 = vmul.f32 %v10426_v47, %v18214_v48 }
 0x661   : > { %v10452_v58 = vadd.f32 1e-05, %v10448_v52 }
 0x663   : > { %16835 = vrsqrt.f32 %v10452_v58  ;;  %vm10462_vm2 = vweird.f32 %v10452_v58 }
 0x666   : > { %v10433_v18 = vpop.xlane.xlu2 %10432 }
 0x667   : > { %v10449_v17 = vmul.f32 %v10433_v18, %v18214_v48 }
 0x669   : > { %v16836_v14 = vpop.eup %16835  ;;  %v10453_v12 = vadd.f32 1e-05, %v10449_v17 }
 0x66a   : > { %v10457_v9 = vmul.f32 %v16836_v14, %v10452_v58  ;;  %vm10463_vm1 = vweird.f32 %v16836_v14 }
 0x66b   : > { %16837 = vrsqrt.f32 %v10453_v12  ;;  %vm10464_vm3 = vmor %vm10462_vm2, %vm10463_vm1  ;;  %vm10472_vm5 = vweird.f32 %v10453_v12 }
 0x66c   : > { %v10458_v15 = vmul.f32 %v16836_v14, %v10457_v9 }
 0x66e   : > { %v10459_v23 = vmul.f32 0.5, %v10458_v15  ;;  %v10440_v28 = vpop.xlane.xlu0 %10439 }
 0x66f   : > { %v10450_v42 = vmul.f32 %v10440_v28, %v18214_v48 }
 0x670   : > { %v10460_v51 = vsub.f32 1.5, %v10459_v23 }
 0x671   : > { %v16838_v35 = vpop.eup %16837  ;;  %v18361_v26 = vadd.f32 1e-05, %v10450_v42 }
 0x672   : > { %v10461_v10 = vmul.f32 %v16836_v14, %v10460_v51  ;;  %v10467_v62 = vmul.f32 %v16838_v35, %v10453_v12  ;;  %vm10473_vm4 = vweird.f32 %v16838_v35 }
 0x673   : > { %16839 = vrsqrt.f32 %v18361_v26  ;;  %vm10474_vm6 = vmor %vm10472_vm5, %vm10473_vm4  ;;  %vm10482_vm8 = vweird.f32 %v18361_v26 }
 0x674   : > { %v10465_v41 = vsel %vm10464_vm3, %v16836_v14, %v10461_v10  ;;  %v10468_v24 = vmul.f32 %v16838_v35, %v10467_v62 }
 0x675   : > { %v10496_v61 = vmul.f32 %v10465_v41, %v18218_v50  ;;  %v10497_v3 = vmul.f32 %v10465_v41, %v18221_v0  ;;  %v10498_v27 = vmul.f32 %v10465_v41, %v18224_v54  ;;  %v10499_v7 = vmul.f32 %v10465_v41, %v18227_v6 }
 0x676   : > { %v10500_v37 = vmul.f32 %v10465_v41, %v18234_v55  ;;  %v10501_v19 = vmul.f32 %v10465_v41, %v18239_v30  ;;  %v10469_v47 = vmul.f32 0.5, %v10468_v24  ;;  %v10447_v52 = vpop.xlane.xlu1 %10446 }
 0x677   : > { %v10533_v58 = vmul.f32 %v18348_v43, %v10496_v61  ;;  %v10534_v18 = vmul.f32 %v18351_v39, %v10497_v3  ;;  %v10535_v50 = vmul.f32 %v18353_v5, %v10498_v27  ;;  %v10536_v0 = vmul.f32 %v18355_v4, %v10499_v7 }
 0x678   : > { %v10537_v54 = vmul.f32 %v18357_v11, %v10500_v37  ;;  %v10538_v6 = vmul.f32 %v18359_v44, %v10501_v19  ;;  %v10470_v17 = vsub.f32 1.5, %v10469_v47  ;;  %v10451_v55 = vmul.f32 %v10447_v52, %v18214_v48 }
 0x679   : > { %v16840_v30 = vpop.eup %16839  ;;  %v10570_v14 = vadd.f32 %v18363_v53, %v10533_v58  ;;  %v10571_v9 = vadd.f32 %v18365_v49, %v10534_v18  ;;  %v10572_v31 = vadd.f32 %v18367_v34, %v10535_v50  ;;  %v10573_v15 = vadd.f32 %v18369_v22, %v10536_v0 }
 0x67a   : > { %v10471_v23 = vmul.f32 %v16838_v35, %v10470_v17  ;;  %v10477_v28 = vmul.f32 %v16840_v30, %v18361_v26  ;;  %v10574_v1 = vadd.f32 %v18372_v16, %v10537_v54  ;;  %v18401_v48 = vadd.f32 1e-05, %v10451_v55 }
 0x67b   : > { %10594 = vst [vmem:[%s18397_s16] sm:$0xff] %v10570_v14  ;;  %v10575_v42 = vadd.f32 %v18374_v2, %v10538_v6  ;;  %vm10483_vm7 = vweird.f32 %v16840_v30 }
 0x67c   : > { %10595 = vst [vmem:[%s18397_s16 + $0x8] sm:$0xff] %v10571_v9  ;;  %v10475_v12 = vsel %vm10474_vm6, %v16838_v35, %v10471_v23  ;;  %v10478_v51 = vmul.f32 %v16840_v30, %v10477_v28  ;;  %16841 = vrsqrt.f32 %v18401_v48  ;;  %vm10484_vm9 = vmor %vm10482_vm8, %vm10483_vm7  ;;  %vm10492_vm11 = vweird.f32 %v18401_v48 }
 0x67d   : > { %10596 = vst [vmem:[%s18397_s16 + $0x10] sm:$0xff] %v10572_v31  ;;  %v10502_v10 = vmul.f32 %v10475_v12, %v18247_v46  ;;  %v10503_v62 = vmul.f32 %v10475_v12, %v18250_v8  ;;  %v10504_v41 = vmul.f32 %v10475_v12, %v18253_v63  ;;  %v10505_v24 = vmul.f32 %v10475_v12, %v18258_v32 }
 0x67e   : > { %10597 = vst [vmem:[%s18397_s16 + $0x18] sm:$0xff] %v10573_v15  ;;  %v10506_v61 = vmul.f32 %v10475_v12, %v18265_v13  ;;  %v10507_v3 = vmul.f32 %v10475_v12, %v18270_v20  ;;  %v10479_v27 = vmul.f32 0.5, %v10478_v51 }
 0x67f   : > { %10598 = vst [vmem:[%s18397_s16 + $0x20] sm:$0xff] %v10574_v1  ;;  %v10539_v35 = vmul.f32 %v18348_v43, %v10502_v10  ;;  %v10540_v46 = vmul.f32 %v18351_v39, %v10503_v62  ;;  %v10541_v8 = vmul.f32 %v18353_v5, %v10504_v41  ;;  %v10542_v63 = vmul.f32 %v18355_v4, %v10505_v24 }
 0x680   : > { %10599 = vst [vmem:[%s18397_s16 + $0x28] sm:$0xff] %v10575_v42  ;;  %v10543_v32 = vmul.f32 %v18357_v11, %v10506_v61  ;;  %v10544_v13 = vmul.f32 %v18359_v44, %v10507_v3  ;;  %v10480_v20 = vsub.f32 1.5, %v10479_v27 }
 0x681   : > { %v10576_v7 = vadd.f32 %v18363_v53, %v10539_v35  ;;  %v10577_v37 = vadd.f32 %v18365_v49, %v10540_v46  ;;  %v10578_v19 = vadd.f32 %v18367_v34, %v10541_v8  ;;  %v10579_v47 = vadd.f32 %v18369_v22, %v10542_v63 }
 0x682   : > { %v10481_v52 = vmul.f32 %v16840_v30, %v10480_v20  ;;  %v10580_v58 = vadd.f32 %v18372_v16, %v10543_v32  ;;  %v16842_v18 = vpop.eup %16841  ;;  %v10581_v50 = vadd.f32 %v18374_v2, %v10544_v13 }
 0x683   : > { %10600 = vst [vmem:[%s18397_s16 + $0x30] sm:$0xff] %v10576_v7  ;;  %v10487_v9 = vmul.f32 %v16842_v18, %v18401_v48  ;;  %vm10493_vm10 = vweird.f32 %v16842_v18 }
 0x684   : > { %10601 = vst [vmem:[%s18397_s16 + $0x38] sm:$0xff] %v10577_v37  ;;  %v10485_v0 = vsel %vm10484_vm9, %v16840_v30, %v10481_v52  ;;  %vm10494_vm12 = vmor %vm10492_vm11, %vm10493_vm10 }
 0x685   : > { %10602 = vst [vmem:[%s18397_s16 + $0x40] sm:$0xff] %v10578_v19  ;;  %v10508_v54 = vmul.f32 %v10485_v0, %v18278_v29  ;;  %v10509_v6 = vmul.f32 %v10485_v0, %v18281_v60  ;;  %v10510_v17 = vmul.f32 %v10485_v0, %v18284_v36  ;;  %v10511_v26 = vmul.f32 %v10485_v0, %v18289_v33 }
 0x686   : > { %10603 = vst [vmem:[%s18397_s16 + $0x48] sm:$0xff] %v10579_v47  ;;  %v10512_v55 = vmul.f32 %v10485_v0, %v18296_v45  ;;  %v10513_v14 = vmul.f32 %v10485_v0, %v18301_v38  ;;  %v10488_v38 = vmul.f32 %v16842_v18, %v10487_v9 }
 0x687   : > { %10604 = vst [vmem:[%s18397_s16 + $0x50] sm:$0xff] %v10580_v58  ;;  %v10545_v30 = vmul.f32 %v18348_v43, %v10508_v54  ;;  %v10546_v29 = vmul.f32 %v18351_v39, %v10509_v6  ;;  %v10547_v60 = vmul.f32 %v18353_v5, %v10510_v17  ;;  %v10548_v36 = vmul.f32 %v18355_v4, %v10511_v26 }
 0x688   : > { %10605 = vst [vmem:[%s18397_s16 + $0x58] sm:$0xff] %v10581_v50  ;;  %v10549_v33 = vmul.f32 %v18357_v11, %v10512_v55  ;;  %v10550_v45 = vmul.f32 %v18359_v44, %v10513_v14  ;;  %v10489_v1 = vmul.f32 0.5, %v10488_v38 }
 0x689   : > { %v10582_v31 = vadd.f32 %v18363_v53, %v10545_v30  ;;  %v10583_v15 = vadd.f32 %v18365_v49, %v10546_v29  ;;  %v10584_v23 = vadd.f32 %v18367_v34, %v10547_v60  ;;  %v10585_v28 = vadd.f32 %v18369_v22, %v10548_v36 }
 0x68a   : > { %v10586_v42 = vadd.f32 %v18372_v16, %v10549_v33  ;;  %v10587_v12 = vadd.f32 %v18374_v2, %v10550_v45  ;;  %v10490_v51 = vsub.f32 1.5, %v10489_v1 }
 0x68b   : > { %10606 = vst [vmem:[%s18397_s16 + $0x60] sm:$0xff] %v10582_v31 }
 0x68c   : > { %10607 = vst [vmem:[%s18397_s16 + $0x68] sm:$0xff] %v10583_v15  ;;  %v10491_v10 = vmul.f32 %v16842_v18, %v10490_v51 }
 0x68d   : > { %10608 = vst [vmem:[%s18397_s16 + $0x70] sm:$0xff] %v10584_v23 }
 0x68e   : > { %10609 = vst [vmem:[%s18397_s16 + $0x78] sm:$0xff] %v10585_v28  ;;  %v10495_v62 = vsel %vm10494_vm12, %v16842_v18, %v10491_v10 }
 0x68f   : > { %10610 = vst [vmem:[%s18397_s16 + $0x80] sm:$0xff] %v10586_v42  ;;  %v10514_v41 = vmul.f32 %v10495_v62, %v18309_v40  ;;  %v10515_v24 = vmul.f32 %v10495_v62, %v18312_v25  ;;  %v10516_v61 = vmul.f32 %v10495_v62, %v18315_v21  ;;  %v10517_v3 = vmul.f32 %v10495_v62, %v18320_v56 }
 0x690   : > { %10611 = vst [vmem:[%s18397_s16 + $0x88] sm:$0xff] %v10587_v12  ;;  %v10518_v27 = vmul.f32 %v10495_v62, %v18327_v59  ;;  %v10519_v35 = vmul.f32 %v10495_v62, %v18332_v57 }
 0x691   : > { %v10551_v48 = vmul.f32 %v18348_v43, %v10514_v41  ;;  %v10552_v46 = vmul.f32 %v18351_v39, %v10515_v24  ;;  %v10553_v40 = vmul.f32 %v18353_v5, %v10516_v61  ;;  %v10554_v25 = vmul.f32 %v18355_v4, %v10517_v3 }
 0x692   : > { %v10555_v21 = vmul.f32 %v18357_v11, %v10518_v27  ;;  %v10556_v56 = vmul.f32 %v18359_v44, %v10519_v35 }
 0x693   : > { %v10588_v59 = vadd.f32 %v18363_v53, %v10551_v48  ;;  %v10589_v57 = vadd.f32 %v18365_v49, %v10552_v46  ;;  %v10590_v43 = vadd.f32 %v18367_v34, %v10553_v40  ;;  %v10591_v39 = vadd.f32 %v18369_v22, %v10554_v25 }
 0x694   : > { %v10592_v5 = vadd.f32 %v18372_v16, %v10555_v21  ;;  %v10593_v4 = vadd.f32 %v18374_v2, %v10556_v56 }
 0x695   : > { %10612 = vst [vmem:[%s18397_s16 + $0x90] sm:$0xff] %v10588_v59 }
 0x696   : > { %10613 = vst [vmem:[%s18397_s16 + $0x98] sm:$0xff] %v10589_v57 }
 0x697   : > { %10614 = vst [vmem:[%s18397_s16 + $0xa0] sm:$0xff] %v10590_v43 }
 0x698   : > { %10615 = vst [vmem:[%s18397_s16 + $0xa8] sm:$0xff] %v10591_v39 }
 0x699   : > { %10616 = vst [vmem:[%s18397_s16 + $0xb0] sm:$0xff] %v10592_v5 }
 0x69a   : > { %10617 = vst [vmem:[%s18397_s16 + $0xb8] sm:$0xff] %v10593_v4 }
 0x69b   : > { %16965 = shalt.err (!%p16962_p5)
}
 0x69c   : > { %s17022_s26 = smov 768   ;;  %s17023_s18 = smov 48  }
 0x69d   : > { %16770 = dma.vmem_to_hbm [thread:$0]  (%p17144_p11), %s10633_s29, 3072, %s10635_s15, %s10619_s17, %s17022_s26, %s17022_s26, %s17023_s18  }
 0x69e PF: > { %s10649_s23 = sand.u32 1, %s17000_s21   ;;  %p18741_p7 = scmp.ge.s32.totalorder %s17012_s24, 2 }
 0x69f   : > { %s10650_s28 = scalar_lea.sflag [#allocation4], %s10649_s23 }
 0x6a0   : > { %p16784_p10 = pnand %p18741_p7, %p17148_p12 }
 0x6a2   : > { %p16785_p13 = pneg %p16784_p10 }
 0x6a4   : > { %16995 = dma.done.wait (%p16785_p13), %s10650_s28, 3072  }
 0x6a5   : > { %16997 = vsyncadd (%p16785_p13), %s10650_s28, 4294964224  ;;  %s18742_s12 = sld [smem:[#allocation13_spill]]  ;;  %p20_p0 = scmp.ge.s32.totalorder %s17080_s25, 4  }
 0x6a6   : > { %s18743_s23 = sld [smem:[#allocation14_spill]]  ;;  %s18744_s21 = smov %s17004_s22 }
 0x6a7   : > { %s18746_s24 = smov %s17080_s25  ;;  %22 = sbr.rel (!%p20_p0) target bundleno = 9 (0x9), region = 104 }
 0x6ab   : > { %s18745_s22 = smov %s18742_s12 }
 0x6ac   :  { %10656 = vsyncpa [#allocation3], 1 }
 0x6ad   :  { %10658 = vsyncpa [#allocation3 + $0x1], 1 }
 0x6ae   :  { %10659 = vsyncpa [#allocation6], 1 }
 0x6af   :  { %10660 = vsyncpa [#allocation4], 1 }
 0x6b0   :  { %10662 = vsyncpa [#allocation4 + $0x1], 1 }

</bundles_post_ra>
